<compile_context>
chip_gen: v5e
topology: v5e:2x2
jax: 0.10.0
libtpu: 0.0.40
codegen_flags: <defaults>
</compile_context>

<pallas_src>
import jax
import jax.numpy as jnp
import numpy as np
from jax.experimental import pallas as pl
from jax.experimental.pallas import tpu as pltpu

_EPS = 1e-5
_LANE = 128
_VMEM_LIMIT_BYTES = 48 * 1024 * 1024
_TILE_BYTES_BUDGET = 2 * 1024 * 1024


# ----------------------------------------------------------------------------
# helpers
# ----------------------------------------------------------------------------
def _round_up(x, m):
    return (x + m - 1) // m * m


def _pick_row_tile(h, w, cp):
    """Largest divisor of h whose f32 output tile (th, w, cp) fits the budget."""
    best = 1
    for th in range(1, h + 1):
        if h % th == 0 and th * w * cp * 4 <= _TILE_BYTES_BUDGET:
            best = th
    return best


def _pick_m_tile(m):
    for tm in (2048, 1024, 512, 256, 128, 64, 32, 16, 8):
        if tm <= m and m % tm == 0:
            return tm
    return m


# ----------------------------------------------------------------------------
# Pallas kernels
# ----------------------------------------------------------------------------
def _conv3x3_stats_kernel(x_ref, w_ref, b_ref, y_ref, stat_ref):
    # x_ref:    (1, th+2, W+2, Cin)   bf16 halo row-tile (spatially pre-padded)
    # w_ref:    (9, Cin, Cp)          bf16 weights, tap-major, VMEM-resident
    # b_ref:    (1, Cp)               f32 conv bias (zero-padded channels)
    # y_ref:    (1, th, W, Cp)        f32 conv output tile
    # stat_ref: (1, 8, Cp)            f32; row 0 = per-channel sum, row 1 = sumsq
    _, th, wo, cp = y_ref.shape
    cin = x_ref.shape[-1]
    x = x_ref[0]                                           # (th+2, W+2, Cin)

    acc = jnp.zeros((th * wo, cp), jnp.float32)
    for kh in range(3):                                    # fused im2col:
        for kw in range(3):                                # 9 shifted slices
            patch = x[kh:kh + th, kw:kw + wo, :].reshape(th * wo, cin)
            acc = acc + jnp.dot(patch, w_ref[kh * 3 + kw],
                                preferred_element_type=jnp.float32)
    acc = acc + b_ref[...]

    y_ref[0] = acc.reshape(th, wo, cp)

    # per-tile BN partial statistics (training-mode batch stats, pass 1)
    s = jnp.sum(acc, axis=0, keepdims=True)                # (1, Cp)
    sq = jnp.sum(acc * acc, axis=0, keepdims=True)         # (1, Cp)
    row = jax.lax.broadcasted_iota(jnp.int32, (8, cp), 0)
    stat_ref[0] = jnp.where(row == 0, jnp.broadcast_to(s, (8, cp)),
                            jnp.where(row == 1, jnp.broadcast_to(sq, (8, cp)),
                                      0.0))


def _bn_relu_apply_kernel(x_ref, scale_ref, shift_ref, o_ref):
    # x_ref: (tm, Cp) f32 ; scale/shift: (1, Cp) ; o_ref: (tm, Cp) f32 or bf16
    y = x_ref[...] * scale_ref[...] + shift_ref[...]
    o_ref[...] = jnp.maximum(y, 0.0).astype(o_ref.dtype)


# ----------------------------------------------------------------------------
# Pallas wrappers
# ----------------------------------------------------------------------------
def _conv3x3_with_stats(x, w9, bias, *, th):
    """3x3 conv (stride 1, pad 1) + per-channel sum/sumsq of the output."""
    n, h, w, cin = x.shape
    cp = w9.shape[-1]
    t = h // th

    xp = jnp.pad(x, ((0, 0), (1, 1), (1, 1), (0, 0)))      # spatial zero pad
    # disjoint halo row-tiles: (N*T, th+2, W+2, Cin) — only (th+2)/th duplication
    rows = (jnp.arange(t) * th)[:, None] + jnp.arange(th + 2)[None, :]
    tiles = xp[:, rows].reshape(n * t, th + 2, w + 2, cin)

    y_tiles, stats = pl.pallas_call(
        _conv3x3_stats_kernel,
        out_shape=(
            jax.ShapeDtypeStruct((n * t, th, w, cp), jnp.float32),
            jax.ShapeDtypeStruct((n * t, 8, cp), jnp.float32),
        ),
        grid=(n * t,),
        in_specs=[
            pl.BlockSpec((1, th + 2, w + 2, cin), lambda i: (i, 0, 0, 0)),
            pl.BlockSpec((9, cin, cp), lambda i: (0, 0, 0)),
            pl.BlockSpec((1, cp), lambda i: (0, 0)),
        ],
        out_specs=[
            pl.BlockSpec((1, th, w, cp), lambda i: (i, 0, 0, 0)),
            pl.BlockSpec((1, 8, cp), lambda i: (i, 0, 0)),
        ],
        compiler_params=pltpu.CompilerParams(
            dimension_semantics=("parallel",),
            vmem_limit_bytes=_VMEM_LIMIT_BYTES),
    )(tiles, w9, bias)

    count = jnp.float32(n * h * w)
    mean = jnp.sum(stats[:, 0, :], axis=0) / count
    var = jnp.maximum(jnp.sum(stats[:, 1, :], axis=0) / count - mean * mean, 0.0)
    return y_tiles, mean, var


def _bn_relu_apply(y2d, scale, shift, out_dtype):
    m, cp = y2d.shape
    tm = _pick_m_tile(m)
    return pl.pallas_call(
        _bn_relu_apply_kernel,
        out_shape=jax.ShapeDtypeStruct((m, cp), out_dtype),
        grid=(m // tm,),
        in_specs=[
            pl.BlockSpec((tm, cp), lambda i: (i, 0)),
            pl.BlockSpec((1, cp), lambda i: (0, 0)),
            pl.BlockSpec((1, cp), lambda i: (0, 0)),
        ],
        out_specs=pl.BlockSpec((tm, cp), lambda i: (i, 0)),
        compiler_params=pltpu.CompilerParams(
            dimension_semantics=("parallel",),
            vmem_limit_bytes=_VMEM_LIMIT_BYTES),
    )(y2d, scale.reshape(1, cp), shift.reshape(1, cp))


def _conv_bn_relu_layer(x, w_hwio, bias, gamma, beta, *, out_dtype):
    """conv3x3(pad 1) -> training-mode BN -> ReLU, channel-padded to 128."""
    n, h, w, cin_x = x.shape
    _, _, cin_w, cout = w_hwio.shape
    cp = _round_up(cout, _LANE)

    # zero-pad params: extra input channels contribute 0, extra output
    # channels stay exactly 0 through conv, BN (gamma=beta=0) and ReLU.
    w_p = jnp.pad(w_hwio, ((0, 0), (0, 0), (0, cin_x - cin_w), (0, cp - cout)))
    w9 = w_p.reshape(9, cin_x, cp).astype(jnp.bfloat16)
    b_p = jnp.pad(bias, (0, cp - cout)).reshape(1, cp).astype(jnp.float32)
    g_p = jnp.pad(gamma, (0, cp - cout)).astype(jnp.float32)
    be_p = jnp.pad(beta, (0, cp - cout)).astype(jnp.float32)

    th = _pick_row_tile(h, w, cp)
    y_tiles, mean, var = _conv3x3_with_stats(
        x.astype(jnp.bfloat16), w9, b_p, th=th)

    scale = g_p * jax.lax.rsqrt(var + _EPS)
    shift = be_p - mean * scale
    a = _bn_relu_apply(y_tiles.reshape(n * h * w, cp), scale, shift, out_dtype)
    return a.reshape(n, h, w, cp), cout


# ----------------------------------------------------------------------------
# double_conv / inconv forward
# ----------------------------------------------------------------------------
def double_conv_forward_nhwc(x, params):
    a1, _ = _conv_bn_relu_layer(
        x, params["w1"], params["b1"], params["bn1_gamma"], params["bn1_beta"],
        out_dtype=jnp.bfloat16)                        # bf16 intermediate
    a2, cout = _conv_bn_relu_layer(
        a1, params["w2"], params["b2"], params["bn2_gamma"], params["bn2_beta"],
        out_dtype=jnp.float32)
    return a2[..., :cout]


def inconv_forward_nchw(x_nchw, params):
    x = jnp.transpose(x_nchw, (0, 2, 3, 1))            # NCHW -> NHWC
    out = double_conv_forward_nhwc(x, params)
    return jnp.transpose(out, (0, 3, 1, 2))            # NHWC -> NCHW


# ----------------------------------------------------------------------------
# Pure-JAX f32 reference (training-mode BN, eps=1e-5)
# ----------------------------------------------------------------------------
def _ref_double_conv_nhwc(x, params):
    def conv(x, w, b):
        y = jax.lax.conv_general_dilated(
            x, w, (1, 1), ((1, 1), (1, 1)),
            dimension_numbers=("NHWC", "HWIO", "NHWC"))
        return y + b.reshape(1, 1, 1, -1)

    def bn_relu(y, g, be):
        mean = y.mean(axis=(0, 1, 2), keepdims=True)
        var = ((y - mean) ** 2).mean(axis=(0, 1, 2), keepdims=True)
        return jnp.maximum((y - mean) * jax.lax.rsqrt(var + _EPS) * g + be, 0.0)

    y = bn_relu(conv(x, params["w1"], params["b1"]),
                params["bn1_gamma"], params["bn1_beta"])
    y = bn_relu(conv(y, params["w2"], params["b2"]),
                params["bn2_gamma"], params["bn2_beta"])
    return y


# ----------------------------------------------------------------------------
# Deterministic parameter init
# ----------------------------------------------------------------------------
def make_params(key, cin, cout):
    ks = jax.random.split(key, 8)
    return {
        "w1": jax.random.normal(ks[0], (3, 3, cin, cout), jnp.float32) * 0.1,
        "b1": jax.random.normal(ks[1], (cout,), jnp.float32) * 0.1,
        "bn1_gamma": jax.random.uniform(ks[2], (cout,), jnp.float32, 0.5, 1.5),
        "bn1_beta": jax.random.normal(ks[3], (cout,), jnp.float32) * 0.1,
        "w2": jax.random.normal(ks[4], (3, 3, cout, cout), jnp.float32) * 0.1,
        "b2": jax.random.normal(ks[5], (cout,), jnp.float32) * 0.1,
        "bn2_gamma": jax.random.uniform(ks[6], (cout,), jnp.float32, 0.5, 1.5),
        "bn2_beta": jax.random.normal(ks[7], (cout,), jnp.float32) * 0.1,
    }


# ----------------------------------------------------------------------------
if __name__ == "__main__":
    key = jax.random.PRNGKey(0)
    k_x, k_p = jax.random.split(key)

    n, cin, h, w = 2, 4, 16, 16
    cout = 8
    x_nchw = jax.random.normal(k_x, (n, cin, h, w), jnp.float32)
    params = make_params(k_p, cin, cout)

    fwd = jax.jit(inconv_forward_nchw)
    out = jax.block_until_ready(fwd(x_nchw, params))
    assert out.shape == (n, cout, h, w)

    ref = _ref_double_conv_nhwc(jnp.transpose(x_nchw, (0, 2, 3, 1)), params)
    ref = jnp.transpose(ref, (0, 3, 1, 2))
    # bf16 MXU operands with f32 accumulation -> loosened tolerance vs f32 ref
    np.testing.assert_allclose(np.asarray(out), np.asarray(ref),
                               rtol=5e-2, atol=1e-1)

    print("KERNEL_OK")
</pallas_src>

<mosaic_0001>
module attributes {stable_mosaic.version = 11 : i64} {
  func.func @_conv3x3_stats_kernel(%arg0: i32, %arg1: memref<1x18x18x4xbf16, #tpu.memory_space<vmem>>, %arg2: memref<9x4x128xbf16, #tpu.memory_space<vmem>>, %arg3: memref<1x128xf32, #tpu.memory_space<vmem>>, %arg4: memref<1x16x16x128xf32, #tpu.memory_space<vmem>>, %arg5: memref<1x8x128xf32, #tpu.memory_space<vmem>>) attributes {dimension_semantics = [#tpu.dimension_semantics<parallel>], iteration_bounds = array<i64: 2>, scalar_prefetch = 0 : i64, scratch_operands = 0 : i64, tpu.core_type = #tpu.core_type<tc>, window_params = [{transform_indices = @transform_0, window_bounds = array<i64: 1, 18, 18, 4>}, {pipeline_mode = #tpu.pipeline_mode<synchronous>, transform_indices = @transform_1, window_bounds = array<i64: 9, 4, 128>}, {pipeline_mode = #tpu.pipeline_mode<synchronous>, transform_indices = @transform_2, window_bounds = array<i64: 1, 128>}, {transform_indices = @transform_3, window_bounds = array<i64: 1, 16, 16, 128>}, {transform_indices = @transform_4, window_bounds = array<i64: 1, 8, 128>}]} {
    %c0 = arith.constant 0 : index
    %c0_0 = arith.constant 0 : index
    %c0_1 = arith.constant 0 : index
    %c0_2 = arith.constant 0 : index
    %0 = vector.load %arg1[%c0, %c0_0, %c0_1, %c0_2] : memref<1x18x18x4xbf16, #tpu.memory_space<vmem>>, vector<1x18x18x4xbf16>
    %1 = vector.shape_cast %0 : vector<1x18x18x4xbf16> to vector<18x18x4xbf16>
    %cst = arith.constant 0.000000e+00 : f32
    %2 = vector.broadcast %cst : f32 to vector<256x128xf32>
    %3 = vector.extract_strided_slice %1 {offsets = [0, 0, 0], sizes = [16, 16, 4], strides = [1, 1, 1]} : vector<18x18x4xbf16> to vector<16x16x4xbf16>
    %4 = vector.shape_cast %3 : vector<16x16x4xbf16> to vector<256x4xbf16>
    %c0_3 = arith.constant 0 : index
    %c0_4 = arith.constant 0 : index
    %c0_5 = arith.constant 0 : index
    %5 = vector.load %arg2[%c0_3, %c0_4, %c0_5] : memref<9x4x128xbf16, #tpu.memory_space<vmem>>, vector<1x4x128xbf16>
    %6 = vector.shape_cast %5 : vector<1x4x128xbf16> to vector<4x128xbf16>
    %cst_6 = arith.constant dense<0.000000e+00> : vector<256x128xf32>
    %7 = tpu.matmul %4, %6, %cst_6 {dimension_numbers = #tpu.dot_dimension_numbers<[1], [0], [0], [1], [0, 0, 1, 1], [], []>} : vector<256x4xbf16>, vector<4x128xbf16>, vector<256x128xf32> -> vector<256x128xf32>
    %8 = arith.addf %2, %7 : vector<256x128xf32>
    %9 = vector.extract_strided_slice %1 {offsets = [0, 1, 0], sizes = [16, 16, 4], strides = [1, 1, 1]} : vector<18x18x4xbf16> to vector<16x16x4xbf16>
    %10 = vector.shape_cast %9 : vector<16x16x4xbf16> to vector<256x4xbf16>
    %c1 = arith.constant 1 : index
    %c0_7 = arith.constant 0 : index
    %c0_8 = arith.constant 0 : index
    %11 = vector.load %arg2[%c1, %c0_7, %c0_8] : memref<9x4x128xbf16, #tpu.memory_space<vmem>>, vector<1x4x128xbf16>
    %12 = vector.shape_cast %11 : vector<1x4x128xbf16> to vector<4x128xbf16>
    %cst_9 = arith.constant dense<0.000000e+00> : vector<256x128xf32>
    %13 = tpu.matmul %10, %12, %cst_9 {dimension_numbers = #tpu.dot_dimension_numbers<[1], [0], [0], [1], [0, 0, 1, 1], [], []>} : vector<256x4xbf16>, vector<4x128xbf16>, vector<256x128xf32> -> vector<256x128xf32>
    %14 = arith.addf %8, %13 : vector<256x128xf32>
    %15 = vector.extract_strided_slice %1 {offsets = [0, 2, 0], sizes = [16, 16, 4], strides = [1, 1, 1]} : vector<18x18x4xbf16> to vector<16x16x4xbf16>
    %16 = vector.shape_cast %15 : vector<16x16x4xbf16> to vector<256x4xbf16>
    %c2 = arith.constant 2 : index
    %c0_10 = arith.constant 0 : index
    %c0_11 = arith.constant 0 : index
    %17 = vector.load %arg2[%c2, %c0_10, %c0_11] : memref<9x4x128xbf16, #tpu.memory_space<vmem>>, vector<1x4x128xbf16>
    %18 = vector.shape_cast %17 : vector<1x4x128xbf16> to vector<4x128xbf16>
    %cst_12 = arith.constant dense<0.000000e+00> : vector<256x128xf32>
    %19 = tpu.matmul %16, %18, %cst_12 {dimension_numbers = #tpu.dot_dimension_numbers<[1], [0], [0], [1], [0, 0, 1, 1], [], []>} : vector<256x4xbf16>, vector<4x128xbf16>, vector<256x128xf32> -> vector<256x128xf32>
    %20 = arith.addf %14, %19 : vector<256x128xf32>
    %21 = vector.extract_strided_slice %1 {offsets = [1, 0, 0], sizes = [16, 16, 4], strides = [1, 1, 1]} : vector<18x18x4xbf16> to vector<16x16x4xbf16>
    %22 = vector.shape_cast %21 : vector<16x16x4xbf16> to vector<256x4xbf16>
    %c3 = arith.constant 3 : index
    %c0_13 = arith.constant 0 : index
    %c0_14 = arith.constant 0 : index
    %23 = vector.load %arg2[%c3, %c0_13, %c0_14] : memref<9x4x128xbf16, #tpu.memory_space<vmem>>, vector<1x4x128xbf16>
    %24 = vector.shape_cast %23 : vector<1x4x128xbf16> to vector<4x128xbf16>
    %cst_15 = arith.constant dense<0.000000e+00> : vector<256x128xf32>
    %25 = tpu.matmul %22, %24, %cst_15 {dimension_numbers = #tpu.dot_dimension_numbers<[1], [0], [0], [1], [0, 0, 1, 1], [], []>} : vector<256x4xbf16>, vector<4x128xbf16>, vector<256x128xf32> -> vector<256x128xf32>
    %26 = arith.addf %20, %25 : vector<256x128xf32>
    %27 = vector.extract_strided_slice %1 {offsets = [1, 1, 0], sizes = [16, 16, 4], strides = [1, 1, 1]} : vector<18x18x4xbf16> to vector<16x16x4xbf16>
    %28 = vector.shape_cast %27 : vector<16x16x4xbf16> to vector<256x4xbf16>
    %c4 = arith.constant 4 : index
    %c0_16 = arith.constant 0 : index
    %c0_17 = arith.constant 0 : index
    %29 = vector.load %arg2[%c4, %c0_16, %c0_17] : memref<9x4x128xbf16, #tpu.memory_space<vmem>>, vector<1x4x128xbf16>
    %30 = vector.shape_cast %29 : vector<1x4x128xbf16> to vector<4x128xbf16>
    %cst_18 = arith.constant dense<0.000000e+00> : vector<256x128xf32>
    %31 = tpu.matmul %28, %30, %cst_18 {dimension_numbers = #tpu.dot_dimension_numbers<[1], [0], [0], [1], [0, 0, 1, 1], [], []>} : vector<256x4xbf16>, vector<4x128xbf16>, vector<256x128xf32> -> vector<256x128xf32>
    %32 = arith.addf %26, %31 : vector<256x128xf32>
    %33 = vector.extract_strided_slice %1 {offsets = [1, 2, 0], sizes = [16, 16, 4], strides = [1, 1, 1]} : vector<18x18x4xbf16> to vector<16x16x4xbf16>
    %34 = vector.shape_cast %33 : vector<16x16x4xbf16> to vector<256x4xbf16>
    %c5 = arith.constant 5 : index
    %c0_19 = arith.constant 0 : index
    %c0_20 = arith.constant 0 : index
    %35 = vector.load %arg2[%c5, %c0_19, %c0_20] : memref<9x4x128xbf16, #tpu.memory_space<vmem>>, vector<1x4x128xbf16>
    %36 = vector.shape_cast %35 : vector<1x4x128xbf16> to vector<4x128xbf16>
    %cst_21 = arith.constant dense<0.000000e+00> : vector<256x128xf32>
    %37 = tpu.matmul %34, %36, %cst_21 {dimension_numbers = #tpu.dot_dimension_numbers<[1], [0], [0], [1], [0, 0, 1, 1], [], []>} : vector<256x4xbf16>, vector<4x128xbf16>, vector<256x128xf32> -> vector<256x128xf32>
    %38 = arith.addf %32, %37 : vector<256x128xf32>
    %39 = vector.extract_strided_slice %1 {offsets = [2, 0, 0], sizes = [16, 16, 4], strides = [1, 1, 1]} : vector<18x18x4xbf16> to vector<16x16x4xbf16>
    %40 = vector.shape_cast %39 : vector<16x16x4xbf16> to vector<256x4xbf16>
    %c6 = arith.constant 6 : index
    %c0_22 = arith.constant 0 : index
    %c0_23 = arith.constant 0 : index
    %41 = vector.load %arg2[%c6, %c0_22, %c0_23] : memref<9x4x128xbf16, #tpu.memory_space<vmem>>, vector<1x4x128xbf16>
    %42 = vector.shape_cast %41 : vector<1x4x128xbf16> to vector<4x128xbf16>
    %cst_24 = arith.constant dense<0.000000e+00> : vector<256x128xf32>
    %43 = tpu.matmul %40, %42, %cst_24 {dimension_numbers = #tpu.dot_dimension_numbers<[1], [0], [0], [1], [0, 0, 1, 1], [], []>} : vector<256x4xbf16>, vector<4x128xbf16>, vector<256x128xf32> -> vector<256x128xf32>
    %44 = arith.addf %38, %43 : vector<256x128xf32>
    %45 = vector.extract_strided_slice %1 {offsets = [2, 1, 0], sizes = [16, 16, 4], strides = [1, 1, 1]} : vector<18x18x4xbf16> to vector<16x16x4xbf16>
    %46 = vector.shape_cast %45 : vector<16x16x4xbf16> to vector<256x4xbf16>
    %c7 = arith.constant 7 : index
    %c0_25 = arith.constant 0 : index
    %c0_26 = arith.constant 0 : index
    %47 = vector.load %arg2[%c7, %c0_25, %c0_26] : memref<9x4x128xbf16, #tpu.memory_space<vmem>>, vector<1x4x128xbf16>
    %48 = vector.shape_cast %47 : vector<1x4x128xbf16> to vector<4x128xbf16>
    %cst_27 = arith.constant dense<0.000000e+00> : vector<256x128xf32>
    %49 = tpu.matmul %46, %48, %cst_27 {dimension_numbers = #tpu.dot_dimension_numbers<[1], [0], [0], [1], [0, 0, 1, 1], [], []>} : vector<256x4xbf16>, vector<4x128xbf16>, vector<256x128xf32> -> vector<256x128xf32>
    %50 = arith.addf %44, %49 : vector<256x128xf32>
    %51 = vector.extract_strided_slice %1 {offsets = [2, 2, 0], sizes = [16, 16, 4], strides = [1, 1, 1]} : vector<18x18x4xbf16> to vector<16x16x4xbf16>
    %52 = vector.shape_cast %51 : vector<16x16x4xbf16> to vector<256x4xbf16>
    %c8 = arith.constant 8 : index
    %c0_28 = arith.constant 0 : index
    %c0_29 = arith.constant 0 : index
    %53 = vector.load %arg2[%c8, %c0_28, %c0_29] : memref<9x4x128xbf16, #tpu.memory_space<vmem>>, vector<1x4x128xbf16>
    %54 = vector.shape_cast %53 : vector<1x4x128xbf16> to vector<4x128xbf16>
    %cst_30 = arith.constant dense<0.000000e+00> : vector<256x128xf32>
    %55 = tpu.matmul %52, %54, %cst_30 {dimension_numbers = #tpu.dot_dimension_numbers<[1], [0], [0], [1], [0, 0, 1, 1], [], []>} : vector<256x4xbf16>, vector<4x128xbf16>, vector<256x128xf32> -> vector<256x128xf32>
    %56 = arith.addf %50, %55 : vector<256x128xf32>
    %c0_31 = arith.constant 0 : index
    %c0_32 = arith.constant 0 : index
    %57 = vector.load %arg3[%c0_31, %c0_32] : memref<1x128xf32, #tpu.memory_space<vmem>>, vector<1x128xf32>
    %58 = vector.broadcast %57 : vector<1x128xf32> to vector<256x128xf32>
    %59 = arith.addf %56, %58 : vector<256x128xf32>
    %60 = vector.shape_cast %59 : vector<256x128xf32> to vector<16x16x128xf32>
    %c0_33 = arith.constant 0 : index
    %c0_34 = arith.constant 0 : index
    %c0_35 = arith.constant 0 : index
    %c0_36 = arith.constant 0 : index
    %61 = vector.load %arg4[%c0_33, %c0_34, %c0_35, %c0_36] : memref<1x16x16x128xf32, #tpu.memory_space<vmem>>, vector<1x16x16x128xf32>
    %62 = vector.shape_cast %61 : vector<1x16x16x128xf32> to vector<16x16x128xf32>
    %63 = vector.shape_cast %60 : vector<16x16x128xf32> to vector<1x16x16x128xf32>
    tpu.vector_store %arg4[%c0_33, %c0_34, %c0_35, %c0_36], %63 {strides = array<i32>} : memref<1x16x16x128xf32, #tpu.memory_space<vmem>>, vector<1x16x16x128xf32>,
    %cst_37 = arith.constant dense<0.000000e+00> : vector<128xf32>
    %64 = vector.multi_reduction <add>, %59, %cst_37 [0] : vector<256x128xf32> to vector<128xf32>
    %65 = vector.shape_cast %64 : vector<128xf32> to vector<1x128xf32>
    %66 = arith.mulf %59, %59 : vector<256x128xf32>
    %cst_38 = arith.constant dense<0.000000e+00> : vector<128xf32>
    %67 = vector.multi_reduction <add>, %66, %cst_38 [0] : vector<256x128xf32> to vector<128xf32>
    %68 = vector.shape_cast %67 : vector<128xf32> to vector<1x128xf32>
    %69 = tpu.iota {dimensions = array<i32: 0>} : vector<8x128xi32>
    %c0_i32 = arith.constant 0 : i32
    %70 = vector.broadcast %c0_i32 : i32 to vector<8x128xi32>
    %71 = arith.cmpi eq, %69, %70 : vector<8x128xi32>
    %72 = vector.shape_cast %65 : vector<1x128xf32> to vector<1x128xf32>
    %73 = vector.broadcast %72 : vector<1x128xf32> to vector<8x128xf32>
    %c1_i32 = arith.constant 1 : i32
    %74 = vector.broadcast %c1_i32 : i32 to vector<8x128xi32>
    %75 = arith.cmpi eq, %69, %74 : vector<8x128xi32>
    %76 = vector.shape_cast %68 : vector<1x128xf32> to vector<1x128xf32>
    %77 = vector.broadcast %76 : vector<1x128xf32> to vector<8x128xf32>
    %cst_39 = arith.constant 0.000000e+00 : f32
    %78 = vector.broadcast %cst_39 : f32 to vector<8x128xf32>
    %79 = arith.select %75, %77, %78 : vector<8x128xi1>, vector<8x128xf32>
    %80 = arith.select %71, %73, %79 : vector<8x128xi1>, vector<8x128xf32>
    %c0_40 = arith.constant 0 : index
    %c0_41 = arith.constant 0 : index
    %c0_42 = arith.constant 0 : index
    %81 = vector.load %arg5[%c0_40, %c0_41, %c0_42] : memref<1x8x128xf32, #tpu.memory_space<vmem>>, vector<1x8x128xf32>
    %82 = vector.shape_cast %81 : vector<1x8x128xf32> to vector<8x128xf32>
    %83 = vector.shape_cast %80 : vector<8x128xf32> to vector<1x8x128xf32>
    tpu.vector_store %arg5[%c0_40, %c0_41, %c0_42], %83 {strides = array<i32>} : memref<1x8x128xf32, #tpu.memory_space<vmem>>, vector<1x8x128xf32>,
    return
  }
  func.func @transform_0(%arg0: i32) -> (i32, i32, i32, i32) {
    %c0_i32 = arith.constant 0 : i32
    %c0_i32_0 = arith.constant 0 : i32
    %c0_i32_1 = arith.constant 0 : i32
    %c0_i32_2 = arith.constant 0 : i32
    return %arg0, %c0_i32, %c0_i32_0, %c0_i32_1 : i32, i32, i32, i32
  }
  func.func @transform_1(%arg0: i32) -> (i32, i32, i32) {
    %c0_i32 = arith.constant 0 : i32
    %c0_i32_0 = arith.constant 0 : i32
    %c0_i32_1 = arith.constant 0 : i32
    %c0_i32_2 = arith.constant 0 : i32
    return %c0_i32, %c0_i32_0, %c0_i32_1 : i32, i32, i32
  }
  func.func @transform_2(%arg0: i32) -> (i32, i32) {
    %c0_i32 = arith.constant 0 : i32
    %c0_i32_0 = arith.constant 0 : i32
    %c0_i32_1 = arith.constant 0 : i32
    return %c0_i32, %c0_i32_0 : i32, i32
  }
  func.func @transform_3(%arg0: i32) -> (i32, i32, i32, i32) {
    %c0_i32 = arith.constant 0 : i32
    %c0_i32_0 = arith.constant 0 : i32
    %c0_i32_1 = arith.constant 0 : i32
    %c0_i32_2 = arith.constant 0 : i32
    return %arg0, %c0_i32, %c0_i32_0, %c0_i32_1 : i32, i32, i32, i32
  }
  func.func @transform_4(%arg0: i32) -> (i32, i32, i32) {
    %c0_i32 = arith.constant 0 : i32
    %c0_i32_0 = arith.constant 0 : i32
    %c0_i32_1 = arith.constant 0 : i32
    return %arg0, %c0_i32, %c0_i32_0 : i32, i32, i32
  }
}

module attributes {stable_mosaic.version = 11 : i64} {
  func.func @_bn_relu_apply_kernel(%arg0: i32, %arg1: memref<512x128xf32, #tpu.memory_space<vmem>>, %arg2: memref<1x128xf32, #tpu.memory_space<vmem>>, %arg3: memref<1x128xf32, #tpu.memory_space<vmem>>, %arg4: memref<512x128xbf16, #tpu.memory_space<vmem>>) attributes {dimension_semantics = [#tpu.dimension_semantics<parallel>], iteration_bounds = array<i64: 1>, scalar_prefetch = 0 : i64, scratch_operands = 0 : i64, tpu.core_type = #tpu.core_type<tc>, window_params = [{transform_indices = @transform_0, window_bounds = array<i64: 512, 128>}, {pipeline_mode = #tpu.pipeline_mode<synchronous>, transform_indices = @transform_1, window_bounds = array<i64: 1, 128>}, {pipeline_mode = #tpu.pipeline_mode<synchronous>, transform_indices = @transform_2, window_bounds = array<i64: 1, 128>}, {transform_indices = @transform_3, window_bounds = array<i64: 512, 128>}]} {
    %c0 = arith.constant 0 : index
    %c0_0 = arith.constant 0 : index
    %0 = vector.load %arg1[%c0, %c0_0] : memref<512x128xf32, #tpu.memory_space<vmem>>, vector<512x128xf32>
    %c0_1 = arith.constant 0 : index
    %c0_2 = arith.constant 0 : index
    %1 = vector.load %arg2[%c0_1, %c0_2] : memref<1x128xf32, #tpu.memory_space<vmem>>, vector<1x128xf32>
    %2 = vector.broadcast %1 : vector<1x128xf32> to vector<512x128xf32>
    %3 = arith.mulf %0, %2 : vector<512x128xf32>
    %c0_3 = arith.constant 0 : index
    %c0_4 = arith.constant 0 : index
    %4 = vector.load %arg3[%c0_3, %c0_4] : memref<1x128xf32, #tpu.memory_space<vmem>>, vector<1x128xf32>
    %5 = vector.broadcast %4 : vector<1x128xf32> to vector<512x128xf32>
    %6 = arith.addf %3, %5 : vector<512x128xf32>
    %cst = arith.constant 0.000000e+00 : f32
    %7 = vector.broadcast %cst : f32 to vector<512x128xf32>
    %8 = arith.maximumf %6, %7 : vector<512x128xf32>
    %9 = arith.truncf %8 : vector<512x128xf32> to vector<512x128xbf16>
    %c0_5 = arith.constant 0 : index
    %c0_6 = arith.constant 0 : index
    %10 = vector.load %arg4[%c0_5, %c0_6] : memref<512x128xbf16, #tpu.memory_space<vmem>>, vector<512x128xbf16>
    tpu.vector_store %arg4[%c0_5, %c0_6], %9 {strides = array<i32>} : memref<512x128xbf16, #tpu.memory_space<vmem>>, vector<512x128xbf16>,
    return
  }
  func.func @transform_0(%arg0: i32) -> (i32, i32) {
    %c0_i32 = arith.constant 0 : i32
    %c0_i32_0 = arith.constant 0 : i32
    return %arg0, %c0_i32 : i32, i32
  }
  func.func @transform_1(%arg0: i32) -> (i32, i32) {
    %c0_i32 = arith.constant 0 : i32
    %c0_i32_0 = arith.constant 0 : i32
    %c0_i32_1 = arith.constant 0 : i32
    return %c0_i32, %c0_i32_0 : i32, i32
  }
  func.func @transform_2(%arg0: i32) -> (i32, i32) {
    %c0_i32 = arith.constant 0 : i32
    %c0_i32_0 = arith.constant 0 : i32
    %c0_i32_1 = arith.constant 0 : i32
    return %c0_i32, %c0_i32_0 : i32, i32
  }
  func.func @transform_3(%arg0: i32) -> (i32, i32) {
    %c0_i32 = arith.constant 0 : i32
    %c0_i32_0 = arith.constant 0 : i32
    return %arg0, %c0_i32 : i32, i32
  }
}

module attributes {stable_mosaic.version = 11 : i64} {
  func.func @_bn_relu_apply_kernel(%arg0: i32, %arg1: memref<512x128xf32, #tpu.memory_space<vmem>>, %arg2: memref<1x128xf32, #tpu.memory_space<vmem>>, %arg3: memref<1x128xf32, #tpu.memory_space<vmem>>, %arg4: memref<512x128xf32, #tpu.memory_space<vmem>>) attributes {dimension_semantics = [#tpu.dimension_semantics<parallel>], iteration_bounds = array<i64: 1>, scalar_prefetch = 0 : i64, scratch_operands = 0 : i64, tpu.core_type = #tpu.core_type<tc>, window_params = [{transform_indices = @transform_0, window_bounds = array<i64: 512, 128>}, {pipeline_mode = #tpu.pipeline_mode<synchronous>, transform_indices = @transform_1, window_bounds = array<i64: 1, 128>}, {pipeline_mode = #tpu.pipeline_mode<synchronous>, transform_indices = @transform_2, window_bounds = array<i64: 1, 128>}, {transform_indices = @transform_3, window_bounds = array<i64: 512, 128>}]} {
    %c0 = arith.constant 0 : index
    %c0_0 = arith.constant 0 : index
    %0 = vector.load %arg1[%c0, %c0_0] : memref<512x128xf32, #tpu.memory_space<vmem>>, vector<512x128xf32>
    %c0_1 = arith.constant 0 : index
    %c0_2 = arith.constant 0 : index
    %1 = vector.load %arg2[%c0_1, %c0_2] : memref<1x128xf32, #tpu.memory_space<vmem>>, vector<1x128xf32>
    %2 = vector.broadcast %1 : vector<1x128xf32> to vector<512x128xf32>
    %3 = arith.mulf %0, %2 : vector<512x128xf32>
    %c0_3 = arith.constant 0 : index
    %c0_4 = arith.constant 0 : index
    %4 = vector.load %arg3[%c0_3, %c0_4] : memref<1x128xf32, #tpu.memory_space<vmem>>, vector<1x128xf32>
    %5 = vector.broadcast %4 : vector<1x128xf32> to vector<512x128xf32>
    %6 = arith.addf %3, %5 : vector<512x128xf32>
    %cst = arith.constant 0.000000e+00 : f32
    %7 = vector.broadcast %cst : f32 to vector<512x128xf32>
    %8 = arith.maximumf %6, %7 : vector<512x128xf32>
    %c0_5 = arith.constant 0 : index
    %c0_6 = arith.constant 0 : index
    %9 = vector.load %arg4[%c0_5, %c0_6] : memref<512x128xf32, #tpu.memory_space<vmem>>, vector<512x128xf32>
    tpu.vector_store %arg4[%c0_5, %c0_6], %8 {strides = array<i32>} : memref<512x128xf32, #tpu.memory_space<vmem>>, vector<512x128xf32>,
    return
  }
  func.func @transform_0(%arg0: i32) -> (i32, i32) {
    %c0_i32 = arith.constant 0 : i32
    %c0_i32_0 = arith.constant 0 : i32
    return %arg0, %c0_i32 : i32, i32
  }
  func.func @transform_1(%arg0: i32) -> (i32, i32) {
    %c0_i32 = arith.constant 0 : i32
    %c0_i32_0 = arith.constant 0 : i32
    %c0_i32_1 = arith.constant 0 : i32
    return %c0_i32, %c0_i32_0 : i32, i32
  }
  func.func @transform_2(%arg0: i32) -> (i32, i32) {
    %c0_i32 = arith.constant 0 : i32
    %c0_i32_0 = arith.constant 0 : i32
    %c0_i32_1 = arith.constant 0 : i32
    return %c0_i32, %c0_i32_0 : i32, i32
  }
  func.func @transform_3(%arg0: i32) -> (i32, i32) {
    %c0_i32 = arith.constant 0 : i32
    %c0_i32_0 = arith.constant 0 : i32
    return %arg0, %c0_i32 : i32, i32
  }
}

module attributes {stable_mosaic.version = 11 : i64} {
  func.func @_conv3x3_stats_kernel(%arg0: i32, %arg1: memref<1x18x18x128xbf16, #tpu.memory_space<vmem>>, %arg2: memref<9x128x128xbf16, #tpu.memory_space<vmem>>, %arg3: memref<1x128xf32, #tpu.memory_space<vmem>>, %arg4: memref<1x16x16x128xf32, #tpu.memory_space<vmem>>, %arg5: memref<1x8x128xf32, #tpu.memory_space<vmem>>) attributes {dimension_semantics = [#tpu.dimension_semantics<parallel>], iteration_bounds = array<i64: 2>, scalar_prefetch = 0 : i64, scratch_operands = 0 : i64, tpu.core_type = #tpu.core_type<tc>, window_params = [{transform_indices = @transform_0, window_bounds = array<i64: 1, 18, 18, 128>}, {pipeline_mode = #tpu.pipeline_mode<synchronous>, transform_indices = @transform_1, window_bounds = array<i64: 9, 128, 128>}, {pipeline_mode = #tpu.pipeline_mode<synchronous>, transform_indices = @transform_2, window_bounds = array<i64: 1, 128>}, {transform_indices = @transform_3, window_bounds = array<i64: 1, 16, 16, 128>}, {transform_indices = @transform_4, window_bounds = array<i64: 1, 8, 128>}]} {
    %c0 = arith.constant 0 : index
    %c0_0 = arith.constant 0 : index
    %c0_1 = arith.constant 0 : index
    %c0_2 = arith.constant 0 : index
    %0 = vector.load %arg1[%c0, %c0_0, %c0_1, %c0_2] : memref<1x18x18x128xbf16, #tpu.memory_space<vmem>>, vector<1x18x18x128xbf16>
    %1 = vector.shape_cast %0 : vector<1x18x18x128xbf16> to vector<18x18x128xbf16>
    %cst = arith.constant 0.000000e+00 : f32
    %2 = vector.broadcast %cst : f32 to vector<256x128xf32>
    %3 = vector.extract_strided_slice %1 {offsets = [0, 0, 0], sizes = [16, 16, 128], strides = [1, 1, 1]} : vector<18x18x128xbf16> to vector<16x16x128xbf16>
    %4 = vector.shape_cast %3 : vector<16x16x128xbf16> to vector<256x128xbf16>
    %c0_3 = arith.constant 0 : index
    %c0_4 = arith.constant 0 : index
    %c0_5 = arith.constant 0 : index
    %5 = vector.load %arg2[%c0_3, %c0_4, %c0_5] : memref<9x128x128xbf16, #tpu.memory_space<vmem>>, vector<1x128x128xbf16>
    %6 = vector.shape_cast %5 : vector<1x128x128xbf16> to vector<128x128xbf16>
    %cst_6 = arith.constant dense<0.000000e+00> : vector<256x128xf32>
    %7 = tpu.matmul %4, %6, %cst_6 {dimension_numbers = #tpu.dot_dimension_numbers<[1], [0], [0], [1], [0, 0, 1, 1], [], []>} : vector<256x128xbf16>, vector<128x128xbf16>, vector<256x128xf32> -> vector<256x128xf32>
    %8 = arith.addf %2, %7 : vector<256x128xf32>
    %9 = vector.extract_strided_slice %1 {offsets = [0, 1, 0], sizes = [16, 16, 128], strides = [1, 1, 1]} : vector<18x18x128xbf16> to vector<16x16x128xbf16>
    %10 = vector.shape_cast %9 : vector<16x16x128xbf16> to vector<256x128xbf16>
    %c1 = arith.constant 1 : index
    %c0_7 = arith.constant 0 : index
    %c0_8 = arith.constant 0 : index
    %11 = vector.load %arg2[%c1, %c0_7, %c0_8] : memref<9x128x128xbf16, #tpu.memory_space<vmem>>, vector<1x128x128xbf16>
    %12 = vector.shape_cast %11 : vector<1x128x128xbf16> to vector<128x128xbf16>
    %cst_9 = arith.constant dense<0.000000e+00> : vector<256x128xf32>
    %13 = tpu.matmul %10, %12, %cst_9 {dimension_numbers = #tpu.dot_dimension_numbers<[1], [0], [0], [1], [0, 0, 1, 1], [], []>} : vector<256x128xbf16>, vector<128x128xbf16>, vector<256x128xf32> -> vector<256x128xf32>
    %14 = arith.addf %8, %13 : vector<256x128xf32>
    %15 = vector.extract_strided_slice %1 {offsets = [0, 2, 0], sizes = [16, 16, 128], strides = [1, 1, 1]} : vector<18x18x128xbf16> to vector<16x16x128xbf16>
    %16 = vector.shape_cast %15 : vector<16x16x128xbf16> to vector<256x128xbf16>
    %c2 = arith.constant 2 : index
    %c0_10 = arith.constant 0 : index
    %c0_11 = arith.constant 0 : index
    %17 = vector.load %arg2[%c2, %c0_10, %c0_11] : memref<9x128x128xbf16, #tpu.memory_space<vmem>>, vector<1x128x128xbf16>
    %18 = vector.shape_cast %17 : vector<1x128x128xbf16> to vector<128x128xbf16>
    %cst_12 = arith.constant dense<0.000000e+00> : vector<256x128xf32>
    %19 = tpu.matmul %16, %18, %cst_12 {dimension_numbers = #tpu.dot_dimension_numbers<[1], [0], [0], [1], [0, 0, 1, 1], [], []>} : vector<256x128xbf16>, vector<128x128xbf16>, vector<256x128xf32> -> vector<256x128xf32>
    %20 = arith.addf %14, %19 : vector<256x128xf32>
    %21 = vector.extract_strided_slice %1 {offsets = [1, 0, 0], sizes = [16, 16, 128], strides = [1, 1, 1]} : vector<18x18x128xbf16> to vector<16x16x128xbf16>
    %22 = vector.shape_cast %21 : vector<16x16x128xbf16> to vector<256x128xbf16>
    %c3 = arith.constant 3 : index
    %c0_13 = arith.constant 0 : index
    %c0_14 = arith.constant 0 : index
    %23 = vector.load %arg2[%c3, %c0_13, %c0_14] : memref<9x128x128xbf16, #tpu.memory_space<vmem>>, vector<1x128x128xbf16>
    %24 = vector.shape_cast %23 : vector<1x128x128xbf16> to vector<128x128xbf16>
    %cst_15 = arith.constant dense<0.000000e+00> : vector<256x128xf32>
    %25 = tpu.matmul %22, %24, %cst_15 {dimension_numbers = #tpu.dot_dimension_numbers<[1], [0], [0], [1], [0, 0, 1, 1], [], []>} : vector<256x128xbf16>, vector<128x128xbf16>, vector<256x128xf32> -> vector<256x128xf32>
    %26 = arith.addf %20, %25 : vector<256x128xf32>
    %27 = vector.extract_strided_slice %1 {offsets = [1, 1, 0], sizes = [16, 16, 128], strides = [1, 1, 1]} : vector<18x18x128xbf16> to vector<16x16x128xbf16>
    %28 = vector.shape_cast %27 : vector<16x16x128xbf16> to vector<256x128xbf16>
    %c4 = arith.constant 4 : index
    %c0_16 = arith.constant 0 : index
    %c0_17 = arith.constant 0 : index
    %29 = vector.load %arg2[%c4, %c0_16, %c0_17] : memref<9x128x128xbf16, #tpu.memory_space<vmem>>, vector<1x128x128xbf16>
    %30 = vector.shape_cast %29 : vector<1x128x128xbf16> to vector<128x128xbf16>
    %cst_18 = arith.constant dense<0.000000e+00> : vector<256x128xf32>
    %31 = tpu.matmul %28, %30, %cst_18 {dimension_numbers = #tpu.dot_dimension_numbers<[1], [0], [0], [1], [0, 0, 1, 1], [], []>} : vector<256x128xbf16>, vector<128x128xbf16>, vector<256x128xf32> -> vector<256x128xf32>
    %32 = arith.addf %26, %31 : vector<256x128xf32>
    %33 = vector.extract_strided_slice %1 {offsets = [1, 2, 0], sizes = [16, 16, 128], strides = [1, 1, 1]} : vector<18x18x128xbf16> to vector<16x16x128xbf16>
    %34 = vector.shape_cast %33 : vector<16x16x128xbf16> to vector<256x128xbf16>
    %c5 = arith.constant 5 : index
    %c0_19 = arith.constant 0 : index
    %c0_20 = arith.constant 0 : index
    %35 = vector.load %arg2[%c5, %c0_19, %c0_20] : memref<9x128x128xbf16, #tpu.memory_space<vmem>>, vector<1x128x128xbf16>
    %36 = vector.shape_cast %35 : vector<1x128x128xbf16> to vector<128x128xbf16>
    %cst_21 = arith.constant dense<0.000000e+00> : vector<256x128xf32>
    %37 = tpu.matmul %34, %36, %cst_21 {dimension_numbers = #tpu.dot_dimension_numbers<[1], [0], [0], [1], [0, 0, 1, 1], [], []>} : vector<256x128xbf16>, vector<128x128xbf16>, vector<256x128xf32> -> vector<256x128xf32>
    %38 = arith.addf %32, %37 : vector<256x128xf32>
    %39 = vector.extract_strided_slice %1 {offsets = [2, 0, 0], sizes = [16, 16, 128], strides = [1, 1, 1]} : vector<18x18x128xbf16> to vector<16x16x128xbf16>
    %40 = vector.shape_cast %39 : vector<16x16x128xbf16> to vector<256x128xbf16>
    %c6 = arith.constant 6 : index
    %c0_22 = arith.constant 0 : index
    %c0_23 = arith.constant 0 : index
    %41 = vector.load %arg2[%c6, %c0_22, %c0_23] : memref<9x128x128xbf16, #tpu.memory_space<vmem>>, vector<1x128x128xbf16>
    %42 = vector.shape_cast %41 : vector<1x128x128xbf16> to vector<128x128xbf16>
    %cst_24 = arith.constant dense<0.000000e+00> : vector<256x128xf32>
    %43 = tpu.matmul %40, %42, %cst_24 {dimension_numbers = #tpu.dot_dimension_numbers<[1], [0], [0], [1], [0, 0, 1, 1], [], []>} : vector<256x128xbf16>, vector<128x128xbf16>, vector<256x128xf32> -> vector<256x128xf32>
    %44 = arith.addf %38, %43 : vector<256x128xf32>
    %45 = vector.extract_strided_slice %1 {offsets = [2, 1, 0], sizes = [16, 16, 128], strides = [1, 1, 1]} : vector<18x18x128xbf16> to vector<16x16x128xbf16>
    %46 = vector.shape_cast %45 : vector<16x16x128xbf16> to vector<256x128xbf16>
    %c7 = arith.constant 7 : index
    %c0_25 = arith.constant 0 : index
    %c0_26 = arith.constant 0 : index
    %47 = vector.load %arg2[%c7, %c0_25, %c0_26] : memref<9x128x128xbf16, #tpu.memory_space<vmem>>, vector<1x128x128xbf16>
    %48 = vector.shape_cast %47 : vector<1x128x128xbf16> to vector<128x128xbf16>
    %cst_27 = arith.constant dense<0.000000e+00> : vector<256x128xf32>
    %49 = tpu.matmul %46, %48, %cst_27 {dimension_numbers = #tpu.dot_dimension_numbers<[1], [0], [0], [1], [0, 0, 1, 1], [], []>} : vector<256x128xbf16>, vector<128x128xbf16>, vector<256x128xf32> -> vector<256x128xf32>
    %50 = arith.addf %44, %49 : vector<256x128xf32>
    %51 = vector.extract_strided_slice %1 {offsets = [2, 2, 0], sizes = [16, 16, 128], strides = [1, 1, 1]} : vector<18x18x128xbf16> to vector<16x16x128xbf16>
    %52 = vector.shape_cast %51 : vector<16x16x128xbf16> to vector<256x128xbf16>
    %c8 = arith.constant 8 : index
    %c0_28 = arith.constant 0 : index
    %c0_29 = arith.constant 0 : index
    %53 = vector.load %arg2[%c8, %c0_28, %c0_29] : memref<9x128x128xbf16, #tpu.memory_space<vmem>>, vector<1x128x128xbf16>
    %54 = vector.shape_cast %53 : vector<1x128x128xbf16> to vector<128x128xbf16>
    %cst_30 = arith.constant dense<0.000000e+00> : vector<256x128xf32>
    %55 = tpu.matmul %52, %54, %cst_30 {dimension_numbers = #tpu.dot_dimension_numbers<[1], [0], [0], [1], [0, 0, 1, 1], [], []>} : vector<256x128xbf16>, vector<128x128xbf16>, vector<256x128xf32> -> vector<256x128xf32>
    %56 = arith.addf %50, %55 : vector<256x128xf32>
    %c0_31 = arith.constant 0 : index
    %c0_32 = arith.constant 0 : index
    %57 = vector.load %arg3[%c0_31, %c0_32] : memref<1x128xf32, #tpu.memory_space<vmem>>, vector<1x128xf32>
    %58 = vector.broadcast %57 : vector<1x128xf32> to vector<256x128xf32>
    %59 = arith.addf %56, %58 : vector<256x128xf32>
    %60 = vector.shape_cast %59 : vector<256x128xf32> to vector<16x16x128xf32>
    %c0_33 = arith.constant 0 : index
    %c0_34 = arith.constant 0 : index
    %c0_35 = arith.constant 0 : index
    %c0_36 = arith.constant 0 : index
    %61 = vector.load %arg4[%c0_33, %c0_34, %c0_35, %c0_36] : memref<1x16x16x128xf32, #tpu.memory_space<vmem>>, vector<1x16x16x128xf32>
    %62 = vector.shape_cast %61 : vector<1x16x16x128xf32> to vector<16x16x128xf32>
    %63 = vector.shape_cast %60 : vector<16x16x128xf32> to vector<1x16x16x128xf32>
    tpu.vector_store %arg4[%c0_33, %c0_34, %c0_35, %c0_36], %63 {strides = array<i32>} : memref<1x16x16x128xf32, #tpu.memory_space<vmem>>, vector<1x16x16x128xf32>,
    %cst_37 = arith.constant dense<0.000000e+00> : vector<128xf32>
    %64 = vector.multi_reduction <add>, %59, %cst_37 [0] : vector<256x128xf32> to vector<128xf32>
    %65 = vector.shape_cast %64 : vector<128xf32> to vector<1x128xf32>
    %66 = arith.mulf %59, %59 : vector<256x128xf32>
    %cst_38 = arith.constant dense<0.000000e+00> : vector<128xf32>
    %67 = vector.multi_reduction <add>, %66, %cst_38 [0] : vector<256x128xf32> to vector<128xf32>
    %68 = vector.shape_cast %67 : vector<128xf32> to vector<1x128xf32>
    %69 = tpu.iota {dimensions = array<i32: 0>} : vector<8x128xi32>
    %c0_i32 = arith.constant 0 : i32
    %70 = vector.broadcast %c0_i32 : i32 to vector<8x128xi32>
    %71 = arith.cmpi eq, %69, %70 : vector<8x128xi32>
    %72 = vector.shape_cast %65 : vector<1x128xf32> to vector<1x128xf32>
    %73 = vector.broadcast %72 : vector<1x128xf32> to vector<8x128xf32>
    %c1_i32 = arith.constant 1 : i32
    %74 = vector.broadcast %c1_i32 : i32 to vector<8x128xi32>
    %75 = arith.cmpi eq, %69, %74 : vector<8x128xi32>
    %76 = vector.shape_cast %68 : vector<1x128xf32> to vector<1x128xf32>
    %77 = vector.broadcast %76 : vector<1x128xf32> to vector<8x128xf32>
    %cst_39 = arith.constant 0.000000e+00 : f32
    %78 = vector.broadcast %cst_39 : f32 to vector<8x128xf32>
    %79 = arith.select %75, %77, %78 : vector<8x128xi1>, vector<8x128xf32>
    %80 = arith.select %71, %73, %79 : vector<8x128xi1>, vector<8x128xf32>
    %c0_40 = arith.constant 0 : index
    %c0_41 = arith.constant 0 : index
    %c0_42 = arith.constant 0 : index
    %81 = vector.load %arg5[%c0_40, %c0_41, %c0_42] : memref<1x8x128xf32, #tpu.memory_space<vmem>>, vector<1x8x128xf32>
    %82 = vector.shape_cast %81 : vector<1x8x128xf32> to vector<8x128xf32>
    %83 = vector.shape_cast %80 : vector<8x128xf32> to vector<1x8x128xf32>
    tpu.vector_store %arg5[%c0_40, %c0_41, %c0_42], %83 {strides = array<i32>} : memref<1x8x128xf32, #tpu.memory_space<vmem>>, vector<1x8x128xf32>,
    return
  }
  func.func @transform_0(%arg0: i32) -> (i32, i32, i32, i32) {
    %c0_i32 = arith.constant 0 : i32
    %c0_i32_0 = arith.constant 0 : i32
    %c0_i32_1 = arith.constant 0 : i32
    %c0_i32_2 = arith.constant 0 : i32
    return %arg0, %c0_i32, %c0_i32_0, %c0_i32_1 : i32, i32, i32, i32
  }
  func.func @transform_1(%arg0: i32) -> (i32, i32, i32) {
    %c0_i32 = arith.constant 0 : i32
    %c0_i32_0 = arith.constant 0 : i32
    %c0_i32_1 = arith.constant 0 : i32
    %c0_i32_2 = arith.constant 0 : i32
    return %c0_i32, %c0_i32_0, %c0_i32_1 : i32, i32, i32
  }
  func.func @transform_2(%arg0: i32) -> (i32, i32) {
    %c0_i32 = arith.constant 0 : i32
    %c0_i32_0 = arith.constant 0 : i32
    %c0_i32_1 = arith.constant 0 : i32
    return %c0_i32, %c0_i32_0 : i32, i32
  }
  func.func @transform_3(%arg0: i32) -> (i32, i32, i32, i32) {
    %c0_i32 = arith.constant 0 : i32
    %c0_i32_0 = arith.constant 0 : i32
    %c0_i32_1 = arith.constant 0 : i32
    %c0_i32_2 = arith.constant 0 : i32
    return %arg0, %c0_i32, %c0_i32_0, %c0_i32_1 : i32, i32, i32, i32
  }
  func.func @transform_4(%arg0: i32) -> (i32, i32, i32) {
    %c0_i32 = arith.constant 0 : i32
    %c0_i32_0 = arith.constant 0 : i32
    %c0_i32_1 = arith.constant 0 : i32
    return %arg0, %c0_i32, %c0_i32_0 : i32, i32, i32
  }
}

</mosaic_0001>

<bundles_post_ra>
// kernel: inconv_forward_nchw.5
= control target key start
LH: loop header
LB: loop body
LE: loop exit
PB: predicated region body
PF: predicated region fallthrough
CT: control target
= control target key end

     0   :  { %s1049_s0 = inlined_call_operand.vmem [shape: f32[512,128], index: 0, kind: input, shape index: {}]   ;;  %s1050_s1 = inlined_call_operand.vmem [shape: f32[1,128], index: 1, kind: input, shape index: {}]   ;;  %s1051_s2 = inlined_call_operand.vmem [shape: f32[1,128], index: 2, kind: input, shape index: {}]   ;;  %s1052_s3 = inlined_call_operand.vmem [shape: bf16[512,128], index: 3, kind: output, shape index: {}]  }
   0x1   :  { %v14_v0 = vld [vmem:[%s1049_s0] sm:$0xff]  ;;  %v15_v1 = vld [vmem:[%s1049_s0 + $0x8] sm:$0xff]  ;;  %v16_v4 = vld [vmem:[%s1049_s0 + $0x10] sm:$0xff] }
   0x2   :  { %v632_v2 = vld [vmem:[%s1050_s1] ss:$0 sm:$0xff]  ;;  %v17_v5 = vld [vmem:[%s1049_s0 + $0x18] sm:$0xff]  ;;  %v19_v11 = vld [vmem:[%s1049_s0 + $0x28] sm:$0xff] }
   0x3   :  { %v637_v3 = vld [vmem:[%s1051_s2] ss:$0 sm:$0xff]  ;;  %v82_v7 = vmul.f32 %v632_v2, %v14_v0  ;;  %v83_v8 = vmul.f32 %v632_v2, %v15_v1  ;;  %v84_v9 = vmul.f32 %v632_v2, %v16_v4  ;;  %v85_v10 = vmul.f32 %v632_v2, %v17_v5  ;;  %v20_v12 = vld [vmem:[%s1049_s0 + $0x30] sm:$0xff]  ;;  %v21_v13 = vld [vmem:[%s1049_s0 + $0x38] sm:$0xff] }
   0x4   :  { %v18_v6 = vld [vmem:[%s1049_s0 + $0x20] sm:$0xff]  ;;  %v87_v15 = vmul.f32 %v632_v2, %v19_v11  ;;  %v88_v16 = vmul.f32 %v632_v2, %v20_v12  ;;  %v89_v17 = vmul.f32 %v632_v2, %v21_v13  ;;  %v23_v27 = vld [vmem:[%s1049_s0 + $0x48] sm:$0xff]  ;;  %v24_v32 = vld [vmem:[%s1049_s0 + $0x50] sm:$0xff] }
   0x5   :  { %v86_v14 = vmul.f32 %v632_v2, %v18_v6  ;;  %v150_v18 = vadd.f32 %v637_v3, %v82_v7  ;;  %v151_v19 = vadd.f32 %v637_v3, %v83_v8  ;;  %v152_v20 = vadd.f32 %v637_v3, %v84_v9  ;;  %v22_v26 = vld [vmem:[%s1049_s0 + $0x40] sm:$0xff]  ;;  %v25_v33 = vld [vmem:[%s1049_s0 + $0x58] sm:$0xff]  ;;  %v27_v39 = vld [vmem:[%s1049_s0 + $0x68] sm:$0xff] }
   0x6   :  { %v153_v21 = vadd.f32 %v637_v3, %v85_v10  ;;  %v155_v23 = vadd.f32 %v637_v3, %v87_v15  ;;  %v156_v24 = vadd.f32 %v637_v3, %v88_v16  ;;  %v157_v25 = vadd.f32 %v637_v3, %v89_v17  ;;  %v26_v38 = vld [vmem:[%s1049_s0 + $0x60] sm:$0xff]  ;;  %v28_v44 = vld [vmem:[%s1049_s0 + $0x70] sm:$0xff]  ;;  %v29_v45 = vld [vmem:[%s1049_s0 + $0x78] sm:$0xff] }
   0x7   :  { %v154_v22 = vadd.f32 %v637_v3, %v86_v14  ;;  %v214_v28 = vmax.f32 %v150_v18, 0.0  ;;  %v215_v29 = vmax.f32 %v151_v19, 0.0  ;;  %v216_v30 = vmax.f32 %v152_v20, 0.0  ;;  %v30_v58 = vld [vmem:[%s1049_s0 + $0x80] sm:$0xff]  ;;  %v31_v63 = vld [vmem:[%s1049_s0 + $0x88] sm:$0xff]  ;;  %v32_v6 = vld [vmem:[%s1049_s0 + $0x90] sm:$0xff] }
   0x8   :  { %v217_v31 = vmax.f32 %v153_v21, 0.0  ;;  %v219_v35 = vmax.f32 %v155_v23, 0.0  ;;  %v220_v36 = vmax.f32 %v156_v24, 0.0  ;;  %v221_v37 = vmax.f32 %v157_v25, 0.0  ;;  %v33_v7 = vld [vmem:[%s1049_s0 + $0x98] sm:$0xff]  ;;  %v34_v12 = vld [vmem:[%s1049_s0 + $0xa0] sm:$0xff] }
   0x9   :  { %v218_v34 = vmax.f32 %v154_v22, 0.0  ;;  %v413_v40 = vpack.c.bf16 %v215_v29, %v214_v28  ;;  %v90_v42 = vmul.f32 %v632_v2, %v22_v26  ;;  %v91_v43 = vmul.f32 %v632_v2, %v23_v27  ;;  %v35_v13 = vld [vmem:[%s1049_s0 + $0xa8] sm:$0xff]  ;;  %v36_v18 = vld [vmem:[%s1049_s0 + $0xb0] sm:$0xff]  ;;  %v37_v23 = vld [vmem:[%s1049_s0 + $0xb8] sm:$0xff] }
   0xa   :  { %v418_v41 = vpack.c.bf16 %v217_v31, %v216_v30  ;;  %v428_v47 = vpack.c.bf16 %v221_v37, %v220_v36  ;;  %v92_v48 = vmul.f32 %v632_v2, %v24_v32  ;;  %v93_v49 = vmul.f32 %v632_v2, %v25_v33  ;;  %v38_v28 = vld [vmem:[%s1049_s0 + $0xc0] sm:$0xff]  ;;  %v39_v37 = vld [vmem:[%s1049_s0 + $0xc8] sm:$0xff] }
   0xb   :  { %v423_v46 = vpack.c.bf16 %v219_v35, %v218_v34  ;;  %414 = vst [vmem:[%s1052_s3] sm:$0xff] %v413_v40   ;;  %v158_v50 = vadd.f32 %v637_v3, %v90_v42  ;;  %v159_v51 = vadd.f32 %v637_v3, %v91_v43  ;;  %v94_v52 = vmul.f32 %v632_v2, %v26_v38  ;;  %v40_v42 = vld [vmem:[%s1049_s0 + $0xd0] sm:$0xff]  ;;  %v41_v43 = vld [vmem:[%s1049_s0 + $0xd8] sm:$0xff] }
   0xc   :  { %v95_v53 = vmul.f32 %v632_v2, %v27_v39  ;;  %570 = vst [vmem:[%s1052_s3 + $0x8] sm:$0xff] %v418_v41   ;;  %v160_v54 = vadd.f32 %v637_v3, %v92_v48  ;;  %v161_v55 = vadd.f32 %v637_v3, %v93_v49  ;;  %v96_v56 = vmul.f32 %v632_v2, %v28_v44  ;;  %v42_v48 = vld [vmem:[%s1049_s0 + $0xe0] sm:$0xff]  ;;  %v43_v49 = vld [vmem:[%s1049_s0 + $0xe8] sm:$0xff] }
   0xd   :  { %v97_v57 = vmul.f32 %v632_v2, %v29_v45  ;;  %571 = vst [vmem:[%s1052_s3 + $0x10] sm:$0xff] %v423_v46   ;;  %v222_v59 = vmax.f32 %v158_v50, 0.0  ;;  %v223_v60 = vmax.f32 %v159_v51, 0.0  ;;  %v162_v61 = vadd.f32 %v637_v3, %v94_v52 }
   0xe   :  { %v163_v62 = vadd.f32 %v637_v3, %v95_v53  ;;  %572 = vst [vmem:[%s1052_s3 + $0x18] sm:$0xff] %v428_v47   ;;  %v224_v0 = vmax.f32 %v160_v54, 0.0  ;;  %v225_v1 = vmax.f32 %v161_v55, 0.0  ;;  %v164_v4 = vadd.f32 %v637_v3, %v96_v56  ;;  %v44_v54 = vld [vmem:[%s1049_s0 + $0xf0] sm:$0xff] }
   0xf   :  { %v165_v5 = vadd.f32 %v637_v3, %v97_v57  ;;  %v433_v8 = vpack.c.bf16 %v223_v60, %v222_v59  ;;  %v226_v9 = vmax.f32 %v162_v61, 0.0  ;;  %v98_v11 = vmul.f32 %v632_v2, %v30_v58  ;;  %v45_v59 = vld [vmem:[%s1049_s0 + $0xf8] sm:$0xff] }
  0x10   :  { %v227_v10 = vmax.f32 %v163_v62, 0.0  ;;  %v438_v14 = vpack.c.bf16 %v225_v1, %v224_v0  ;;  %v228_v15 = vmax.f32 %v164_v4, 0.0  ;;  %v99_v17 = vmul.f32 %v632_v2, %v31_v63  ;;  %v46_v0 = vld [vmem:[%s1049_s0 + $0x100] sm:$0xff] }
  0x11   :  { %v229_v16 = vmax.f32 %v165_v5, 0.0  ;;  %573 = vst [vmem:[%s1052_s3 + $0x20] sm:$0xff] %v433_v8   ;;  %v166_v20 = vadd.f32 %v637_v3, %v98_v11  ;;  %v100_v21 = vmul.f32 %v632_v2, %v32_v6  ;;  %v101_v22 = vmul.f32 %v632_v2, %v33_v7  ;;  %v47_v11 = vld [vmem:[%s1049_s0 + $0x108] sm:$0xff] }
  0x12   :  { %v443_v19 = vpack.c.bf16 %v227_v10, %v226_v9  ;;  %574 = vst [vmem:[%s1052_s3 + $0x28] sm:$0xff] %v438_v14   ;;  %v167_v25 = vadd.f32 %v637_v3, %v99_v17  ;;  %v102_v26 = vmul.f32 %v632_v2, %v34_v12  ;;  %v103_v27 = vmul.f32 %v632_v2, %v35_v13  ;;  %v49_v17 = vld [vmem:[%s1049_s0 + $0x118] sm:$0xff] }
  0x13   :  { %v448_v24 = vpack.c.bf16 %v229_v16, %v228_v15  ;;  %v230_v29 = vmax.f32 %v166_v20, 0.0  ;;  %v168_v30 = vadd.f32 %v637_v3, %v100_v21  ;;  %v169_v31 = vadd.f32 %v637_v3, %v101_v22  ;;  %v48_v16 = vld [vmem:[%s1049_s0 + $0x110] sm:$0xff]  ;;  %v50_v22 = vld [vmem:[%s1049_s0 + $0x120] sm:$0xff] }
  0x14   :  { %575 = vst [vmem:[%s1052_s3 + $0x30] sm:$0xff] %v443_v19   ;;  %v104_v32 = vmul.f32 %v632_v2, %v36_v18  ;;  %v231_v33 = vmax.f32 %v167_v25, 0.0  ;;  %v170_v34 = vadd.f32 %v637_v3, %v102_v26  ;;  %v171_v35 = vadd.f32 %v637_v3, %v103_v27 }
  0x15   :  { %576 = vst [vmem:[%s1052_s3 + $0x38] sm:$0xff] %v448_v24   ;;  %v105_v36 = vmul.f32 %v632_v2, %v37_v23  ;;  %v232_v38 = vmax.f32 %v168_v30, 0.0  ;;  %v233_v39 = vmax.f32 %v169_v31, 0.0  ;;  %v106_v41 = vmul.f32 %v632_v2, %v38_v28  ;;  %v51_v23 = vld [vmem:[%s1049_s0 + $0x128] sm:$0xff]  ;;  %v52_v28 = vld [vmem:[%s1049_s0 + $0x130] sm:$0xff] }
  0x16   :  { %v172_v40 = vadd.f32 %v637_v3, %v104_v32  ;;  %v453_v44 = vpack.c.bf16 %v231_v33, %v230_v29  ;;  %v234_v45 = vmax.f32 %v170_v34, 0.0  ;;  %v235_v46 = vmax.f32 %v171_v35, 0.0  ;;  %v53_v33 = vld [vmem:[%s1049_s0 + $0x138] sm:$0xff] }
  0x17   :  { %v173_v47 = vadd.f32 %v637_v3, %v105_v36  ;;  %v458_v50 = vpack.c.bf16 %v233_v39, %v232_v38  ;;  %v107_v52 = vmul.f32 %v632_v2, %v39_v37  ;;  %v174_v53 = vadd.f32 %v637_v3, %v106_v41  ;;  %v54_v38 = vld [vmem:[%s1049_s0 + $0x140] sm:$0xff] }
  0x18   :  { %v236_v51 = vmax.f32 %v172_v40, 0.0  ;;  %577 = vst [vmem:[%s1052_s3 + $0x40] sm:$0xff] %v453_v44   ;;  %v463_v55 = vpack.c.bf16 %v235_v46, %v234_v45  ;;  %v108_v57 = vmul.f32 %v632_v2, %v40_v42  ;;  %v109_v58 = vmul.f32 %v632_v2, %v41_v43 }
  0x19   :  { %v237_v56 = vmax.f32 %v173_v47, 0.0  ;;  %578 = vst [vmem:[%s1052_s3 + $0x48] sm:$0xff] %v458_v50   ;;  %v175_v60 = vadd.f32 %v637_v3, %v107_v52  ;;  %v238_v61 = vmax.f32 %v174_v53, 0.0  ;;  %v110_v62 = vmul.f32 %v632_v2, %v42_v48  ;;  %v55_v47 = vld [vmem:[%s1049_s0 + $0x148] sm:$0xff]  ;;  %v56_v52 = vld [vmem:[%s1049_s0 + $0x150] sm:$0xff]  ;;  %v57_v53 = vld [vmem:[%s1049_s0 + $0x158] sm:$0xff] }
  0x1a   :  { %v111_v63 = vmul.f32 %v632_v2, %v43_v49  ;;  %579 = vst [vmem:[%s1052_s3 + $0x50] sm:$0xff] %v463_v55   ;;  %v176_v4 = vadd.f32 %v637_v3, %v108_v57  ;;  %v177_v5 = vadd.f32 %v637_v3, %v109_v58  ;;  %v112_v6 = vmul.f32 %v632_v2, %v44_v54  ;;  %v58_v58 = vld [vmem:[%s1049_s0 + $0x160] sm:$0xff] }
  0x1b   :  { %v468_v1 = vpack.c.bf16 %v237_v56, %v236_v51  ;;  %v239_v7 = vmax.f32 %v175_v60, 0.0  ;;  %v178_v8 = vadd.f32 %v637_v3, %v110_v62  ;;  %v113_v10 = vmul.f32 %v632_v2, %v45_v59  ;;  %v59_v59 = vld [vmem:[%s1049_s0 + $0x168] sm:$0xff] }
  0x1c   :  { %v179_v9 = vadd.f32 %v637_v3, %v111_v63  ;;  %v240_v12 = vmax.f32 %v176_v4, 0.0  ;;  %v241_v13 = vmax.f32 %v177_v5, 0.0  ;;  %v180_v14 = vadd.f32 %v637_v3, %v112_v6 }
  0x1d   :  { %580 = vst [vmem:[%s1052_s3 + $0x58] sm:$0xff] %v468_v1   ;;  %v114_v15 = vmul.f32 %v632_v2, %v46_v0  ;;  %v473_v18 = vpack.c.bf16 %v239_v7, %v238_v61  ;;  %v242_v19 = vmax.f32 %v178_v8, 0.0  ;;  %v181_v21 = vadd.f32 %v637_v3, %v113_v10  ;;  %v60_v0 = vld [vmem:[%s1049_s0 + $0x170] sm:$0xff]  ;;  %v61_v7 = vld [vmem:[%s1049_s0 + $0x178] sm:$0xff] }
  0x1e   :  { %v243_v20 = vmax.f32 %v179_v9, 0.0  ;;  %v478_v24 = vpack.c.bf16 %v241_v13, %v240_v12  ;;  %v244_v25 = vmax.f32 %v180_v14, 0.0  ;;  %v115_v26 = vmul.f32 %v632_v2, %v47_v11  ;;  %v62_v12 = vld [vmem:[%s1049_s0 + $0x180] sm:$0xff] }
  0x1f   :  { %v182_v27 = vadd.f32 %v637_v3, %v114_v15  ;;  %581 = vst [vmem:[%s1052_s3 + $0x60] sm:$0xff] %v473_v18   ;;  %v245_v30 = vmax.f32 %v181_v21, 0.0  ;;  %v116_v31 = vmul.f32 %v632_v2, %v48_v16  ;;  %v117_v32 = vmul.f32 %v632_v2, %v49_v17  ;;  %v63_v21 = vld [vmem:[%s1049_s0 + $0x188] sm:$0xff] }
  0x20   :  { %v483_v29 = vpack.c.bf16 %v243_v20, %v242_v19  ;;  %582 = vst [vmem:[%s1052_s3 + $0x68] sm:$0xff] %v478_v24   ;;  %v183_v34 = vadd.f32 %v637_v3, %v115_v26  ;;  %v118_v36 = vmul.f32 %v632_v2, %v50_v22  ;;  %v119_v37 = vmul.f32 %v632_v2, %v51_v23  ;;  %v64_v26 = vld [vmem:[%s1049_s0 + $0x190] sm:$0xff] }
  0x21   :  { %v246_v35 = vmax.f32 %v182_v27, 0.0  ;;  %v488_v39 = vpack.c.bf16 %v245_v30, %v244_v25  ;;  %v184_v40 = vadd.f32 %v637_v3, %v116_v31  ;;  %v185_v41 = vadd.f32 %v637_v3, %v117_v32  ;;  %v65_v27 = vld [vmem:[%s1049_s0 + $0x198] sm:$0xff]  ;;  %v66_v32 = vld [vmem:[%s1049_s0 + $0x1a0] sm:$0xff] }
  0x22   :  { %583 = vst [vmem:[%s1052_s3 + $0x70] sm:$0xff] %v483_v29   ;;  %v120_v42 = vmul.f32 %v632_v2, %v52_v28  ;;  %v247_v43 = vmax.f32 %v183_v34, 0.0  ;;  %v186_v44 = vadd.f32 %v637_v3, %v118_v36  ;;  %v187_v45 = vadd.f32 %v637_v3, %v119_v37 }
  0x23   :  { %v121_v46 = vmul.f32 %v632_v2, %v53_v33  ;;  %584 = vst [vmem:[%s1052_s3 + $0x78] sm:$0xff] %v488_v39   ;;  %v248_v48 = vmax.f32 %v184_v40, 0.0  ;;  %v249_v49 = vmax.f32 %v185_v41, 0.0  ;;  %v122_v51 = vmul.f32 %v632_v2, %v54_v38  ;;  %v67_v33 = vld [vmem:[%s1049_s0 + $0x1a8] sm:$0xff]  ;;  %v68_v38 = vld [vmem:[%s1049_s0 + $0x1b0] sm:$0xff] }
  0x24   :  { %v188_v50 = vadd.f32 %v637_v3, %v120_v42  ;;  %v493_v54 = vpack.c.bf16 %v247_v43, %v246_v35  ;;  %v250_v55 = vmax.f32 %v186_v44, 0.0  ;;  %v251_v56 = vmax.f32 %v187_v45, 0.0  ;;  %v69_v43 = vld [vmem:[%s1049_s0 + $0x1b8] sm:$0xff] }
  0x25   :  { %v189_v57 = vadd.f32 %v637_v3, %v121_v46  ;;  %v498_v60 = vpack.c.bf16 %v249_v49, %v248_v48  ;;  %v123_v62 = vmul.f32 %v632_v2, %v55_v47  ;;  %v190_v63 = vadd.f32 %v637_v3, %v122_v51  ;;  %v70_v48 = vld [vmem:[%s1049_s0 + $0x1c0] sm:$0xff] }
  0x26   :  { %v252_v61 = vmax.f32 %v188_v50, 0.0  ;;  %585 = vst [vmem:[%s1052_s3 + $0x80] sm:$0xff] %v493_v54   ;;  %v503_v1 = vpack.c.bf16 %v251_v56, %v250_v55  ;;  %v124_v5 = vmul.f32 %v632_v2, %v56_v52  ;;  %v125_v6 = vmul.f32 %v632_v2, %v57_v53 }
  0x27   :  { %v253_v4 = vmax.f32 %v189_v57, 0.0  ;;  %586 = vst [vmem:[%s1052_s3 + $0x88] sm:$0xff] %v498_v60   ;;  %v191_v8 = vadd.f32 %v637_v3, %v123_v62  ;;  %v254_v9 = vmax.f32 %v190_v63, 0.0  ;;  %v126_v10 = vmul.f32 %v632_v2, %v58_v58  ;;  %v71_v57 = vld [vmem:[%s1049_s0 + $0x1c8] sm:$0xff]  ;;  %v72_v62 = vld [vmem:[%s1049_s0 + $0x1d0] sm:$0xff]  ;;  %v73_v63 = vld [vmem:[%s1049_s0 + $0x1d8] sm:$0xff] }
  0x28   :  { %v127_v11 = vmul.f32 %v632_v2, %v59_v59  ;;  %587 = vst [vmem:[%s1052_s3 + $0x90] sm:$0xff] %v503_v1   ;;  %v192_v14 = vadd.f32 %v637_v3, %v124_v5  ;;  %v193_v15 = vadd.f32 %v637_v3, %v125_v6  ;;  %v128_v16 = vmul.f32 %v632_v2, %v60_v0  ;;  %v74_v6 = vld [vmem:[%s1049_s0 + $0x1e0] sm:$0xff] }
  0x29   :  { %v508_v13 = vpack.c.bf16 %v253_v4, %v252_v61  ;;  %v255_v17 = vmax.f32 %v191_v8, 0.0  ;;  %v194_v18 = vadd.f32 %v637_v3, %v126_v10  ;;  %v129_v20 = vmul.f32 %v632_v2, %v61_v7  ;;  %v75_v7 = vld [vmem:[%s1049_s0 + $0x1e8] sm:$0xff] }
  0x2a   :  { %v195_v19 = vadd.f32 %v637_v3, %v127_v11  ;;  %v256_v22 = vmax.f32 %v192_v14, 0.0  ;;  %v257_v23 = vmax.f32 %v193_v15, 0.0  ;;  %v196_v24 = vadd.f32 %v637_v3, %v128_v16 }
  0x2b   :  { %588 = vst [vmem:[%s1052_s3 + $0x98] sm:$0xff] %v508_v13   ;;  %v130_v25 = vmul.f32 %v632_v2, %v62_v12  ;;  %v513_v28 = vpack.c.bf16 %v255_v17, %v254_v9  ;;  %v258_v29 = vmax.f32 %v194_v18, 0.0  ;;  %v197_v31 = vadd.f32 %v637_v3, %v129_v20  ;;  %v76_v12 = vld [vmem:[%s1049_s0 + $0x1f0] sm:$0xff]  ;;  %v77_v17 = vld [vmem:[%s1049_s0 + $0x1f8] sm:$0xff] }
  0x2c   :  { %v259_v30 = vmax.f32 %v195_v19, 0.0  ;;  %v518_v34 = vpack.c.bf16 %v257_v23, %v256_v22  ;;  %v260_v35 = vmax.f32 %v196_v24, 0.0  ;;  %v131_v36 = vmul.f32 %v632_v2, %v63_v21 }
  0x2d   :  { %v198_v37 = vadd.f32 %v637_v3, %v130_v25  ;;  %589 = vst [vmem:[%s1052_s3 + $0xa0] sm:$0xff] %v513_v28   ;;  %v261_v40 = vmax.f32 %v197_v31, 0.0  ;;  %v132_v41 = vmul.f32 %v632_v2, %v64_v26  ;;  %v133_v42 = vmul.f32 %v632_v2, %v65_v27 }
  0x2e   :  { %v523_v39 = vpack.c.bf16 %v259_v30, %v258_v29  ;;  %590 = vst [vmem:[%s1052_s3 + $0xa8] sm:$0xff] %v518_v34   ;;  %v199_v44 = vadd.f32 %v637_v3, %v131_v36  ;;  %v134_v46 = vmul.f32 %v632_v2, %v66_v32  ;;  %v135_v47 = vmul.f32 %v632_v2, %v67_v33 }
  0x2f   :  { %v262_v45 = vmax.f32 %v198_v37, 0.0  ;;  %v528_v49 = vpack.c.bf16 %v261_v40, %v260_v35  ;;  %v200_v50 = vadd.f32 %v637_v3, %v132_v41  ;;  %v201_v51 = vadd.f32 %v637_v3, %v133_v42 }
  0x30   :  { %591 = vst [vmem:[%s1052_s3 + $0xb0] sm:$0xff] %v523_v39   ;;  %v136_v52 = vmul.f32 %v632_v2, %v68_v38  ;;  %v263_v53 = vmax.f32 %v199_v44, 0.0  ;;  %v202_v54 = vadd.f32 %v637_v3, %v134_v46  ;;  %v203_v55 = vadd.f32 %v637_v3, %v135_v47 }
  0x31   :  { %v137_v56 = vmul.f32 %v632_v2, %v69_v43  ;;  %592 = vst [vmem:[%s1052_s3 + $0xb8] sm:$0xff] %v528_v49   ;;  %v264_v58 = vmax.f32 %v200_v50, 0.0  ;;  %v265_v59 = vmax.f32 %v201_v51, 0.0  ;;  %v138_v61 = vmul.f32 %v632_v2, %v70_v48 }
  0x32   :  { %v204_v60 = vadd.f32 %v637_v3, %v136_v52  ;;  %v533_v0 = vpack.c.bf16 %v263_v53, %v262_v45  ;;  %v266_v1 = vmax.f32 %v202_v54, 0.0  ;;  %v267_v4 = vmax.f32 %v203_v55, 0.0 }
  0x33   :  { %v205_v5 = vadd.f32 %v637_v3, %v137_v56  ;;  %v538_v8 = vpack.c.bf16 %v265_v59, %v264_v58  ;;  %v139_v10 = vmul.f32 %v632_v2, %v71_v57  ;;  %v206_v11 = vadd.f32 %v637_v3, %v138_v61 }
  0x34   :  { %v268_v9 = vmax.f32 %v204_v60, 0.0  ;;  %593 = vst [vmem:[%s1052_s3 + $0xc0] sm:$0xff] %v533_v0   ;;  %v543_v13 = vpack.c.bf16 %v267_v4, %v266_v1  ;;  %v140_v15 = vmul.f32 %v632_v2, %v72_v62  ;;  %v141_v16 = vmul.f32 %v632_v2, %v73_v63 }
  0x35   :  { %v269_v14 = vmax.f32 %v205_v5, 0.0  ;;  %594 = vst [vmem:[%s1052_s3 + $0xc8] sm:$0xff] %v538_v8   ;;  %v207_v18 = vadd.f32 %v637_v3, %v139_v10  ;;  %v270_v19 = vmax.f32 %v206_v11, 0.0  ;;  %v142_v20 = vmul.f32 %v632_v2, %v74_v6 }
  0x36   :  { %v143_v21 = vmul.f32 %v632_v2, %v75_v7  ;;  %595 = vst [vmem:[%s1052_s3 + $0xd0] sm:$0xff] %v543_v13   ;;  %v208_v23 = vadd.f32 %v637_v3, %v140_v15  ;;  %v209_v24 = vadd.f32 %v637_v3, %v141_v16  ;;  %v144_v25 = vmul.f32 %v632_v2, %v76_v12 }
  0x37   :  { %v548_v22 = vpack.c.bf16 %v269_v14, %v268_v9  ;;  %v271_v26 = vmax.f32 %v207_v18, 0.0  ;;  %v210_v27 = vadd.f32 %v637_v3, %v142_v20  ;;  %v145_v29 = vmul.f32 %v632_v2, %v77_v17 }
  0x38   :  { %v211_v28 = vadd.f32 %v637_v3, %v143_v21  ;;  %v272_v30 = vmax.f32 %v208_v23, 0.0  ;;  %v273_v31 = vmax.f32 %v209_v24, 0.0  ;;  %v212_v32 = vadd.f32 %v637_v3, %v144_v25 }
  0x39   :  { %596 = vst [vmem:[%s1052_s3 + $0xd8] sm:$0xff] %v548_v22   ;;  %v553_v33 = vpack.c.bf16 %v271_v26, %v270_v19  ;;  %v274_v34 = vmax.f32 %v210_v27, 0.0  ;;  %v213_v36 = vadd.f32 %v637_v3, %v145_v29 }
  0x3a   :  { %v275_v35 = vmax.f32 %v211_v28, 0.0  ;;  %v558_v37 = vpack.c.bf16 %v273_v31, %v272_v30  ;;  %v276_v38 = vmax.f32 %v212_v32, 0.0 }
  0x3b   :  { %597 = vst [vmem:[%s1052_s3 + $0xe0] sm:$0xff] %v553_v33   ;;  %v277_v39 = vmax.f32 %v213_v36, 0.0 }
  0x3c   :  { %v563_v2 = vpack.c.bf16 %v275_v35, %v274_v34  ;;  %598 = vst [vmem:[%s1052_s3 + $0xe8] sm:$0xff] %v558_v37  }
  0x3d   :  { %v568_v40 = vpack.c.bf16 %v277_v39, %v276_v38 }
  0x3e   :  { %599 = vst [vmem:[%s1052_s3 + $0xf0] sm:$0xff] %v563_v2  }
  0x3f   :  { %600 = vst [vmem:[%s1052_s3 + $0xf8] sm:$0xff] %v568_v40  }

// kernel: inconv_forward_nchw.4
= control target key start
LH: loop header
LB: loop body
LE: loop exit
PB: predicated region body
PF: predicated region fallthrough
CT: control target
= control target key end

     0   :  { %s2870_s15 = smov 0   ;;  %s4011_s0 = inlined_call_operand.vmem [shape: bf16[2,18,18,4], index: 0, kind: input, shape index: {}]   ;;  %s4012_s1 = inlined_call_operand.vmem [shape: bf16[9,4,128], index: 1, kind: input, shape index: {}]   ;;  %s4013_s2 = inlined_call_operand.vmem [shape: f32[1,128], index: 2, kind: input, shape index: {}]   ;;  %s4014_s3 = inlined_call_operand.vmem [shape: f32[2,16,16,128], index: 3, kind: output, shape index: {0}]   ;;  %s4015_s4 = inlined_call_operand.vmem [shape: f32[2,8,128], index: 4, kind: output, shape index: {1}]  }
   0x1 LB: > { %s2544_s16 = sadd.s32 4294967295, %s2843_s15   ;;  %p2548_p0 = scmp.ge.s32.totalorder %s2843_s15, 1  ;;  %s2843_s15 = sphi %s2870_s15, %s15_s15  }
   0x2   : > { %p165_p1 = scmp.lt.s32.totalorder %s2843_s15, 3 }
   0x4   : > { %p166_p2 = pnand %p2548_p0, %p165_p1 }
   0x6   : > { %169 = sbr.rel (%p166_p2) target bundleno = 774 (0x306), region = 32 }
   0xb   : > { %v2553_v0 = vld [vmem:[%s4012_s1 + $0x2] sm:$0x3]  ;;  %vm751_vm0 = vcmask 1041408   ;;  %p195_p3 = scmp.lt.s32.totalorder %s2544_s16, 1  ;;  %v2666_v2 = vld [vmem:[%s4012_s1 + $0x4] sm:$0x3] }
   0xc   : > { %v753_v1 = vsel %vm751_vm0, %v2553_v0, 0  ;;  %v1294_v3 = vsel %vm751_vm0, %v2666_v2, 0  ;;  %v2683_v4 = vld [vmem:[%s4012_s1 + $0x6] sm:$0x3]  ;;  %v264_v5 = vld [vmem:[%s4012_s1] sm:$0x3] }
   0xd   : > { %2816 = vmatpush.bf16.msra.mxu1 %v753_v1  ;;  %2817 = vmatpush.bf16.msra.mxu2 %v753_v1  ;;  %s4155_s16 = smov (!%p195_p3, %s2544_s16), 1  ;;  %v2704_v6 = vld [vmem:[%s4012_s1 + $0x8] sm:$0x3]  ;;  %v1428_v7 = vsel %vm751_vm0, %v2683_v4, 0  ;;  %v973_v8 = vsel %vm751_vm0, %v264_v5, 0  ;;  %vm702_vm4 = vcmask 31744  }
   0xe   : > { %2818 = vmatpush.bf16.msra.mxu3 %v753_v1  ;;  %762 = vmatpush.bf16.msra.mxu0 %v753_v1  ;;  %s2819_s27 = smul.u32 216, %s4155_s16  ;;  %v1584_v9 = vsel %vm751_vm0, %v2704_v6, 0  ;;  %vm265_vm1 = vsmask.f32 3328  ;;  %vm266_vm2 = vsmask.f32 7440 }
   0xf   : > { %vm2931_vm3 = vmor %vm265_vm1, %vm266_vm2  ;;  %vm1080_vm5 = vcmask 1042432   ;;  %vm1081_vm6 = vcmask 1046532   ;;  %s2797_s13 = sshll.u32 %s4155_s16, 8  ;;  %s2552_s21 = sshll.u32 %s4155_s16, 3 }
  0x10   : > { %s2904_s30 = scalar_lea.vmem %s4011_s0, %s2819_s27  ;;  %vm3234_vm7 = vmor %vm1080_vm5, %vm1081_vm6  ;;  %s3830_s20 = scalar_lea.vmem %s4014_s3, %s2797_s13 }
  0x11   : > { %1303 = vmatpush.bf16.msrb.mxu2 %v1294_v3  ;;  %982 = vmatpush.bf16.msrb.mxu1 %v973_v8  ;;  %v2907_v10 = vld [vmem:[%s2904_s30 + $0x30] sm:$0xf]  ;;  %v2910_v11 = vld [vmem:[%s2904_s30 + $0x34] sm:$0xf]  ;;  %v2913_v12 = vld [vmem:[%s2904_s30 + $0x38] sm:$0x1]  ;;  %s208_s24 = scalar_lea.vmem %s4015_s4, %s2552_s21 }
  0x12   : > { %1437 = vmatpush.bf16.msrb.mxu3 %v1428_v7  ;;  %1593 = vmatpush.bf16.msrb.mxu0 %v1584_v9  ;;  %v365_v13 = vshrl.u32 %v2907_v10, 16  ;;  %v368_v14 = vshll.u32 %v2907_v10, 16  ;;  %v374_v15 = vshll.u32 %v2910_v11, 16  ;;  %v378_v16 = vshrl.u32 %v2910_v11, 16  ;;  %v234_v17 = vld [vmem:[%s2904_s30 + $0x60] sm:$0xf] }
  0x13   : > { %v384_v18 = vshll.u32 %v2913_v12, 16  ;;  %v2922_v19 = vld [vmem:[%s2904_s30 + $0x64] sm:$0xf]  ;;  %v236_v20 = vld [vmem:[%s2904_s30 + $0x68] sm:$0x1]  ;;  %v461_v21 = vshrl.u32 %v234_v17, 16 }
  0x14   : > { %v367_v22 = vrot.slane %v365_v13, 4  ;;  %v370_v23 = vrot.slane %v368_v14, 5  ;;  %v376_v24 = vrot.slane %v374_v15, 5  ;;  %v380_v25 = vrot.slane %v378_v16, 4  ;;  %v246_v26 = vld [vmem:[%s2904_s30 + $0x90] sm:$0xf] }
  0x15   : > { %v386_v27 = vrot.slane %v384_v18, 5  ;;  %v463_v28 = vrot.slane %v461_v21, 4  ;;  %v464_v29 = vshll.u32 %v234_v17, 16  ;;  %v470_v30 = vshll.u32 %v2922_v19, 16  ;;  %v247_v35 = vld [vmem:[%s2904_s30 + $0x94] sm:$0xf] }
  0x16   : > { %v371_v31 = vor.u32 %v370_v23, %v367_v22  ;;  %v381_v32 = vor.u32 %v380_v25, %v376_v24  ;;  %v474_v33 = vshrl.u32 %v2922_v19, 16  ;;  %v480_v34 = vshll.u32 %v236_v20, 16  ;;  %v248_v45 = vld [vmem:[%s2904_s30 + $0x98] sm:$0x1]  ;;  %v2941_v61 = vld [vmem:[%s2904_s30] sm:$0xf] }
  0x17   : > { %v466_v37 = vrot.slane %v464_v29, 5  ;;  %v472_v38 = vrot.slane %v470_v30, 5  ;;  %v557_v39 = vshrl.u32 %v246_v26, 16  ;;  %v560_v47 = vshll.u32 %v246_v26, 16  ;;  %v2948_v1 = vld [vmem:[%s2904_s30 + $0x4] sm:$0xf] }
  0x18   : > { %v372_v40 = vrot.slane %v371_v31, 4  ;;  %v382_v41 = vrot.slane %v381_v32, 4  ;;  %v476_v42 = vrot.slane %v474_v33, 4  ;;  %v482_v43 = vrot.slane %v480_v34, 5  ;;  %v2951_v2 = vld [vmem:[%s2904_s30 + $0x8] sm:$0x1] }
  0x19   : > { %v467_v44 = vor.u32 %v466_v37, %v463_v28  ;;  %v559_v46 = vrot.slane %v557_v39, 4  ;;  %v566_v48 = vshll.u32 %v247_v35, 16  ;;  %v570_v52 = vshrl.u32 %v247_v35, 16  ;;  %v2967_v23 = vld [vmem:[%s2904_s30 + $0x3c] sm:$0xf] }
  0x1a   : > { %v377_v49 = vsel %vm2931_vm3, %v372_v40, %v376_v24  ;;  %v387_v50 = vsel %vm2931_vm3, %v382_v41, %v386_v27  ;;  %v477_v51 = vor.u32 %v476_v42, %v472_v38  ;;  %v562_v56 = vrot.slane %v560_v47, 5  ;;  %v2970_v24 = vld [vmem:[%s2904_s30 + $0x40] sm:$0xf]  ;;  %v2975_v29 = vld [vmem:[%s2904_s30 + $0x44] sm:$0x1] }
  0x1b   : > { %v662_v53 = vunpack.c.l.b16 %v377_v49  ;;  %v663_v54 = vunpack.c.l.b16 %v387_v50  ;;  %v468_v55 = vrot.slane %v467_v44, 4  ;;  %v568_v58 = vrot.slane %v566_v48, 5  ;;  %v2990_v47 = vld [vmem:[%s2904_s30 + $0x70] sm:$0xf] }
  0x1c   : > { %v478_v57 = vrot.slane %v477_v51, 4  ;;  %v572_v59 = vrot.slane %v570_v52, 4  ;;  %v576_v60 = vshll.u32 %v248_v45, 16  ;;  %v563_v0 = vor.u32 %v562_v56, %v559_v46  ;;  %v2997_v51 = vld [vmem:[%s2904_s30 + $0x74] sm:$0x1] }
  0x1d   : > { %v2943_v62 = vpack.c.b16 %v663_v54, %v662_v53  ;;  %v473_v63 = vsel %vm2931_vm3, %v468_v55, %v472_v38  ;;  %v269_v9 = vshrl.u32 %v2941_v61, 16  ;;  %v272_v13 = vshll.u32 %v2941_v61, 16  ;;  %v2983_v38 = vld [vmem:[%s2904_s30 + $0x6c] sm:$0xf] }
  0x1e   : > { %v483_v3 = vsel %vm2931_vm3, %v478_v57, %v482_v43  ;;  %v670_v4 = vunpack.c.l.b16 %v473_v63  ;;  %v573_v5 = vor.u32 %v572_v59, %v568_v58  ;;  %v578_v6 = vrot.slane %v576_v60, 5 }
  0x1f   : > { %2558 = vmatmul.msk.bf16.vlgmr.msra.gmra.mxu1 %vm702_vm4, %v2943_v62  ;;  %v671_v7 = vunpack.c.l.b16 %v483_v3  ;;  %v564_v8 = vrot.slane %v563_v0, 4  ;;  %v278_v15 = vshll.u32 %v2948_v1, 16  ;;  %v282_v16 = vshrl.u32 %v2948_v1, 16 }
  0x20   : > { %v574_v14 = vrot.slane %v573_v5, 4  ;;  %v288_v17 = vshll.u32 %v2951_v2, 16  ;;  %v271_v21 = vrot.slane %v269_v9, 4  ;;  %v274_v22 = vrot.slane %v272_v13, 5  ;;  %v249_v5 = vld [vmem:[%s2904_s30 + $0x9c] sm:$0xf] }
  0x21   : > { %v2962_v18 = vpack.c.b16 %v671_v7, %v670_v4  ;;  %v569_v20 = vsel %vm2931_vm3, %v564_v8, %v568_v58  ;;  %v280_v27 = vrot.slane %v278_v15, 5  ;;  %v284_v28 = vrot.slane %v282_v16, 4  ;;  %v250_v9 = vld [vmem:[%s2904_s30 + $0xa0] sm:$0xf] }
  0x22   : > { %v579_v25 = vsel %vm2931_vm3, %v574_v14, %v578_v6  ;;  %v678_v26 = vunpack.c.l.b16 %v569_v20  ;;  %v275_v31 = vor.u32 %v274_v22, %v271_v21  ;;  %v290_v32 = vrot.slane %v288_v17, 5  ;;  %v251_v17 = vld [vmem:[%s2904_s30 + $0xa4] sm:$0x1] }
  0x23   : > { %4058 = vst [vmem:[#allocation2_spill] sm:$0xff] %v2962_v18  ;;  %2562 = vmatmul.msk.bf16.vlgmr.msra.gmra.mxu2 %vm702_vm4, %v2962_v18  ;;  %v679_v30 = vunpack.c.l.b16 %v579_v25  ;;  %v285_v33 = vor.u32 %v284_v28, %v280_v27  ;;  %v389_v34 = vshrl.u32 %v2967_v23, 16  ;;  %v392_v35 = vshll.u32 %v2967_v23, 16 }
  0x24   : > { %v398_v37 = vshll.u32 %v2970_v24, 16  ;;  %v276_v40 = vrot.slane %v275_v31, 4  ;;  %v402_v41 = vshrl.u32 %v2970_v24, 16  ;;  %v408_v42 = vshll.u32 %v2975_v29, 16 }
  0x25   : > { %v2985_v39 = vpack.c.b16 %v679_v30, %v678_v26  ;;  %v286_v43 = vrot.slane %v285_v33, 4  ;;  %v391_v44 = vrot.slane %v389_v34, 4  ;;  %v394_v45 = vrot.slane %v392_v35, 5  ;;  %v3015_v35 = vld [vmem:[%s2904_s30 + $0xc] sm:$0xf] }
  0x26   : > { %v400_v46 = vrot.slane %v398_v37, 5  ;;  %v281_v48 = vsel %vm2931_vm3, %v276_v40, %v280_v27  ;;  %v404_v49 = vrot.slane %v402_v41, 4  ;;  %v410_v50 = vrot.slane %v408_v42, 5 }
  0x27   : > { %4059 = vst [vmem:[#allocation3_spill] sm:$0xff] %v2985_v39  ;;  %2566 = vmatmul.msk.bf16.vlgmr.msra.gmra.mxu3 %vm702_vm4, %v2985_v39  ;;  %v485_v52 = vshrl.u32 %v2983_v38, 16  ;;  %v291_v53 = vsel %vm2931_vm3, %v286_v43, %v290_v32  ;;  %v654_v54 = vunpack.c.l.b16 %v281_v48  ;;  %v395_v55 = vor.u32 %v394_v45, %v391_v44  ;;  %v3022_v43 = vld [vmem:[%s2904_s30 + $0x10] sm:$0xf]  ;;  %v3025_v48 = vld [vmem:[%s2904_s30 + $0x14] sm:$0x1] }
  0x28   : > { %v488_v56 = vshll.u32 %v2983_v38, 16  ;;  %v655_v57 = vunpack.c.l.b16 %v291_v53  ;;  %v405_v58 = vor.u32 %v404_v49, %v400_v46  ;;  %v494_v60 = vshll.u32 %v2990_v47, 16  ;;  %v3202_v39 = vld [vmem:[%s2904_s30 + $0x2c] sm:$0x1] }
  0x29   : > { %v487_v59 = vrot.slane %v485_v52, 4  ;;  %v396_v63 = vrot.slane %v395_v55, 4  ;;  %v498_v3 = vshrl.u32 %v2990_v47, 16  ;;  %v504_v4 = vshll.u32 %v2997_v51, 16 }
  0x2a   : > { %v490_v0 = vrot.slane %v488_v56, 5  ;;  %v686_v6 = vpack.c.b16 %v655_v57, %v654_v54  ;;  %v406_v7 = vrot.slane %v405_v58, 4  ;;  %v496_v8 = vrot.slane %v494_v60, 5  ;;  %v3035_v58 = vld [vmem:[%s2904_s30 + $0x48] sm:$0xf] }
  0x2b   : > { %v401_v13 = vsel %vm2931_vm3, %v396_v63, %v400_v46  ;;  %v500_v15 = vrot.slane %v498_v3, 4  ;;  %v506_v16 = vrot.slane %v504_v4, 5  ;;  %v581_v22 = vshrl.u32 %v249_v5, 16  ;;  %v3040_v3 = vld [vmem:[%s2904_s30 + $0x4c] sm:$0xf] }
  0x2c   : > { %v491_v14 = vor.u32 %v490_v0, %v487_v59  ;;  %2554 = vmatmul.msk.bf16.vlgmr.msra.gmra.mxu0 %vm702_vm4, %v686_v6  ;;  %v411_v20 = vsel %vm2931_vm3, %v406_v7, %v410_v50  ;;  %v664_v21 = vunpack.c.l.b16 %v401_v13  ;;  %v584_v25 = vshll.u32 %v249_v5, 16 }
  0x2d   : > { %v665_v26 = vunpack.c.l.b16 %v411_v20  ;;  %v501_v28 = vor.u32 %v500_v15, %v496_v8  ;;  %v590_v30 = vshll.u32 %v250_v9, 16  ;;  %v583_v31 = vrot.slane %v581_v22, 4  ;;  %v3047_v15 = vld [vmem:[%s2904_s30 + $0x50] sm:$0x1] }
  0x2e   : > { %v492_v27 = vrot.slane %v491_v14, 4  ;;  %v586_v32 = vrot.slane %v584_v25, 5  ;;  %v594_v33 = vshrl.u32 %v250_v9, 16  ;;  %v600_v34 = vshll.u32 %v251_v17, 16 }
  0x2f   : > { %v3017_v37 = vpack.c.b16 %v665_v26, %v664_v21  ;;  %v502_v41 = vrot.slane %v501_v28, 4  ;;  %v592_v42 = vrot.slane %v590_v30, 5  ;;  %v293_v52 = vshrl.u32 %v3015_v35, 16  ;;  %v3058_v28 = vld [vmem:[%s2904_s30 + $0x78] sm:$0xf] }
  0x30   : > { %v497_v40 = vsel %vm2931_vm3, %v492_v27, %v496_v8  ;;  %v587_v45 = vor.u32 %v586_v32, %v583_v31  ;;  %v596_v46 = vrot.slane %v594_v33, 4  ;;  %v602_v50 = vrot.slane %v600_v34, 5  ;;  %v3062_v34 = vld [vmem:[%s2904_s30 + $0x7c] sm:$0xf] }
  0x31   : > { %v672_v44 = vunpack.c.l.b16 %v497_v40  ;;  %2559 = vmatmul.msk.bf16.gmra.mxu1 %vm702_vm4, %v3017_v37  ;;  %v507_v49 = vsel %vm2931_vm3, %v502_v41, %v506_v16  ;;  %v296_v53 = vshll.u32 %v3015_v35, 16  ;;  %v302_v57 = vshll.u32 %v3022_v43, 16 }
  0x32   : > { %v673_v54 = vunpack.c.l.b16 %v507_v49  ;;  %v588_v55 = vrot.slane %v587_v45, 4  ;;  %v597_v56 = vor.u32 %v596_v46, %v592_v42  ;;  %v295_v59 = vrot.slane %v293_v52, 4 }
  0x33   : > { %v298_v60 = vrot.slane %v296_v53, 5  ;;  %v306_v63 = vshrl.u32 %v3022_v43, 16  ;;  %v312_v0 = vshll.u32 %v3025_v48, 16  ;;  %v304_v7 = vrot.slane %v302_v57, 5 }
  0x34   : > { %v3042_v4 = vpack.c.b16 %v673_v54, %v672_v44  ;;  %v593_v5 = vsel %vm2931_vm3, %v588_v55, %v592_v42  ;;  %v598_v6 = vrot.slane %v597_v56, 4  ;;  %v413_v17 = vshrl.u32 %v3035_v58, 16 }
  0x35   : > { %v680_v8 = vunpack.c.l.b16 %v593_v5  ;;  %v299_v9 = vor.u32 %v298_v60, %v295_v59  ;;  %v308_v13 = vrot.slane %v306_v63, 4  ;;  %v314_v14 = vrot.slane %v312_v0, 5 }
  0x36   : > { %2563 = vmatmul.msk.bf16.gmra.mxu2 %vm702_vm4, %v3042_v4  ;;  %v603_v16 = vsel %vm2931_vm3, %v598_v6, %v602_v50  ;;  %v416_v20 = vshll.u32 %v3035_v58, 16  ;;  %v422_v21 = vshll.u32 %v3040_v3, 16  ;;  %v426_v27 = vshrl.u32 %v3040_v3, 16  ;;  %v3069_v50 = vld [vmem:[%s2904_s30 + $0x80] sm:$0x1] }
  0x37   : > { %v681_v22 = vunpack.c.l.b16 %v603_v16  ;;  %v300_v25 = vrot.slane %v299_v9, 4  ;;  %v309_v26 = vor.u32 %v308_v13, %v304_v7  ;;  %v415_v30 = vrot.slane %v413_v17, 4  ;;  %v3088_v16 = vld [vmem:[%s2904_s30 + $0xac] sm:$0xf]  ;;  %v3091_v17 = vld [vmem:[%s2904_s30 + $0xb0] sm:$0x1] }
  0x38   : > { %v418_v31 = vrot.slane %v416_v20, 5  ;;  %v424_v32 = vrot.slane %v422_v21, 5  ;;  %v432_v33 = vshll.u32 %v3047_v15, 16  ;;  %v428_v44 = vrot.slane %v426_v27, 4  ;;  %4062 = vst [vmem:[#allocation6_spill] sm:$0xff] %v3088_v16 }
  0x39   : > { %v3064_v40 = vpack.c.b16 %v681_v22, %v680_v8  ;;  %v305_v41 = vsel %vm2931_vm3, %v300_v25, %v304_v7  ;;  %v310_v42 = vrot.slane %v309_v26, 4  ;;  %v509_v52 = vshrl.u32 %v3058_v28, 16  ;;  %v3081_v8 = vld [vmem:[%s2904_s30 + $0xa8] sm:$0xf]  ;;  %4063 = vst [vmem:[#allocation7_spill] sm:$0xff] %v3091_v17 }
  0x3a   : > { %v656_v45 = vunpack.c.l.b16 %v305_v41  ;;  %v419_v46 = vor.u32 %v418_v31, %v415_v30  ;;  %v434_v49 = vrot.slane %v432_v33, 5  ;;  %v429_v54 = vor.u32 %v428_v44, %v424_v32  ;;  %4061 = vst [vmem:[#allocation5_spill] sm:$0xff] %v3081_v8 }
  0x3b   : > { %4060 = vst [vmem:[#allocation4_spill] sm:$0xff] %v3064_v40  ;;  %2567 = vmatmul.msk.bf16.gmra.mxu3 %vm702_vm4, %v3064_v40  ;;  %v315_v53 = vsel %vm2931_vm3, %v310_v42, %v314_v14  ;;  %v512_v55 = vshll.u32 %v3058_v28, 16  ;;  %v518_v56 = vshll.u32 %v3062_v34, 16  ;;  %v511_v60 = vrot.slane %v509_v52, 4  ;;  %v3105_v52 = vld [vmem:[%s2904_s30 + $0x18] sm:$0xf] }
  0x3c   : > { %v657_v57 = vunpack.c.l.b16 %v315_v53  ;;  %v420_v59 = vrot.slane %v419_v46, 4  ;;  %v522_v63 = vshrl.u32 %v3062_v34, 16  ;;  %v430_v0 = vrot.slane %v429_v54, 4  ;;  %v3191_v40 = vld [vmem:[%s2904_s30 + $0x24] sm:$0xf] }
  0x3d   : > { %v514_v5 = vrot.slane %v512_v55, 5  ;;  %v520_v6 = vrot.slane %v518_v56, 5  ;;  %v528_v7 = vshll.u32 %v3069_v50, 16  ;;  %v605_v30 = vshrl.u32 %v3081_v8, 16  ;;  %v3110_v56 = vld [vmem:[%s2904_s30 + $0x1c] sm:$0xf] }
  0x3e   : > { %v3083_v9 = vpack.c.b16 %v657_v57, %v656_v45  ;;  %v425_v13 = vsel %vm2931_vm3, %v420_v59, %v424_v32  ;;  %v524_v14 = vrot.slane %v522_v63, 4  ;;  %v435_v20 = vsel %vm2931_vm3, %v430_v0, %v434_v49  ;;  %v3113_v57 = vld [vmem:[%s2904_s30 + $0x20] sm:$0x1] }
  0x3f   : > { %v666_v21 = vunpack.c.l.b16 %v425_v13  ;;  %v515_v22 = vor.u32 %v514_v5, %v511_v60  ;;  %v530_v25 = vrot.slane %v528_v7, 5  ;;  %v667_v26 = vunpack.c.l.b16 %v435_v20 }
  0x40   : > { %2555 = vmatmul.msk.bf16.gmra.mxu0 %vm702_vm4, %v3083_v9  ;;  %v525_v27 = vor.u32 %v524_v14, %v520_v6  ;;  %v608_v31 = vshll.u32 %v3081_v8, 16  ;;  %v614_v33 = vshll.u32 %v3088_v16, 16  ;;  %v618_v41 = vshrl.u32 %v3088_v16, 16 }
  0x41   : > { %v516_v32 = vrot.slane %v515_v22, 4  ;;  %v624_v42 = vshll.u32 %v3091_v17, 16  ;;  %v3102_v44 = vpack.c.b16 %v667_v26, %v666_v21  ;;  %v607_v46 = vrot.slane %v605_v30, 4  ;;  %v3125_v26 = vld [vmem:[%s2904_s30 + $0x54] sm:$0xf] }
  0x42   : > { %v526_v45 = vrot.slane %v525_v27, 4  ;;  %v610_v49 = vrot.slane %v608_v31, 5  ;;  %v616_v54 = vrot.slane %v614_v33, 5  ;;  %v620_v55 = vrot.slane %v618_v41, 4  ;;  %v3169_v17 = vld [vmem:[%s2904_s30 + $0xb4] sm:$0xf] }
  0x43   : > { %4064 = vst [vmem:[#allocation8_spill] sm:$0xff] %v3102_v44  ;;  %v521_v53 = vsel %vm2931_vm3, %v516_v32, %v520_v6  ;;  %2560 = vmatmul.msk.bf16.gmra.mxu1 %vm702_vm4, %v3102_v44  ;;  %v626_v0 = vrot.slane %v624_v42, 5  ;;  %v317_v6 = vshrl.u32 %v3105_v52, 16  ;;  %v320_v13 = vshll.u32 %v3105_v52, 16  ;;  %v3130_v32 = vld [vmem:[%s2904_s30 + $0x58] sm:$0xf] }
  0x44   : > { %v531_v59 = vsel %vm2931_vm3, %v526_v45, %v530_v25  ;;  %v674_v60 = vunpack.c.l.b16 %v521_v53  ;;  %v611_v63 = vor.u32 %v610_v49, %v607_v46  ;;  %v621_v7 = vor.u32 %v620_v55, %v616_v54  ;;  %v3135_v46 = vld [vmem:[%s2904_s30 + $0x5c] sm:$0x1]  ;;  %4067 = vst [vmem:[#allocation11_spill] sm:$0xff] %v3169_v17 }
  0x45   : > { %v675_v5 = vunpack.c.l.b16 %v531_v59  ;;  %v326_v20 = vshll.u32 %v3110_v56, 16  ;;  %v330_v21 = vshrl.u32 %v3110_v56, 16  ;;  %v336_v22 = vshll.u32 %v3113_v57, 16 }
  0x46   : > { %v612_v14 = vrot.slane %v611_v63, 4  ;;  %v622_v27 = vrot.slane %v621_v7, 4  ;;  %v319_v30 = vrot.slane %v317_v6, 4  ;;  %v322_v31 = vrot.slane %v320_v13, 5  ;;  %v3145_v7 = vld [vmem:[%s2904_s30 + $0x84] sm:$0xf] }
  0x47   : > { %v3127_v25 = vpack.c.b16 %v675_v5, %v674_v60  ;;  %v328_v41 = vrot.slane %v326_v20, 5  ;;  %v332_v42 = vrot.slane %v330_v21, 4  ;;  %v338_v45 = vrot.slane %v336_v22, 5  ;;  %4065 = vst [vmem:[#allocation9_spill] sm:$0xff] %v3145_v7 }
  0x48   : > { %v617_v33 = vsel %vm2931_vm3, %v612_v14, %v616_v54  ;;  %v627_v49 = vsel %vm2931_vm3, %v622_v27, %v626_v0  ;;  %v323_v55 = vor.u32 %v322_v31, %v319_v30  ;;  %v437_v59 = vshrl.u32 %v3125_v26, 16  ;;  %v3152_v30 = vld [vmem:[%s2904_s30 + $0x88] sm:$0xf] }
  0x49   : > { %2564 = vmatmul.msk.bf16.gmra.mxu2 %vm702_vm4, %v3127_v25  ;;  %v682_v53 = vunpack.c.l.b16 %v617_v33  ;;  %v683_v60 = vunpack.c.l.b16 %v627_v49  ;;  %v333_v63 = vor.u32 %v332_v42, %v328_v41  ;;  %v440_v54 = vshll.u32 %v3125_v26, 16  ;;  %v3157_v49 = vld [vmem:[%s2904_s30 + $0x8c] sm:$0x1] }
  0x4a   : > { %v446_v5 = vshll.u32 %v3130_v32, 16  ;;  %v324_v6 = vrot.slane %v323_v55, 4  ;;  %v439_v13 = vrot.slane %v437_v59, 4  ;;  %v450_v14 = vshrl.u32 %v3130_v32, 16 }
  0x4b   : > { %v456_v0 = vshll.u32 %v3135_v46, 16  ;;  %v3149_v20 = vpack.c.b16 %v683_v60, %v682_v53  ;;  %v334_v21 = vrot.slane %v333_v63, 4  ;;  %v442_v22 = vrot.slane %v440_v54, 5 }
  0x4c   : > { %v448_v27 = vrot.slane %v446_v5, 5  ;;  %v329_v31 = vsel %vm2931_vm3, %v324_v6, %v328_v41  ;;  %v452_v33 = vrot.slane %v450_v14, 4  ;;  %v533_v55 = vshrl.u32 %v3145_v7, 16 }
  0x4d   : > { %4066 = vst [vmem:[#allocation10_spill] sm:$0xff] %v3149_v20  ;;  %v458_v42 = vrot.slane %v456_v0, 5  ;;  %2568 = vmatmul.msk.bf16.gmra.mxu3 %vm702_vm4, %v3149_v20  ;;  %v339_v53 = vsel %vm2931_vm3, %v334_v21, %v338_v45  ;;  %v658_v59 = vunpack.c.l.b16 %v329_v31  ;;  %v443_v60 = vor.u32 %v442_v22, %v439_v13  ;;  %v3174_v22 = vld [vmem:[%s2904_s30 + $0xb8] sm:$0xf] }
  0x4e   : > { %v536_v63 = vshll.u32 %v3145_v7, 16  ;;  %v659_v54 = vunpack.c.l.b16 %v339_v53  ;;  %v453_v41 = vor.u32 %v452_v33, %v448_v27  ;;  %v535_v5 = vrot.slane %v533_v55, 4  ;;  %4068 = vst [vmem:[#allocation12_spill] sm:$0xff] %v3174_v22 }
  0x4f   : > { %v542_v6 = vshll.u32 %v3152_v30, 16  ;;  %v444_v14 = vrot.slane %v443_v60, 4  ;;  %v546_v8 = vshrl.u32 %v3152_v30, 16  ;;  %v552_v20 = vshll.u32 %v3157_v49, 16  ;;  %v3179_v60 = vld [vmem:[%s2904_s30 + $0xbc] sm:$0x1] }
  0x50   : > { %v538_v0 = vrot.slane %v536_v63, 5  ;;  %v3171_v45 = vpack.c.b16 %v659_v54, %v658_v59  ;;  %v454_v21 = vrot.slane %v453_v41, 4  ;;  %4069 = vst [vmem:[#allocation13_spill] sm:$0xff] %v3179_v60  ;;  %v629_v54 = vshrl.u32 %v3169_v17, 16 }
  0x51   : > { %v544_v13 = vrot.slane %v542_v6, 5  ;;  %v449_v31 = vsel %vm2931_vm3, %v444_v14, %v448_v27  ;;  %v548_v55 = vrot.slane %v546_v8, 4  ;;  %v554_v53 = vrot.slane %v552_v20, 5 }
  0x52   : > { %v539_v33 = vor.u32 %v538_v0, %v535_v5  ;;  %2556 = vmatmul.msk.bf16.gmra.mxu0 %vm702_vm4, %v3171_v45  ;;  %v459_v59 = vsel %vm2931_vm3, %v454_v21, %v458_v42  ;;  %v668_v63 = vunpack.c.l.b16 %v449_v31  ;;  %v632_v41 = vshll.u32 %v3169_v17, 16 }
  0x53   : > { %v669_v6 = vunpack.c.l.b16 %v459_v59  ;;  %v549_v5 = vor.u32 %v548_v55, %v544_v13  ;;  %v638_v8 = vshll.u32 %v3174_v22, 16  ;;  %v631_v20 = vrot.slane %v629_v54, 4 }
  0x54   : > { %v540_v27 = vrot.slane %v539_v33, 4  ;;  %v634_v14 = vrot.slane %v632_v41, 5  ;;  %v642_v0 = vshrl.u32 %v3174_v22, 16  ;;  %v648_v16 = vshll.u32 %v3179_v60, 16  ;;  %v3198_v33 = vld [vmem:[%s2904_s30 + $0x28] sm:$0xf] }
  0x55   : > { %v3193_v42 = vpack.c.b16 %v669_v6, %v668_v63  ;;  %v550_v31 = vrot.slane %v549_v5, 4  ;;  %v640_v59 = vrot.slane %v638_v8, 5  ;;  %v1088_v55 = vrot.slane %v2951_v2, 5 }
  0x56   : > { %v545_v21 = vsel %vm2931_vm3, %v540_v27, %v544_v13  ;;  %v635_v54 = vor.u32 %v634_v14, %v631_v20  ;;  %v644_v41 = vrot.slane %v642_v0, 4  ;;  %v650_v6 = vrot.slane %v648_v16, 5 }
  0x57   : > { %4070 = vst [vmem:[#allocation14_spill] sm:$0xff] %v3193_v42  ;;  %v676_v17 = vunpack.c.l.b16 %v545_v21  ;;  %2561 = vmatmul.msk.bf16.gmra.mxu1 %vm702_vm4, %v3193_v42  ;;  %v555_v63 = vsel %vm2931_vm3, %v550_v31, %v554_v53  ;;  %v341_v13 = vshrl.u32 %v3191_v40, 16  ;;  %v344_v27 = vshll.u32 %v3191_v40, 16 }
  0x58   : > { %v677_v5 = vunpack.c.l.b16 %v555_v63  ;;  %v636_v8 = vrot.slane %v635_v54, 4  ;;  %v645_v60 = vor.u32 %v644_v41, %v640_v59  ;;  %v350_v2 = vshll.u32 %v3198_v33, 16  ;;  %v2739_v54 = vld [vmem:[%s4012_s1 + $0xc] sm:$0x3]  ;;  %v2760_v41 = vld [vmem:[%s4012_s1 + $0xe] sm:$0x3] }
  0x59   : > { %v343_v20 = vrot.slane %v341_v13, 4  ;;  %v346_v14 = vrot.slane %v344_v27, 5  ;;  %v354_v0 = vshrl.u32 %v3198_v33, 16  ;;  %v360_v21 = vshll.u32 %v3202_v39, 16 }
  0x5a   : > { %v3213_v22 = vpack.c.b16 %v677_v5, %v676_v17  ;;  %v641_v16 = vsel %vm2931_vm3, %v636_v8, %v640_v59  ;;  %v646_v53 = vrot.slane %v645_v60, 4  ;;  %v352_v31 = vrot.slane %v350_v2, 5  ;;  %v2722_v17 = vld [vmem:[%s4012_s1 + $0xa] sm:$0x3]  ;;  %v2778_v60 = vld [vmem:[%s4012_s1 + $0x10] sm:$0x3] }
  0x5b   : > { %v684_v63 = vunpack.c.l.b16 %v641_v16  ;;  %v347_v13 = vor.u32 %v346_v14, %v343_v20  ;;  %v356_v27 = vrot.slane %v354_v0, 4  ;;  %v362_v7 = vrot.slane %v360_v21, 5 }
  0x5c   : > { %4071 = vst [vmem:[#allocation15_spill] sm:$0xff] %v3213_v22  ;;  %2565 = vmatmul.msk.bf16.gmra.mxu2 %vm702_vm4, %v3213_v22  ;;  %v651_v59 = vsel %vm2931_vm3, %v646_v53, %v650_v6  ;;  %v2650_v5 = vrot.slane %v2941_v61, 9  ;;  %v1085_v0 = vrot.slane %v2948_v1, 5  ;;  %v1858_v21 = vsel %vm751_vm0, %v2739_v54, 0 }
  0x5d   : > { %v685_v8 = vunpack.c.l.b16 %v651_v59  ;;  %v348_v2 = vrot.slane %v347_v13, 4  ;;  %v357_v20 = vor.u32 %v356_v27, %v352_v31  ;;  %v2014_v16 = vsel %vm751_vm0, %v2760_v41, 0  ;;  %1867 = vmatpush.bf16.msra.mxu2 %v1858_v21  ;;  %v2799_v21 = vld [vmem:[%s2904_s30 + $0xc] sm:$0xff] }
  0x5e   : > { %v1724_v22 = vsel %vm751_vm0, %v2722_v17, 0  ;;  %v2154_v6 = vsel %vm751_vm0, %v2778_v60, 0  ;;  %v1086_v27 = vsel %vm3234_vm7, %v2650_v5, %v1085_v0  ;;  %2023 = vmatpush.bf16.msra.mxu3 %v2014_v16  ;;  %v1087_v54 = vrot.slane %v1085_v0, 4 }
  0x5f   : > { %v3243_v53 = vpack.c.b16 %v685_v8, %v684_v63  ;;  %v353_v61 = vsel %vm2931_vm3, %v348_v2, %v352_v31  ;;  %v358_v13 = vrot.slane %v357_v20, 4  ;;  %1733 = vmatpush.bf16.msra.mxu1 %v1724_v22  ;;  %2163 = vmatpush.bf16.msra.mxu0 %v2154_v6  ;;  %v2651_v41 = vrot.slane %v3015_v35, 9  ;;  %v2798_v22 = vld [vmem:[%s2904_s30] sm:$0xff]  ;;  %v3280_v6 = vld [vmem:[%s2904_s30 + $0x18] sm:$0xff] }
  0x60   : > { %v660_v1 = vunpack.c.l.b16 %v353_v61  ;;  %v1197_v31 = vunpack.c.l.b16 %v1086_v27  ;;  %v1092_v17 = vrot.slane %v3022_v43, 5  ;;  %v1095_v60 = vrot.slane %v3025_v48, 5 }
  0x61   : > { %2569 = vmatmul.msk.bf16.gmra.mxu3 %vm702_vm4, %v3243_v53  ;;  %v363_v63 = vsel %vm2931_vm3, %v358_v13, %v362_v7  ;;  %v1089_v5 = vsel %vm3234_vm7, %v1087_v54, %v1088_v55  ;;  %v1099_v16 = vrot.slane %v3110_v56, 5  ;;  %v2652_v61 = vrot.slane %v3105_v52, 9 }
  0x62   : > { %v661_v59 = vunpack.c.l.b16 %v363_v63  ;;  %v1198_v8 = vunpack.c.l.b16 %v1089_v5  ;;  %v1093_v35 = vsel %vm3234_vm7, %v2651_v41, %v1092_v17  ;;  %v1094_v2 = vrot.slane %v1092_v17, 4  ;;  %v3300_v41 = vld [vmem:[%s2904_s30 + $0x24] sm:$0xff] }
  0x63   : > { %v1199_v7 = vunpack.c.l.b16 %v1093_v35  ;;  %v1101_v13 = vrot.slane %v1099_v16, 4  ;;  %v1102_v27 = vrot.slane %v3113_v57, 5  ;;  %v1106_v57 = vrot.slane %v3198_v33, 5 }
  0x64   : > { %v3261_v20 = vpack.c.b16 %v661_v59, %v660_v1  ;;  %v1229_v0 = vpack.c.b16 %v1198_v8, %v1197_v31  ;;  %v1096_v43 = vsel %vm3234_vm7, %v1094_v2, %v1095_v60  ;;  %v2653_v63 = vrot.slane %v3191_v40, 9  ;;  %v3322_v8 = vld [vmem:[%s2904_s30 + $0x30] sm:$0xff] }
  0x65   : > { %v1200_v48 = vunpack.c.l.b16 %v1096_v43  ;;  %v1103_v56 = vsel %vm3234_vm7, %v1101_v13, %v1102_v27  ;;  %v1108_v31 = vrot.slane %v1106_v57, 4  ;;  %v1109_v17 = vrot.slane %v3202_v39, 5  ;;  %v3350_v27 = vld [vmem:[%s2904_s30 + $0x3c] sm:$0xff] }
  0x66   : > { %2557 = vmatmul.msk.bf16.gmra.mxu0 %vm702_vm4, %v3261_v20  ;;  %v1202_v54 = vunpack.c.l.b16 %v1103_v56  ;;  %v1107_v60 = vsel %vm3234_vm7, %v2653_v63, %v1106_v57  ;;  %v1113_v39 = vrot.slane %v2910_v11, 5  ;;  %v2654_v35 = vrot.slane %v2907_v10, 9 }
  0x67   : > { %2634 = vmatmul.msk.bf16.vlgmr.msrb.gmra.mxu1 %vm702_vm4, %v2798_v22  ;;  %v3268_v55 = vpack.c.b16 %v1200_v48, %v1199_v7  ;;  %v1110_v33 = vsel %vm3234_vm7, %v1108_v31, %v1109_v17  ;;  %v1203_v59 = vunpack.c.l.b16 %v1107_v60  ;;  %v1116_v7 = vrot.slane %v2913_v12, 5 }
  0x68   : > { %v1204_v5 = vunpack.c.l.b16 %v1110_v33  ;;  %v1115_v2 = vrot.slane %v1113_v39, 4  ;;  %v1120_v13 = vrot.slane %v2970_v24, 5  ;;  %v2655_v56 = vrot.slane %v2967_v23, 9 }
  0x6a   : > { %v3314_v40 = vpack.c.b16 %v1204_v5, %v1203_v59  ;;  %v1117_v11 = vsel %vm3234_vm7, %v1115_v2, %v1116_v7  ;;  %v1121_v24 = vsel %vm3234_vm7, %v2655_v56, %v1120_v13  ;;  %v1127_v5 = vrot.slane %v3040_v3, 5 }
  0x6b   : > { %v1207_v23 = vunpack.c.l.b16 %v1121_v24  ;;  %v2656_v7 = vrot.slane %v3035_v58, 9  ;;  %v1134_v24 = vrot.slane %v3130_v32, 5 }
  0x6c   : > { %2667 = vmatmul.msk.bf16.vlgmr.msrb.gmra.mxu2 %vm702_vm4, %v1229_v0  ;;  %v1114_v0 = vsel %vm3234_vm7, %v2654_v35, %v1113_v39  ;;  %v3384_v35 = vld [vmem:[%s2904_s30 + $0x48] sm:$0xff] }
  0x6d   : > { %v1205_v48 = vunpack.c.l.b16 %v1114_v0  ;;  %4076 = vst [vmem:[#allocation18_spill] sm:$0xff] %v3384_v35  ;;  %v1129_v0 = vrot.slane %v1127_v5, 4 }
  0x71   : > { %2688 = vmatmul.msk.bf16.vlgmr.msrb.gmra.mxu3 %vm702_vm4, %v2799_v21 }
  0x76   : > { %2705 = vmatmul.msk.bf16.vlgmr.msrb.gmra.mxu0 %vm702_vm4, %v3083_v9  ;;  %v1100_v9 = vsel %vm3234_vm7, %v2652_v61, %v1099_v16 }
  0x77   : > { %2635 = vmatmul.msk.bf16.gmra.mxu1 %vm702_vm4, %v2799_v21  ;;  %v1201_v1 = vunpack.c.l.b16 %v1100_v9  ;;  %v1206_v21 = vunpack.c.l.b16 %v1117_v11  ;;  %v1130_v11 = vrot.slane %v3047_v15, 5 }
  0x79   : > { %v3294_v52 = vpack.c.b16 %v1202_v54, %v1201_v1  ;;  %v3342_v12 = vpack.c.b16 %v1206_v21, %v1205_v48  ;;  %v1122_v1 = vrot.slane %v1120_v13, 4  ;;  %v1123_v54 = vrot.slane %v2975_v29, 5 }
  0x7a   : > { %v1128_v21 = vsel %vm3234_vm7, %v2656_v7, %v1127_v5  ;;  %v1131_v13 = vsel %vm3234_vm7, %v1129_v0, %v1130_v11  ;;  %v2657_v5 = vrot.slane %v3125_v26, 9  ;;  %v1136_v7 = vrot.slane %v1134_v24, 4 }
  0x7b   : > { %v1124_v63 = vsel %vm3234_vm7, %v1122_v1, %v1123_v54  ;;  %v1209_v56 = vunpack.c.l.b16 %v1128_v21  ;;  %v1210_v1 = vunpack.c.l.b16 %v1131_v13  ;;  %v1137_v0 = vrot.slane %v3135_v46, 5 }
  0x7c   : > { %2668 = vmatmul.msk.bf16.gmra.mxu2 %vm702_vm4, %v3268_v55  ;;  %v1208_v60 = vunpack.c.l.b16 %v1124_v63  ;;  %v1135_v32 = vsel %vm3234_vm7, %v2657_v5, %v1134_v24  ;;  %v1141_v5 = vrot.slane %v2922_v19, 5 }
  0x7d   : > { %v3408_v54 = vpack.c.b16 %v1210_v1, %v1209_v56  ;;  %v1138_v13 = vsel %vm3234_vm7, %v1136_v7, %v1137_v0  ;;  %v1211_v56 = vunpack.c.l.b16 %v1135_v32  ;;  %v2829_v32 = vld [vmem:[%s2904_s30 + $0x68] sm:$0x1] }
  0x7e   : > { %v3374_v33 = vpack.c.b16 %v1208_v60, %v1207_v23  ;;  %v3418_v60 = vld [vmem:[%s2904_s30 + $0x54] sm:$0xff]  ;;  %v1212_v46 = vunpack.c.l.b16 %v1138_v13  ;;  %v1144_v13 = vrot.slane %v2829_v32, 5 }
  0x7f   : > { %4079 = vst [vmem:[#allocation21_spill] sm:$0xff] %v3408_v54 }
  0x80   : > { %4080 = vst [vmem:[#allocation22_spill] sm:$0xff] %v3418_v60 }
  0x81   : > { %2689 = vmatmul.msk.bf16.gmra.mxu3 %vm702_vm4, %v3280_v6 }
  0x86   : > { %2706 = vmatmul.msk.bf16.gmra.mxu0 %vm702_vm4, %v3171_v45 }
  0x87   : > { %2636 = vmatmul.msk.bf16.gmra.mxu1 %vm702_vm4, %v3280_v6 }
  0x8c   : > { %2669 = vmatmul.msk.bf16.gmra.mxu2 %vm702_vm4, %v3294_v52 }
  0x91   : > { %2690 = vmatmul.msk.bf16.gmra.mxu3 %vm702_vm4, %v3300_v41 }
  0x96   : > { %2707 = vmatmul.msk.bf16.gmra.mxu0 %vm702_vm4, %v3261_v20 }
  0x97   : > { %2637 = vmatmul.msk.bf16.gmra.mxu1 %vm702_vm4, %v3300_v41 }
  0x9c   : > { %v3317_v22 = vpop.f32.mrf.mxu1  ;;  %2670 = vmatmul.msk.bf16.gmra.mxu2 %vm702_vm4, %v3314_v40 }
  0xa1   : > { %2691 = vmatmul.msk.bf16.gmra.mxu3 %vm702_vm4, %v3322_v8 }
  0xa4   : > { %v3332_v43 = vpop.f32.mrf.mxu1 }
  0xa6   : > { %v3334_v16 = vpop.f32.mrf.mxu2  ;;  %2708 = vmatmul.msk.bf16.gmra.mxu0 %vm702_vm4, %v2943_v62 }
  0xa7   : > { %2638 = vmatmul.msk.bf16.gmra.mxu1 %vm702_vm4, %v3322_v8 }
  0xa9   : > { %v3340_v10 = vpop.f32.mrf.mxu0 }
  0xaa   : > { %v3344_v61 = vpop.f32.mrf.mxu3 }
  0xab   : > { %4074 = vst [vmem:[#allocation16_spill] sm:$0xff] %v3344_v61 }
  0xac   : > { %2671 = vmatmul.msk.bf16.gmra.mxu2 %vm702_vm4, %v3342_v12 }
  0xae   : > { %v3352_v9 = vpop.f32.mrf.mxu1  ;;  %v3356_v57 = vpop.f32.mrf.mxu2 }
  0xb1   : > { %2692 = vmatmul.msk.bf16.gmra.mxu3 %vm702_vm4, %v3350_v27  ;;  %v3364_v31 = vpop.f32.mrf.mxu0 }
  0xb2   : > { %v3366_v17 = vpop.f32.mrf.mxu3 }
  0xb3   : > { %4075 = vst [vmem:[#allocation17_spill] sm:$0xff] %v3366_v17 }
  0xb6   : > { %2709 = vmatmul.msk.bf16.gmra.mxu0 %vm702_vm4, %v3017_v37  ;;  %v3370_v29 = vpop.f32.mrf.mxu1 }
  0xb7   : > { %2639 = vmatmul.msk.bf16.gmra.mxu1 %vm702_vm4, %v3350_v27 }
  0xb9   : > { %v3376_v59 = vpop.f32.mrf.mxu2 }
  0xbc   : > { %2672 = vmatmul.msk.bf16.gmra.mxu2 %vm702_vm4, %v3374_v33 }
  0xbd   : > { %v3379_v39 = vpop.f32.mrf.mxu0 }
  0xbe   : > { %v3386_v2 = vpop.f32.mrf.mxu3 }
  0xbf   : > { %4077 = vst [vmem:[#allocation19_spill] sm:$0xff] %v3386_v2 }
  0xc0   : > { %v3390_v48 = vpop.f32.mrf.mxu1 }
  0xc1   : > { %2693 = vmatmul.msk.bf16.gmra.mxu3 %vm702_vm4, %v3384_v35  ;;  %v3394_v3 = vpop.f32.mrf.mxu2 }
  0xc5   : > { %v3400_v58 = vpop.f32.mrf.mxu0 }
  0xc6   : > { %2710 = vmatmul.msk.bf16.gmra.mxu0 %vm702_vm4, %v3102_v44  ;;  %v3404_v15 = vpop.f32.mrf.mxu3 }
  0xc7   : > { %4078 = vst [vmem:[#allocation20_spill] sm:$0xff] %v3404_v15  ;;  %2640 = vmatmul.msk.bf16.gmra.mxu1 %vm702_vm4, %v3384_v35  ;;  %v3453_v15 = vld [vmem:[%s2904_s30 + $0x60] sm:$0xff] }
  0xc8   : > { %v3411_v63 = vpop.f32.mrf.mxu1  ;;  %4084 = vst [vmem:[#allocation26_spill] sm:$0xff] %v3453_v15 }
  0xcc   : > { %v3413_v23 = vpop.f32.mrf.mxu2  ;;  %2673 = vmatmul.msk.bf16.gmra.mxu2 %vm702_vm4, %v3408_v54 }
  0xcf   : > { %v3422_v11 = vpop.f32.mrf.mxu0 }
  0xd0   : > { %v3424_v21 = vpop.f32.mrf.mxu3 }
  0xd1   : > { %4081 = vst [vmem:[#allocation23_spill] sm:$0xff] %v3424_v21  ;;  %2694 = vmatmul.msk.bf16.gmra.mxu3 %vm702_vm4, %v3418_v60  ;;  %v3440_v21 = vpack.c.b16 %v1212_v46, %v1211_v56 }
  0xd3   : > { %4082 = vst [vmem:[#allocation24_spill] sm:$0xff] %v3440_v21 }
  0xd4   : > { %v3432_v26 = vpop.f32.mrf.mxu1  ;;  %v3434_v1 = vpop.f32.mrf.mxu2 }
  0xd6   : > { %2711 = vmatmul.msk.bf16.gmra.mxu0 %vm702_vm4, %v3193_v42  ;;  %v2830_v42 = vld [vmem:[%s2904_s30 + $0x60] sm:$0xf] }
  0xd7   : > { %2641 = vmatmul.msk.bf16.gmra.mxu1 %vm702_vm4, %v3418_v60  ;;  %v3442_v24 = vpop.f32.mrf.mxu0  ;;  %v2658_v2 = vrot.slane %v2830_v42, 9  ;;  %v1143_v60 = vrot.slane %v1141_v5, 4 }
  0xd8   : > { %v3445_v7 = vpop.f32.mrf.mxu3 }
  0xd9   : > { %4083 = vst [vmem:[#allocation25_spill] sm:$0xff] %v3445_v7  ;;  %v1142_v19 = vsel %vm3234_vm7, %v2658_v2, %v1141_v5  ;;  %v1145_v46 = vsel %vm3234_vm7, %v1143_v60, %v1144_v13  ;;  %v1148_v60 = vrot.slane %v2990_v47, 5 }
  0xda   : > { %v1213_v17 = vunpack.c.l.b16 %v1142_v19  ;;  %v1214_v42 = vunpack.c.l.b16 %v1145_v46  ;;  %v3486_v19 = vld [vmem:[%s2904_s30 + $0x6c] sm:$0xff] }
  0xdc   : > { %2674 = vmatmul.msk.bf16.gmra.mxu2 %vm702_vm4, %v3440_v21  ;;  %v3449_v0 = vpop.f32.mrf.mxu1  ;;  %v3475_v2 = vpack.c.b16 %v1214_v42, %v1213_v17  ;;  %v1150_v17 = vrot.slane %v1148_v60, 4 }
  0xde   : > { %4086 = vst [vmem:[#allocation28_spill] sm:$0xff] %v3475_v2 }
  0xdf   : > { %v3456_v56 = vpop.f32.mrf.mxu2 }
  0xe1   : > { %2695 = vmatmul.msk.bf16.gmra.mxu3 %vm702_vm4, %v3453_v15 }
  0xe3   : > { %v3464_v7 = vpop.f32.mrf.mxu0 }
  0xe4   : > { %v3466_v32 = vpop.f32.mrf.mxu3  ;;  %v984_v21 = vpop.f32.mrf.mxu1 }
  0xe5   : > { %4085 = vst [vmem:[#allocation27_spill] sm:$0xff] %v3466_v32  ;;  %v985_v54 = vadd.f32 %v984_v21, %v3340_v10  ;;  %v1151_v21 = vrot.slane %v2997_v51, 5  ;;  %v2659_v32 = vrot.slane %v2983_v38, 9 }
  0xe6   : > { %2712 = vmatmul.msk.bf16.gmra.mxu0 %vm702_vm4, %v2962_v18 }
  0xe7   : > { %v3471_v44 = vpop.f32.mrf.mxu2  ;;  %2642 = vmatmul.msk.bf16.gmra.mxu1 %vm702_vm4, %v3453_v15  ;;  %v1149_v47 = vsel %vm3234_vm7, %v2659_v32, %v1148_v60 }
  0xe8   : > { %v1215_v61 = vunpack.c.l.b16 %v1149_v47 }
  0xeb   : > { %v3478_v5 = vpop.f32.mrf.mxu0 }
  0xec   : > { %v3480_v13 = vpop.f32.mrf.mxu3  ;;  %2675 = vmatmul.msk.bf16.gmra.mxu2 %vm702_vm4, %v3475_v2  ;;  %v986_v10 = vpop.f32.mrf.mxu1 }
  0xed   : > { %4087 = vst [vmem:[#allocation29_spill] sm:$0xff] %v3480_v13  ;;  %v987_v46 = vadd.f32 %v986_v10, %v3364_v31  ;;  %v1152_v13 = vsel %vm3234_vm7, %v1150_v17, %v1151_v21  ;;  %v1155_v21 = vrot.slane %v3062_v34, 5 }
  0xee   : > { %v1216_v35 = vunpack.c.l.b16 %v1152_v13  ;;  %v1158_v13 = vrot.slane %v3069_v50, 5 }
  0xef   : > { %v1305_v42 = vpop.f32.mrf.mxu2 }
  0xf0   : > { %v1385_v18 = vadd.f32 %v1305_v42, %v985_v54  ;;  %v3503_v10 = vpack.c.b16 %v1216_v35, %v1215_v61  ;;  %v3510_v42 = vld [vmem:[%s2904_s30 + $0x78] sm:$0xff] }
  0xf1   : > { %2696 = vmatmul.msk.bf16.gmra.mxu3 %vm702_vm4, %v3486_v19 }
  0xf3   : > { %v1595_v2 = vpop.f32.mrf.mxu0 }
  0xf4   : > { %v1439_v51 = vpop.f32.mrf.mxu3  ;;  %v989_v15 = vpop.f32.mrf.mxu1 }
  0xf5   : > { %v1519_v31 = vadd.f32 %v1439_v51, %v1385_v18  ;;  %v990_v38 = vadd.f32 %v989_v15, %v3379_v39 }
  0xf6   : > { %2713 = vmatmul.msk.bf16.gmra.mxu0 %vm702_vm4, %v3042_v4 }
  0xf7   : > { %v1307_v54 = vpop.f32.mrf.mxu2  ;;  %2643 = vmatmul.msk.bf16.gmra.mxu1 %vm702_vm4, %v3486_v19  ;;  %v3501_v32 = vadd.f32 %v1595_v2, %v1519_v31  ;;  %v2660_v2 = vrot.slane %v3058_v28, 9 }
  0xf8   : > { %v1386_v60 = vadd.f32 %v1307_v54, %v987_v46  ;;  %v1157_v46 = vrot.slane %v1155_v21, 4 }
  0xf9   : > { %v1156_v50 = vsel %vm3234_vm7, %v2660_v2, %v1155_v21 }
  0xfa   : > { %v1159_v51 = vsel %vm3234_vm7, %v1157_v46, %v1158_v13  ;;  %v1165_v46 = vrot.slane %v3157_v49, 5 }
  0xfb   : > { %v1597_v17 = vpop.f32.mrf.mxu0 }
  0xfc   : > { %v1441_v18 = vpop.f32.mrf.mxu3  ;;  %2676 = vmatmul.msk.bf16.gmra.mxu2 %vm702_vm4, %v3503_v10  ;;  %v991_v39 = vpop.f32.mrf.mxu1 }
  0xfd   : > { %v1520_v15 = vadd.f32 %v1441_v18, %v1386_v60  ;;  %v992_v47 = vadd.f32 %v991_v39, %v3400_v58  ;;  %v1217_v58 = vunpack.c.l.b16 %v1156_v50  ;;  %v1218_v18 = vunpack.c.l.b16 %v1159_v51  ;;  %v3536_v50 = vld [vmem:[%s2904_s30 + $0x84] sm:$0xff] }
  0xff   : > { %v1310_v61 = vpop.f32.mrf.mxu2  ;;  %v3514_v35 = vadd.f32 %v1597_v17, %v1520_v15  ;;  %v3529_v13 = vpack.c.b16 %v1218_v18, %v1217_v58  ;;  %v1162_v15 = vrot.slane %v3152_v30, 5 }
 0x100   : > { %v1387_v34 = vadd.f32 %v1310_v61, %v990_v38 }
 0x101   : > { %2697 = vmatmul.msk.bf16.gmra.mxu3 %vm702_vm4, %v3510_v42 }
 0x103   : > { %v1600_v31 = vpop.f32.mrf.mxu0 }
 0x104   : > { %v1444_v54 = vpop.f32.mrf.mxu3  ;;  %v994_v60 = vpop.f32.mrf.mxu1 }
 0x105   : > { %v1521_v28 = vadd.f32 %v1444_v54, %v1387_v34  ;;  %v995_v17 = vadd.f32 %v994_v60, %v3422_v11 }
 0x106   : > { %2714 = vmatmul.msk.bf16.gmra.mxu0 %vm702_vm4, %v3127_v25 }
 0x107   : > { %v1312_v38 = vpop.f32.mrf.mxu2  ;;  %2644 = vmatmul.msk.bf16.gmra.mxu1 %vm702_vm4, %v3510_v42  ;;  %v3527_v21 = vadd.f32 %v1600_v31, %v1521_v28  ;;  %v4088_v31 = vld [vmem:[#allocation9_spill] sm:$0xff] }
 0x108   : > { %v1388_v39 = vadd.f32 %v1312_v38, %v992_v47  ;;  %v2661_v54 = vrot.slane %v4088_v31, 9  ;;  %v1164_v47 = vrot.slane %v1162_v15, 4 }
 0x10a   : > { %v1163_v49 = vsel %vm3234_vm7, %v2661_v54, %v1162_v15  ;;  %v1166_v18 = vsel %vm3234_vm7, %v1164_v47, %v1165_v46  ;;  %v2831_v54 = vld [vmem:[%s2904_s30 + $0x94] sm:$0xf] }
 0x10b   : > { %v1602_v2 = vpop.f32.mrf.mxu0  ;;  %v1169_v47 = vrot.slane %v2831_v54, 5 }
 0x10c   : > { %v1446_v61 = vpop.f32.mrf.mxu3  ;;  %2677 = vmatmul.msk.bf16.gmra.mxu2 %vm702_vm4, %v3529_v13  ;;  %v996_v11 = vpop.f32.mrf.mxu1 }
 0x10d   : > { %v1522_v34 = vadd.f32 %v1446_v61, %v1388_v39  ;;  %v997_v51 = vadd.f32 %v996_v11, %v3442_v24  ;;  %v1219_v39 = vunpack.c.l.b16 %v1163_v49  ;;  %v1220_v61 = vunpack.c.l.b16 %v1166_v18 }
 0x10f   : > { %v1315_v60 = vpop.f32.mrf.mxu2  ;;  %v3540_v58 = vadd.f32 %v1602_v2, %v1522_v34  ;;  %v3555_v31 = vpack.c.b16 %v1220_v61, %v1219_v39 }
 0x110   : > { %v1389_v30 = vadd.f32 %v1315_v60, %v995_v17  ;;  %v4090_v17 = vld [vmem:[#allocation15_spill] sm:$0xff] }
 0x111   : > { %4089 = vst [vmem:[#allocation9_spill] sm:$0xff] %v3540_v58  ;;  %2698 = vmatmul.msk.bf16.gmra.mxu3 %vm702_vm4, %v3536_v50 }
 0x112   : > { %4092 = vst [vmem:[#allocation31_spill] sm:$0xff] %v3555_v31 }
 0x113   : > { %v1605_v28 = vpop.f32.mrf.mxu0 }
 0x114   : > { %v1449_v24 = vpop.f32.mrf.mxu3  ;;  %v999_v38 = vpop.f32.mrf.mxu1 }
 0x115   : > { %v1523_v11 = vadd.f32 %v1449_v24, %v1389_v30  ;;  %v1000_v2 = vadd.f32 %v999_v38, %v3464_v7  ;;  %v2832_v30 = vld [vmem:[%s2904_s30 + $0x98] sm:$0x1]  ;;  %v3562_v38 = vld [vmem:[%s2904_s30 + $0x90] sm:$0xff] }
 0x116   : > { %2715 = vmatmul.msk.bf16.gmra.mxu0 %vm702_vm4, %v4090_v17  ;;  %v1172_v49 = vrot.slane %v2832_v30, 5  ;;  %4093 = vst [vmem:[#allocation32_spill] sm:$0xff] %v3562_v38 }
 0x117   : > { %v1317_v34 = vpop.f32.mrf.mxu2  ;;  %2645 = vmatmul.msk.bf16.gmra.mxu1 %vm702_vm4, %v3536_v50  ;;  %v3553_v15 = vadd.f32 %v1605_v28, %v1523_v11  ;;  %v2833_v28 = vld [vmem:[%s2904_s30 + $0x90] sm:$0xf] }
 0x118   : > { %v1390_v46 = vadd.f32 %v1317_v34, %v997_v51  ;;  %v2662_v11 = vrot.slane %v2833_v28, 9  ;;  %v1171_v51 = vrot.slane %v1169_v47, 4 }
 0x119   : > { %4091 = vst [vmem:[#allocation30_spill] sm:$0xff] %v3553_v15 }
 0x11a   : > { %v1170_v54 = vsel %vm3234_vm7, %v2662_v11, %v1169_v47  ;;  %v2834_v11 = vld [vmem:[%s2904_s30 + $0xa0] sm:$0xf] }
 0x11b   : > { %v1607_v60 = vpop.f32.mrf.mxu0 }
 0x11c   : > { %v1451_v7 = vpop.f32.mrf.mxu3  ;;  %2678 = vmatmul.msk.bf16.gmra.mxu2 %vm702_vm4, %v3555_v31  ;;  %v1001_v18 = vpop.f32.mrf.mxu1  ;;  %v2836_v31 = vld [vmem:[%s2904_s30 + $0x9c] sm:$0xf] }
 0x11d   : > { %v1524_v24 = vadd.f32 %v1451_v7, %v1390_v46  ;;  %v1002_v58 = vadd.f32 %v1001_v18, %v3478_v5  ;;  %v1173_v46 = vsel %vm3234_vm7, %v1171_v51, %v1172_v49  ;;  %v1221_v18 = vunpack.c.l.b16 %v1170_v54 }
 0x11e   : > { %v1222_v28 = vunpack.c.l.b16 %v1173_v46  ;;  %v1176_v51 = vrot.slane %v2834_v11, 5  ;;  %v2835_v46 = vld [vmem:[%s2904_s30 + $0xa4] sm:$0x1] }
 0x11f   : > { %v1320_v39 = vpop.f32.mrf.mxu2  ;;  %v3566_v61 = vadd.f32 %v1607_v60, %v1524_v24  ;;  %v4095_v60 = vld [vmem:[#allocation3_spill] sm:$0xff] }
 0x120   : > { %v1391_v34 = vadd.f32 %v1320_v39, %v1000_v2  ;;  %v3580_v49 = vpack.c.b16 %v1222_v28, %v1221_v18 }
 0x121   : > { %4094 = vst [vmem:[#allocation33_spill] sm:$0xff] %v3566_v61  ;;  %2699 = vmatmul.msk.bf16.gmra.mxu3 %vm702_vm4, %v3562_v38 }
 0x122   : > { %4097 = vst [vmem:[#allocation35_spill] sm:$0xff] %v3580_v49 }
 0x123   : > { %v1610_v30 = vpop.f32.mrf.mxu0 }
 0x124   : > { %v1454_v7 = vpop.f32.mrf.mxu3  ;;  %v1004_v5 = vpop.f32.mrf.mxu1 }
 0x125   : > { %v1525_v15 = vadd.f32 %v1454_v7, %v1391_v34  ;;  %v1179_v7 = vrot.slane %v2835_v46, 5 }
 0x126   : > { %2716 = vmatmul.msk.bf16.gmra.mxu0 %vm702_vm4, %v4095_v60  ;;  %v3587_v60 = vld [vmem:[%s2904_s30 + $0x9c] sm:$0xff] }
 0x127   : > { %v1322_v2 = vpop.f32.mrf.mxu2  ;;  %2646 = vmatmul.msk.bf16.gmra.mxu1 %vm702_vm4, %v3562_v38  ;;  %v3578_v47 = vadd.f32 %v1610_v30, %v1525_v15  ;;  %4098 = vst [vmem:[#allocation36_spill] sm:$0xff] %v3587_v60  ;;  %v2663_v38 = vrot.slane %v2836_v31, 9  ;;  %v1178_v15 = vrot.slane %v1176_v51, 4 }
 0x128   : > { %v1392_v24 = vadd.f32 %v1322_v2, %v1002_v58  ;;  %v1005_v58 = vadd.f32 %v1004_v5, %v3317_v22  ;;  %v4100_v5 = vld [vmem:[#allocation4_spill] sm:$0xff] }
 0x129   : > { %4096 = vst [vmem:[#allocation34_spill] sm:$0xff] %v3578_v47  ;;  %v1177_v2 = vsel %vm3234_vm7, %v2663_v38, %v1176_v51 }
 0x12a   : > { %v1223_v31 = vunpack.c.l.b16 %v1177_v2 }
 0x12b   : > { %v1612_v39 = vpop.f32.mrf.mxu0 }
 0x12c   : > { %v1456_v54 = vpop.f32.mrf.mxu3  ;;  %2679 = vmatmul.msk.bf16.gmra.mxu2 %vm702_vm4, %v3580_v49  ;;  %v1006_v34 = vpop.f32.mrf.mxu1 }
 0x12d   : > { %v1526_v61 = vadd.f32 %v1456_v54, %v1392_v24  ;;  %v1180_v24 = vsel %vm3234_vm7, %v1178_v15, %v1179_v7  ;;  %v4103_v15 = vld [vmem:[#allocation6_spill] sm:$0xff] }
 0x12e   : > { %v1224_v47 = vunpack.c.l.b16 %v1180_v24  ;;  %v4104_v24 = vld [vmem:[#allocation7_spill] sm:$0xff] }
 0x12f   : > { %v1325_v30 = vpop.f32.mrf.mxu2  ;;  %v3591_v18 = vadd.f32 %v1612_v39, %v1526_v61  ;;  %v1007_v61 = vadd.f32 %v1006_v34, %v3332_v43  ;;  %v3613_v34 = vld [vmem:[%s2904_s30 + $0xa8] sm:$0xff] }
 0x130   : > { %v1393_v28 = vadd.f32 %v1325_v30, %v1005_v58  ;;  %v3606_v7 = vpack.c.b16 %v1224_v47, %v1223_v31  ;;  %v1183_v58 = vrot.slane %v4103_v15, 5  ;;  %4105 = vst [vmem:[#allocation6_spill] sm:$0xff] %v3613_v34 }
 0x131   : > { %4099 = vst [vmem:[#allocation37_spill] sm:$0xff] %v3591_v18  ;;  %2700 = vmatmul.msk.bf16.gmra.mxu3 %vm702_vm4, %v3587_v60  ;;  %v4106_v18 = vld [vmem:[#allocation5_spill] sm:$0xff] }
 0x132   : > { %4102 = vst [vmem:[#allocation39_spill] sm:$0xff] %v3606_v7 }
 0x133   : > { %v1615_v11 = vpop.f32.mrf.mxu0 }
 0x134   : > { %v1459_v54 = vpop.f32.mrf.mxu3  ;;  %v1009_v46 = vpop.f32.mrf.mxu1 }
 0x135   : > { %v1527_v22 = vadd.f32 %v1459_v54, %v1393_v28  ;;  %v1186_v54 = vrot.slane %v4104_v24, 5 }
 0x136   : > { %2717 = vmatmul.msk.bf16.gmra.mxu0 %vm702_vm4, %v4100_v5  ;;  %v2664_v5 = vrot.slane %v4106_v18, 9 }
 0x137   : > { %v1327_v39 = vpop.f32.mrf.mxu2  ;;  %2647 = vmatmul.msk.bf16.gmra.mxu1 %vm702_vm4, %v3587_v60  ;;  %v3604_v38 = vadd.f32 %v1615_v11, %v1527_v22  ;;  %v1185_v11 = vrot.slane %v1183_v58, 4  ;;  %v1010_v22 = vadd.f32 %v1009_v46, %v3352_v9 }
 0x138   : > { %v1394_v51 = vadd.f32 %v1327_v39, %v1007_v61  ;;  %v1184_v39 = vsel %vm3234_vm7, %v2664_v5, %v1183_v58  ;;  %v3631_v5 = vld [vmem:[%s2904_s30 + $0xc0] sm:$0xf] }
 0x139   : > { %4101 = vst [vmem:[#allocation38_spill] sm:$0xff] %v3604_v38  ;;  %v1225_v24 = vunpack.c.l.b16 %v1184_v39  ;;  %v4108_v38 = vld [vmem:[#allocation10_spill] sm:$0xff]  ;;  %v1552_v39 = vshrl.u32 %v3631_v5, 16 }
 0x13a   : > { %4109 = vst [vmem:[#allocation5_spill] sm:$0xff] %v3631_v5 }
 0x13b   : > { %v1617_v30 = vpop.f32.mrf.mxu0 }
 0x13c   : > { %v1461_v2 = vpop.f32.mrf.mxu3  ;;  %2680 = vmatmul.msk.bf16.gmra.mxu2 %vm702_vm4, %v3606_v7  ;;  %v1011_v28 = vpop.f32.mrf.mxu1 }
 0x13d   : > { %v1528_v43 = vadd.f32 %v1461_v2, %v1394_v51  ;;  %v1187_v51 = vsel %vm3234_vm7, %v1185_v11, %v1186_v54 }
 0x13e   : > { %v1226_v9 = vunpack.c.l.b16 %v1187_v51 }
 0x13f   : > { %v1330_v47 = vpop.f32.mrf.mxu2  ;;  %v3617_v31 = vadd.f32 %v1617_v30, %v1528_v43  ;;  %v1012_v30 = vadd.f32 %v1011_v28, %v3370_v29  ;;  %v1555_v29 = vshll.u32 %v3631_v5, 16 }
 0x140   : > { %v1395_v61 = vadd.f32 %v1330_v47, %v1010_v22  ;;  %v3635_v11 = vpack.c.b16 %v1226_v9, %v1225_v24  ;;  %v3638_v22 = vld [vmem:[%s2904_s30 + $0xc4] sm:$0xf]  ;;  %v4113_v47 = vld [vmem:[#allocation12_spill] sm:$0xff]  ;;  %v4114_v24 = vld [vmem:[#allocation13_spill] sm:$0xff] }
 0x141   : > { %4107 = vst [vmem:[#allocation7_spill] sm:$0xff] %v3617_v31  ;;  %2701 = vmatmul.msk.bf16.gmra.mxu3 %vm702_vm4, %v3613_v34  ;;  %v1561_v28 = vshll.u32 %v3638_v22, 16  ;;  %v1193_v9 = vrot.slane %v4114_v24, 5  ;;  %v1557_v7 = vrot.slane %v1555_v29, 5 }
 0x142   : > { %4111 = vst [vmem:[#allocation41_spill] sm:$0xff] %v3635_v11 }
 0x143   : > { %v1620_v15 = vpop.f32.mrf.mxu0  ;;  %4112 = vst [vmem:[#allocation42_spill] sm:$0xff] %v3638_v22 }
 0x144   : > { %v1464_v18 = vpop.f32.mrf.mxu3  ;;  %v1014_v2 = vpop.f32.mrf.mxu1 }
 0x145   : > { %v1529_v46 = vadd.f32 %v1464_v18, %v1395_v61  ;;  %v1190_v61 = vrot.slane %v4113_v47, 5  ;;  %v1565_v18 = vshrl.u32 %v3638_v22, 16  ;;  %v1015_v5 = vadd.f32 %v1014_v2, %v3390_v48 }
 0x146   : > { %2718 = vmatmul.msk.bf16.gmra.mxu0 %vm702_vm4, %v4108_v38  ;;  %v1554_v38 = vrot.slane %v1552_v39, 4  ;;  %v1563_v22 = vrot.slane %v1561_v28, 5 }
 0x147   : > { %v1332_v43 = vpop.f32.mrf.mxu2  ;;  %2648 = vmatmul.msk.bf16.gmra.mxu1 %vm702_vm4, %v3613_v34  ;;  %v3633_v58 = vadd.f32 %v1620_v15, %v1529_v46  ;;  %v1567_v60 = vrot.slane %v1565_v18, 4 }
 0x148   : > { %v1396_v54 = vadd.f32 %v1332_v43, %v1012_v30  ;;  %v3649_v30 = vld [vmem:[%s2904_s30 + $0xb4] sm:$0xff]  ;;  %v4115_v43 = vld [vmem:[#allocation11_spill] sm:$0xff]  ;;  %v1558_v2 = vor.u32 %v1557_v7, %v1554_v38 }
 0x149   : > { %4110 = vst [vmem:[#allocation40_spill] sm:$0xff] %v3633_v58  ;;  %v2665_v47 = vrot.slane %v4115_v43, 9  ;;  %v1192_v58 = vrot.slane %v1190_v61, 4  ;;  %v1568_v39 = vor.u32 %v1567_v60, %v1563_v22 }
 0x14b   : > { %v1622_v51 = vpop.f32.mrf.mxu0  ;;  %v1569_v38 = vrot.slane %v1568_v39, 4 }
 0x14c   : > { %v1466_v31 = vpop.f32.mrf.mxu3  ;;  %2681 = vmatmul.msk.bf16.gmra.mxu2 %vm702_vm4, %v3635_v11  ;;  %v1016_v15 = vpop.f32.mrf.mxu1  ;;  %v3656_v11 = vld [vmem:[%s2904_s30 + $0xc8] sm:$0x1] }
 0x14d   : > { %v1530_v46 = vadd.f32 %v1466_v31, %v1396_v54  ;;  %v1191_v31 = vsel %vm3234_vm7, %v2665_v47, %v1190_v61  ;;  %v1194_v54 = vsel %vm3234_vm7, %v1192_v58, %v1193_v9  ;;  %v1571_v29 = vshll.u32 %v3656_v11, 16 }
 0x14e   : > { %v1227_v18 = vunpack.c.l.b16 %v1191_v31  ;;  %v1017_v24 = vadd.f32 %v1016_v15, %v3411_v63  ;;  %v1559_v58 = vrot.slane %v1558_v2, 4 }
 0x14f   : > { %v1335_v34 = vpop.f32.mrf.mxu2  ;;  %v3653_v49 = vadd.f32 %v1622_v51, %v1530_v46  ;;  %v1573_v60 = vrot.slane %v1571_v29, 5 }
 0x150   : > { %v1397_v17 = vadd.f32 %v1335_v34, %v1015_v5  ;;  %v1228_v34 = vunpack.c.l.b16 %v1194_v54  ;;  %v3681_v54 = vld [vmem:[%s2904_s30 + $0xc0] sm:$0xff] }
 0x151   : > { %2702 = vmatmul.msk.bf16.gmra.mxu3 %vm702_vm4, %v3649_v30  ;;  %v1574_v63 = vsel %vm2931_vm3, %v1569_v38, %v1573_v60 }
 0x152   : > { %v3672_v46 = vpack.c.b16 %v1228_v34, %v1227_v18  ;;  %v1578_v39 = vunpack.c.l.b16 %v1574_v63 }
 0x153   : > { %v1625_v48 = vpop.f32.mrf.mxu0 }
 0x154   : > { %v1469_v28 = vpop.f32.mrf.mxu3  ;;  %v1019_v51 = vpop.f32.mrf.mxu1 }
 0x155   : > { %v1531_v5 = vadd.f32 %v1469_v28, %v1397_v17  ;;  %v1564_v17 = vsel %vm2931_vm3, %v1559_v58, %v1563_v22 }
 0x156   : > { %2719 = vmatmul.msk.bf16.gmra.mxu0 %vm702_vm4, %v3243_v53  ;;  %v1577_v2 = vunpack.c.l.b16 %v1564_v17 }
 0x157   : > { %v1337_v61 = vpop.f32.mrf.mxu2  ;;  %2649 = vmatmul.msk.bf16.gmra.mxu1 %vm702_vm4, %v3649_v30  ;;  %v3670_v7 = vadd.f32 %v1625_v48, %v1531_v5  ;;  %v1020_v48 = vadd.f32 %v1019_v51, %v3432_v26 }
 0x158   : > { %v1398_v9 = vadd.f32 %v1337_v61, %v1017_v24  ;;  %v3688_v22 = vpack.c.b16 %v1578_v39, %v1577_v2 }
 0x15b   : > { %v1627_v43 = vpop.f32.mrf.mxu0 }
 0x15c   : > { %v1471_v15 = vpop.f32.mrf.mxu3  ;;  %2682 = vmatmul.msk.bf16.gmra.mxu2 %vm702_vm4, %v3672_v46  ;;  %v1021_v47 = vpop.f32.mrf.mxu1 }
 0x15d   : > { %v1532_v31 = vadd.f32 %v1471_v15, %v1398_v9  ;;  %v1022_v26 = vadd.f32 %v1021_v47, %v3449_v0 }
 0x15f   : > { %v1340_v29 = vpop.f32.mrf.mxu2  ;;  %v3684_v28 = vadd.f32 %v1627_v43, %v1532_v31 }
 0x160   : > { %v1399_v18 = vadd.f32 %v1340_v29, %v1020_v48 }
 0x161   : > { %2703 = vmatmul.msk.bf16.gmra.mxu3 %vm702_vm4, %v3681_v54 }
 0x163   : > { %v1630_v34 = vpop.f32.mrf.mxu0 }
 0x164   : > { %v1474_v5 = vpop.f32.mrf.mxu3  ;;  %v1024_v24 = vpop.f32.mrf.mxu1 }
 0x165   : > { %v1533_v61 = vadd.f32 %v1474_v5, %v1399_v18  ;;  %v1025_v63 = vadd.f32 %v1024_v24, %v3334_v16 }
 0x166   : > { %2720 = vmatmul.msk.bf16.gmra.mxu0 %vm702_vm4, %v3688_v22 }
 0x167   : > { %v1342_v51 = vpop.f32.mrf.mxu2  ;;  %2723 = vmatmul.msk.bf16.vlgmr.msra.gmra.mxu1 %vm702_vm4, %v3268_v55  ;;  %v3695_v58 = vadd.f32 %v1630_v34, %v1533_v61 }
 0x168   : > { %v1400_v38 = vadd.f32 %v1342_v51, %v1022_v26 }
 0x16b   : > { %v1632_v60 = vpop.f32.mrf.mxu0 }
 0x16c   : > { %v1476_v9 = vpop.f32.mrf.mxu3  ;;  %2744 = vmatmul.msk.bf16.vlgmr.msra.gmra.mxu2 %vm702_vm4, %v3280_v6  ;;  %v1026_v43 = vpop.f32.mrf.mxu1 }
 0x16d   : > { %v1534_v17 = vadd.f32 %v1476_v9, %v1400_v38  ;;  %v1027_v6 = vadd.f32 %v1026_v43, %v3356_v57 }
 0x16f   : > { %v1345_v15 = vpop.f32.mrf.mxu2  ;;  %v3700_v31 = vadd.f32 %v1632_v60, %v1534_v17 }
 0x170   : > { %v1401_v0 = vadd.f32 %v1345_v15, %v1025_v63 }
 0x171   : > { %2761 = vmatmul.msk.bf16.vlgmr.msra.gmra.mxu3 %vm702_vm4, %v3171_v45 }
 0x173   : > { %v1635_v55 = vpop.f32.mrf.mxu0 }
 0x174   : > { %v1479_v47 = vpop.f32.mrf.mxu3  ;;  %v1029_v48 = vpop.f32.mrf.mxu1 }
 0x175   : > { %v1535_v2 = vadd.f32 %v1479_v47, %v1401_v0  ;;  %v1030_v24 = vadd.f32 %v1029_v48, %v3376_v59 }
 0x176   : > { %2779 = vmatmul.msk.bf16.vlgmr.msra.gmra.mxu0 %vm702_vm4, %v3294_v52 }
 0x177   : > { %v1347_v39 = vpop.f32.mrf.mxu2  ;;  %2724 = vmatmul.msk.bf16.gmra.mxu1 %vm702_vm4, %v3294_v52  ;;  %v3709_v16 = vadd.f32 %v1635_v55, %v1535_v2 }
 0x178   : > { %v1402_v29 = vadd.f32 %v1347_v39, %v1027_v6 }
 0x17b   : > { %v1637_v18 = vpop.f32.mrf.mxu0 }
 0x17c   : > { %v1481_v34 = vpop.f32.mrf.mxu3  ;;  %2745 = vmatmul.msk.bf16.gmra.mxu2 %vm702_vm4, %v3300_v41  ;;  %v1031_v45 = vpop.f32.mrf.mxu1 }
 0x17d   : > { %v1536_v5 = vadd.f32 %v1481_v34, %v1402_v29  ;;  %v1032_v41 = vadd.f32 %v1031_v45, %v3394_v3 }
 0x17f   : > { %v1350_v61 = vpop.f32.mrf.mxu2  ;;  %v3714_v26 = vadd.f32 %v1637_v18, %v1536_v5 }
 0x180   : > { %v1403_v57 = vadd.f32 %v1350_v61, %v1030_v24 }
 0x181   : > { %2762 = vmatmul.msk.bf16.gmra.mxu3 %vm702_vm4, %v3261_v20 }
 0x183   : > { %v1640_v52 = vpop.f32.mrf.mxu0 }
 0x184   : > { %v1484_v51 = vpop.f32.mrf.mxu3  ;;  %v1034_v38 = vpop.f32.mrf.mxu1 }
 0x185   : > { %v1537_v60 = vadd.f32 %v1484_v51, %v1403_v57  ;;  %v1035_v0 = vadd.f32 %v1034_v38, %v3413_v23 }
 0x186   : > { %2780 = vmatmul.msk.bf16.gmra.mxu0 %vm702_vm4, %v3314_v40 }
 0x187   : > { %v1352_v9 = vpop.f32.mrf.mxu2  ;;  %2725 = vmatmul.msk.bf16.gmra.mxu1 %vm702_vm4, %v3314_v40  ;;  %v3723_v59 = vadd.f32 %v1640_v52, %v1537_v60 }
 0x188   : > { %v1404_v43 = vadd.f32 %v1352_v9, %v1032_v41 }
 0x18b   : > { %v1642_v17 = vpop.f32.mrf.mxu0 }
 0x18c   : > { %v1486_v63 = vpop.f32.mrf.mxu3  ;;  %2746 = vmatmul.msk.bf16.gmra.mxu2 %vm702_vm4, %v3322_v8  ;;  %v1036_v20 = vpop.f32.mrf.mxu1 }
 0x18d   : > { %v1538_v15 = vadd.f32 %v1486_v63, %v1404_v43  ;;  %v1037_v8 = vadd.f32 %v1036_v20, %v3434_v1  ;;  %v4116_v43 = vld [vmem:[#allocation18_spill] sm:$0xff]  ;;  %v4117_v63 = vld [vmem:[#allocation16_spill] sm:$0xff] }
 0x18f   : > { %v1355_v55 = vpop.f32.mrf.mxu2  ;;  %v3728_v47 = vadd.f32 %v1642_v17, %v1538_v15 }
 0x190   : > { %v1405_v3 = vadd.f32 %v1355_v55, %v1035_v0  ;;  %v4118_v55 = vld [vmem:[#allocation8_spill] sm:$0xff] }
 0x191   : > { %2763 = vmatmul.msk.bf16.gmra.mxu3 %vm702_vm4, %v2943_v62 }
 0x193   : > { %v1645_v40 = vpop.f32.mrf.mxu0 }
 0x194   : > { %v1489_v48 = vpop.f32.mrf.mxu3  ;;  %v1039_v2 = vpop.f32.mrf.mxu1 }
 0x195   : > { %v1539_v6 = vadd.f32 %v1489_v48, %v1405_v3  ;;  %v1040_v5 = vadd.f32 %v1039_v2, %v3456_v56  ;;  %v4119_v2 = vld [vmem:[#allocation21_spill] sm:$0xff] }
 0x196   : > { %2781 = vmatmul.msk.bf16.gmra.mxu0 %vm702_vm4, %v3342_v12 }
 0x197   : > { %v1357_v39 = vpop.f32.mrf.mxu2  ;;  %2726 = vmatmul.msk.bf16.gmra.mxu1 %vm702_vm4, %v3342_v12  ;;  %v3737_v23 = vadd.f32 %v1645_v40, %v1539_v6  ;;  %v4120_v6 = vld [vmem:[#allocation17_spill] sm:$0xff] }
 0x198   : > { %v1406_v29 = vadd.f32 %v1357_v39, %v1037_v8 }
 0x19b   : > { %v1647_v18 = vpop.f32.mrf.mxu0 }
 0x19c   : > { %v1491_v34 = vpop.f32.mrf.mxu3  ;;  %2747 = vmatmul.msk.bf16.gmra.mxu2 %vm702_vm4, %v3350_v27  ;;  %v1041_v62 = vpop.f32.mrf.mxu1 }
 0x19d   : > { %v1540_v45 = vadd.f32 %v1491_v34, %v1406_v29  ;;  %v1042_v27 = vadd.f32 %v1041_v62, %v3471_v44 }
 0x19f   : > { %v1360_v24 = vpop.f32.mrf.mxu2  ;;  %v3742_v61 = vadd.f32 %v1647_v18, %v1540_v45  ;;  %v4121_v45 = vld [vmem:[#allocation22_spill] sm:$0xff] }
 0x1a0   : > { %v1407_v1 = vadd.f32 %v1360_v24, %v1040_v5 }
 0x1a1   : > { %2764 = vmatmul.msk.bf16.gmra.mxu3 %vm702_vm4, %v3017_v37 }
 0x1a3   : > { %v1650_v12 = vpop.f32.mrf.mxu0 }
 0x1a4   : > { %v1494_v57 = vpop.f32.mrf.mxu3  ;;  %v1044_v52 = vpop.f32.mrf.mxu1 }
 0x1a5   : > { %v1541_v51 = vadd.f32 %v1494_v57, %v1407_v1  ;;  %v1045_v20 = vadd.f32 %v1044_v52, %v4117_v63  ;;  %v4122_v1 = vld [vmem:[#allocation19_spill] sm:$0xff] }
 0x1a6   : > { %2782 = vmatmul.msk.bf16.gmra.mxu0 %vm702_vm4, %v3374_v33 }
 0x1a7   : > { %v1362_v38 = vpop.f32.mrf.mxu2  ;;  %2727 = vmatmul.msk.bf16.gmra.mxu1 %vm702_vm4, %v3374_v33  ;;  %v3751_v56 = vadd.f32 %v1650_v12, %v1541_v51 }
 0x1a8   : > { %v1408_v60 = vadd.f32 %v1362_v38, %v1042_v27  ;;  %v4123_v27 = vld [vmem:[#allocation14_spill] sm:$0xff] }
 0x1ab   : > { %v1652_v41 = vpop.f32.mrf.mxu0 }
 0x1ac   : > { %v1496_v9 = vpop.f32.mrf.mxu3  ;;  %2748 = vmatmul.msk.bf16.gmra.mxu2 %vm702_vm4, %v4116_v43  ;;  %v1046_v37 = vpop.f32.mrf.mxu1  ;;  %v4124_v43 = vld [vmem:[#allocation24_spill] sm:$0xff] }
 0x1ad   : > { %v1542_v17 = vadd.f32 %v1496_v9, %v1408_v60  ;;  %v1047_v8 = vadd.f32 %v1046_v37, %v4120_v6  ;;  %v4125_v37 = vld [vmem:[#allocation20_spill] sm:$0xff] }
 0x1af   : > { %v1365_v15 = vpop.f32.mrf.mxu2  ;;  %v3756_v0 = vadd.f32 %v1652_v41, %v1542_v17 }
 0x1b0   : > { %v1409_v44 = vadd.f32 %v1365_v15, %v1045_v20 }
 0x1b1   : > { %2765 = vmatmul.msk.bf16.gmra.mxu3 %vm702_vm4, %v4118_v55 }
 0x1b3   : > { %v1655_v33 = vpop.f32.mrf.mxu0 }
 0x1b4   : > { %v1499_v3 = vpop.f32.mrf.mxu3  ;;  %v1049_v40 = vpop.f32.mrf.mxu1 }
 0x1b5   : > { %v1543_v48 = vadd.f32 %v1499_v3, %v1409_v44  ;;  %v1050_v12 = vadd.f32 %v1049_v40, %v4122_v1  ;;  %v4130_v1 = vld [vmem:[#allocation25_spill] sm:$0xff] }
 0x1b6   : > { %2783 = vmatmul.msk.bf16.gmra.mxu0 %vm702_vm4, %v4119_v2 }
 0x1b7   : > { %v1367_v39 = vpop.f32.mrf.mxu2  ;;  %2728 = vmatmul.msk.bf16.gmra.mxu1 %vm702_vm4, %v4119_v2  ;;  %v3765_v29 = vadd.f32 %v1655_v33, %v1543_v48  ;;  %v4126_v33 = vld [vmem:[#allocation26_spill] sm:$0xff]  ;;  %v4127_v48 = vld [vmem:[#allocation23_spill] sm:$0xff] }
 0x1b8   : > { %v1410_v18 = vadd.f32 %v1367_v39, %v1047_v8 }
 0x1bb   : > { %v1657_v34 = vpop.f32.mrf.mxu0 }
 0x1bc   : > { %v1501_v62 = vpop.f32.mrf.mxu3  ;;  %2749 = vmatmul.msk.bf16.gmra.mxu2 %vm702_vm4, %v4121_v45  ;;  %v1051_v5 = vpop.f32.mrf.mxu1 }
 0x1bd   : > { %v1544_v24 = vadd.f32 %v1501_v62, %v1410_v18  ;;  %v1052_v17 = vadd.f32 %v1051_v5, %v4125_v37  ;;  %v4128_v18 = vld [vmem:[#allocation2_spill] sm:$0xff] }
 0x1bf   : > { %v1370_v57 = vpop.f32.mrf.mxu2  ;;  %v3770_v52 = vadd.f32 %v1657_v34, %v1544_v24  ;;  %v4129_v24 = vld [vmem:[#allocation28_spill] sm:$0xff] }
 0x1c0   : > { %v1411_v51 = vadd.f32 %v1370_v57, %v1050_v12 }
 0x1c1   : > { %2766 = vmatmul.msk.bf16.gmra.mxu3 %vm702_vm4, %v4123_v27 }
 0x1c3   : > { %v1660_v38 = vpop.f32.mrf.mxu0 }
 0x1c4   : > { %v1504_v60 = vpop.f32.mrf.mxu3  ;;  %v1054_v41 = vpop.f32.mrf.mxu1 }
 0x1c5   : > { %v1545_v9 = vadd.f32 %v1504_v60, %v1411_v51  ;;  %v1055_v2 = vadd.f32 %v1054_v41, %v4127_v48 }
 0x1c6   : > { %2784 = vmatmul.msk.bf16.gmra.mxu0 %vm702_vm4, %v4124_v43 }
 0x1c7   : > { %v1372_v63 = vpop.f32.mrf.mxu2  ;;  %2729 = vmatmul.msk.bf16.gmra.mxu1 %vm702_vm4, %v4124_v43  ;;  %v3779_v20 = vadd.f32 %v1660_v38, %v1545_v9  ;;  %v4131_v43 = vld [vmem:[#allocation27_spill] sm:$0xff] }
 0x1c8   : > { %v1412_v15 = vadd.f32 %v1372_v63, %v1052_v17 }
 0x1cb   : > { %v1662_v44 = vpop.f32.mrf.mxu0 }
 0x1cc   : > { %v1506_v55 = vpop.f32.mrf.mxu3  ;;  %2750 = vmatmul.msk.bf16.gmra.mxu2 %vm702_vm4, %v4126_v33  ;;  %v1056_v3 = vpop.f32.mrf.mxu1 }
 0x1cd   : > { %v1546_v40 = vadd.f32 %v1506_v55, %v1412_v15  ;;  %v1057_v12 = vadd.f32 %v1056_v3, %v4130_v1 }
 0x1cf   : > { %v1375_v6 = vpop.f32.mrf.mxu2  ;;  %v3784_v8 = vadd.f32 %v1662_v44, %v1546_v40  ;;  %v4132_v40 = vld [vmem:[#allocation29_spill] sm:$0xff] }
 0x1d0   : > { %v1413_v39 = vadd.f32 %v1375_v6, %v1055_v2 }
 0x1d1   : > { %2767 = vmatmul.msk.bf16.gmra.mxu3 %vm702_vm4, %v4128_v18 }
 0x1d3   : > { %v1665_v34 = vpop.f32.mrf.mxu0 }
 0x1d4   : > { %v1509_v62 = vpop.f32.mrf.mxu3  ;;  %v1059_v45 = vpop.f32.mrf.mxu1 }
 0x1d5   : > { %v1547_v5 = vadd.f32 %v1509_v62, %v1413_v39  ;;  %v1060_v37 = vadd.f32 %v1059_v45, %v4131_v43 }
 0x1d6   : > { %2785 = vmatmul.msk.bf16.gmra.mxu0 %vm702_vm4, %v4129_v24 }
 0x1d7   : > { %v1377_v57 = vpop.f32.mrf.mxu2  ;;  %2730 = vmatmul.msk.bf16.gmra.mxu1 %vm702_vm4, %v4129_v24  ;;  %v3793_v51 = vadd.f32 %v1665_v34, %v1547_v5 }
 0x1d8   : > { %v1414_v27 = vadd.f32 %v1377_v57, %v1057_v12 }
 0x1db   : > { %v1667_v38 = vpop.f32.mrf.mxu0 }
 0x1dc   : > { %v1511_v60 = vpop.f32.mrf.mxu3  ;;  %2751 = vmatmul.msk.bf16.gmra.mxu2 %vm702_vm4, %v3486_v19  ;;  %v1061_v41 = vpop.f32.mrf.mxu1 }
 0x1dd   : > { %v1548_v9 = vadd.f32 %v1511_v60, %v1414_v27  ;;  %v1062_v19 = vadd.f32 %v1061_v41, %v4132_v40 }
 0x1df   : > { %v1380_v17 = vpop.f32.mrf.mxu2  ;;  %v3798_v63 = vadd.f32 %v1667_v38, %v1548_v9 }
 0x1e0   : > { %v1415_v15 = vadd.f32 %v1380_v17, %v1060_v37 }
 0x1e1   : > { %2768 = vmatmul.msk.bf16.gmra.mxu3 %vm702_vm4, %v3042_v4 }
 0x1e3   : > { %v1670_v44 = vpop.f32.mrf.mxu0 }
 0x1e4   : > { %v1514_v55 = vpop.f32.mrf.mxu3  ;;  %v1735_v33 = vpop.f32.mrf.mxu1 }
 0x1e5   : > { %v1549_v3 = vadd.f32 %v1514_v55, %v1415_v15  ;;  %v1815_v62 = vadd.f32 %v1735_v33, %v3501_v32 }
 0x1e6   : > { %2786 = vmatmul.msk.bf16.gmra.mxu0 %vm702_vm4, %v3503_v10 }
 0x1e7   : > { %v1382_v48 = vpop.f32.mrf.mxu2  ;;  %2731 = vmatmul.msk.bf16.gmra.mxu1 %vm702_vm4, %v3503_v10  ;;  %v3807_v2 = vadd.f32 %v1670_v44, %v1549_v3  ;;  %v4133_v44 = vld [vmem:[#allocation15_spill] sm:$0xff] }
 0x1e8   : > { %v1416_v6 = vadd.f32 %v1382_v48, %v1062_v19 }
 0x1eb   : > { %v1672_v39 = vpop.f32.mrf.mxu0 }
 0x1ec   : > { %v1516_v18 = vpop.f32.mrf.mxu3  ;;  %2752 = vmatmul.msk.bf16.gmra.mxu2 %vm702_vm4, %v3510_v42  ;;  %v1737_v4 = vpop.f32.mrf.mxu1  ;;  %v3820_v42 = vld [vmem:[%s4013_s2] ss:$0 sm:$0xff] }
 0x1ed   : > { %v1550_v34 = vadd.f32 %v1516_v18, %v1416_v6  ;;  %v1816_v27 = vadd.f32 %v1737_v4, %v3514_v35  ;;  %v4134_v18 = vld [vmem:[#allocation31_spill] sm:$0xff]  ;;  %v4135_v4 = vld [vmem:[#allocation9_spill] sm:$0xff] }
 0x1ef   : > { %v1869_v45 = vpop.f32.mrf.mxu2  ;;  %v3812_v5 = vadd.f32 %v1672_v39, %v1550_v34 }
 0x1f0   : > { %v1949_v10 = vadd.f32 %v1869_v45, %v1815_v62 }
 0x1f1   : > { %2769 = vmatmul.msk.bf16.gmra.mxu3 %vm702_vm4, %v3127_v25 }
 0x1f3   : > { %v2165_v24 = vpop.f32.mrf.mxu0 }
 0x1f4   : > { %v2025_v1 = vpop.f32.mrf.mxu3  ;;  %v1740_v12 = vpop.f32.mrf.mxu1 }
 0x1f5   : > { %v2105_v57 = vadd.f32 %v2025_v1, %v1949_v10 }
 0x1f6   : > { %2787 = vmatmul.msk.bf16.gmra.mxu0 %vm702_vm4, %v3529_v13 }
 0x1f7   : > { %v2245_v32 = vadd.f32 %v2165_v24, %v2105_v57  ;;  %v1871_v38 = vpop.f32.mrf.mxu2  ;;  %2732 = vmatmul.msk.bf16.gmra.mxu1 %vm702_vm4, %v3529_v13  ;;  %v1817_v13 = vadd.f32 %v1740_v12, %v3527_v21 }
 0x1f8   : > { %v1950_v60 = vadd.f32 %v1871_v38, %v1816_v27 }
 0x1f9   : > { %v2281_v25 = vadd.f32 %v3820_v42, %v2245_v32  ;;  %v4136_v32 = vld [vmem:[#allocation32_spill] sm:$0xff] }
 0x1fb   : > { %2313 = vst [vmem:[%s3830_s20] sm:$0xff] %v2281_v25  ;;  %v2167_v41 = vpop.f32.mrf.mxu0  ;;  %v2382_v33 = vmul.f32 %v2281_v25, %v2281_v25 }
 0x1fc   : > { %v2027_v9 = vpop.f32.mrf.mxu3  ;;  %2753 = vmatmul.msk.bf16.gmra.mxu2 %vm702_vm4, %v3536_v50  ;;  %v1742_v35 = vpop.f32.mrf.mxu1 }
 0x1fd   : > { %v2106_v43 = vadd.f32 %v2027_v9, %v1950_v60  ;;  %v1818_v34 = vadd.f32 %v1742_v35, %v4135_v4 }
 0x1ff   : > { %v2246_v37 = vadd.f32 %v2167_v41, %v2106_v43  ;;  %v1874_v17 = vpop.f32.mrf.mxu2  ;;  %v4137_v41 = vld [vmem:[#allocation30_spill] sm:$0xff] }
 0x200   : > { %v1951_v55 = vadd.f32 %v1874_v17, %v1817_v13 }
 0x201   : > { %v2282_v15 = vadd.f32 %v3820_v42, %v2246_v37  ;;  %2770 = vmatmul.msk.bf16.gmra.mxu3 %vm702_vm4, %v4133_v44  ;;  %v4138_v37 = vld [vmem:[#allocation3_spill] sm:$0xff] }
 0x203   : > { %2314 = vst [vmem:[%s3830_s20 + $0x8] sm:$0xff] %v2282_v15  ;;  %v2345_v3 = vadd.f32 %v2282_v15, %v2281_v25  ;;  %v2383_v40 = vmul.f32 %v2282_v15, %v2282_v15  ;;  %v2170_v19 = vpop.f32.mrf.mxu0 }
 0x204   : > { %v2030_v48 = vpop.f32.mrf.mxu3  ;;  %v1745_v50 = vpop.f32.mrf.mxu1 }
 0x205   : > { %v2414_v6 = vadd.f32 %v2383_v40, %v2382_v33  ;;  %v2107_v39 = vadd.f32 %v2030_v48, %v1951_v55  ;;  %v1819_v9 = vadd.f32 %v1745_v50, %v4137_v41  ;;  %v4140_v50 = vld [vmem:[#allocation33_spill] sm:$0xff] }
 0x206   : > { %2788 = vmatmul.msk.bf16.gmra.mxu0 %vm702_vm4, %v4134_v18 }
 0x207   : > { %v2247_v21 = vadd.f32 %v2170_v19, %v2107_v39  ;;  %v1876_v62 = vpop.f32.mrf.mxu2  ;;  %2733 = vmatmul.msk.bf16.gmra.mxu1 %vm702_vm4, %v4134_v18  ;;  %v4139_v19 = vld [vmem:[#allocation35_spill] sm:$0xff] }
 0x208   : > { %v1952_v10 = vadd.f32 %v1876_v62, %v1818_v34 }
 0x209   : > { %v2283_v45 = vadd.f32 %v3820_v42, %v2247_v21 }
 0x20b   : > { %2315 = vst [vmem:[%s3830_s20 + $0x10] sm:$0xff] %v2283_v45  ;;  %v2346_v24 = vadd.f32 %v2345_v3, %v2283_v45  ;;  %v2384_v1 = vmul.f32 %v2283_v45, %v2283_v45  ;;  %v2172_v12 = vpop.f32.mrf.mxu0 }
 0x20c   : > { %v2032_v57 = vpop.f32.mrf.mxu3  ;;  %2754 = vmatmul.msk.bf16.gmra.mxu2 %vm702_vm4, %v4136_v32  ;;  %v1747_v27 = vpop.f32.mrf.mxu1  ;;  %v4142_v32 = vld [vmem:[#allocation34_spill] sm:$0xff] }
 0x20d   : > { %v2415_v38 = vadd.f32 %v2414_v6, %v2384_v1  ;;  %v2108_v25 = vadd.f32 %v2032_v57, %v1952_v10  ;;  %v1820_v6 = vadd.f32 %v1747_v27, %v4140_v50  ;;  %v4141_v10 = vld [vmem:[#allocation36_spill] sm:$0xff] }
 0x20f   : > { %v2248_v60 = vadd.f32 %v2172_v12, %v2108_v25  ;;  %v1879_v35 = vpop.f32.mrf.mxu2 }
 0x210   : > { %v1953_v13 = vadd.f32 %v1879_v35, %v1819_v9 }
 0x211   : > { %v2284_v43 = vadd.f32 %v3820_v42, %v2248_v60  ;;  %2771 = vmatmul.msk.bf16.gmra.mxu3 %vm702_vm4, %v4138_v37  ;;  %v4143_v60 = vld [vmem:[#allocation4_spill] sm:$0xff] }
 0x213   : > { %2316 = vst [vmem:[%s3830_s20 + $0x18] sm:$0xff] %v2284_v43  ;;  %v2347_v17 = vadd.f32 %v2346_v24, %v2284_v43  ;;  %v2385_v15 = vmul.f32 %v2284_v43, %v2284_v43  ;;  %v2175_v44 = vpop.f32.mrf.mxu0 }
 0x214   : > { %v2035_v55 = vpop.f32.mrf.mxu3  ;;  %v1750_v33 = vpop.f32.mrf.mxu1 }
 0x215   : > { %v2416_v3 = vadd.f32 %v2415_v38, %v2385_v15  ;;  %v2109_v40 = vadd.f32 %v2035_v55, %v1953_v13  ;;  %v1821_v27 = vadd.f32 %v1750_v33, %v4142_v32  ;;  %v4145_v33 = vld [vmem:[#allocation37_spill] sm:$0xff] }
 0x216   : > { %2789 = vmatmul.msk.bf16.gmra.mxu0 %vm702_vm4, %v4139_v19 }
 0x217   : > { %v2249_v48 = vadd.f32 %v2175_v44, %v2109_v40  ;;  %v1881_v39 = vpop.f32.mrf.mxu2  ;;  %2734 = vmatmul.msk.bf16.gmra.mxu1 %vm702_vm4, %v4139_v19  ;;  %v4144_v44 = vld [vmem:[#allocation39_spill] sm:$0xff] }
 0x218   : > { %v1954_v21 = vadd.f32 %v1881_v39, %v1820_v6 }
 0x219   : > { %v2285_v18 = vadd.f32 %v3820_v42, %v2249_v48 }
 0x21b   : > { %2317 = vst [vmem:[%s3830_s20 + $0x20] sm:$0xff] %v2285_v18  ;;  %v2348_v4 = vadd.f32 %v2347_v17, %v2285_v18  ;;  %v2386_v34 = vmul.f32 %v2285_v18, %v2285_v18  ;;  %v2177_v62 = vpop.f32.mrf.mxu0 }
 0x21c   : > { %v2037_v45 = vpop.f32.mrf.mxu3  ;;  %2755 = vmatmul.msk.bf16.gmra.mxu2 %vm702_vm4, %v4141_v10  ;;  %v1752_v24 = vpop.f32.mrf.mxu1  ;;  %v4147_v10 = vld [vmem:[#allocation38_spill] sm:$0xff] }
 0x21d   : > { %v2417_v1 = vadd.f32 %v2416_v3, %v2386_v34  ;;  %v2110_v12 = vadd.f32 %v2037_v45, %v1954_v21  ;;  %v1822_v3 = vadd.f32 %v1752_v24, %v4145_v33  ;;  %v4146_v21 = vld [vmem:[#allocation6_spill] sm:$0xff] }
 0x21f   : > { %v2250_v57 = vadd.f32 %v2177_v62, %v2110_v12  ;;  %v1884_v38 = vpop.f32.mrf.mxu2 }
 0x220   : > { %v1955_v41 = vadd.f32 %v1884_v38, %v1821_v27 }
 0x221   : > { %v2286_v25 = vadd.f32 %v3820_v42, %v2250_v57  ;;  %2772 = vmatmul.msk.bf16.gmra.mxu3 %vm702_vm4, %v4143_v60  ;;  %v4148_v57 = vld [vmem:[#allocation10_spill] sm:$0xff] }
 0x223   : > { %2318 = vst [vmem:[%s3830_s20 + $0x28] sm:$0xff] %v2286_v25  ;;  %v2349_v9 = vadd.f32 %v2348_v4, %v2286_v25  ;;  %v2387_v35 = vmul.f32 %v2286_v25, %v2286_v25  ;;  %v2180_v43 = vpop.f32.mrf.mxu0 }
 0x224   : > { %v2040_v37 = vpop.f32.mrf.mxu3  ;;  %v1755_v13 = vpop.f32.mrf.mxu1 }
 0x225   : > { %v2418_v17 = vadd.f32 %v2417_v1, %v2387_v35  ;;  %v2111_v15 = vadd.f32 %v2040_v37, %v1955_v41  ;;  %v1823_v24 = vadd.f32 %v1755_v13, %v4147_v10  ;;  %v4150_v13 = vld [vmem:[#allocation7_spill] sm:$0xff] }
 0x226   : > { %2790 = vmatmul.msk.bf16.gmra.mxu0 %vm702_vm4, %v4144_v44 }
 0x227   : > { %v2251_v55 = vadd.f32 %v2180_v43, %v2111_v15  ;;  %v1886_v40 = vpop.f32.mrf.mxu2  ;;  %2735 = vmatmul.msk.bf16.gmra.mxu1 %vm702_vm4, %v4144_v44  ;;  %v4149_v43 = vld [vmem:[#allocation41_spill] sm:$0xff] }
 0x228   : > { %v1956_v48 = vadd.f32 %v1886_v40, %v1822_v3 }
 0x229   : > { %v2287_v19 = vadd.f32 %v3820_v42, %v2251_v55 }
 0x22b   : > { %2319 = vst [vmem:[%s3830_s20 + $0x30] sm:$0xff] %v2287_v19  ;;  %v2350_v50 = vadd.f32 %v2349_v9, %v2287_v19  ;;  %v2388_v6 = vmul.f32 %v2287_v19, %v2287_v19  ;;  %v2182_v39 = vpop.f32.mrf.mxu0 }
 0x22c   : > { %v2042_v18 = vpop.f32.mrf.mxu3  ;;  %2756 = vmatmul.msk.bf16.gmra.mxu2 %vm702_vm4, %v4146_v21  ;;  %v1757_v4 = vpop.f32.mrf.mxu1 }
 0x22d   : > { %v2419_v34 = vadd.f32 %v2418_v17, %v2388_v6  ;;  %v2112_v62 = vadd.f32 %v2042_v18, %v1956_v48  ;;  %v1824_v17 = vadd.f32 %v1757_v4, %v4150_v13  ;;  %v4151_v18 = vld [vmem:[#allocation40_spill] sm:$0xff] }
 0x22f   : > { %v2252_v45 = vadd.f32 %v2182_v39, %v2112_v62  ;;  %v1889_v1 = vpop.f32.mrf.mxu2 }
 0x230   : > { %v1957_v32 = vadd.f32 %v1889_v1, %v1823_v24  ;;  %v4152_v1 = vld [vmem:[#allocation42_spill] sm:$0xff] }
 0x231   : > { %v2288_v12 = vadd.f32 %v3820_v42, %v2252_v45  ;;  %2773 = vmatmul.msk.bf16.gmra.mxu3 %vm702_vm4, %v4148_v57  ;;  %v3902_v57 = vld [vmem:[%s2904_s30 + $0xd0] sm:$0xf] }
 0x233   : > { %2320 = vst [vmem:[%s3830_s20 + $0x38] sm:$0xff] %v2288_v12  ;;  %v2351_v27 = vadd.f32 %v2350_v50, %v2288_v12  ;;  %v2389_v38 = vmul.f32 %v2288_v12, %v2288_v12  ;;  %v2185_v25 = vpop.f32.mrf.mxu0  ;;  %v3899_v12 = vld [vmem:[%s2904_s30 + $0xcc] sm:$0xf] }
 0x234   : > { %v2045_v60 = vpop.f32.mrf.mxu3  ;;  %v1760_v41 = vpop.f32.mrf.mxu1 }
 0x235   : > { %v2420_v9 = vadd.f32 %v2419_v34, %v2389_v38  ;;  %v2113_v35 = vadd.f32 %v2045_v60, %v1957_v32  ;;  %v1825_v21 = vadd.f32 %v1760_v41, %v4151_v18  ;;  %v4153_v60 = vld [vmem:[#allocation5_spill] sm:$0xff]  ;;  %v263_v18 = vld [vmem:[%s2904_s30 + $0xd4] sm:$0x1] }
 0x236   : > { %2791 = vmatmul.msk.bf16.gmra.mxu0 %vm702_vm4, %v4149_v43  ;;  %v2721_v41 = vrot.slane %v4153_v60, 9 }
 0x237   : > { %v2253_v37 = vadd.f32 %v2185_v25, %v2113_v35  ;;  %v1891_v15 = vpop.f32.mrf.mxu2  ;;  %2736 = vmatmul.msk.bf16.gmra.mxu1 %vm702_vm4, %v4149_v43  ;;  %v1991_v35 = vshll.u32 %v3902_v57, 16  ;;  %v1995_v43 = vshrl.u32 %v3902_v57, 16 }
 0x238   : > { %v1958_v55 = vadd.f32 %v1891_v15, %v1824_v17 }
 0x239   : > { %v2289_v44 = vadd.f32 %v3820_v42, %v2253_v37 }
 0x23b   : > { %2321 = vst [vmem:[%s3830_s20 + $0x40] sm:$0xff] %v2289_v44  ;;  %v2352_v33 = vadd.f32 %v2351_v27, %v2289_v44  ;;  %v2390_v3 = vmul.f32 %v2289_v44, %v2289_v44  ;;  %v2187_v40 = vpop.f32.mrf.mxu0  ;;  %v1713_v44 = vrot.slane %v3656_v11, 5 }
 0x23c   : > { %v2047_v19 = vpop.f32.mrf.mxu3  ;;  %2757 = vmatmul.msk.bf16.gmra.mxu2 %vm702_vm4, %v3649_v30  ;;  %v1762_v48 = vpop.f32.mrf.mxu1  ;;  %v1710_v30 = vrot.slane %v4152_v1, 5 }
 0x23d   : > { %v2421_v50 = vadd.f32 %v2420_v9, %v2390_v3  ;;  %v2114_v6 = vadd.f32 %v2047_v19, %v1958_v55  ;;  %v1985_v9 = vshll.u32 %v3899_v12, 16  ;;  %v1826_v13 = vadd.f32 %v1762_v48, %v3653_v49 }
 0x23e   : > { %v1712_v15 = vrot.slane %v1710_v30, 4  ;;  %v1711_v3 = vsel %vm3234_vm7, %v2721_v41, %v1710_v30  ;;  %v2001_v30 = vshll.u32 %v263_v18, 16 }
 0x23f   : > { %v2254_v39 = vadd.f32 %v2187_v40, %v2114_v6  ;;  %v1894_v4 = vpop.f32.mrf.mxu2  ;;  %v1987_v19 = vrot.slane %v1985_v9, 5  ;;  %v1997_v6 = vrot.slane %v1995_v43, 4 }
 0x240   : > { %v1959_v62 = vadd.f32 %v1894_v4, %v1825_v21  ;;  %v2003_v9 = vrot.slane %v2001_v30, 5 }
 0x241   : > { %v2290_v34 = vadd.f32 %v3820_v42, %v2254_v39  ;;  %2774 = vmatmul.msk.bf16.gmra.mxu3 %vm702_vm4, %v3243_v53  ;;  %v1982_v53 = vshrl.u32 %v3899_v12, 16 }
 0x243   : > { %2322 = vst [vmem:[%s3830_s20 + $0x48] sm:$0xff] %v2290_v34  ;;  %v2353_v45 = vadd.f32 %v2352_v33, %v2290_v34  ;;  %v2391_v10 = vmul.f32 %v2290_v34, %v2290_v34  ;;  %v2190_v24 = vpop.f32.mrf.mxu0  ;;  %v1984_v40 = vrot.slane %v1982_v53, 4 }
 0x244   : > { %v2050_v32 = vpop.f32.mrf.mxu3  ;;  %v1765_v27 = vpop.f32.mrf.mxu1 }
 0x245   : > { %v2422_v38 = vadd.f32 %v2421_v50, %v2391_v10  ;;  %v2115_v25 = vadd.f32 %v2050_v32, %v1959_v62  ;;  %v1993_v50 = vrot.slane %v1991_v35, 5  ;;  %v1717_v62 = vunpack.c.l.b16 %v1711_v3 }
 0x246   : > { %2792 = vmatmul.msk.bf16.gmra.mxu0 %vm702_vm4, %v3672_v46  ;;  %v1827_v32 = vadd.f32 %v1765_v27, %v3670_v7 }
 0x247   : > { %v2255_v37 = vadd.f32 %v2190_v24, %v2115_v25  ;;  %v1896_v17 = vpop.f32.mrf.mxu2  ;;  %2737 = vmatmul.msk.bf16.gmra.mxu1 %vm702_vm4, %v3672_v46  ;;  %v1714_v46 = vsel %vm3234_vm7, %v1712_v15, %v1713_v44  ;;  %v1988_v24 = vor.u32 %v1987_v19, %v1984_v40  ;;  %v1998_v1 = vor.u32 %v1997_v6, %v1993_v50  ;;  %v2815_v6 = vld [vmem:[%s2904_s30 + $0xcc] sm:$0xff] }
 0x248   : > { %v1960_v33 = vadd.f32 %v1896_v17, %v1826_v13  ;;  %v1718_v10 = vunpack.c.l.b16 %v1714_v46  ;;  %v2140_v13 = vrot.slane %v3902_v57, 5  ;;  %v2143_v19 = vrot.slane %v263_v18, 5 }
 0x249   : > { %v2291_v55 = vadd.f32 %v3820_v42, %v2255_v37  ;;  %v1989_v53 = vrot.slane %v1988_v24, 4 }
 0x24a   : > { %v2142_v57 = vrot.slane %v2140_v13, 4 }
 0x24b   : > { %2323 = vst [vmem:[%s3830_s20 + $0x50] sm:$0xff] %v2291_v55  ;;  %v2354_v49 = vadd.f32 %v2353_v45, %v2291_v55  ;;  %v2392_v48 = vmul.f32 %v2291_v55, %v2291_v55  ;;  %v2192_v39 = vpop.f32.mrf.mxu0  ;;  %v2777_v55 = vrot.slane %v3899_v12, 9 }
 0x24c   : > { %v2052_v21 = vpop.f32.mrf.mxu3  ;;  %2758 = vmatmul.msk.bf16.gmra.mxu2 %vm702_vm4, %v3681_v54  ;;  %v1767_v11 = vpop.f32.mrf.mxu1  ;;  %v1719_v54 = vpack.c.b16 %v1718_v10, %v1717_v62 }
 0x24d   : > { %v2423_v4 = vadd.f32 %v2422_v38, %v2392_v48  ;;  %v2116_v34 = vadd.f32 %v2052_v21, %v1960_v33  ;;  %v1999_v38 = vrot.slane %v1998_v1, 4  ;;  %v1828_v3 = vadd.f32 %v1767_v11, %v3684_v28 }
 0x24e   : > { %v2141_v12 = vsel %vm3234_vm7, %v2777_v55, %v2140_v13  ;;  %v2144_v28 = vsel %vm3234_vm7, %v2142_v57, %v2143_v19 }
 0x24f   : > { %v2256_v45 = vadd.f32 %v2192_v39, %v2116_v34  ;;  %v1899_v25 = vpop.f32.mrf.mxu2  ;;  %v2004_v44 = vsel %vm2931_vm3, %v1999_v38, %v2003_v9  ;;  %v2147_v10 = vunpack.c.l.b16 %v2141_v12  ;;  %v2148_v24 = vunpack.c.l.b16 %v2144_v28 }
 0x250   : > { %v1961_v41 = vadd.f32 %v1899_v25, %v1827_v32  ;;  %v2008_v46 = vunpack.c.l.b16 %v2004_v44 }
 0x251   : > { %v2292_v60 = vadd.f32 %v3820_v42, %v2256_v45  ;;  %2775 = vmatmul.msk.bf16.gmra.mxu3 %vm702_vm4, %v3688_v22  ;;  %v1994_v22 = vsel %vm2931_vm3, %v1989_v53, %v1993_v50  ;;  %v2149_v25 = vpack.c.b16 %v2148_v24, %v2147_v10 }
 0x252   : > { %v2007_v39 = vunpack.c.l.b16 %v1994_v22 }
 0x253   : > { %2324 = vst [vmem:[%s3830_s20 + $0x58] sm:$0xff] %v2292_v60  ;;  %v2355_v35 = vadd.f32 %v2354_v49, %v2292_v60  ;;  %v2393_v43 = vmul.f32 %v2292_v60, %v2292_v60  ;;  %v2195_v37 = vpop.f32.mrf.mxu0 }
 0x254   : > { %v2055_v17 = vpop.f32.mrf.mxu3  ;;  %v1770_v7 = vpop.f32.mrf.mxu1  ;;  %v2009_v62 = vpack.c.b16 %v2008_v46, %v2007_v39 }
 0x255   : > { %v2424_v27 = vadd.f32 %v2423_v4, %v2393_v43  ;;  %v2117_v15 = vadd.f32 %v2055_v17, %v1961_v41  ;;  %v1829_v30 = vadd.f32 %v1770_v7, %v3695_v58 }
 0x256   : > { %2793 = vmatmul.msk.bf16.gmra.mxu0 %vm702_vm4, %v1719_v54 }
 0x257   : > { %v2257_v33 = vadd.f32 %v2195_v37, %v2117_v15  ;;  %v1901_v40 = vpop.f32.mrf.mxu2  ;;  %2738 = vmatmul.msk.bf16.gmra.mxu1 %vm702_vm4, %v1719_v54 }
 0x258   : > { %v1962_v48 = vadd.f32 %v1901_v40, %v1828_v3 }
 0x259   : > { %v2293_v49 = vadd.f32 %v3820_v42, %v2257_v33 }
 0x25b   : > { %2325 = vst [vmem:[%s3830_s20 + $0x60] sm:$0xff] %v2293_v49  ;;  %v2356_v50 = vadd.f32 %v2355_v35, %v2293_v49  ;;  %v2394_v36 = vmul.f32 %v2293_v49, %v2293_v49  ;;  %v2197_v21 = vpop.f32.mrf.mxu0 }
 0x25c   : > { %v2057_v11 = vpop.f32.mrf.mxu3  ;;  %2759 = vmatmul.msk.bf16.gmra.mxu2 %vm702_vm4, %v2815_v6  ;;  %v1772_v18 = vpop.f32.mrf.mxu1 }
 0x25d   : > { %v2425_v4 = vadd.f32 %v2424_v27, %v2394_v36  ;;  %v2118_v34 = vadd.f32 %v2057_v11, %v1962_v48  ;;  %v1830_v58 = vadd.f32 %v1772_v18, %v3700_v31 }
 0x25f   : > { %v2258_v1 = vadd.f32 %v2197_v21, %v2118_v34  ;;  %v1904_v45 = vpop.f32.mrf.mxu2 }
 0x260   : > { %v1963_v14 = vadd.f32 %v1904_v45, %v1829_v30 }
 0x261   : > { %v2294_v32 = vadd.f32 %v3820_v42, %v2258_v1  ;;  %2776 = vmatmul.msk.bf16.gmra.mxu3 %vm702_vm4, %v2009_v62 }
 0x263   : > { %2326 = vst [vmem:[%s3830_s20 + $0x68] sm:$0xff] %v2294_v32  ;;  %v2357_v60 = vadd.f32 %v2356_v50, %v2294_v32  ;;  %v2395_v41 = vmul.f32 %v2294_v32, %v2294_v32  ;;  %v2200_v54 = vpop.f32.mrf.mxu0 }
 0x264   : > { %v2060_v53 = vpop.f32.mrf.mxu3  ;;  %v1775_v38 = vpop.f32.mrf.mxu1 }
 0x265   : > { %v2426_v9 = vadd.f32 %v2425_v4, %v2395_v41  ;;  %v2119_v35 = vadd.f32 %v2060_v53, %v1963_v14  ;;  %v1831_v40 = vadd.f32 %v1775_v38, %v3709_v16 }
 0x266   : > { %2794 = vmatmul.msk.bf16.gmra.mxu0 %vm702_vm4, %v2149_v25 }
 0x267   : > { %v2259_v43 = vadd.f32 %v2200_v54, %v2119_v35  ;;  %v1906_v37 = vpop.f32.mrf.mxu2 }
 0x268   : > { %v1964_v17 = vadd.f32 %v1906_v37, %v1830_v58 }
 0x269   : > { %v2295_v13 = vadd.f32 %v3820_v42, %v2259_v43 }
 0x26b   : > { %2327 = vst [vmem:[%s3830_s20 + $0x70] sm:$0xff] %v2295_v13  ;;  %v2358_v7 = vadd.f32 %v2357_v60, %v2295_v13  ;;  %v2396_v27 = vmul.f32 %v2295_v13, %v2295_v13  ;;  %v2202_v15 = vpop.f32.mrf.mxu0 }
 0x26c   : > { %v2062_v22 = vpop.f32.mrf.mxu3  ;;  %v1777_v44 = vpop.f32.mrf.mxu1 }
 0x26d   : > { %v2427_v55 = vadd.f32 %v2426_v9, %v2396_v27  ;;  %v2120_v33 = vadd.f32 %v2062_v22, %v1964_v17  ;;  %v1832_v12 = vadd.f32 %v1777_v44, %v3714_v26 }
 0x26f   : > { %v2260_v3 = vadd.f32 %v2202_v15, %v2120_v33  ;;  %v1909_v57 = vpop.f32.mrf.mxu2 }
 0x270   : > { %v1965_v19 = vadd.f32 %v1909_v57, %v1831_v40 }
 0x271   : > { %v2296_v31 = vadd.f32 %v3820_v42, %v2260_v3 }
 0x273   : > { %2328 = vst [vmem:[%s3830_s20 + $0x78] sm:$0xff] %v2296_v31  ;;  %v2359_v6 = vadd.f32 %v2358_v7, %v2296_v31  ;;  %v2397_v49 = vmul.f32 %v2296_v31, %v2296_v31  ;;  %v2205_v48 = vpop.f32.mrf.mxu0 }
 0x274   : > { %v2065_v39 = vpop.f32.mrf.mxu3  ;;  %v1780_v46 = vpop.f32.mrf.mxu1 }
 0x275   : > { %v2428_v50 = vadd.f32 %v2427_v55, %v2397_v49  ;;  %v2121_v36 = vadd.f32 %v2065_v39, %v1965_v19  ;;  %v1833_v45 = vadd.f32 %v1780_v46, %v3723_v59 }
 0x277   : > { %v2261_v21 = vadd.f32 %v2205_v48, %v2121_v36  ;;  %v1911_v28 = vpop.f32.mrf.mxu2 }
 0x278   : > { %v1966_v11 = vadd.f32 %v1911_v28, %v1832_v12 }
 0x279   : > { %v2297_v16 = vadd.f32 %v3820_v42, %v2261_v21 }
 0x27b   : > { %2329 = vst [vmem:[%s3830_s20 + $0x80] sm:$0xff] %v2297_v16  ;;  %v2360_v18 = vadd.f32 %v2359_v6, %v2297_v16  ;;  %v2398_v4 = vmul.f32 %v2297_v16, %v2297_v16  ;;  %v2207_v34 = vpop.f32.mrf.mxu0 }
 0x27c   : > { %v2067_v62 = vpop.f32.mrf.mxu3  ;;  %v1782_v10 = vpop.f32.mrf.mxu1 }
 0x27d   : > { %v2429_v24 = vadd.f32 %v2428_v50, %v2398_v4  ;;  %v2122_v1 = vadd.f32 %v2067_v62, %v1966_v11  ;;  %v1834_v43 = vadd.f32 %v1782_v10, %v3728_v47 }
 0x27f   : > { %v2262_v30 = vadd.f32 %v2207_v34, %v2122_v1  ;;  %v1914_v32 = vpop.f32.mrf.mxu2 }
 0x280   : > { %v1967_v14 = vadd.f32 %v1914_v32, %v1833_v45 }
 0x281   : > { %v2298_v26 = vadd.f32 %v3820_v42, %v2262_v30 }
 0x283   : > { %2330 = vst [vmem:[%s3830_s20 + $0x88] sm:$0xff] %v2298_v26  ;;  %v2361_v25 = vadd.f32 %v2360_v18, %v2298_v26  ;;  %v2399_v60 = vmul.f32 %v2298_v26, %v2298_v26  ;;  %v2210_v41 = vpop.f32.mrf.mxu0 }
 0x284   : > { %v2070_v54 = vpop.f32.mrf.mxu3  ;;  %v1785_v53 = vpop.f32.mrf.mxu1 }
 0x285   : > { %v2430_v38 = vadd.f32 %v2429_v24, %v2399_v60  ;;  %v2123_v9 = vadd.f32 %v2070_v54, %v1967_v14  ;;  %v1835_v33 = vadd.f32 %v1785_v53, %v3737_v23 }
 0x287   : > { %v2263_v35 = vadd.f32 %v2210_v41, %v2123_v9  ;;  %v1916_v58 = vpop.f32.mrf.mxu2 }
 0x288   : > { %v1968_v37 = vadd.f32 %v1916_v58, %v1834_v43 }
 0x289   : > { %v2299_v59 = vadd.f32 %v3820_v42, %v2263_v35 }
 0x28b   : > { %2331 = vst [vmem:[%s3830_s20 + $0x90] sm:$0xff] %v2299_v59  ;;  %v2362_v13 = vadd.f32 %v2361_v25, %v2299_v59  ;;  %v2400_v17 = vmul.f32 %v2299_v59, %v2299_v59  ;;  %v2212_v7 = vpop.f32.mrf.mxu0 }
 0x28c   : > { %v2072_v27 = vpop.f32.mrf.mxu3  ;;  %v1787_v15 = vpop.f32.mrf.mxu1 }
 0x28d   : > { %v2431_v22 = vadd.f32 %v2430_v38, %v2400_v17  ;;  %v2124_v44 = vadd.f32 %v2072_v27, %v1968_v37  ;;  %v1836_v50 = vadd.f32 %v1787_v15, %v3742_v61 }
 0x28f   : > { %v2264_v55 = vadd.f32 %v2212_v7, %v2124_v44  ;;  %v1919_v3 = vpop.f32.mrf.mxu2 }
 0x290   : > { %v1969_v40 = vadd.f32 %v1919_v3, %v1835_v33 }
 0x291   : > { %v2300_v47 = vadd.f32 %v3820_v42, %v2264_v55 }
 0x293   : > { %2332 = vst [vmem:[%s3830_s20 + $0x98] sm:$0xff] %v2300_v47  ;;  %v2363_v57 = vadd.f32 %v2362_v13, %v2300_v47  ;;  %v2401_v31 = vmul.f32 %v2300_v47, %v2300_v47  ;;  %v2215_v19 = vpop.f32.mrf.mxu0 }
 0x294   : > { %v2075_v6 = vpop.f32.mrf.mxu3  ;;  %v1790_v49 = vpop.f32.mrf.mxu1 }
 0x295   : > { %v2432_v48 = vadd.f32 %v2431_v22, %v2401_v31  ;;  %v2125_v39 = vadd.f32 %v2075_v6, %v1969_v40  ;;  %v1837_v10 = vadd.f32 %v1790_v49, %v3751_v56 }
 0x297   : > { %v2265_v46 = vadd.f32 %v2215_v19, %v2125_v39  ;;  %v1921_v36 = vpop.f32.mrf.mxu2 }
 0x298   : > { %v1970_v21 = vadd.f32 %v1921_v36, %v1836_v50 }
 0x299   : > { %v2301_v23 = vadd.f32 %v3820_v42, %v2265_v46 }
 0x29b   : > { %2333 = vst [vmem:[%s3830_s20 + $0xa0] sm:$0xff] %v2301_v23  ;;  %v2364_v12 = vadd.f32 %v2363_v57, %v2301_v23  ;;  %v2402_v28 = vmul.f32 %v2301_v23, %v2301_v23  ;;  %v2217_v16 = vpop.f32.mrf.mxu0 }
 0x29c   : > { %v2077_v11 = vpop.f32.mrf.mxu3  ;;  %v1792_v18 = vpop.f32.mrf.mxu1 }
 0x29d   : > { %v2433_v4 = vadd.f32 %v2432_v48, %v2402_v28  ;;  %v2126_v34 = vadd.f32 %v2077_v11, %v1970_v21  ;;  %v1838_v54 = vadd.f32 %v1792_v18, %v3756_v0 }
 0x29f   : > { %v2266_v62 = vadd.f32 %v2217_v16, %v2126_v34  ;;  %v1924_v24 = vpop.f32.mrf.mxu2 }
 0x2a0   : > { %v1971_v1 = vadd.f32 %v1924_v24, %v1837_v10 }
 0x2a1   : > { %v2302_v61 = vadd.f32 %v3820_v42, %v2266_v62 }
 0x2a3   : > { %2334 = vst [vmem:[%s3830_s20 + $0xa8] sm:$0xff] %v2302_v61  ;;  %v2365_v30 = vadd.f32 %v2364_v12, %v2302_v61  ;;  %v2403_v45 = vmul.f32 %v2302_v61, %v2302_v61  ;;  %v2220_v32 = vpop.f32.mrf.mxu0 }
 0x2a4   : > { %v2080_v26 = vpop.f32.mrf.mxu3  ;;  %v1795_v14 = vpop.f32.mrf.mxu1 }
 0x2a5   : > { %v2434_v25 = vadd.f32 %v2433_v4, %v2403_v45  ;;  %v2127_v60 = vadd.f32 %v2080_v26, %v1971_v1  ;;  %v1839_v7 = vadd.f32 %v1795_v14, %v3765_v29 }
 0x2a7   : > { %v2267_v41 = vadd.f32 %v2220_v32, %v2127_v60  ;;  %v1926_v53 = vpop.f32.mrf.mxu2 }
 0x2a8   : > { %v1972_v38 = vadd.f32 %v1926_v53, %v1838_v54 }
 0x2a9   : > { %v2303_v56 = vadd.f32 %v3820_v42, %v2267_v41 }
 0x2ab   : > { %2335 = vst [vmem:[%s3830_s20 + $0xb0] sm:$0xff] %v2303_v56  ;;  %v2366_v9 = vadd.f32 %v2365_v30, %v2303_v56  ;;  %v2404_v35 = vmul.f32 %v2303_v56, %v2303_v56  ;;  %v2222_v43 = vpop.f32.mrf.mxu0 }
 0x2ac   : > { %v2082_v58 = vpop.f32.mrf.mxu3  ;;  %v1797_v59 = vpop.f32.mrf.mxu1 }
 0x2ad   : > { %v2435_v37 = vadd.f32 %v2434_v25, %v2404_v35  ;;  %v2128_v13 = vadd.f32 %v2082_v58, %v1972_v38  ;;  %v1840_v31 = vadd.f32 %v1797_v59, %v3770_v52 }
 0x2af   : > { %v2268_v17 = vadd.f32 %v2222_v43, %v2128_v13  ;;  %v1929_v27 = vpop.f32.mrf.mxu2 }
 0x2b0   : > { %v1973_v15 = vadd.f32 %v1929_v27, %v1839_v7 }
 0x2b1   : > { %v2304_v0 = vadd.f32 %v3820_v42, %v2268_v17 }
 0x2b3   : > { %2336 = vst [vmem:[%s3830_s20 + $0xb8] sm:$0xff] %v2304_v0  ;;  %v2367_v22 = vadd.f32 %v2366_v9, %v2304_v0  ;;  %v2405_v44 = vmul.f32 %v2304_v0, %v2304_v0  ;;  %v2225_v55 = vpop.f32.mrf.mxu0 }
 0x2b4   : > { %v2085_v33 = vpop.f32.mrf.mxu3  ;;  %v1800_v3 = vpop.f32.mrf.mxu1 }
 0x2b5   : > { %v2436_v47 = vadd.f32 %v2435_v37, %v2405_v44  ;;  %v2129_v40 = vadd.f32 %v2085_v33, %v1973_v15  ;;  %v1841_v12 = vadd.f32 %v1800_v3, %v3779_v20 }
 0x2b7   : > { %v2269_v57 = vadd.f32 %v2225_v55, %v2129_v40  ;;  %v1931_v19 = vpop.f32.mrf.mxu2 }
 0x2b8   : > { %v1974_v6 = vadd.f32 %v1931_v19, %v1840_v31 }
 0x2b9   : > { %v2305_v29 = vadd.f32 %v3820_v42, %v2269_v57 }
 0x2bb   : > { %2337 = vst [vmem:[%s3830_s20 + $0xc0] sm:$0xff] %v2305_v29  ;;  %v2368_v49 = vadd.f32 %v2367_v22, %v2305_v29  ;;  %v2406_v48 = vmul.f32 %v2305_v29, %v2305_v29  ;;  %v2227_v39 = vpop.f32.mrf.mxu0 }
 0x2bc   : > { %v2087_v46 = vpop.f32.mrf.mxu3  ;;  %v1802_v50 = vpop.f32.mrf.mxu1 }
 0x2bd   : > { %v2437_v36 = vadd.f32 %v2436_v47, %v2406_v48  ;;  %v2130_v23 = vadd.f32 %v2087_v46, %v1974_v6  ;;  %v1842_v1 = vadd.f32 %v1802_v50, %v3784_v8 }
 0x2bf   : > { %v2270_v21 = vadd.f32 %v2227_v39, %v2130_v23  ;;  %v1934_v28 = vpop.f32.mrf.mxu2 }
 0x2c0   : > { %v1975_v16 = vadd.f32 %v1934_v28, %v1841_v12 }
 0x2c1   : > { %v2306_v52 = vadd.f32 %v3820_v42, %v2270_v21 }
 0x2c3   : > { %2338 = vst [vmem:[%s3830_s20 + $0xc8] sm:$0xff] %v2306_v52  ;;  %v2369_v11 = vadd.f32 %v2368_v49, %v2306_v52  ;;  %v2407_v18 = vmul.f32 %v2306_v52, %v2306_v52  ;;  %v2230_v4 = vpop.f32.mrf.mxu0 }
 0x2c4   : > { %v2090_v34 = vpop.f32.mrf.mxu3  ;;  %v1805_v24 = vpop.f32.mrf.mxu1 }
 0x2c5   : > { %v2438_v62 = vadd.f32 %v2437_v36, %v2407_v18  ;;  %v2131_v10 = vadd.f32 %v2090_v34, %v1975_v16  ;;  %v1843_v53 = vadd.f32 %v1805_v24, %v3793_v51 }
 0x2c7   : > { %v2271_v61 = vadd.f32 %v2230_v4, %v2131_v10  ;;  %v1936_v30 = vpop.f32.mrf.mxu2 }
 0x2c8   : > { %v1976_v45 = vadd.f32 %v1936_v30, %v1842_v1 }
 0x2c9   : > { %v2307_v20 = vadd.f32 %v3820_v42, %v2271_v61 }
 0x2cb   : > { %2339 = vst [vmem:[%s3830_s20 + $0xd0] sm:$0xff] %v2307_v20  ;;  %v2370_v32 = vadd.f32 %v2369_v11, %v2307_v20  ;;  %v2408_v26 = vmul.f32 %v2307_v20, %v2307_v20  ;;  %v2232_v14 = vpop.f32.mrf.mxu0  ;;  %v2451_v20 = vlaneseq }
 0x2cc   : > { %v2092_v25 = vpop.f32.mrf.mxu3  ;;  %v1807_v38 = vpop.f32.mrf.mxu1 }
 0x2cd   : > { %v2439_v60 = vadd.f32 %v2438_v62, %v2408_v26  ;;  %v2132_v41 = vadd.f32 %v2092_v25, %v1976_v45  ;;  %v1844_v7 = vadd.f32 %v1807_v38, %v3798_v63  ;;  %v2452_v25 = vshrl.u32 %v2451_v20, 7 }
 0x2cf   : > { %v2272_v54 = vadd.f32 %v2232_v14, %v2132_v41  ;;  %v1939_v56 = vpop.f32.mrf.mxu2  ;;  %vm2454_vm8 = vcmp.eq.s32.totalorder %v2452_v25, 1  ;;  %vm2453_vm9 = vcmp.eq.s32.totalorder %v2452_v25, 0 }
 0x2d0   : > { %v1977_v9 = vadd.f32 %v1939_v56, %v1843_v53 }
 0x2d1   : > { %v2308_v8 = vadd.f32 %v3820_v42, %v2272_v54 }
 0x2d3   : > { %2340 = vst [vmem:[%s3830_s20 + $0xd8] sm:$0xff] %v2308_v8  ;;  %v2371_v35 = vadd.f32 %v2370_v32, %v2308_v8  ;;  %v2409_v43 = vmul.f32 %v2308_v8, %v2308_v8  ;;  %v2235_v58 = vpop.f32.mrf.mxu0 }
 0x2d4   : > { %v2095_v59 = vpop.f32.mrf.mxu3  ;;  %v1810_v15 = vpop.f32.mrf.mxu1 }
 0x2d5   : > { %v2440_v37 = vadd.f32 %v2439_v60, %v2409_v43  ;;  %v2133_v13 = vadd.f32 %v2095_v59, %v1977_v9  ;;  %v1845_v57 = vadd.f32 %v1810_v15, %v3807_v2 }
 0x2d7   : > { %v2273_v17 = vadd.f32 %v2235_v58, %v2133_v13  ;;  %v1941_v27 = vpop.f32.mrf.mxu2 }
 0x2d8   : > { %v1978_v0 = vadd.f32 %v1941_v27, %v1844_v7 }
 0x2d9   : > { %v2309_v51 = vadd.f32 %v3820_v42, %v2273_v17 }
 0x2db   : > { %2341 = vst [vmem:[%s3830_s20 + $0xe0] sm:$0xff] %v2309_v51  ;;  %v2372_v22 = vadd.f32 %v2371_v35, %v2309_v51  ;;  %v2410_v44 = vmul.f32 %v2309_v51, %v2309_v51  ;;  %v2237_v55 = vpop.f32.mrf.mxu0 }
 0x2dc   : > { %v2097_v33 = vpop.f32.mrf.mxu3  ;;  %v1812_v49 = vpop.f32.mrf.mxu1 }
 0x2dd   : > { %v2441_v3 = vadd.f32 %v2440_v37, %v2410_v44  ;;  %v2134_v47 = vadd.f32 %v2097_v33, %v1978_v0  ;;  %v1846_v23 = vadd.f32 %v1812_v49, %v3812_v5 }
 0x2df   : > { %v2274_v40 = vadd.f32 %v2237_v55, %v2134_v47  ;;  %v1944_v31 = vpop.f32.mrf.mxu2 }
 0x2e0   : > { %v1979_v19 = vadd.f32 %v1944_v31, %v1845_v57 }
 0x2e1   : > { %v2310_v63 = vadd.f32 %v3820_v42, %v2274_v40 }
 0x2e3   : > { %2342 = vst [vmem:[%s3830_s20 + $0xe8] sm:$0xff] %v2310_v63  ;;  %v2373_v29 = vadd.f32 %v2372_v22, %v2310_v63  ;;  %v2411_v6 = vmul.f32 %v2310_v63, %v2310_v63  ;;  %v2240_v48 = vpop.f32.mrf.mxu0 }
 0x2e4   : > { %v2100_v39 = vpop.f32.mrf.mxu3 }
 0x2e5   : > { %v2442_v46 = vadd.f32 %v2441_v3, %v2411_v6  ;;  %v2135_v50 = vadd.f32 %v2100_v39, %v1979_v19 }
 0x2e7   : > { %v2275_v36 = vadd.f32 %v2240_v48, %v2135_v50  ;;  %v1946_v21 = vpop.f32.mrf.mxu2 }
 0x2e8   : > { %v1980_v12 = vadd.f32 %v1946_v21, %v1846_v23 }
 0x2e9   : > { %v2311_v2 = vadd.f32 %v3820_v42, %v2275_v36 }
 0x2eb   : > { %2343 = vst [vmem:[%s3830_s20 + $0xf0] sm:$0xff] %v2311_v2  ;;  %v2374_v28 = vadd.f32 %v2373_v29, %v2311_v2  ;;  %v2412_v52 = vmul.f32 %v2311_v2, %v2311_v2  ;;  %v2242_v4 = vpop.f32.mrf.mxu0 }
 0x2ec   : > { %v2102_v16 = vpop.f32.mrf.mxu3 }
 0x2ed   : > { %v2443_v11 = vadd.f32 %v2442_v46, %v2412_v52  ;;  %v2136_v18 = vadd.f32 %v2102_v16, %v1980_v12 }
 0x2ef   : > { %v2276_v34 = vadd.f32 %v2242_v4, %v2136_v18 }
 0x2f1   : > { %v2312_v62 = vadd.f32 %v3820_v42, %v2276_v34 }
 0x2f3   : > { %2344 = vst [vmem:[%s3830_s20 + $0xf8] sm:$0xff] %v2312_v62  ;;  %v2375_v10 = vadd.f32 %v2374_v28, %v2312_v62  ;;  %v2413_v24 = vmul.f32 %v2312_v62, %v2312_v62 }
 0x2f5   : > { %v2376_v61 = vrot.slane %v2375_v10, 4  ;;  %v2444_v5 = vadd.f32 %v2443_v11, %v2413_v24 }
 0x2f7   : > { %v2377_v1 = vadd.f32 %v2376_v61, %v2375_v10  ;;  %v2445_v30 = vrot.slane %v2444_v5, 4 }
 0x2f9   : > { %v2378_v45 = vrot.slane %v2377_v1, 2  ;;  %v2446_v32 = vadd.f32 %v2445_v30, %v2444_v5 }
 0x2fb   : > { %v2379_v26 = vadd.f32 %v2378_v45, %v2377_v1  ;;  %v2447_v14 = vrot.slane %v2446_v32, 2 }
 0x2fd   : > { %v2448_v60 = vadd.f32 %v2447_v14, %v2446_v32  ;;  %v2380_v41 = vrot.slane %v2379_v26, 1 }
 0x2ff   : > { %v2449_v54 = vrot.slane %v2448_v60, 1  ;;  %v2381_v53 = vadd.f32 %v2380_v41, %v2379_v26 }
 0x301   : > { %v2450_v42 = vadd.f32 %v2449_v54, %v2448_v60 }
 0x303   : > { %v2455_v56 = vsel %vm2454_vm8, %v2450_v42, 0.0 }
 0x304   : > { %v2456_v38 = vsel %vm2453_vm9, %v2381_v53, %v2455_v56 }
 0x305   : > { %2457 = vst [vmem:[%s208_s24] sm:$0xff] %v2456_v38 }
 0x306 PF: > { %s15_s15 = sadd.s32 1, %s2843_s15  }
 0x307   : > { %p12_p4 = scmp.ge.s32.totalorder %s15_s15, 4  }
 0x309   :  { %14 = sbr.rel (!%p12_p4) target bundleno = 1 (0x1), region = 82 }

// kernel: inconv_forward_nchw.7
= control target key start
LH: loop header
LB: loop body
LE: loop exit
PB: predicated region body
PF: predicated region fallthrough
CT: control target
= control target key end

     0   :  { %s893_s0 = inlined_call_operand.vmem [shape: f32[512,128], index: 0, kind: input, shape index: {}]   ;;  %s894_s1 = inlined_call_operand.vmem [shape: f32[1,128], index: 1, kind: input, shape index: {}]   ;;  %s895_s2 = inlined_call_operand.vmem [shape: f32[1,128], index: 2, kind: input, shape index: {}]   ;;  %s896_s3 = inlined_call_operand.vmem [shape: f32[512,128], index: 3, kind: output, shape index: {}]  }
   0x1   :  { %v14_v0 = vld [vmem:[%s893_s0] sm:$0xff]  ;;  %v15_v3 = vld [vmem:[%s893_s0 + $0x8] sm:$0xff]  ;;  %v16_v6 = vld [vmem:[%s893_s0 + $0x10] sm:$0xff] }
   0x2   :  { %v374_v1 = vld [vmem:[%s894_s1] ss:$0 sm:$0xff]  ;;  %v17_v7 = vld [vmem:[%s893_s0 + $0x18] sm:$0xff]  ;;  %v19_v12 = vld [vmem:[%s893_s0 + $0x28] sm:$0xff] }
   0x3   :  { %v379_v2 = vld [vmem:[%s895_s2] ss:$0 sm:$0xff]  ;;  %v82_v4 = vmul.f32 %v374_v1, %v14_v0  ;;  %v83_v5 = vmul.f32 %v374_v1, %v15_v3  ;;  %v84_v9 = vmul.f32 %v374_v1, %v16_v6  ;;  %v85_v10 = vmul.f32 %v374_v1, %v17_v7  ;;  %v20_v13 = vld [vmem:[%s893_s0 + $0x30] sm:$0xff]  ;;  %v21_v14 = vld [vmem:[%s893_s0 + $0x38] sm:$0xff] }
   0x4   :  { %v18_v8 = vld [vmem:[%s893_s0 + $0x20] sm:$0xff]  ;;  %v87_v17 = vmul.f32 %v374_v1, %v19_v12  ;;  %v88_v18 = vmul.f32 %v374_v1, %v20_v13  ;;  %v89_v22 = vmul.f32 %v374_v1, %v21_v14  ;;  %v23_v24 = vld [vmem:[%s893_s0 + $0x48] sm:$0xff]  ;;  %v24_v29 = vld [vmem:[%s893_s0 + $0x50] sm:$0xff] }
   0x5   :  { %v86_v11 = vmul.f32 %v374_v1, %v18_v8  ;;  %v150_v15 = vadd.f32 %v379_v2, %v82_v4  ;;  %v151_v16 = vadd.f32 %v379_v2, %v83_v5  ;;  %v152_v19 = vadd.f32 %v379_v2, %v84_v9  ;;  %v22_v23 = vld [vmem:[%s893_s0 + $0x40] sm:$0xff]  ;;  %v25_v30 = vld [vmem:[%s893_s0 + $0x58] sm:$0xff]  ;;  %v27_v35 = vld [vmem:[%s893_s0 + $0x68] sm:$0xff] }
   0x6   :  { %v153_v20 = vadd.f32 %v379_v2, %v85_v10  ;;  %v155_v27 = vadd.f32 %v379_v2, %v87_v17  ;;  %v156_v28 = vadd.f32 %v379_v2, %v88_v18  ;;  %v26_v31 = vld [vmem:[%s893_s0 + $0x60] sm:$0xff]  ;;  %v157_v34 = vadd.f32 %v379_v2, %v89_v22  ;;  %v28_v36 = vld [vmem:[%s893_s0 + $0x70] sm:$0xff]  ;;  %v29_v41 = vld [vmem:[%s893_s0 + $0x78] sm:$0xff] }
   0x7   :  { %v154_v21 = vadd.f32 %v379_v2, %v86_v11  ;;  %v214_v25 = vmax.f32 %v150_v15, 0.0  ;;  %v215_v26 = vmax.f32 %v151_v16, 0.0  ;;  %v216_v32 = vmax.f32 %v152_v19, 0.0  ;;  %v30_v54 = vld [vmem:[%s893_s0 + $0x80] sm:$0xff]  ;;  %v31_v55 = vld [vmem:[%s893_s0 + $0x88] sm:$0xff]  ;;  %v32_v58 = vld [vmem:[%s893_s0 + $0x90] sm:$0xff] }
   0x8   :  { %v217_v33 = vmax.f32 %v153_v20, 0.0  ;;  %v219_v38 = vmax.f32 %v155_v27, 0.0  ;;  %v90_v39 = vmul.f32 %v374_v1, %v22_v23  ;;  %v91_v40 = vmul.f32 %v374_v1, %v23_v24  ;;  %v33_v59 = vld [vmem:[%s893_s0 + $0x98] sm:$0xff]  ;;  %v34_v62 = vld [vmem:[%s893_s0 + $0xa0] sm:$0xff]  ;;  %v35_v5 = vld [vmem:[%s893_s0 + $0xa8] sm:$0xff] }
   0x9   :  { %278 = vst [vmem:[%s896_s3] sm:$0xff] %v214_v25  ;;  %v218_v37 = vmax.f32 %v154_v21, 0.0  ;;  %v220_v42 = vmax.f32 %v156_v28, 0.0  ;;  %v92_v43 = vmul.f32 %v374_v1, %v24_v29  ;;  %v93_v44 = vmul.f32 %v374_v1, %v25_v30  ;;  %v36_v10 = vld [vmem:[%s893_s0 + $0xb0] sm:$0xff]  ;;  %v37_v14 = vld [vmem:[%s893_s0 + $0xb8] sm:$0xff]  ;;  %v38_v18 = vld [vmem:[%s893_s0 + $0xc0] sm:$0xff] }
   0xa   :  { %279 = vst [vmem:[%s896_s3 + $0x8] sm:$0xff] %v215_v26  ;;  %v94_v45 = vmul.f32 %v374_v1, %v26_v31  ;;  %v158_v46 = vadd.f32 %v379_v2, %v90_v39  ;;  %v159_v47 = vadd.f32 %v379_v2, %v91_v40  ;;  %v95_v48 = vmul.f32 %v374_v1, %v27_v35  ;;  %v39_v22 = vld [vmem:[%s893_s0 + $0xc8] sm:$0xff]  ;;  %v40_v26 = vld [vmem:[%s893_s0 + $0xd0] sm:$0xff]  ;;  %v41_v30 = vld [vmem:[%s893_s0 + $0xd8] sm:$0xff] }
   0xb   :  { %280 = vst [vmem:[%s896_s3 + $0x10] sm:$0xff] %v216_v32  ;;  %v96_v49 = vmul.f32 %v374_v1, %v28_v36  ;;  %v221_v50 = vmax.f32 %v157_v34, 0.0  ;;  %v160_v51 = vadd.f32 %v379_v2, %v92_v43  ;;  %v161_v52 = vadd.f32 %v379_v2, %v93_v44  ;;  %v42_v34 = vld [vmem:[%s893_s0 + $0xe0] sm:$0xff] }
   0xc   :  { %281 = vst [vmem:[%s896_s3 + $0x18] sm:$0xff] %v217_v33  ;;  %v97_v53 = vmul.f32 %v374_v1, %v29_v41  ;;  %v222_v56 = vmax.f32 %v158_v46, 0.0  ;;  %v162_v57 = vadd.f32 %v379_v2, %v94_v45  ;;  %v223_v60 = vmax.f32 %v159_v47, 0.0  ;;  %v45_v46 = vld [vmem:[%s893_s0 + $0xf8] sm:$0xff] }
   0xd   :  { %282 = vst [vmem:[%s896_s3 + $0x20] sm:$0xff] %v218_v37  ;;  %v163_v61 = vadd.f32 %v379_v2, %v95_v48  ;;  %v224_v63 = vmax.f32 %v160_v51, 0.0  ;;  %v164_v0 = vadd.f32 %v379_v2, %v96_v49  ;;  %v98_v3 = vmul.f32 %v374_v1, %v30_v54  ;;  %v47_v54 = vld [vmem:[%s893_s0 + $0x108] sm:$0xff] }
   0xe   :  { %283 = vst [vmem:[%s896_s3 + $0x28] sm:$0xff] %v219_v38  ;;  %v99_v4 = vmul.f32 %v374_v1, %v31_v55  ;;  %v225_v6 = vmax.f32 %v161_v52, 0.0  ;;  %v165_v7 = vadd.f32 %v379_v2, %v97_v53  ;;  %v100_v8 = vmul.f32 %v374_v1, %v32_v58  ;;  %v43_v38 = vld [vmem:[%s893_s0 + $0xe8] sm:$0xff]  ;;  %v48_v58 = vld [vmem:[%s893_s0 + $0x110] sm:$0xff] }
   0xf   :  { %284 = vst [vmem:[%s896_s3 + $0x30] sm:$0xff] %v220_v42  ;;  %v101_v9 = vmul.f32 %v374_v1, %v33_v59  ;;  %v226_v11 = vmax.f32 %v162_v57, 0.0  ;;  %v166_v12 = vadd.f32 %v379_v2, %v98_v3  ;;  %v102_v13 = vmul.f32 %v374_v1, %v34_v62  ;;  %v44_v42 = vld [vmem:[%s893_s0 + $0xf0] sm:$0xff]  ;;  %v49_v62 = vld [vmem:[%s893_s0 + $0x118] sm:$0xff] }
  0x10   :  { %285 = vst [vmem:[%s896_s3 + $0x38] sm:$0xff] %v221_v50  ;;  %v227_v15 = vmax.f32 %v163_v61, 0.0  ;;  %v167_v16 = vadd.f32 %v379_v2, %v99_v4  ;;  %v103_v17 = vmul.f32 %v374_v1, %v35_v5  ;;  %v228_v19 = vmax.f32 %v164_v0, 0.0  ;;  %v46_v50 = vld [vmem:[%s893_s0 + $0x100] sm:$0xff] }
  0x11   :  { %286 = vst [vmem:[%s896_s3 + $0x40] sm:$0xff] %v222_v56  ;;  %v168_v20 = vadd.f32 %v379_v2, %v100_v8  ;;  %v104_v21 = vmul.f32 %v374_v1, %v36_v10  ;;  %v229_v23 = vmax.f32 %v165_v7, 0.0  ;;  %v169_v24 = vadd.f32 %v379_v2, %v101_v9  ;;  %v50_v4 = vld [vmem:[%s893_s0 + $0x120] sm:$0xff]  ;;  %v51_v8 = vld [vmem:[%s893_s0 + $0x128] sm:$0xff] }
  0x12   :  { %287 = vst [vmem:[%s896_s3 + $0x48] sm:$0xff] %v223_v60  ;;  %v105_v25 = vmul.f32 %v374_v1, %v37_v14  ;;  %v230_v27 = vmax.f32 %v166_v12, 0.0  ;;  %v170_v28 = vadd.f32 %v379_v2, %v102_v13  ;;  %v106_v29 = vmul.f32 %v374_v1, %v38_v18  ;;  %v52_v12 = vld [vmem:[%s893_s0 + $0x130] sm:$0xff] }
  0x13   :  { %288 = vst [vmem:[%s896_s3 + $0x50] sm:$0xff] %v224_v63  ;;  %v231_v31 = vmax.f32 %v167_v16, 0.0  ;;  %v171_v32 = vadd.f32 %v379_v2, %v103_v17  ;;  %v107_v33 = vmul.f32 %v374_v1, %v39_v22  ;;  %v232_v35 = vmax.f32 %v168_v20, 0.0  ;;  %v53_v16 = vld [vmem:[%s893_s0 + $0x138] sm:$0xff]  ;;  %v54_v20 = vld [vmem:[%s893_s0 + $0x140] sm:$0xff] }
  0x14   :  { %289 = vst [vmem:[%s896_s3 + $0x58] sm:$0xff] %v225_v6  ;;  %v172_v36 = vadd.f32 %v379_v2, %v104_v21  ;;  %v108_v37 = vmul.f32 %v374_v1, %v40_v26  ;;  %v233_v39 = vmax.f32 %v169_v24, 0.0  ;;  %v173_v40 = vadd.f32 %v379_v2, %v105_v25  ;;  %v55_v24 = vld [vmem:[%s893_s0 + $0x148] sm:$0xff] }
  0x15   :  { %290 = vst [vmem:[%s896_s3 + $0x60] sm:$0xff] %v226_v11  ;;  %v109_v41 = vmul.f32 %v374_v1, %v41_v30  ;;  %v234_v43 = vmax.f32 %v170_v28, 0.0  ;;  %v174_v44 = vadd.f32 %v379_v2, %v106_v29  ;;  %v110_v45 = vmul.f32 %v374_v1, %v42_v34  ;;  %v56_v28 = vld [vmem:[%s893_s0 + $0x150] sm:$0xff] }
  0x16   :  { %291 = vst [vmem:[%s896_s3 + $0x68] sm:$0xff] %v227_v15  ;;  %v235_v47 = vmax.f32 %v171_v32, 0.0  ;;  %v175_v48 = vadd.f32 %v379_v2, %v107_v33  ;;  %v111_v49 = vmul.f32 %v374_v1, %v43_v38  ;;  %v236_v51 = vmax.f32 %v172_v36, 0.0  ;;  %v57_v32 = vld [vmem:[%s893_s0 + $0x158] sm:$0xff]  ;;  %v58_v36 = vld [vmem:[%s893_s0 + $0x160] sm:$0xff] }
  0x17   :  { %292 = vst [vmem:[%s896_s3 + $0x70] sm:$0xff] %v228_v19  ;;  %v176_v52 = vadd.f32 %v379_v2, %v108_v37  ;;  %v112_v53 = vmul.f32 %v374_v1, %v44_v42  ;;  %v237_v55 = vmax.f32 %v173_v40, 0.0  ;;  %v177_v56 = vadd.f32 %v379_v2, %v109_v41  ;;  %v59_v40 = vld [vmem:[%s893_s0 + $0x168] sm:$0xff] }
  0x18   :  { %293 = vst [vmem:[%s896_s3 + $0x78] sm:$0xff] %v229_v23  ;;  %v113_v57 = vmul.f32 %v374_v1, %v45_v46  ;;  %v238_v59 = vmax.f32 %v174_v44, 0.0  ;;  %v178_v60 = vadd.f32 %v379_v2, %v110_v45  ;;  %v114_v61 = vmul.f32 %v374_v1, %v46_v50  ;;  %v60_v44 = vld [vmem:[%s893_s0 + $0x170] sm:$0xff] }
  0x19   :  { %294 = vst [vmem:[%s896_s3 + $0x80] sm:$0xff] %v230_v27  ;;  %v239_v63 = vmax.f32 %v175_v48, 0.0  ;;  %v179_v0 = vadd.f32 %v379_v2, %v111_v49  ;;  %v115_v3 = vmul.f32 %v374_v1, %v47_v54  ;;  %v240_v5 = vmax.f32 %v176_v52, 0.0  ;;  %v61_v48 = vld [vmem:[%s893_s0 + $0x178] sm:$0xff]  ;;  %v62_v52 = vld [vmem:[%s893_s0 + $0x180] sm:$0xff] }
  0x1a   :  { %295 = vst [vmem:[%s896_s3 + $0x88] sm:$0xff] %v231_v31  ;;  %v180_v6 = vadd.f32 %v379_v2, %v112_v53  ;;  %v116_v7 = vmul.f32 %v374_v1, %v48_v58  ;;  %v241_v9 = vmax.f32 %v177_v56, 0.0  ;;  %v181_v10 = vadd.f32 %v379_v2, %v113_v57  ;;  %v63_v56 = vld [vmem:[%s893_s0 + $0x188] sm:$0xff] }
  0x1b   :  { %296 = vst [vmem:[%s896_s3 + $0x90] sm:$0xff] %v232_v35  ;;  %v117_v11 = vmul.f32 %v374_v1, %v49_v62  ;;  %v242_v13 = vmax.f32 %v178_v60, 0.0  ;;  %v182_v14 = vadd.f32 %v379_v2, %v114_v61  ;;  %v118_v15 = vmul.f32 %v374_v1, %v50_v4  ;;  %v64_v60 = vld [vmem:[%s893_s0 + $0x190] sm:$0xff] }
  0x1c   :  { %297 = vst [vmem:[%s896_s3 + $0x98] sm:$0xff] %v233_v39  ;;  %v243_v17 = vmax.f32 %v179_v0, 0.0  ;;  %v183_v18 = vadd.f32 %v379_v2, %v115_v3  ;;  %v119_v19 = vmul.f32 %v374_v1, %v51_v8  ;;  %v244_v21 = vmax.f32 %v180_v6, 0.0  ;;  %v65_v0 = vld [vmem:[%s893_s0 + $0x198] sm:$0xff] }
  0x1d   :  { %298 = vst [vmem:[%s896_s3 + $0xa0] sm:$0xff] %v234_v43  ;;  %v184_v22 = vadd.f32 %v379_v2, %v116_v7  ;;  %v120_v23 = vmul.f32 %v374_v1, %v52_v12  ;;  %v245_v25 = vmax.f32 %v181_v10, 0.0  ;;  %v185_v26 = vadd.f32 %v379_v2, %v117_v11  ;;  %v77_v3 = vld [vmem:[%s893_s0 + $0x1f8] sm:$0xff]  ;;  %v66_v7 = vld [vmem:[%s893_s0 + $0x1a0] sm:$0xff]  ;;  %v67_v11 = vld [vmem:[%s893_s0 + $0x1a8] sm:$0xff] }
  0x1e   :  { %299 = vst [vmem:[%s896_s3 + $0xa8] sm:$0xff] %v235_v47  ;;  %v121_v27 = vmul.f32 %v374_v1, %v53_v16  ;;  %v246_v29 = vmax.f32 %v182_v14, 0.0  ;;  %v186_v30 = vadd.f32 %v379_v2, %v118_v15  ;;  %v122_v31 = vmul.f32 %v374_v1, %v54_v20  ;;  %v68_v15 = vld [vmem:[%s893_s0 + $0x1b0] sm:$0xff]  ;;  %v69_v20 = vld [vmem:[%s893_s0 + $0x1b8] sm:$0xff] }
  0x1f   :  { %300 = vst [vmem:[%s896_s3 + $0xb0] sm:$0xff] %v236_v51  ;;  %v247_v33 = vmax.f32 %v183_v18, 0.0  ;;  %v187_v34 = vadd.f32 %v379_v2, %v119_v19  ;;  %v123_v35 = vmul.f32 %v374_v1, %v55_v24  ;;  %v248_v37 = vmax.f32 %v184_v22, 0.0  ;;  %v70_v24 = vld [vmem:[%s893_s0 + $0x1c0] sm:$0xff] }
  0x20   :  { %301 = vst [vmem:[%s896_s3 + $0xb8] sm:$0xff] %v237_v55  ;;  %v188_v38 = vadd.f32 %v379_v2, %v120_v23  ;;  %v124_v39 = vmul.f32 %v374_v1, %v56_v28  ;;  %v249_v41 = vmax.f32 %v185_v26, 0.0  ;;  %v189_v42 = vadd.f32 %v379_v2, %v121_v27 }
  0x21   :  { %302 = vst [vmem:[%s896_s3 + $0xc0] sm:$0xff] %v238_v59  ;;  %v125_v43 = vmul.f32 %v374_v1, %v57_v32  ;;  %v250_v45 = vmax.f32 %v186_v30, 0.0  ;;  %v190_v46 = vadd.f32 %v379_v2, %v122_v31  ;;  %v126_v47 = vmul.f32 %v374_v1, %v58_v36 }
  0x22   :  { %303 = vst [vmem:[%s896_s3 + $0xc8] sm:$0xff] %v239_v63  ;;  %v251_v49 = vmax.f32 %v187_v34, 0.0  ;;  %v191_v50 = vadd.f32 %v379_v2, %v123_v35  ;;  %v127_v51 = vmul.f32 %v374_v1, %v59_v40  ;;  %v252_v53 = vmax.f32 %v188_v38, 0.0 }
  0x23   :  { %304 = vst [vmem:[%s896_s3 + $0xd0] sm:$0xff] %v240_v5  ;;  %v192_v54 = vadd.f32 %v379_v2, %v124_v39  ;;  %v128_v55 = vmul.f32 %v374_v1, %v60_v44  ;;  %v253_v57 = vmax.f32 %v189_v42, 0.0  ;;  %v193_v58 = vadd.f32 %v379_v2, %v125_v43 }
  0x24   :  { %305 = vst [vmem:[%s896_s3 + $0xd8] sm:$0xff] %v241_v9  ;;  %v129_v59 = vmul.f32 %v374_v1, %v61_v48  ;;  %v254_v61 = vmax.f32 %v190_v46, 0.0  ;;  %v194_v62 = vadd.f32 %v379_v2, %v126_v47  ;;  %v130_v63 = vmul.f32 %v374_v1, %v62_v52 }
  0x25   :  { %306 = vst [vmem:[%s896_s3 + $0xe0] sm:$0xff] %v242_v13  ;;  %v255_v4 = vmax.f32 %v191_v50, 0.0  ;;  %v195_v5 = vadd.f32 %v379_v2, %v127_v51  ;;  %v131_v6 = vmul.f32 %v374_v1, %v63_v56  ;;  %v256_v8 = vmax.f32 %v192_v54, 0.0 }
  0x26   :  { %307 = vst [vmem:[%s896_s3 + $0xe8] sm:$0xff] %v243_v17  ;;  %v196_v9 = vadd.f32 %v379_v2, %v128_v55  ;;  %v132_v10 = vmul.f32 %v374_v1, %v64_v60  ;;  %v257_v12 = vmax.f32 %v193_v58, 0.0  ;;  %v197_v13 = vadd.f32 %v379_v2, %v129_v59 }
  0x27   :  { %308 = vst [vmem:[%s896_s3 + $0xf0] sm:$0xff] %v244_v21  ;;  %v133_v14 = vmul.f32 %v374_v1, %v65_v0  ;;  %v145_v16 = vmul.f32 %v374_v1, %v77_v3  ;;  %v258_v17 = vmax.f32 %v194_v62, 0.0  ;;  %v198_v18 = vadd.f32 %v379_v2, %v130_v63 }
  0x28   :  { %309 = vst [vmem:[%s896_s3 + $0xf8] sm:$0xff] %v245_v25  ;;  %v134_v19 = vmul.f32 %v374_v1, %v66_v7  ;;  %v259_v21 = vmax.f32 %v195_v5, 0.0  ;;  %v199_v22 = vadd.f32 %v379_v2, %v131_v6  ;;  %v135_v23 = vmul.f32 %v374_v1, %v67_v11 }
  0x29   :  { %310 = vst [vmem:[%s896_s3 + $0x100] sm:$0xff] %v246_v29  ;;  %v784_v25 = vadd.f32 %v379_v2, %v145_v16  ;;  %v260_v26 = vmax.f32 %v196_v9, 0.0  ;;  %v200_v27 = vadd.f32 %v379_v2, %v132_v10  ;;  %v136_v28 = vmul.f32 %v374_v1, %v68_v15  ;;  %v71_v29 = vld [vmem:[%s893_s0 + $0x1c8] sm:$0xff] }
  0x2a   :  { %311 = vst [vmem:[%s896_s3 + $0x108] sm:$0xff] %v247_v33  ;;  %v261_v30 = vmax.f32 %v197_v13, 0.0  ;;  %v201_v31 = vadd.f32 %v379_v2, %v133_v14  ;;  %v137_v32 = vmul.f32 %v374_v1, %v69_v20  ;;  %v72_v33 = vld [vmem:[%s893_s0 + $0x1d0] sm:$0xff]  ;;  %v262_v34 = vmax.f32 %v198_v18, 0.0 }
  0x2b   :  { %312 = vst [vmem:[%s896_s3 + $0x110] sm:$0xff] %v248_v37  ;;  %v202_v35 = vadd.f32 %v379_v2, %v134_v19  ;;  %v138_v36 = vmul.f32 %v374_v1, %v70_v24  ;;  %v73_v37 = vld [vmem:[%s893_s0 + $0x1d8] sm:$0xff]  ;;  %v263_v38 = vmax.f32 %v199_v22, 0.0  ;;  %v203_v39 = vadd.f32 %v379_v2, %v135_v23 }
  0x2c   :  { %313 = vst [vmem:[%s896_s3 + $0x118] sm:$0xff] %v249_v41  ;;  %v139_v40 = vmul.f32 %v374_v1, %v71_v29  ;;  %v74_v41 = vld [vmem:[%s893_s0 + $0x1e0] sm:$0xff]  ;;  %v264_v42 = vmax.f32 %v200_v27, 0.0  ;;  %v204_v43 = vadd.f32 %v379_v2, %v136_v28  ;;  %v140_v44 = vmul.f32 %v374_v1, %v72_v33 }
  0x2d   :  { %314 = vst [vmem:[%s896_s3 + $0x120] sm:$0xff] %v250_v45  ;;  %v75_v45 = vld [vmem:[%s893_s0 + $0x1e8] sm:$0xff]  ;;  %v265_v46 = vmax.f32 %v201_v31, 0.0  ;;  %v205_v47 = vadd.f32 %v379_v2, %v137_v32  ;;  %v141_v48 = vmul.f32 %v374_v1, %v73_v37  ;;  %v266_v50 = vmax.f32 %v202_v35, 0.0 }
  0x2e   :  { %315 = vst [vmem:[%s896_s3 + $0x128] sm:$0xff] %v251_v49  ;;  %v76_v49 = vld [vmem:[%s893_s0 + $0x1f0] sm:$0xff]  ;;  %v206_v51 = vadd.f32 %v379_v2, %v138_v36  ;;  %v142_v52 = vmul.f32 %v374_v1, %v74_v41  ;;  %v207_v54 = vadd.f32 %v379_v2, %v139_v40  ;;  %v143_v55 = vmul.f32 %v374_v1, %v75_v45 }
  0x2f   :  { %316 = vst [vmem:[%s896_s3 + $0x130] sm:$0xff] %v252_v53  ;;  %v267_v53 = vmax.f32 %v203_v39, 0.0  ;;  %v268_v56 = vmax.f32 %v204_v43, 0.0  ;;  %v144_v58 = vmul.f32 %v374_v1, %v76_v49  ;;  %v269_v59 = vmax.f32 %v205_v47, 0.0 }
  0x30   :  { %317 = vst [vmem:[%s896_s3 + $0x138] sm:$0xff] %v253_v57  ;;  %v208_v57 = vadd.f32 %v379_v2, %v140_v44  ;;  %v209_v60 = vadd.f32 %v379_v2, %v141_v48  ;;  %v210_v62 = vadd.f32 %v379_v2, %v142_v52  ;;  %v271_v63 = vmax.f32 %v207_v54, 0.0 }
  0x31   :  { %318 = vst [vmem:[%s896_s3 + $0x140] sm:$0xff] %v254_v61  ;;  %v270_v61 = vmax.f32 %v206_v51, 0.0  ;;  %v211_v1 = vadd.f32 %v379_v2, %v143_v55  ;;  %v212_v3 = vadd.f32 %v379_v2, %v144_v58  ;;  %v277_v7 = vmax.f32 %v784_v25, 0.0 }
  0x32   :  { %319 = vst [vmem:[%s896_s3 + $0x148] sm:$0xff] %v255_v4  ;;  %v272_v0 = vmax.f32 %v208_v57, 0.0  ;;  %v273_v4 = vmax.f32 %v209_v60, 0.0  ;;  %v274_v5 = vmax.f32 %v210_v62, 0.0 }
  0x33   :  { %320 = vst [vmem:[%s896_s3 + $0x150] sm:$0xff] %v256_v8  ;;  %v275_v6 = vmax.f32 %v211_v1, 0.0  ;;  %v276_v2 = vmax.f32 %v212_v3, 0.0 }
  0x34   :  { %321 = vst [vmem:[%s896_s3 + $0x158] sm:$0xff] %v257_v12 }
  0x35   :  { %322 = vst [vmem:[%s896_s3 + $0x160] sm:$0xff] %v258_v17 }
  0x36   :  { %323 = vst [vmem:[%s896_s3 + $0x168] sm:$0xff] %v259_v21 }
  0x37   :  { %324 = vst [vmem:[%s896_s3 + $0x170] sm:$0xff] %v260_v26 }
  0x38   :  { %325 = vst [vmem:[%s896_s3 + $0x178] sm:$0xff] %v261_v30 }
  0x39   :  { %326 = vst [vmem:[%s896_s3 + $0x180] sm:$0xff] %v262_v34 }
  0x3a   :  { %327 = vst [vmem:[%s896_s3 + $0x188] sm:$0xff] %v263_v38 }
  0x3b   :  { %328 = vst [vmem:[%s896_s3 + $0x190] sm:$0xff] %v264_v42 }
  0x3c   :  { %329 = vst [vmem:[%s896_s3 + $0x198] sm:$0xff] %v265_v46 }
  0x3d   :  { %330 = vst [vmem:[%s896_s3 + $0x1a0] sm:$0xff] %v266_v50 }
  0x3e   :  { %331 = vst [vmem:[%s896_s3 + $0x1a8] sm:$0xff] %v267_v53 }
  0x3f   :  { %332 = vst [vmem:[%s896_s3 + $0x1b0] sm:$0xff] %v268_v56 }
  0x40   :  { %333 = vst [vmem:[%s896_s3 + $0x1b8] sm:$0xff] %v269_v59 }
  0x41   :  { %334 = vst [vmem:[%s896_s3 + $0x1c0] sm:$0xff] %v270_v61 }
  0x42   :  { %335 = vst [vmem:[%s896_s3 + $0x1c8] sm:$0xff] %v271_v63 }
  0x43   :  { %336 = vst [vmem:[%s896_s3 + $0x1d0] sm:$0xff] %v272_v0 }
  0x44   :  { %337 = vst [vmem:[%s896_s3 + $0x1d8] sm:$0xff] %v273_v4 }
  0x45   :  { %338 = vst [vmem:[%s896_s3 + $0x1e0] sm:$0xff] %v274_v5 }
  0x46   :  { %339 = vst [vmem:[%s896_s3 + $0x1e8] sm:$0xff] %v275_v6 }
  0x47   :  { %340 = vst [vmem:[%s896_s3 + $0x1f0] sm:$0xff] %v276_v2 }
  0x48   :  { %341 = vst [vmem:[%s896_s3 + $0x1f8] sm:$0xff] %v277_v7 }

// kernel: inconv_forward_nchw.6
= control target key start
LH: loop header
LB: loop body
LE: loop exit
PB: predicated region body
PF: predicated region fallthrough
CT: control target
= control target key end

     0   :  { %s3666_s15 = smov 0   ;;  %s4806_s0 = inlined_call_operand.vmem [shape: bf16[2,18,18,128], index: 0, kind: input, shape index: {}]   ;;  %s4807_s1 = inlined_call_operand.vmem [shape: bf16[9,128,128], index: 1, kind: input, shape index: {}]   ;;  %s4808_s2 = inlined_call_operand.vmem [shape: f32[1,128], index: 2, kind: input, shape index: {}]   ;;  %s4809_s3 = inlined_call_operand.vmem [shape: f32[2,16,16,128], index: 3, kind: output, shape index: {0}]   ;;  %s4810_s4 = inlined_call_operand.vmem [shape: f32[2,8,128], index: 4, kind: output, shape index: {1}]  }
   0x1 LB: > { %s2973_s16 = sadd.s32 4294967295, %s3639_s15   ;;  %p2977_p0 = scmp.ge.s32.totalorder %s3639_s15, 1  ;;  %s3639_s15 = sphi %s3666_s15, %s15_s15  }
   0x2   : > { %p165_p1 = scmp.lt.s32.totalorder %s3639_s15, 3 }
   0x4   : > { %p166_p2 = pnand %p2977_p0, %p165_p1 }
   0x6   : > { %169 = sbr.rel (%p166_p2) target bundleno = 774 (0x306), region = 32 }
   0xb   : > { %v3524_v0 = vld [vmem:[%s4807_s1 + $0x78] sm:$0xff]  ;;  %p195_p3 = scmp.lt.s32.totalorder %s2973_s16, 1  ;;  %v3523_v1 = vld [vmem:[%s4807_s1 + $0x70] sm:$0xff]  ;;  %v3522_v2 = vld [vmem:[%s4807_s1 + $0x68] sm:$0xff]  ;;  %vm279_vm0 = vsmask.f32 3328 }
   0xc   : > { %3581 = vmatpush.bf16.msra.mxu1 %v3524_v0  ;;  %3582 = vmatpush.bf16.msra.mxu2 %v3524_v0  ;;  %vm280_vm1 = vsmask.f32 7440  ;;  %v3521_v6 = vld [vmem:[%s4807_s1 + $0x60] sm:$0xff]  ;;  %v3520_v35 = vld [vmem:[%s4807_s1 + $0x58] sm:$0xff]  ;;  %v3519_v54 = vld [vmem:[%s4807_s1 + $0x50] sm:$0xff]  ;;  %vm1133_vm3 = vcmask 1042432  }
   0xd   : > { %s4930_s16 = smov (!%p195_p3, %s2973_s16), 1  ;;  %3583 = vmatpush.bf16.msra.mxu3 %v3524_v0  ;;  %795 = vmatpush.bf16.msra.mxu0 %v3524_v0  ;;  %vm3704_vm2 = vmor %vm279_vm0, %vm280_vm1  ;;  %vm1134_vm4 = vcmask 1046532  }
   0xe   : > { %s3605_s21 = smul.u32 216, %s4930_s16  ;;  %vm4077_vm5 = vmor %vm1133_vm3, %vm1134_vm4  ;;  %s3490_s27 = sshll.u32 %s4930_s16, 8 }
   0xf   : > { %s4651_s6 = scalar_lea.vmem %s4809_s3, %s3490_s27 }
  0x10   : > { %3584 = vmatpush.bf16.msra.mxu1 %v3523_v1  ;;  %3585 = vmatpush.bf16.msra.mxu2 %v3523_v1  ;;  %s3689_s26 = scalar_lea.vmem %s4806_s0, %s3605_s21 }
  0x11   : > { %3586 = vmatpush.bf16.msra.mxu3 %v3523_v1  ;;  %796 = vmatpush.bf16.msra.mxu0 %v3523_v1  ;;  %v221_v3 = vld [vmem:[%s3689_s26 + $0x30] sm:$0xf]  ;;  %v222_v4 = vld [vmem:[%s3689_s26 + $0x34] sm:$0xf]  ;;  %v223_v5 = vld [vmem:[%s3689_s26 + $0x38] sm:$0x1] }
  0x12   : > { %v379_v7 = vshrl.u32 %v221_v3, 16  ;;  %v382_v8 = vshll.u32 %v221_v3, 16  ;;  %v388_v9 = vshll.u32 %v222_v4, 16  ;;  %v392_v10 = vshrl.u32 %v222_v4, 16  ;;  %v233_v11 = vld [vmem:[%s3689_s26 + $0x60] sm:$0xf] }
  0x13   : > { %v398_v12 = vshll.u32 %v223_v5, 16  ;;  %v234_v13 = vld [vmem:[%s3689_s26 + $0x64] sm:$0xf]  ;;  %v235_v14 = vld [vmem:[%s3689_s26 + $0x68] sm:$0x1]  ;;  %v475_v15 = vshrl.u32 %v233_v11, 16 }
  0x14   : > { %3587 = vmatpush.bf16.msra.mxu1 %v3522_v2  ;;  %3588 = vmatpush.bf16.msra.mxu2 %v3522_v2  ;;  %v381_v16 = vrot.slane %v379_v7, 4  ;;  %v384_v17 = vrot.slane %v382_v8, 5  ;;  %v390_v18 = vrot.slane %v388_v9, 5  ;;  %v394_v19 = vrot.slane %v392_v10, 4  ;;  %v245_v20 = vld [vmem:[%s3689_s26 + $0x90] sm:$0xf] }
  0x15   : > { %3589 = vmatpush.bf16.msra.mxu3 %v3522_v2  ;;  %797 = vmatpush.bf16.msra.mxu0 %v3522_v2  ;;  %v400_v21 = vrot.slane %v398_v12, 5  ;;  %v477_v22 = vrot.slane %v475_v15, 4  ;;  %v478_v23 = vshll.u32 %v233_v11, 16  ;;  %v484_v24 = vshll.u32 %v234_v13, 16  ;;  %v246_v29 = vld [vmem:[%s3689_s26 + $0x94] sm:$0xf] }
  0x16   : > { %v385_v25 = vor.u32 %v384_v17, %v381_v16  ;;  %v395_v26 = vor.u32 %v394_v19, %v390_v18  ;;  %v488_v27 = vshrl.u32 %v234_v13, 16  ;;  %v494_v28 = vshll.u32 %v235_v14, 16  ;;  %v247_v41 = vld [vmem:[%s3689_s26 + $0x98] sm:$0x1]  ;;  %v3717_v49 = vld [vmem:[%s3689_s26] sm:$0xf] }
  0x17   : > { %v480_v31 = vrot.slane %v478_v23, 5  ;;  %v486_v32 = vrot.slane %v484_v24, 5  ;;  %v571_v33 = vshrl.u32 %v245_v20, 16  ;;  %v574_v34 = vshll.u32 %v245_v20, 16  ;;  %v3727_v62 = vld [vmem:[%s3689_s26 + $0x4] sm:$0xf] }
  0x18   : > { %3590 = vmatpush.bf16.msra.mxu1 %v3521_v6  ;;  %3591 = vmatpush.bf16.msra.mxu2 %v3521_v6  ;;  %v386_v36 = vrot.slane %v385_v25, 4  ;;  %v396_v37 = vrot.slane %v395_v26, 4  ;;  %v490_v38 = vrot.slane %v488_v27, 4  ;;  %v496_v39 = vrot.slane %v494_v28, 5  ;;  %v3733_v4 = vld [vmem:[%s3689_s26 + $0x8] sm:$0x1] }
  0x19   : > { %3592 = vmatpush.bf16.msra.mxu3 %v3521_v6  ;;  %798 = vmatpush.bf16.msra.mxu0 %v3521_v6  ;;  %v481_v40 = vor.u32 %v480_v31, %v477_v22  ;;  %v573_v42 = vrot.slane %v571_v33, 4  ;;  %v576_v43 = vrot.slane %v574_v34, 5  ;;  %v580_v44 = vshll.u32 %v246_v29, 16  ;;  %v3736_v5 = vld [vmem:[%s3689_s26 + $0x3c] sm:$0xf]  ;;  %v3518_v10 = vld [vmem:[%s4807_s1 + $0x48] sm:$0xff] }
  0x1a   : > { %v391_v45 = vsel %vm3704_vm2, %v386_v36, %v390_v18  ;;  %v401_v46 = vsel %vm3704_vm2, %v396_v37, %v400_v21  ;;  %v491_v47 = vor.u32 %v490_v38, %v486_v32  ;;  %v584_v48 = vshrl.u32 %v246_v29, 16  ;;  %v3747_v15 = vld [vmem:[%s3689_s26 + $0x40] sm:$0xf]  ;;  %v3753_v19 = vld [vmem:[%s3689_s26 + $0x44] sm:$0x1]  ;;  %v3532_v37 = vld [vmem:[%s4807_s1 + $0xb8] sm:$0xff] }
  0x1b   : > { %v691_v50 = vunpack.c.l.b16 %v391_v45  ;;  %v692_v51 = vunpack.c.l.b16 %v401_v46  ;;  %v482_v52 = vrot.slane %v481_v40, 4  ;;  %v577_v53 = vor.u32 %v576_v43, %v573_v42  ;;  %v236_v25 = vld [vmem:[%s3689_s26 + $0x6c] sm:$0xf]  ;;  %v3517_v31 = vld [vmem:[%s4807_s1 + $0x40] sm:$0xff]  ;;  %v237_v40 = vld [vmem:[%s3689_s26 + $0x70] sm:$0xf] }
  0x1c   : > { %3593 = vmatpush.bf16.msra.mxu1 %v3520_v35  ;;  %3594 = vmatpush.bf16.msra.mxu2 %v3520_v35  ;;  %v492_v55 = vrot.slane %v491_v47, 4  ;;  %v582_v56 = vrot.slane %v580_v44, 5  ;;  %v586_v57 = vrot.slane %v584_v48, 4  ;;  %v590_v58 = vshll.u32 %v247_v41, 16  ;;  %v3540_v43 = vld [vmem:[%s4807_s1 + $0xf8] sm:$0xff] }
  0x1d   : > { %3595 = vmatpush.bf16.msra.mxu3 %v3520_v35  ;;  %799 = vmatpush.bf16.msra.mxu0 %v3520_v35  ;;  %v3722_v59 = vpack.c.b16 %v692_v51, %v691_v50  ;;  %v487_v60 = vsel %vm3704_vm2, %v482_v52, %v486_v32  ;;  %v578_v61 = vrot.slane %v577_v53, 4  ;;  %v283_v63 = vshrl.u32 %v3717_v49, 16  ;;  %v238_v47 = vld [vmem:[%s3689_s26 + $0x74] sm:$0x1]  ;;  %v248_v53 = vld [vmem:[%s3689_s26 + $0x9c] sm:$0xf] }
  0x1e   : > { %v497_v0 = vsel %vm3704_vm2, %v492_v55, %v496_v39  ;;  %v699_v1 = vunpack.c.l.b16 %v487_v60  ;;  %v587_v2 = vor.u32 %v586_v57, %v582_v56  ;;  %v592_v3 = vrot.slane %v590_v58, 5 }
  0x1f   : > { %v700_v6 = vunpack.c.l.b16 %v497_v0  ;;  %v583_v7 = vsel %vm3704_vm2, %v578_v61, %v582_v56  ;;  %v285_v8 = vrot.slane %v283_v63, 4  ;;  %v286_v9 = vshll.u32 %v3717_v49, 16  ;;  %v3516_v56 = vld [vmem:[%s4807_s1 + $0x38] sm:$0xff]  ;;  %v3531_v61 = vld [vmem:[%s4807_s1 + $0xb0] sm:$0xff] }
  0x20   : > { %3596 = vmatpush.bf16.msra.mxu1 %v3519_v54  ;;  %3597 = vmatpush.bf16.msra.mxu2 %v3519_v54  ;;  %v588_v11 = vrot.slane %v587_v2, 4  ;;  %v707_v12 = vunpack.c.l.b16 %v583_v7  ;;  %v292_v13 = vshll.u32 %v3727_v62, 16  ;;  %v296_v14 = vshrl.u32 %v3727_v62, 16  ;;  %v3539_v2 = vld [vmem:[%s4807_s1 + $0xf0] sm:$0xff] }
  0x21   : > { %3598 = vmatpush.bf16.msra.mxu3 %v3519_v54  ;;  %800 = vmatpush.bf16.msra.mxu0 %v3519_v54  ;;  %v3749_v16 = vpack.c.b16 %v700_v6, %v699_v1  ;;  %v288_v17 = vrot.slane %v286_v9, 5  ;;  %v302_v18 = vshll.u32 %v3733_v4, 16  ;;  %v403_v20 = vshrl.u32 %v3736_v5, 16 }
  0x22   : > { %v593_v21 = vsel %vm3704_vm2, %v588_v11, %v592_v3  ;;  %v294_v22 = vrot.slane %v292_v13, 5  ;;  %v298_v23 = vrot.slane %v296_v14, 4  ;;  %v406_v24 = vshll.u32 %v3736_v5, 16  ;;  %v3548_v11 = vld [vmem:[%s4807_s1 + $0x138] sm:$0xff] }
  0x23   : > { %4845 = vst [vmem:[#allocation2_spill] sm:$0xff] %v3749_v16  ;;  %v708_v26 = vunpack.c.l.b16 %v593_v21  ;;  %v289_v27 = vor.u32 %v288_v17, %v285_v8  ;;  %v304_v28 = vrot.slane %v302_v18, 5  ;;  %v405_v29 = vrot.slane %v403_v20, 4  ;;  %v249_v8 = vld [vmem:[%s3689_s26 + $0xa0] sm:$0xf]  ;;  %v3515_v20 = vld [vmem:[%s4807_s1 + $0x30] sm:$0xff] }
  0x24   : > { %3599 = vmatpush.bf16.msra.mxu1 %v3518_v10  ;;  %3600 = vmatpush.bf16.msra.mxu2 %v3518_v10  ;;  %v299_v32 = vor.u32 %v298_v23, %v294_v22  ;;  %v408_v33 = vrot.slane %v406_v24, 5  ;;  %v412_v34 = vshll.u32 %v3747_v15, 16  ;;  %v416_v35 = vshrl.u32 %v3747_v15, 16  ;;  %v250_v17 = vld [vmem:[%s3689_s26 + $0xa4] sm:$0x1] }
  0x25   : > { %3601 = vmatpush.bf16.msra.mxu3 %v3518_v10  ;;  %801 = vmatpush.bf16.msra.mxu0 %v3518_v10  ;;  %v3765_v36 = vpack.c.b16 %v708_v26, %v707_v12  ;;  %v290_v38 = vrot.slane %v289_v27, 4  ;;  %v422_v39 = vshll.u32 %v3753_v19, 16  ;;  %v499_v41 = vshrl.u32 %v236_v25, 16  ;;  %v3800_v18 = vld [vmem:[%s3689_s26 + $0xc] sm:$0xf] }
  0x26   : > { %v300_v42 = vrot.slane %v299_v32, 4  ;;  %v409_v44 = vor.u32 %v408_v33, %v405_v29  ;;  %v414_v45 = vrot.slane %v412_v34, 5  ;;  %v418_v46 = vrot.slane %v416_v35, 4  ;;  %v3530_v29 = vld [vmem:[%s4807_s1 + $0xa8] sm:$0xff]  ;;  %v3812_v34 = vld [vmem:[%s3689_s26 + $0x10] sm:$0xf] }
  0x27   : > { %v295_v48 = vsel %vm3704_vm2, %v290_v38, %v294_v22  ;;  %v424_v50 = vrot.slane %v422_v39, 5  ;;  %v501_v51 = vrot.slane %v499_v41, 4  ;;  %v502_v52 = vshll.u32 %v236_v25, 16 }
  0x28   : > { %3602 = vmatpush.bf16.msra.mxu1 %v3517_v31  ;;  %3603 = vmatpush.bf16.msra.mxu2 %v3517_v31  ;;  %v305_v54 = vsel %vm3704_vm2, %v300_v42, %v304_v28  ;;  %v683_v55 = vunpack.c.l.b16 %v295_v48  ;;  %v410_v57 = vrot.slane %v409_v44, 4  ;;  %v419_v58 = vor.u32 %v418_v46, %v414_v45  ;;  %v3823_v42 = vld [vmem:[%s3689_s26 + $0x14] sm:$0x1]  ;;  %v3514_v48 = vld [vmem:[%s4807_s1 + $0x28] sm:$0xff] }
  0x29   : > { %3604 = vmatpush.bf16.msra.mxu3 %v3517_v31  ;;  %802 = vmatpush.bf16.msra.mxu0 %v3517_v31  ;;  %v684_v60 = vunpack.c.l.b16 %v305_v54  ;;  %v504_v63 = vrot.slane %v502_v52, 5  ;;  %v508_v0 = vshll.u32 %v237_v40, 16  ;;  %v512_v1 = vshrl.u32 %v237_v40, 16  ;;  %v3834_v54 = vld [vmem:[%s3689_s26 + $0x48] sm:$0xf] }
  0x2a   : > { %v415_v3 = vsel %vm3704_vm2, %v410_v57, %v414_v45  ;;  %v420_v6 = vrot.slane %v419_v58, 4  ;;  %v518_v7 = vshll.u32 %v238_v47, 16  ;;  %v595_v9 = vshrl.u32 %v248_v53, 16 }
  0x2b   : > { %823 = vmatmul.bf16.vlgmr.msra.gmra.mxu1 %v3722_v59  ;;  %843 = vmatmul.bf16.vlgmr.msra.gmra.mxu2 %v3749_v16  ;;  %v715_v10 = vpack.c.b16 %v684_v60, %v683_v55  ;;  %v693_v12 = vunpack.c.l.b16 %v415_v3  ;;  %v505_v13 = vor.u32 %v504_v63, %v501_v51  ;;  %v510_v14 = vrot.slane %v508_v0, 5  ;;  %v3529_v60 = vld [vmem:[%s4807_s1 + $0xa0] sm:$0xff]  ;;  %v3546_v3 = vld [vmem:[%s4807_s1 + $0x128] sm:$0xff] }
  0x2c   : > { %1377 = vmatpush.bf16.msrb.mxu2 %v3532_v37  ;;  %863 = vmatmul.bf16.vlgmr.msra.gmra.mxu3 %v3765_v36  ;;  %v425_v21 = vsel %vm3704_vm2, %v420_v6, %v424_v50  ;;  %v514_v22 = vrot.slane %v512_v1, 4  ;;  %v520_v23 = vrot.slane %v518_v7, 5  ;;  %v597_v24 = vrot.slane %v595_v9, 4  ;;  %v3538_v37 = vld [vmem:[%s4807_s1 + $0xe8] sm:$0xff]  ;;  %v3513_v6 = vld [vmem:[%s4807_s1 + $0x20] sm:$0xff] }
  0x2d   : > { %1569 = vmatpush.bf16.msrb.mxu3 %v3540_v43  ;;  %1028 = vmatpush.bf16.msrb.mxu1 %v3516_v56  ;;  %v694_v25 = vunpack.c.l.b16 %v425_v21  ;;  %v506_v26 = vrot.slane %v505_v13, 4  ;;  %v598_v27 = vshll.u32 %v248_v53, 16  ;;  %v604_v28 = vshll.u32 %v249_v8, 16  ;;  %v3547_v43 = vld [vmem:[%s4807_s1 + $0x130] sm:$0xff]  ;;  %v3865_v21 = vld [vmem:[%s3689_s26 + $0x78] sm:$0xf] }
  0x2e   : > { %803 = vmatmul.bf16.vlgmr.msra.gmra.mxu0 %v715_v10  ;;  %v515_v31 = vor.u32 %v514_v22, %v510_v14  ;;  %v608_v32 = vshrl.u32 %v249_v8, 16  ;;  %v614_v33 = vshll.u32 %v250_v17, 16  ;;  %v307_v35 = vshrl.u32 %v3800_v18, 16  ;;  %v3853_v10 = vld [vmem:[%s3689_s26 + $0x4c] sm:$0xf] }
  0x2f   : > { %1783 = vmatpush.bf16.msrb.mxu0 %v3548_v11  ;;  %v3818_v38 = vpack.c.b16 %v694_v25, %v693_v12  ;;  %v511_v39 = vsel %vm3704_vm2, %v506_v26, %v510_v14  ;;  %v600_v40 = vrot.slane %v598_v27, 5  ;;  %v606_v41 = vrot.slane %v604_v28, 5  ;;  %v3861_v17 = vld [vmem:[%s3689_s26 + $0x50] sm:$0x1]  ;;  %v3528_v26 = vld [vmem:[%s4807_s1 + $0x98] sm:$0xff] }
  0x30   : > { %1378 = vmatpush.bf16.msrb.mxu2 %v3531_v61  ;;  %v516_v44 = vrot.slane %v515_v31, 4  ;;  %v701_v45 = vunpack.c.l.b16 %v511_v39  ;;  %v610_v46 = vrot.slane %v608_v32, 4  ;;  %v616_v47 = vrot.slane %v614_v33, 5  ;;  %v3537_v61 = vld [vmem:[%s4807_s1 + $0xe0] sm:$0xff]  ;;  %v3536_v27 = vld [vmem:[%s4807_s1 + $0xd8] sm:$0xff] }
  0x31   : > { %1570 = vmatpush.bf16.msrb.mxu3 %v3539_v2  ;;  %4846 = vst [vmem:[#allocation3_spill] sm:$0xff] %v3818_v38  ;;  %1029 = vmatpush.bf16.msrb.mxu1 %v3515_v20  ;;  %v601_v50 = vor.u32 %v600_v40, %v597_v24  ;;  %v309_v51 = vrot.slane %v307_v35, 4  ;;  %v310_v52 = vshll.u32 %v3800_v18, 16  ;;  %v316_v53 = vshll.u32 %v3812_v34, 16  ;;  %v3545_v40 = vld [vmem:[%s4807_s1 + $0x120] sm:$0xff] }
  0x32   : > { %v521_v55 = vsel %vm3704_vm2, %v516_v44, %v520_v23  ;;  %v611_v56 = vor.u32 %v610_v46, %v606_v41  ;;  %v320_v57 = vshrl.u32 %v3812_v34, 16  ;;  %v326_v58 = vshll.u32 %v3823_v42, 16  ;;  %v3887_v46 = vld [vmem:[%s3689_s26 + $0x7c] sm:$0xf] }
  0x33   : > { %v702_v63 = vunpack.c.l.b16 %v521_v55  ;;  %v602_v0 = vrot.slane %v601_v50, 4  ;;  %v312_v1 = vrot.slane %v310_v52, 5  ;;  %v318_v2 = vrot.slane %v316_v53, 5  ;;  %1784 = vmatpush.bf16.msrb.mxu0 %v3547_v43  ;;  %v251_v55 = vld [vmem:[%s3689_s26 + $0xa8] sm:$0xf] }
  0x34   : > { %1379 = vmatpush.bf16.msrb.mxu2 %v3530_v29  ;;  %v612_v7 = vrot.slane %v611_v56, 4  ;;  %v322_v8 = vrot.slane %v320_v57, 4  ;;  %v328_v9 = vrot.slane %v326_v58, 5  ;;  %v427_v11 = vshrl.u32 %v3834_v54, 16  ;;  %v3527_v56 = vld [vmem:[%s4807_s1 + $0x90] sm:$0xff] }
  0x35   : > { %1571 = vmatpush.bf16.msrb.mxu3 %v3538_v37  ;;  %1030 = vmatpush.bf16.msrb.mxu1 %v3514_v48  ;;  %v3856_v12 = vpack.c.b16 %v702_v63, %v701_v45  ;;  %v607_v13 = vsel %vm3704_vm2, %v602_v0, %v606_v41  ;;  %v313_v14 = vor.u32 %v312_v1, %v309_v51  ;;  %v430_v20 = vshll.u32 %v3834_v54, 16  ;;  %v3512_v48 = vld [vmem:[%s4807_s1 + $0x18] sm:$0xff]  ;;  %v3535_v57 = vld [vmem:[%s4807_s1 + $0xd0] sm:$0xff] }
  0x36   : > { %v617_v22 = vsel %vm3704_vm2, %v612_v7, %v616_v47  ;;  %v709_v23 = vunpack.c.l.b16 %v607_v13  ;;  %v323_v24 = vor.u32 %v322_v8, %v318_v2  ;;  %v429_v25 = vrot.slane %v427_v11, 4  ;;  %v3890_v47 = vld [vmem:[%s3689_s26 + $0x80] sm:$0x1]  ;;  %v252_v11 = vld [vmem:[%s3689_s26 + $0xac] sm:$0xf] }
  0x37   : > { %v710_v28 = vunpack.c.l.b16 %v617_v22  ;;  %v314_v29 = vrot.slane %v313_v14, 4  ;;  %1785 = vmatpush.bf16.msrb.mxu0 %v3546_v3  ;;  %v432_v31 = vrot.slane %v430_v20, 5  ;;  %v436_v32 = vshll.u32 %v3853_v10, 16  ;;  %v3511_v14 = vld [vmem:[%s4807_s1 + $0x10] sm:$0xff] }
  0x38   : > { %1380 = vmatpush.bf16.msrb.mxu2 %v3529_v60  ;;  %v324_v33 = vrot.slane %v323_v24, 4  ;;  %v440_v35 = vshrl.u32 %v3853_v10, 16  ;;  %v446_v37 = vshll.u32 %v3861_v17, 16  ;;  %v523_v39 = vshrl.u32 %v3865_v21, 16 }
  0x39   : > { %1572 = vmatpush.bf16.msrb.mxu3 %v3537_v61  ;;  %1031 = vmatpush.bf16.msrb.mxu1 %v3513_v6  ;;  %v3882_v41 = vpack.c.b16 %v710_v28, %v709_v23  ;;  %v319_v43 = vsel %vm3704_vm2, %v314_v29, %v318_v2  ;;  %v433_v44 = vor.u32 %v432_v31, %v429_v25  ;;  %v438_v45 = vrot.slane %v436_v32, 5  ;;  %v3544_v6 = vld [vmem:[%s4807_s1 + $0x118] sm:$0xff]  ;;  %v253_v25 = vld [vmem:[%s3689_s26 + $0xb0] sm:$0x1] }
  0x3a   : > { %v329_v50 = vsel %vm3704_vm2, %v324_v33, %v328_v9  ;;  %v685_v51 = vunpack.c.l.b16 %v319_v43  ;;  %v442_v52 = vrot.slane %v440_v35, 4  ;;  %v448_v53 = vrot.slane %v446_v37, 5  ;;  %v3925_v31 = vld [vmem:[%s3689_s26 + $0x18] sm:$0xf] }
  0x3b   : > { %4847 = vst [vmem:[#allocation4_spill] sm:$0xff] %v3882_v41  ;;  %828 = vmatmul.bf16.gmra.mxu1 %v3818_v38  ;;  %848 = vmatmul.bf16.gmra.mxu2 %v3856_v12  ;;  %v686_v58 = vunpack.c.l.b16 %v329_v50  ;;  %v434_v60 = vrot.slane %v433_v44, 4  ;;  %v525_v61 = vrot.slane %v523_v39, 4  ;;  %v526_v63 = vshll.u32 %v3865_v21, 16 }
  0x3c   : > { %1381 = vmatpush.bf16.msrb.mxu2 %v3528_v26  ;;  %868 = vmatmul.bf16.gmra.mxu3 %v3882_v41  ;;  %v443_v0 = vor.u32 %v442_v52, %v438_v45  ;;  %v532_v1 = vshll.u32 %v3887_v46, 16  ;;  %v536_v2 = vshrl.u32 %v3887_v46, 16  ;;  %v542_v3 = vshll.u32 %v3890_v47, 16  ;;  %v3933_v52 = vld [vmem:[%s3689_s26 + $0x1c] sm:$0xf] }
  0x3d   : > { %1573 = vmatpush.bf16.msrb.mxu3 %v3536_v27  ;;  %1786 = vmatpush.bf16.msrb.mxu0 %v3545_v40  ;;  %v3914_v7 = vpack.c.b16 %v686_v58, %v685_v51  ;;  %v439_v8 = vsel %vm3704_vm2, %v434_v60, %v438_v45  ;;  %v528_v9 = vrot.slane %v526_v63, 5  ;;  %v619_v13 = vshrl.u32 %v251_v55, 16  ;;  %v3526_v45 = vld [vmem:[%s4807_s1 + $0x88] sm:$0xff]  ;;  %v3941_v60 = vld [vmem:[%s3689_s26 + $0x20] sm:$0x1] }
  0x3e   : > { %1032 = vmatpush.bf16.msrb.mxu1 %v3512_v48  ;;  %v444_v20 = vrot.slane %v443_v0, 4  ;;  %v695_v22 = vunpack.c.l.b16 %v439_v8  ;;  %v534_v23 = vrot.slane %v532_v1, 5  ;;  %v538_v24 = vrot.slane %v536_v2, 4 }
  0x3f   : > { %808 = vmatmul.bf16.gmra.mxu0 %v3914_v7  ;;  %v529_v26 = vor.u32 %v528_v9, %v525_v61  ;;  %v544_v27 = vrot.slane %v542_v3, 5  ;;  %v621_v28 = vrot.slane %v619_v13, 4  ;;  %v622_v29 = vshll.u32 %v251_v55, 16  ;;  %v3944_v61 = vld [vmem:[%s3689_s26 + $0x54] sm:$0xf] }
  0x40   : > { %1382 = vmatpush.bf16.msrb.mxu2 %v3527_v56  ;;  %v449_v32 = vsel %vm3704_vm2, %v444_v20, %v448_v53  ;;  %v539_v33 = vor.u32 %v538_v24, %v534_v23  ;;  %v628_v35 = vshll.u32 %v252_v11, 16  ;;  %v632_v37 = vshrl.u32 %v252_v11, 16  ;;  %v3534_v11 = vld [vmem:[%s4807_s1 + $0xc8] sm:$0xff]  ;;  %v3543_v13 = vld [vmem:[%s4807_s1 + $0x110] sm:$0xff] }
  0x41   : > { %1574 = vmatpush.bf16.msrb.mxu3 %v3535_v57  ;;  %1787 = vmatpush.bf16.msrb.mxu0 %v3544_v6  ;;  %v696_v39 = vunpack.c.l.b16 %v449_v32  ;;  %v530_v40 = vrot.slane %v529_v26, 4  ;;  %v624_v43 = vrot.slane %v622_v29, 5  ;;  %v638_v44 = vshll.u32 %v253_v25, 16  ;;  %v3525_v25 = vld [vmem:[%s4807_s1 + $0x80] sm:$0xff]  ;;  %v3970_v32 = vld [vmem:[%s3689_s26 + $0x58] sm:$0xf] }
  0x42   : > { %1033 = vmatpush.bf16.msrb.mxu1 %v3511_v14  ;;  %v540_v48 = vrot.slane %v539_v33, 4  ;;  %v630_v50 = vrot.slane %v628_v35, 5  ;;  %v634_v51 = vrot.slane %v632_v37, 4  ;;  %v331_v53 = vshrl.u32 %v3925_v31, 16  ;;  %v3510_v14 = vld [vmem:[%s4807_s1 + $0x8] sm:$0xff] }
  0x43   : > { %v3936_v55 = vpack.c.b16 %v696_v39, %v695_v22  ;;  %v535_v56 = vsel %vm3704_vm2, %v530_v40, %v534_v23  ;;  %v625_v57 = vor.u32 %v624_v43, %v621_v28  ;;  %v640_v58 = vrot.slane %v638_v44, 5  ;;  %v3973_v33 = vld [vmem:[%s3689_s26 + $0x5c] sm:$0x1]  ;;  %v3978_v43 = vld [vmem:[%s3689_s26 + $0x84] sm:$0xf] }
  0x44   : > { %1383 = vmatpush.bf16.msrb.mxu2 %v3526_v45  ;;  %v545_v63 = vsel %vm3704_vm2, %v540_v48, %v544_v27  ;;  %v703_v0 = vunpack.c.l.b16 %v535_v56  ;;  %v635_v1 = vor.u32 %v634_v51, %v630_v50  ;;  %v333_v2 = vrot.slane %v331_v53, 4  ;;  %v3533_v44 = vld [vmem:[%s4807_s1 + $0xc0] sm:$0xff]  ;;  %v3542_v45 = vld [vmem:[%s4807_s1 + $0x108] sm:$0xff] }
  0x45   : > { %4848 = vst [vmem:[#allocation5_spill] sm:$0xff] %v3936_v55  ;;  %v704_v3 = vunpack.c.l.b16 %v545_v63  ;;  %v626_v6 = vrot.slane %v625_v57, 4  ;;  %v334_v8 = vshll.u32 %v3925_v31, 16  ;;  %v340_v9 = vshll.u32 %v3933_v52, 16  ;;  %1575 = vmatpush.bf16.msrb.mxu3 %v3534_v11  ;;  %1788 = vmatpush.bf16.msrb.mxu0 %v3543_v13  ;;  %v3509_v56 = vld [vmem:[%s4807_s1] sm:$0xff] }
  0x46   : > { %v636_v20 = vrot.slane %v635_v1, 4  ;;  %v344_v22 = vshrl.u32 %v3933_v52, 16  ;;  %v350_v23 = vshll.u32 %v3941_v60, 16  ;;  %v451_v24 = vshrl.u32 %v3944_v61, 16  ;;  %1034 = vmatpush.bf16.msrb.mxu1 %v3510_v14 }
  0x47   : > { %v3965_v26 = vpack.c.b16 %v704_v3, %v703_v0  ;;  %v631_v27 = vsel %vm3704_vm2, %v626_v6, %v630_v50  ;;  %v336_v28 = vrot.slane %v334_v8, 5  ;;  %v342_v29 = vrot.slane %v340_v9, 5  ;;  %v3998_v6 = vld [vmem:[%s3689_s26 + $0x88] sm:$0xf] }
  0x48   : > { %v641_v35 = vsel %vm3704_vm2, %v636_v20, %v640_v58  ;;  %v711_v37 = vunpack.c.l.b16 %v631_v27  ;;  %v346_v39 = vrot.slane %v344_v22, 4  ;;  %v352_v40 = vrot.slane %v350_v23, 5  ;;  %1384 = vmatpush.bf16.msrb.mxu2 %v3525_v25  ;;  %v3541_v20 = vld [vmem:[%s4807_s1 + $0x100] sm:$0xff] }
  0x49   : > { %v712_v48 = vunpack.c.l.b16 %v641_v35  ;;  %v337_v50 = vor.u32 %v336_v28, %v333_v2  ;;  %v453_v51 = vrot.slane %v451_v24, 4  ;;  %v454_v53 = vshll.u32 %v3944_v61, 16  ;;  %1576 = vmatpush.bf16.msrb.mxu3 %v3533_v44  ;;  %1789 = vmatpush.bf16.msrb.mxu0 %v3542_v45  ;;  %v4008_v24 = vld [vmem:[%s3689_s26 + $0x8c] sm:$0x1]  ;;  %v4012_v28 = vld [vmem:[%s3689_s26 + $0xb4] sm:$0xf] }
  0x4a   : > { %v347_v57 = vor.u32 %v346_v39, %v342_v29  ;;  %v460_v58 = vshll.u32 %v3970_v32, 16  ;;  %v464_v63 = vshrl.u32 %v3970_v32, 16  ;;  %v470_v0 = vshll.u32 %v3973_v33, 16  ;;  %4850 = vst [vmem:[#allocation7_spill] sm:$0xff] %v4012_v28  ;;  %1035 = vmatpush.bf16.msrb.mxu1 %v3509_v56 }
  0x4b   : > { %833 = vmatmul.bf16.gmra.mxu1 %v3936_v55  ;;  %853 = vmatmul.bf16.gmra.mxu2 %v3965_v26  ;;  %v3995_v1 = vpack.c.b16 %v712_v48, %v711_v37  ;;  %v338_v2 = vrot.slane %v337_v50, 4  ;;  %v456_v3 = vrot.slane %v454_v53, 5  ;;  %v547_v8 = vshrl.u32 %v3978_v43, 16 }
  0x4c   : > { %v348_v9 = vrot.slane %v347_v57, 4  ;;  %v462_v11 = vrot.slane %v460_v58, 5  ;;  %v466_v13 = vrot.slane %v464_v63, 4  ;;  %v472_v14 = vrot.slane %v470_v0, 5  ;;  %v4020_v58 = vld [vmem:[%s3689_s26 + $0xb8] sm:$0xf] }
  0x4d   : > { %4849 = vst [vmem:[#allocation6_spill] sm:$0xff] %v3995_v1  ;;  %873 = vmatmul.bf16.gmra.mxu3 %v3995_v1  ;;  %v343_v22 = vsel %vm3704_vm2, %v338_v2, %v342_v29  ;;  %v457_v23 = vor.u32 %v456_v3, %v453_v51  ;;  %v549_v25 = vrot.slane %v547_v8, 4  ;;  %v550_v27 = vshll.u32 %v3978_v43, 16  ;;  %1790 = vmatpush.bf16.msrb.mxu0 %v3541_v20  ;;  %v4028_v3 = vld [vmem:[%s3689_s26 + $0xbc] sm:$0x1] }
  0x4e   : > { %v353_v35 = vsel %vm3704_vm2, %v348_v9, %v352_v40  ;;  %v687_v37 = vunpack.c.l.b16 %v343_v22  ;;  %v467_v39 = vor.u32 %v466_v13, %v462_v11  ;;  %v556_v44 = vshll.u32 %v3998_v6, 16  ;;  %4851 = vst [vmem:[#allocation8_spill] sm:$0xff] %v4020_v58  ;;  %v4031_v8 = vld [vmem:[%s3689_s26 + $0x24] sm:$0xf]  ;;  %v3564_v9 = vld [vmem:[%s4807_s1 + $0x1b8] sm:$0xff] }
  0x4f   : > { %v688_v29 = vunpack.c.l.b16 %v353_v35  ;;  %v458_v45 = vrot.slane %v457_v23, 4  ;;  %v552_v48 = vrot.slane %v550_v27, 5  ;;  %v560_v50 = vshrl.u32 %v3998_v6, 16  ;;  %4852 = vst [vmem:[#allocation9_spill] sm:$0xff] %v4028_v3  ;;  %2173 = vmatpush.bf16.msra.mxu2 %v3564_v9 }
  0x50   : > { %v468_v51 = vrot.slane %v467_v39, 4  ;;  %v558_v53 = vrot.slane %v556_v44, 5  ;;  %v566_v57 = vshll.u32 %v4008_v24, 16  ;;  %v643_v56 = vshrl.u32 %v4012_v28, 16 }
  0x51   : > { %v4023_v40 = vpack.c.b16 %v688_v29, %v687_v37  ;;  %v463_v63 = vsel %vm3704_vm2, %v458_v45, %v462_v11  ;;  %v553_v0 = vor.u32 %v552_v48, %v549_v25  ;;  %v562_v2 = vrot.slane %v560_v50, 4  ;;  %v4044_v29 = vld [vmem:[%s3689_s26 + $0x28] sm:$0xf] }
  0x52   : > { %v473_v13 = vsel %vm3704_vm2, %v468_v51, %v472_v14  ;;  %v697_v20 = vunpack.c.l.b16 %v463_v63  ;;  %v568_v22 = vrot.slane %v566_v57, 5  ;;  %v645_v23 = vrot.slane %v643_v56, 4  ;;  %v3572_v57 = vld [vmem:[%s4807_s1 + $0x1f8] sm:$0xff] }
  0x53   : > { %813 = vmatmul.bf16.gmra.mxu0 %v4023_v40  ;;  %v698_v11 = vunpack.c.l.b16 %v473_v13  ;;  %v554_v25 = vrot.slane %v553_v0, 4  ;;  %v563_v27 = vor.u32 %v562_v2, %v558_v53  ;;  %v646_v35 = vshll.u32 %v4012_v28, 16  ;;  %v3556_v56 = vld [vmem:[%s4807_s1 + $0x178] sm:$0xff]  ;;  %2387 = vmatpush.bf16.msra.mxu3 %v3572_v57 }
  0x54   : > { %v652_v37 = vshll.u32 %v4020_v58, 16  ;;  %v656_v39 = vshrl.u32 %v4020_v58, 16  ;;  %v662_v44 = vshll.u32 %v4028_v3, 16  ;;  %v355_v14 = vshrl.u32 %v4031_v8, 16  ;;  %v3580_v63 = vld [vmem:[%s4807_s1 + $0x238] sm:$0xff]  ;;  %1981 = vmatpush.bf16.msra.mxu1 %v3556_v56 }
  0x55   : > { %v4047_v45 = vpack.c.b16 %v698_v11, %v697_v20  ;;  %v559_v48 = vsel %vm3704_vm2, %v554_v25, %v558_v53  ;;  %v564_v50 = vrot.slane %v563_v27, 4  ;;  %v648_v51 = vrot.slane %v646_v35, 5  ;;  %v4061_v20 = vld [vmem:[%s3689_s26 + $0x2c] sm:$0x1]  ;;  %2585 = vmatpush.bf16.msra.mxu0 %v3580_v63 }
  0x56   : > { %v705_v0 = vunpack.c.l.b16 %v559_v48  ;;  %v654_v2 = vrot.slane %v652_v37, 5  ;;  %v658_v9 = vrot.slane %v656_v39, 4  ;;  %v664_v13 = vrot.slane %v662_v44, 5 }
  0x57   : > { %4853 = vst [vmem:[#allocation10_spill] sm:$0xff] %v4047_v45  ;;  %v569_v53 = vsel %vm3704_vm2, %v564_v50, %v568_v22  ;;  %v649_v11 = vor.u32 %v648_v51, %v645_v23  ;;  %v357_v25 = vrot.slane %v355_v14, 4  ;;  %v358_v27 = vshll.u32 %v4031_v8, 16 }
  0x58   : > { %v706_v35 = vunpack.c.l.b16 %v569_v53  ;;  %v659_v3 = vor.u32 %v658_v9, %v654_v2  ;;  %v364_v28 = vshll.u32 %v4044_v29, 16  ;;  %v368_v48 = vshrl.u32 %v4044_v29, 16 }
  0x59   : > { %v650_v37 = vrot.slane %v649_v11, 4  ;;  %v360_v39 = vrot.slane %v358_v27, 5  ;;  %v374_v44 = vshll.u32 %v4061_v20, 16  ;;  %v1141_v11 = vrot.slane %v3733_v4, 5 }
  0x5a   : > { %v4069_v58 = vpack.c.b16 %v706_v35, %v705_v0  ;;  %v660_v22 = vrot.slane %v659_v3, 4  ;;  %v366_v23 = vrot.slane %v364_v28, 5  ;;  %v370_v14 = vrot.slane %v368_v48, 4 }
  0x5b   : > { %838 = vmatmul.bf16.gmra.mxu1 %v4047_v45  ;;  %v655_v50 = vsel %vm3704_vm2, %v650_v37, %v654_v2  ;;  %v361_v51 = vor.u32 %v360_v39, %v357_v25  ;;  %v376_v57 = vrot.slane %v374_v44, 5  ;;  %v4854_v0 = vmov 0 }
  0x5c   : > { %858 = vmatmul.bf16.gmra.mxu2 %v4069_v58  ;;  %v665_v56 = vsel %vm3704_vm2, %v660_v22, %v664_v13  ;;  %v713_v63 = vunpack.c.l.b16 %v655_v50  ;;  %v371_v9 = vor.u32 %v370_v14, %v366_v23  ;;  %v4855_v0 = vsel %vm4077_vm5, 4294967295, %v4854_v0 }
  0x5d   : > { %4856 = vst [vmem:[#allocation11_spill] sm:$0xff] %v4855_v0  ;;  %v3126_v28 = vrot.slane %v3717_v49, 9  ;;  %v714_v3 = vunpack.c.l.b16 %v665_v56  ;;  %v362_v53 = vrot.slane %v361_v51, 4  ;;  %v1138_v2 = vrot.slane %v3727_v62, 5 }
  0x5e   : > { %v372_v25 = vrot.slane %v371_v9, 4  ;;  %v3127_v27 = vrot.slane %v3800_v18, 9  ;;  %v1145_v35 = vrot.slane %v3812_v34, 5  ;;  %v1148_v13 = vrot.slane %v3823_v42, 5  ;;  %v3491_v9 = vld [vmem:[%s3689_s26] sm:$0xff] }
  0x5f   : > { %v4087_v48 = vpack.c.b16 %v714_v3, %v713_v63  ;;  %v367_v37 = vsel %vm3704_vm2, %v362_v53, %v366_v23  ;;  %v1139_v49 = vsel %vm4077_vm5, %v3126_v28, %v1138_v2  ;;  %v1140_v39 = vrot.slane %v1138_v2, 4  ;;  %v3492_v28 = vld [vmem:[%s3689_s26 + $0xc] sm:$0xff] }
  0x60   : > { %v377_v62 = vsel %vm3704_vm2, %v372_v25, %v376_v57  ;;  %v689_v4 = vunpack.c.l.b16 %v367_v37  ;;  %v1265_v44 = vunpack.c.l.b16 %v1139_v49  ;;  %v1146_v18 = vsel %vm4077_vm5, %v3127_v27, %v1145_v35  ;;  %v3563_v3 = vld [vmem:[%s4807_s1 + $0x1b0] sm:$0xff] }
  0x61   : > { %878 = vmatmul.bf16.gmra.mxu3 %v4087_v48  ;;  %v690_v34 = vunpack.c.l.b16 %v377_v62  ;;  %v1142_v42 = vsel %vm4077_vm5, %v1140_v39, %v1141_v11  ;;  %v1147_v22 = vrot.slane %v1145_v35, 4  ;;  %v1267_v14 = vunpack.c.l.b16 %v1146_v18  ;;  %2174 = vmatpush.bf16.msra.mxu2 %v3563_v3  ;;  %v3571_v53 = vld [vmem:[%s4807_s1 + $0x1f0] sm:$0xff] }
  0x62   : > { %v1266_v23 = vunpack.c.l.b16 %v1142_v42  ;;  %v3555_v2 = vld [vmem:[%s4807_s1 + $0x170] sm:$0xff]  ;;  %2388 = vmatpush.bf16.msra.mxu3 %v3571_v53  ;;  %v1152_v25 = vrot.slane %v3933_v52, 5  ;;  %v3128_v27 = vrot.slane %v3925_v31, 9  ;;  %v4141_v31 = vld [vmem:[%s3689_s26 + $0x24] sm:$0xff]  ;;  %v1162_v18 = vrot.slane %v4061_v20, 5 }
  0x63   : > { %v4100_v50 = vpack.c.b16 %v690_v34, %v689_v4  ;;  %v1149_v51 = vsel %vm4077_vm5, %v1147_v22, %v1148_v13  ;;  %v3579_v11 = vld [vmem:[%s4807_s1 + $0x230] sm:$0xff]  ;;  %1982 = vmatpush.bf16.msra.mxu1 %v3555_v2  ;;  %v1155_v13 = vrot.slane %v3941_v60, 5  ;;  %v1159_v4 = vrot.slane %v4044_v29, 5  ;;  %v3562_v42 = vld [vmem:[%s4807_s1 + $0x1a8] sm:$0xff]  ;;  %v3617_v2 = vld [vmem:[%s3689_s26 + $0x38] sm:$0x1] }
  0x64   : > { %v1297_v57 = vpack.c.b16 %v1266_v23, %v1265_v44  ;;  %v1268_v56 = vunpack.c.l.b16 %v1149_v51  ;;  %2586 = vmatpush.bf16.msra.mxu0 %v3579_v11  ;;  %v1154_v35 = vrot.slane %v1152_v25, 4  ;;  %v1153_v37 = vsel %vm4077_vm5, %v3128_v27, %v1152_v25  ;;  %v3570_v20 = vld [vmem:[%s4807_s1 + $0x1e8] sm:$0xff] }
  0x65   : > { %818 = vmatmul.bf16.gmra.mxu0 %v4100_v50  ;;  %v1269_v52 = vunpack.c.l.b16 %v1153_v37  ;;  %v3129_v60 = vrot.slane %v4031_v8, 9  ;;  %v1161_v44 = vrot.slane %v1159_v4, 4  ;;  %2175 = vmatpush.bf16.msra.mxu2 %v3562_v42  ;;  %v3554_v23 = vld [vmem:[%s4807_s1 + $0x168] sm:$0xff]  ;;  %v1169_v11 = vrot.slane %v3617_v2, 5 }
  0x66   : > { %v4105_v63 = vpack.c.b16 %v1268_v56, %v1267_v14  ;;  %v1156_v49 = vsel %vm4077_vm5, %v1154_v35, %v1155_v13  ;;  %v3578_v14 = vld [vmem:[%s4807_s1 + $0x228] sm:$0xff]  ;;  %2389 = vmatpush.bf16.msra.mxu3 %v3570_v20  ;;  %v1180_v2 = vrot.slane %v3853_v10, 5 }
  0x67   : > { %v1270_v39 = vunpack.c.l.b16 %v1156_v49  ;;  %v1160_v34 = vsel %vm4077_vm5, %v3129_v60, %v1159_v4  ;;  %v1163_v29 = vsel %vm4077_vm5, %v1161_v44, %v1162_v18  ;;  %1983 = vmatpush.bf16.msra.mxu1 %v3554_v23  ;;  %v4189_v4 = vld [vmem:[%s3689_s26 + $0x3c] sm:$0xff]  ;;  %v3131_v60 = vrot.slane %v3736_v5, 9 }
  0x68   : > { %v1271_v8 = vunpack.c.l.b16 %v1160_v34  ;;  %v1272_v22 = vunpack.c.l.b16 %v1163_v29  ;;  %2587 = vmatpush.bf16.msra.mxu0 %v3578_v14  ;;  %v1176_v18 = vrot.slane %v3753_v19, 5  ;;  %v3561_v5 = vld [vmem:[%s4807_s1 + $0x1a0] sm:$0xff] }
  0x69   : > { %v4135_v62 = vpack.c.b16 %v1270_v39, %v1269_v52  ;;  %v1173_v52 = vrot.slane %v3747_v15, 5  ;;  %2176 = vmatpush.bf16.msra.mxu2 %v3561_v5  ;;  %v3569_v23 = vld [vmem:[%s4807_s1 + $0x1e0] sm:$0xff] }
  0x6a   : > { %v4163_v51 = vpack.c.b16 %v1272_v22, %v1271_v8  ;;  %v3553_v14 = vld [vmem:[%s4807_s1 + $0x160] sm:$0xff]  ;;  %2390 = vmatpush.bf16.msra.mxu3 %v3569_v23  ;;  %v1187_v23 = vrot.slane %v3970_v32, 5 }
  0x6b   : > { %1036 = vmatmul.bf16.vlgmr.msrb.gmra.mxu1 %v3491_v9  ;;  %v4169_v9 = vld [vmem:[%s3689_s26 + $0x30] sm:$0xff]  ;;  %v1175_v44 = vrot.slane %v1173_v52, 4  ;;  %v1174_v15 = vsel %vm4077_vm5, %v3131_v60, %v1173_v52 }
  0x6c   : > { %1385 = vmatmul.bf16.vlgmr.msrb.gmra.mxu2 %v1297_v57  ;;  %v3615_v57 = vld [vmem:[%s3689_s26 + $0x34] sm:$0xf]  ;;  %v1275_v19 = vunpack.c.l.b16 %v1174_v15  ;;  %1984 = vmatpush.bf16.msra.mxu1 %v3553_v14 }
  0x6d   : > { %v1166_v56 = vrot.slane %v3615_v57, 5  ;;  %v1177_v8 = vsel %vm4077_vm5, %v1175_v44, %v1176_v18  ;;  %v4263_v14 = vld [vmem:[%s3689_s26 + $0x54] sm:$0xff] }
  0x6e   : > { %v1276_v20 = vunpack.c.l.b16 %v1177_v8  ;;  %4864 = vst [vmem:[#allocation19_spill] sm:$0xff] %v4263_v14 }
  0x6f   : > { %v1168_v53 = vrot.slane %v1166_v56, 4 }
  0x71   : > { %1577 = vmatmul.bf16.vlgmr.msrb.gmra.mxu3 %v3492_v28  ;;  %v1170_v27 = vsel %vm4077_vm5, %v1168_v53, %v1169_v11  ;;  %v3577_v53 = vld [vmem:[%s4807_s1 + $0x220] sm:$0xff] }
  0x72   : > { %v1274_v13 = vunpack.c.l.b16 %v1170_v27  ;;  %2588 = vmatpush.bf16.msra.mxu0 %v3577_v53  ;;  %v3132_v27 = vrot.slane %v3834_v54, 9  ;;  %v3133_v53 = vrot.slane %v3944_v61, 9 }
  0x74   : > { %v1181_v44 = vsel %vm4077_vm5, %v3132_v27, %v1180_v2  ;;  %v1190_v27 = vrot.slane %v3973_v33, 5  ;;  %v3560_v33 = vld [vmem:[%s4807_s1 + $0x198] sm:$0xff] }
  0x75   : > { %1791 = vmatmul.bf16.vlgmr.msrb.gmra.mxu0 %v3914_v7  ;;  %v4125_v7 = vld [vmem:[%s3689_s26 + $0x18] sm:$0xff]  ;;  %v1277_v15 = vunpack.c.l.b16 %v1181_v44  ;;  %2177 = vmatpush.bf16.msra.mxu2 %v3560_v33 }
  0x7b   : > { %1041 = vmatmul.bf16.gmra.mxu1 %v3492_v28  ;;  %v3616_v28 = vld [vmem:[%s3689_s26 + $0x30] sm:$0xf] }
  0x7c   : > { %1390 = vmatmul.bf16.gmra.mxu2 %v4105_v63  ;;  %v3130_v3 = vrot.slane %v3616_v28, 9 }
  0x7e   : > { %v1167_v25 = vsel %vm4077_vm5, %v3130_v3, %v1166_v56  ;;  %v4222_v3 = vpack.c.b16 %v1276_v20, %v1275_v19 }
  0x7f   : > { %v1273_v35 = vunpack.c.l.b16 %v1167_v25  ;;  %v4233_v25 = vld [vmem:[%s3689_s26 + $0x48] sm:$0xff] }
  0x80   : > { %4859 = vst [vmem:[#allocation14_spill] sm:$0xff] %v4222_v3 }
  0x81   : > { %1582 = vmatmul.bf16.gmra.mxu3 %v4125_v7  ;;  %v4181_v49 = vpack.c.b16 %v1274_v13, %v1273_v35  ;;  %4860 = vst [vmem:[#allocation15_spill] sm:$0xff] %v4233_v25  ;;  %v1182_v35 = vrot.slane %v1180_v2, 4  ;;  %v1183_v13 = vrot.slane %v3861_v17, 5  ;;  %v1189_v2 = vrot.slane %v1187_v23, 4 }
  0x83   : > { %v1184_v18 = vsel %vm4077_vm5, %v1182_v35, %v1183_v13  ;;  %v1191_v61 = vsel %vm4077_vm5, %v1189_v2, %v1190_v27 }
  0x84   : > { %v1278_v54 = vunpack.c.l.b16 %v1184_v18  ;;  %v1188_v18 = vsel %vm4077_vm5, %v3133_v53, %v1187_v23  ;;  %v3552_v23 = vld [vmem:[%s4807_s1 + $0x158] sm:$0xff] }
  0x85   : > { %1796 = vmatmul.bf16.gmra.mxu0 %v4023_v40  ;;  %1985 = vmatpush.bf16.msra.mxu1 %v3552_v23  ;;  %v3619_v23 = vld [vmem:[%s3689_s26 + $0x60] sm:$0xf] }
  0x86   : > { %v4257_v20 = vpack.c.b16 %v1278_v54, %v1277_v15  ;;  %v1279_v15 = vunpack.c.l.b16 %v1188_v18  ;;  %v1280_v54 = vunpack.c.l.b16 %v1191_v61  ;;  %v3618_v61 = vld [vmem:[%s3689_s26 + $0x64] sm:$0xf] }
  0x87   : > { %v1194_v33 = vrot.slane %v3618_v61, 5 }
  0x88   : > { %4863 = vst [vmem:[#allocation18_spill] sm:$0xff] %v4257_v20  ;;  %v4294_v27 = vpack.c.b16 %v1280_v54, %v1279_v15  ;;  %v3134_v15 = vrot.slane %v3619_v23, 9 }
  0x89   : > { %v1196_v54 = vrot.slane %v1194_v33, 4 }
  0x8a   : > { %4866 = vst [vmem:[#allocation21_spill] sm:$0xff] %v4294_v27 }
  0x8b   : > { %1046 = vmatmul.bf16.gmra.mxu1 %v4125_v7 }
  0x8c   : > { %1395 = vmatmul.bf16.gmra.mxu2 %v4135_v62 }
  0x91   : > { %1587 = vmatmul.bf16.gmra.mxu3 %v4141_v31 }
  0x95   : > { %1801 = vmatmul.bf16.gmra.mxu0 %v4100_v50 }
  0x9b   : > { %1051 = vmatmul.bf16.gmra.mxu1 %v4141_v31 }
  0x9c   : > { %1400 = vmatmul.bf16.gmra.mxu2 %v4163_v51 }
  0xa1   : > { %1592 = vmatmul.bf16.gmra.mxu3 %v4169_v9 }
  0xa5   : > { %1806 = vmatmul.bf16.gmra.mxu0 %v3722_v59 }
  0xa8   : > { %v4179_v37 = vpop.f32.mrf.mxu1 }
  0xab   : > { %v4184_v39 = vpop.f32.mrf.mxu0  ;;  %1056 = vmatmul.bf16.gmra.mxu1 %v4169_v9 }
  0xac   : > { %1405 = vmatmul.bf16.gmra.mxu2 %v4181_v49 }
  0xae   : > { %v4193_v34 = vpop.f32.mrf.mxu2 }
  0xaf   : > { %v4195_v29 = vpop.f32.mrf.mxu3 }
  0xb0   : > { %4857 = vst [vmem:[#allocation12_spill] sm:$0xff] %v4195_v29  ;;  %v4197_v42 = vpop.f32.mrf.mxu1 }
  0xb1   : > { %1597 = vmatmul.bf16.gmra.mxu3 %v4189_v4 }
  0xb3   : > { %v4207_v22 = vpop.f32.mrf.mxu0 }
  0xb5   : > { %1811 = vmatmul.bf16.gmra.mxu0 %v3818_v38 }
  0xb6   : > { %v4216_v57 = vpop.f32.mrf.mxu2 }
  0xb7   : > { %v4218_v56 = vpop.f32.mrf.mxu3 }
  0xb8   : > { %4858 = vst [vmem:[#allocation13_spill] sm:$0xff] %v4218_v56  ;;  %v4220_v28 = vpop.f32.mrf.mxu1 }
  0xbb   : > { %1061 = vmatmul.bf16.gmra.mxu1 %v4189_v4 }
  0xbc   : > { %v4229_v11 = vpop.f32.mrf.mxu0  ;;  %1410 = vmatmul.bf16.gmra.mxu2 %v4222_v3 }
  0xbe   : > { %v4237_v52 = vpop.f32.mrf.mxu2 }
  0xbf   : > { %v4239_v60 = vpop.f32.mrf.mxu3 }
  0xc0   : > { %4861 = vst [vmem:[#allocation16_spill] sm:$0xff] %v4239_v60  ;;  %v4241_v10 = vpop.f32.mrf.mxu1  ;;  %v3620_v60 = vld [vmem:[%s3689_s26 + $0x68] sm:$0x1] }
  0xc1   : > { %1602 = vmatmul.bf16.gmra.mxu3 %v4233_v25  ;;  %v1197_v56 = vrot.slane %v3620_v60, 5 }
  0xc4   : > { %v4249_v17 = vpop.f32.mrf.mxu0 }
  0xc5   : > { %1816 = vmatmul.bf16.gmra.mxu0 %v3936_v55 }
  0xc6   : > { %v4251_v8 = vpop.f32.mrf.mxu2 }
  0xc7   : > { %v4253_v5 = vpop.f32.mrf.mxu3 }
  0xc8   : > { %4862 = vst [vmem:[#allocation17_spill] sm:$0xff] %v4253_v5  ;;  %v4255_v19 = vpop.f32.mrf.mxu1 }
  0xcb   : > { %1066 = vmatmul.bf16.gmra.mxu1 %v4233_v25 }
  0xcc   : > { %1415 = vmatmul.bf16.gmra.mxu2 %v4257_v20 }
  0xce   : > { %v4267_v35 = vpop.f32.mrf.mxu2 }
  0xd0   : > { %v4269_v13 = vpop.f32.mrf.mxu0  ;;  %v4271_v44 = vpop.f32.mrf.mxu3 }
  0xd1   : > { %4865 = vst [vmem:[#allocation20_spill] sm:$0xff] %v4271_v44  ;;  %1607 = vmatmul.bf16.gmra.mxu3 %v4263_v14  ;;  %v4274_v32 = vpop.f32.mrf.mxu1  ;;  %v3568_v44 = vld [vmem:[%s4807_s1 + $0x1d8] sm:$0xff] }
  0xd2   : > { %2391 = vmatpush.bf16.msra.mxu3 %v3568_v44  ;;  %v4307_v44 = vld [vmem:[%s3689_s26 + $0x60] sm:$0xff] }
  0xd3   : > { %4868 = vst [vmem:[#allocation23_spill] sm:$0xff] %v4307_v44 }
  0xd5   : > { %1821 = vmatmul.bf16.gmra.mxu0 %v4047_v45  ;;  %v3576_v45 = vld [vmem:[%s4807_s1 + $0x218] sm:$0xff] }
  0xd6   : > { %v4290_v53 = vpop.f32.mrf.mxu2  ;;  %2589 = vmatpush.bf16.msra.mxu0 %v3576_v45  ;;  %v1198_v45 = vsel %vm4077_vm5, %v1196_v54, %v1197_v56 }
  0xd7   : > { %v1282_v60 = vunpack.c.l.b16 %v1198_v45  ;;  %v3622_v45 = vld [vmem:[%s3689_s26 + $0x6c] sm:$0xf] }
  0xd8   : > { %v4292_v2 = vpop.f32.mrf.mxu0  ;;  %v4299_v5 = vpop.f32.mrf.mxu3 }
  0xd9   : > { %v4296_v18 = vpop.f32.mrf.mxu1  ;;  %4867 = vst [vmem:[#allocation22_spill] sm:$0xff] %v4299_v5 }
  0xdb   : > { %1071 = vmatmul.bf16.gmra.mxu1 %v4263_v14  ;;  %v1195_v14 = vsel %vm4077_vm5, %v3134_v15, %v1194_v33  ;;  %v3621_v33 = vld [vmem:[%s3689_s26 + $0x70] sm:$0xf] }
  0xdc   : > { %1420 = vmatmul.bf16.gmra.mxu2 %v4294_v27  ;;  %v1281_v20 = vunpack.c.l.b16 %v1195_v14  ;;  %v1201_v15 = vrot.slane %v3621_v33, 5  ;;  %v4338_v14 = vld [vmem:[%s3689_s26 + $0x6c] sm:$0xff] }
  0xde   : > { %v4327_v29 = vpack.c.b16 %v1282_v60, %v1281_v20  ;;  %v3623_v20 = vld [vmem:[%s3689_s26 + $0x74] sm:$0x1] }
  0xdf   : > { %v4311_v61 = vpop.f32.mrf.mxu2  ;;  %v1204_v60 = vrot.slane %v3623_v20, 5 }
  0xe0   : > { %4869 = vst [vmem:[#allocation24_spill] sm:$0xff] %v4311_v61 }
  0xe1   : > { %1612 = vmatmul.bf16.gmra.mxu3 %v4307_v44  ;;  %v4314_v5 = vpop.f32.mrf.mxu1  ;;  %4872 = vst [vmem:[#allocation27_spill] sm:$0xff] %v4327_v29 }
  0xe2   : > { %v4320_v27 = vpop.f32.mrf.mxu0 }
  0xe4   : > { %v4322_v23 = vpop.f32.mrf.mxu3 }
  0xe5   : > { %4870 = vst [vmem:[#allocation25_spill] sm:$0xff] %v4322_v23  ;;  %1826 = vmatmul.bf16.gmra.mxu0 %v3749_v16  ;;  %v3135_v23 = vrot.slane %v3622_v45, 9  ;;  %v1203_v16 = vrot.slane %v1201_v15, 4  ;;  %v3559_v45 = vld [vmem:[%s4807_s1 + $0x190] sm:$0xff] }
  0xe6   : > { %2178 = vmatpush.bf16.msra.mxu2 %v3559_v45 }
  0xe7   : > { %v4325_v55 = vpop.f32.mrf.mxu2 }
  0xe8   : > { %4871 = vst [vmem:[#allocation26_spill] sm:$0xff] %v4325_v55 }
  0xe9   : > { %v1037_v25 = vpop.f32.mrf.mxu1 }
  0xea   : > { %v4330_v3 = vpop.f32.mrf.mxu0  ;;  %v1038_v56 = vadd.f32 %v1037_v25, %v4184_v39  ;;  %v1202_v39 = vsel %vm4077_vm5, %v3135_v23, %v1201_v15  ;;  %v1205_v25 = vsel %vm4077_vm5, %v1203_v16, %v1204_v60  ;;  %v3567_v23 = vld [vmem:[%s4807_s1 + $0x1d0] sm:$0xff] }
  0xeb   : > { %1076 = vmatmul.bf16.gmra.mxu1 %v4307_v44  ;;  %v1283_v20 = vunpack.c.l.b16 %v1202_v39  ;;  %v1284_v61 = vunpack.c.l.b16 %v1205_v25  ;;  %v3551_v16 = vld [vmem:[%s4807_s1 + $0x150] sm:$0xff]  ;;  %2392 = vmatpush.bf16.msra.mxu3 %v3567_v23 }
  0xec   : > { %v4334_v54 = vpop.f32.mrf.mxu3  ;;  %1425 = vmatmul.bf16.gmra.mxu2 %v4327_v29  ;;  %1986 = vmatpush.bf16.msra.mxu1 %v3551_v16  ;;  %v3575_v25 = vld [vmem:[%s4807_s1 + $0x210] sm:$0xff] }
  0xed   : > { %4873 = vst [vmem:[#allocation28_spill] sm:$0xff] %v4334_v54  ;;  %v4360_v60 = vpack.c.b16 %v1284_v61, %v1283_v20  ;;  %2590 = vmatpush.bf16.msra.mxu0 %v3575_v25  ;;  %v3136_v61 = vrot.slane %v3865_v21, 9 }
  0xef   : > { %v1386_v55 = vpop.f32.mrf.mxu2 }
  0xf0   : > { %v1466_v38 = vadd.f32 %v1386_v55, %v1038_v56 }
  0xf1   : > { %1617 = vmatmul.bf16.gmra.mxu3 %v4338_v14  ;;  %v1039_v33 = vpop.f32.mrf.mxu1 }
  0xf2   : > { %v1792_v54 = vpop.f32.mrf.mxu0  ;;  %v1040_v29 = vadd.f32 %v1039_v33, %v4207_v22 }
  0xf4   : > { %v1578_v44 = vpop.f32.mrf.mxu3 }
  0xf5   : > { %1831 = vmatmul.bf16.gmra.mxu0 %v3856_v12  ;;  %v1658_v55 = vadd.f32 %v1578_v44, %v1466_v38  ;;  %v1208_v38 = vrot.slane %v3887_v46, 5  ;;  %v1211_v46 = vrot.slane %v3890_v47, 5 }
  0xf7   : > { %v1388_v22 = vpop.f32.mrf.mxu2  ;;  %v4358_v15 = vadd.f32 %v1792_v54, %v1658_v55  ;;  %v1210_v20 = vrot.slane %v1208_v38, 4 }
  0xf8   : > { %v1467_v56 = vadd.f32 %v1388_v22, %v1040_v29  ;;  %v4370_v29 = vld [vmem:[%s3689_s26 + $0x78] sm:$0xff]  ;;  %v1209_v22 = vsel %vm4077_vm5, %v3136_v61, %v1208_v38  ;;  %v1215_v61 = vrot.slane %v3998_v6, 5 }
  0xf9   : > { %v1042_v33 = vpop.f32.mrf.mxu1 }
  0xfa   : > { %v1794_v44 = vpop.f32.mrf.mxu0  ;;  %v1043_v39 = vadd.f32 %v1042_v33, %v4229_v11 }
  0xfb   : > { %1081 = vmatmul.bf16.gmra.mxu1 %v4338_v14 }
  0xfc   : > { %v1580_v45 = vpop.f32.mrf.mxu3  ;;  %1430 = vmatmul.bf16.gmra.mxu2 %v4360_v60 }
  0xfd   : > { %v1659_v54 = vadd.f32 %v1580_v45, %v1467_v56  ;;  %v1212_v56 = vsel %vm4077_vm5, %v1210_v20, %v1211_v46  ;;  %v1285_v45 = vunpack.c.l.b16 %v1209_v22  ;;  %v4392_v22 = vld [vmem:[%s3689_s26 + $0x84] sm:$0xff] }
  0xfe   : > { %v1286_v47 = vunpack.c.l.b16 %v1212_v56  ;;  %v1217_v56 = vrot.slane %v1215_v61, 4 }
  0xff   : > { %v1391_v55 = vpop.f32.mrf.mxu2  ;;  %v4374_v11 = vadd.f32 %v1794_v44, %v1659_v54 }
 0x100   : > { %v1468_v23 = vadd.f32 %v1391_v55, %v1043_v39 }
 0x101   : > { %4874 = vst [vmem:[#allocation29_spill] sm:$0xff] %v4374_v11  ;;  %1622 = vmatmul.bf16.gmra.mxu3 %v4370_v29  ;;  %v1044_v16 = vpop.f32.mrf.mxu1  ;;  %v4385_v11 = vpack.c.b16 %v1286_v47, %v1285_v45 }
 0x102   : > { %v1797_v33 = vpop.f32.mrf.mxu0  ;;  %v1045_v25 = vadd.f32 %v1044_v16, %v4249_v17 }
 0x104   : > { %v1583_v21 = vpop.f32.mrf.mxu3 }
 0x105   : > { %1836 = vmatmul.bf16.gmra.mxu0 %v3965_v26  ;;  %v1660_v44 = vadd.f32 %v1583_v21, %v1468_v23  ;;  %v3137_v23 = vrot.slane %v3978_v43, 9  ;;  %v3558_v43 = vld [vmem:[%s4807_s1 + $0x188] sm:$0xff] }
 0x106   : > { %2179 = vmatpush.bf16.msra.mxu2 %v3558_v43  ;;  %v3625_v43 = vld [vmem:[%s3689_s26 + $0x90] sm:$0xf] }
 0x107   : > { %v1393_v39 = vpop.f32.mrf.mxu2  ;;  %v4383_v54 = vadd.f32 %v1797_v33, %v1660_v44  ;;  %v1218_v33 = vrot.slane %v4008_v24, 5  ;;  %v1216_v45 = vsel %vm4077_vm5, %v3137_v23, %v1215_v61  ;;  %v3566_v61 = vld [vmem:[%s4807_s1 + $0x1c8] sm:$0xff] }
 0x108   : > { %v1469_v55 = vadd.f32 %v1393_v39, %v1045_v25  ;;  %2393 = vmatpush.bf16.msra.mxu3 %v3566_v61 }
 0x109   : > { %v1047_v38 = vpop.f32.mrf.mxu1  ;;  %v1219_v47 = vsel %vm4077_vm5, %v1217_v56, %v1218_v33  ;;  %v3624_v33 = vld [vmem:[%s3689_s26 + $0x94] sm:$0xf] }
 0x10a   : > { %v1799_v20 = vpop.f32.mrf.mxu0  ;;  %v1048_v46 = vadd.f32 %v1047_v38, %v4269_v13  ;;  %v1288_v38 = vunpack.c.l.b16 %v1219_v47 }
 0x10b   : > { %1086 = vmatmul.bf16.gmra.mxu1 %v4370_v29 }
 0x10c   : > { %v1585_v17 = vpop.f32.mrf.mxu3  ;;  %1435 = vmatmul.bf16.gmra.mxu2 %v4385_v11 }
 0x10d   : > { %v1661_v16 = vadd.f32 %v1585_v17, %v1469_v55  ;;  %v1287_v55 = vunpack.c.l.b16 %v1216_v45  ;;  %v3574_v45 = vld [vmem:[%s4807_s1 + $0x208] sm:$0xff] }
 0x10e   : > { %2591 = vmatpush.bf16.msra.mxu0 %v3574_v45 }
 0x10f   : > { %v1396_v25 = vpop.f32.mrf.mxu2  ;;  %v4396_v21 = vadd.f32 %v1799_v20, %v1661_v16  ;;  %v4416_v23 = vpack.c.b16 %v1288_v38, %v1287_v55  ;;  %v3626_v38 = vld [vmem:[%s3689_s26 + $0x98] sm:$0x1] }
 0x110   : > { %v1470_v6 = vadd.f32 %v1396_v25, %v1048_v46  ;;  %v1222_v25 = vrot.slane %v3624_v33, 5 }
 0x111   : > { %1627 = vmatmul.bf16.gmra.mxu3 %v4392_v22  ;;  %v1049_v13 = vpop.f32.mrf.mxu1 }
 0x112   : > { %v1802_v44 = vpop.f32.mrf.mxu0  ;;  %v1050_v39 = vadd.f32 %v1049_v13, %v4292_v2  ;;  %v3550_v2 = vld [vmem:[%s4807_s1 + $0x148] sm:$0xff]  ;;  %v1224_v55 = vrot.slane %v1222_v25, 4 }
 0x113   : > { %1987 = vmatpush.bf16.msra.mxu1 %v3550_v2 }
 0x114   : > { %v1588_v24 = vpop.f32.mrf.mxu3 }
 0x115   : > { %1841 = vmatmul.bf16.gmra.mxu0 %v4069_v58  ;;  %v1662_v20 = vadd.f32 %v1588_v24, %v1470_v6  ;;  %v3138_v24 = vrot.slane %v3625_v43, 9 }
 0x117   : > { %v1398_v46 = vpop.f32.mrf.mxu2  ;;  %v4414_v17 = vadd.f32 %v1802_v44, %v1662_v20  ;;  %v1225_v20 = vrot.slane %v3626_v38, 5 }
 0x118   : > { %v1471_v16 = vadd.f32 %v1398_v46, %v1050_v39  ;;  %v4426_v39 = vld [vmem:[%s3689_s26 + $0x90] sm:$0xff] }
 0x119   : > { %v1052_v56 = vpop.f32.mrf.mxu1 }
 0x11a   : > { %v1804_v6 = vpop.f32.mrf.mxu0  ;;  %v1053_v13 = vadd.f32 %v1052_v56, %v4320_v27  ;;  %v1223_v56 = vsel %vm4077_vm5, %v3138_v24, %v1222_v25 }
 0x11b   : > { %1091 = vmatmul.bf16.gmra.mxu1 %v4392_v22  ;;  %v1289_v43 = vunpack.c.l.b16 %v1223_v56  ;;  %v4447_v56 = vld [vmem:[%s3689_s26 + $0x9c] sm:$0xff] }
 0x11c   : > { %v1590_v47 = vpop.f32.mrf.mxu3  ;;  %1440 = vmatmul.bf16.gmra.mxu2 %v4416_v23  ;;  %4878 = vst [vmem:[#allocation33_spill] sm:$0xff] %v4447_v56 }
 0x11d   : > { %v1663_v44 = vadd.f32 %v1590_v47, %v1471_v16  ;;  %v1226_v16 = vsel %vm4077_vm5, %v1224_v55, %v1225_v20  ;;  %v3627_v55 = vld [vmem:[%s3689_s26 + $0xa0] sm:$0xf] }
 0x11e   : > { %v1290_v38 = vunpack.c.l.b16 %v1226_v16  ;;  %v1229_v20 = vrot.slane %v3627_v55, 5 }
 0x11f   : > { %v1401_v61 = vpop.f32.mrf.mxu2  ;;  %v4430_v27 = vadd.f32 %v1804_v6, %v1663_v44 }
 0x120   : > { %v1472_v2 = vadd.f32 %v1401_v61, %v1053_v13  ;;  %v4441_v25 = vpack.c.b16 %v1290_v38, %v1289_v43 }
 0x121   : > { %4875 = vst [vmem:[#allocation30_spill] sm:$0xff] %v4430_v27  ;;  %1632 = vmatmul.bf16.gmra.mxu3 %v4426_v39  ;;  %v1054_v46 = vpop.f32.mrf.mxu1 }
 0x122   : > { %v1807_v33 = vpop.f32.mrf.mxu0  ;;  %v1055_v45 = vadd.f32 %v1054_v46, %v4330_v3  ;;  %4877 = vst [vmem:[#allocation32_spill] sm:$0xff] %v4441_v25 }
 0x124   : > { %v1593_v47 = vpop.f32.mrf.mxu3 }
 0x125   : > { %1846 = vmatmul.bf16.gmra.mxu0 %v3765_v36  ;;  %v1664_v6 = vadd.f32 %v1593_v47, %v1472_v2  ;;  %v3628_v2 = vld [vmem:[%s3689_s26 + $0x9c] sm:$0xf]  ;;  %v1231_v47 = vrot.slane %v1229_v20, 4 }
 0x126   : > { %v3139_v16 = vrot.slane %v3628_v2, 9  ;;  %v3557_v2 = vld [vmem:[%s4807_s1 + $0x180] sm:$0xff] }
 0x127   : > { %v1403_v13 = vpop.f32.mrf.mxu2  ;;  %v4439_v44 = vadd.f32 %v1807_v33, %v1664_v6  ;;  %v3629_v33 = vld [vmem:[%s3689_s26 + $0xa4] sm:$0x1]  ;;  %2180 = vmatpush.bf16.msra.mxu2 %v3557_v2 }
 0x128   : > { %v1473_v61 = vadd.f32 %v1403_v13, %v1055_v45  ;;  %v1232_v6 = vrot.slane %v3629_v33, 5 }
 0x129   : > { %4876 = vst [vmem:[#allocation31_spill] sm:$0xff] %v4439_v44  ;;  %v1057_v24 = vpop.f32.mrf.mxu1  ;;  %v1230_v44 = vsel %vm4077_vm5, %v3139_v16, %v1229_v20  ;;  %v3565_v20 = vld [vmem:[%s4807_s1 + $0x1c0] sm:$0xff] }
 0x12a   : > { %v1809_v27 = vpop.f32.mrf.mxu0  ;;  %v1058_v45 = vadd.f32 %v1057_v24, %v4179_v37  ;;  %v1291_v37 = vunpack.c.l.b16 %v1230_v44  ;;  %2394 = vmatpush.bf16.msra.mxu3 %v3565_v20  ;;  %v3632_v20 = vld [vmem:[%s3689_s26 + $0xb0] sm:$0x1] }
 0x12b   : > { %1096 = vmatmul.bf16.gmra.mxu1 %v4426_v39 }
 0x12c   : > { %v1595_v3 = vpop.f32.mrf.mxu3  ;;  %1445 = vmatmul.bf16.gmra.mxu2 %v4441_v25  ;;  %v4519_v25 = vld [vmem:[%s3689_s26 + $0xc8] sm:$0x1] }
 0x12d   : > { %v1665_v46 = vadd.f32 %v1595_v3, %v1473_v61  ;;  %v1233_v61 = vsel %vm4077_vm5, %v1231_v47, %v1232_v6 }
 0x12f   : > { %v1406_v43 = vpop.f32.mrf.mxu2  ;;  %v4452_v38 = vadd.f32 %v1809_v27, %v1665_v46  ;;  %v1292_v27 = vunpack.c.l.b16 %v1233_v61  ;;  %v3549_v46 = vld [vmem:[%s4807_s1 + $0x140] sm:$0xff] }
 0x130   : > { %v1474_v13 = vadd.f32 %v1406_v43, %v1058_v45  ;;  %1988 = vmatpush.bf16.msra.mxu1 %v3549_v46  ;;  %v1239_v46 = vrot.slane %v3632_v20, 5 }
 0x131   : > { %4879 = vst [vmem:[#allocation34_spill] sm:$0xff] %v4452_v38  ;;  %1637 = vmatmul.bf16.gmra.mxu3 %v4447_v56  ;;  %v1059_v55 = vpop.f32.mrf.mxu1  ;;  %v4472_v45 = vpack.c.b16 %v1292_v27, %v1291_v37 }
 0x132   : > { %v1812_v3 = vpop.f32.mrf.mxu0  ;;  %v1060_v16 = vadd.f32 %v1059_v55, %v4197_v42 }
 0x133   : > { %4881 = vst [vmem:[#allocation36_spill] sm:$0xff] %v4472_v45 }
 0x134   : > { %v1598_v33 = vpop.f32.mrf.mxu3 }
 0x135   : > { %1851 = vmatmul.bf16.gmra.mxu0 %v3882_v41  ;;  %v1666_v24 = vadd.f32 %v1598_v33, %v1474_v13  ;;  %v3630_v13 = vld [vmem:[%s3689_s26 + $0xac] sm:$0xf]  ;;  %v3573_v33 = vld [vmem:[%s4807_s1 + $0x200] sm:$0xff] }
 0x136   : > { %v1236_v61 = vrot.slane %v3630_v13, 5  ;;  %2592 = vmatpush.bf16.msra.mxu0 %v3573_v33 }
 0x137   : > { %v1408_v47 = vpop.f32.mrf.mxu2  ;;  %v4470_v44 = vadd.f32 %v1812_v3, %v1666_v24  ;;  %v4481_v3 = vld [vmem:[%s3689_s26 + $0xa8] sm:$0xff] }
 0x138   : > { %v1475_v6 = vadd.f32 %v1408_v47, %v1060_v16  ;;  %4882 = vst [vmem:[#allocation37_spill] sm:$0xff] %v4481_v3  ;;  %v3631_v24 = vld [vmem:[%s3689_s26 + $0xa8] sm:$0xf]  ;;  %v1238_v27 = vrot.slane %v1236_v61, 4 }
 0x139   : > { %4880 = vst [vmem:[#allocation35_spill] sm:$0xff] %v4470_v44  ;;  %v1062_v43 = vpop.f32.mrf.mxu1  ;;  %v3140_v37 = vrot.slane %v3631_v24, 9 }
 0x13a   : > { %v1814_v2 = vpop.f32.mrf.mxu0  ;;  %v1063_v16 = vadd.f32 %v1062_v43, %v4220_v28  ;;  %v1240_v33 = vsel %vm4077_vm5, %v1238_v27, %v1239_v46  ;;  %v4495_v43 = vld [vmem:[%s3689_s26 + $0xc0] sm:$0xf] }
 0x13b   : > { %1101 = vmatmul.bf16.gmra.mxu1 %v4447_v56  ;;  %v1294_v20 = vunpack.c.l.b16 %v1240_v33  ;;  %4884 = vst [vmem:[#allocation39_spill] sm:$0xff] %v4495_v43  ;;  %v1691_v27 = vshrl.u32 %v4495_v43, 16 }
 0x13c   : > { %v1600_v42 = vpop.f32.mrf.mxu3  ;;  %1450 = vmatmul.bf16.gmra.mxu2 %v4472_v45 }
 0x13d   : > { %v1667_v55 = vadd.f32 %v1600_v42, %v1475_v6  ;;  %v1237_v6 = vsel %vm4077_vm5, %v3140_v37, %v1236_v61 }
 0x13e   : > { %v1293_v45 = vunpack.c.l.b16 %v1237_v6  ;;  %v4888_v6 = vld [vmem:[#allocation8_spill] sm:$0xff] }
 0x13f   : > { %v1411_v47 = vpop.f32.mrf.mxu2  ;;  %v4486_v44 = vadd.f32 %v1814_v2, %v1667_v55  ;;  %v1243_v33 = vrot.slane %v4888_v6, 5  ;;  %v4890_v6 = vld [vmem:[#allocation9_spill] sm:$0xff] }
 0x140   : > { %v1476_v13 = vadd.f32 %v1411_v47, %v1063_v16  ;;  %v4499_v16 = vld [vmem:[%s3689_s26 + $0xc4] sm:$0xf]  ;;  %v4503_v37 = vpack.c.b16 %v1294_v20, %v1293_v45  ;;  %v1693_v45 = vrot.slane %v1691_v27, 4  ;;  %v4513_v20 = vld [vmem:[%s3689_s26 + $0xb4] sm:$0xff] }
 0x141   : > { %4883 = vst [vmem:[#allocation38_spill] sm:$0xff] %v4486_v44  ;;  %1642 = vmatmul.bf16.gmra.mxu3 %v4481_v3  ;;  %v1064_v38 = vpop.f32.mrf.mxu1 }
 0x142   : > { %v1817_v42 = vpop.f32.mrf.mxu0  ;;  %v1065_v2 = vadd.f32 %v1064_v38, %v4241_v10  ;;  %4885 = vst [vmem:[#allocation40_spill] sm:$0xff] %v4499_v16  ;;  %v1704_v10 = vshrl.u32 %v4499_v16, 16 }
 0x143   : > { %4887 = vst [vmem:[#allocation42_spill] sm:$0xff] %v4503_v37 }
 0x144   : > { %v1603_v24 = vpop.f32.mrf.mxu3  ;;  %v1706_v56 = vrot.slane %v1704_v10, 4 }
 0x145   : > { %1856 = vmatmul.bf16.gmra.mxu0 %v3995_v1  ;;  %v1668_v28 = vadd.f32 %v1603_v24, %v1476_v13  ;;  %v1694_v13 = vshll.u32 %v4495_v43, 16  ;;  %v1700_v24 = vshll.u32 %v4499_v16, 16 }
 0x147   : > { %v1413_v55 = vpop.f32.mrf.mxu2  ;;  %v4501_v47 = vadd.f32 %v1817_v42, %v1668_v28  ;;  %v4889_v28 = vld [vmem:[#allocation7_spill] sm:$0xff]  ;;  %v1696_v1 = vrot.slane %v1694_v13, 5  ;;  %v1702_v41 = vrot.slane %v1700_v24, 5  ;;  %v1710_v13 = vshll.u32 %v4519_v25, 16 }
 0x148   : > { %v1477_v61 = vadd.f32 %v1413_v55, %v1065_v2  ;;  %v3141_v2 = vrot.slane %v4889_v28, 9  ;;  %v1245_v55 = vrot.slane %v1243_v33, 4 }
 0x149   : > { %4886 = vst [vmem:[#allocation41_spill] sm:$0xff] %v4501_v47  ;;  %v1067_v46 = vpop.f32.mrf.mxu1  ;;  %v1246_v47 = vrot.slane %v4890_v6, 5 }
 0x14a   : > { %v1819_v44 = vpop.f32.mrf.mxu0  ;;  %v1068_v43 = vadd.f32 %v1067_v46, %v4255_v19  ;;  %v1244_v27 = vsel %vm4077_vm5, %v3141_v2, %v1243_v33  ;;  %v1697_v19 = vor.u32 %v1696_v1, %v1693_v45  ;;  %v1707_v46 = vor.u32 %v1706_v56, %v1702_v41 }
 0x14b   : > { %1106 = vmatmul.bf16.gmra.mxu1 %v4481_v3  ;;  %v1295_v10 = vunpack.c.l.b16 %v1244_v27  ;;  %v1712_v33 = vrot.slane %v1710_v13, 5  ;;  %v4542_v27 = vld [vmem:[%s3689_s26 + $0xc0] sm:$0xff] }
 0x14c   : > { %v1605_v38 = vpop.f32.mrf.mxu3  ;;  %1455 = vmatmul.bf16.gmra.mxu2 %v4503_v37 }
 0x14d   : > { %v1669_v42 = vadd.f32 %v1605_v38, %v1477_v61  ;;  %v1247_v38 = vsel %vm4077_vm5, %v1245_v55, %v1246_v47 }
 0x14e   : > { %v1296_v6 = vunpack.c.l.b16 %v1247_v38 }
 0x14f   : > { %v1416_v16 = vpop.f32.mrf.mxu2  ;;  %v4521_v3 = vadd.f32 %v1819_v44, %v1669_v42  ;;  %v1708_v42 = vrot.slane %v1707_v46, 4 }
 0x150   : > { %v1478_v37 = vadd.f32 %v1416_v16, %v1068_v43  ;;  %v1698_v16 = vrot.slane %v1697_v19, 4  ;;  %v4533_v1 = vpack.c.b16 %v1296_v6, %v1295_v10 }
 0x151   : > { %1647 = vmatmul.bf16.gmra.mxu3 %v4513_v20  ;;  %v1069_v61 = vpop.f32.mrf.mxu1 }
 0x152   : > { %v1822_v28 = vpop.f32.mrf.mxu0  ;;  %v1070_v43 = vadd.f32 %v1069_v61, %v4274_v32  ;;  %v1703_v55 = vsel %vm3704_vm2, %v1698_v16, %v1702_v41 }
 0x153   : > { %v1731_v38 = vunpack.c.l.b16 %v1703_v55 }
 0x154   : > { %v1608_v24 = vpop.f32.mrf.mxu3 }
 0x155   : > { %1861 = vmatmul.bf16.gmra.mxu0 %v4087_v48  ;;  %v1670_v44 = vadd.f32 %v1608_v24, %v1478_v37  ;;  %v1713_v37 = vsel %vm3704_vm2, %v1708_v42, %v1712_v33 }
 0x157   : > { %v1418_v2 = vpop.f32.mrf.mxu2  ;;  %v4531_v0 = vadd.f32 %v1822_v28, %v1670_v44  ;;  %v1732_v28 = vunpack.c.l.b16 %v1713_v37 }
 0x158   : > { %v1479_v47 = vadd.f32 %v1418_v2, %v1070_v43 }
 0x159   : > { %v1072_v56 = vpop.f32.mrf.mxu1  ;;  %v4548_v41 = vpack.c.b16 %v1732_v28, %v1731_v38 }
 0x15a   : > { %v1824_v45 = vpop.f32.mrf.mxu0  ;;  %v1073_v19 = vadd.f32 %v1072_v56, %v4296_v18 }
 0x15b   : > { %1111 = vmatmul.bf16.gmra.mxu1 %v4513_v20 }
 0x15c   : > { %v1610_v32 = vpop.f32.mrf.mxu3  ;;  %1460 = vmatmul.bf16.gmra.mxu2 %v4533_v1 }
 0x15d   : > { %v1671_v61 = vadd.f32 %v1610_v32, %v1479_v47 }
 0x15f   : > { %v1421_v46 = vpop.f32.mrf.mxu2  ;;  %v4545_v13 = vadd.f32 %v1824_v45, %v1671_v61 }
 0x160   : > { %v1480_v24 = vadd.f32 %v1421_v46, %v1073_v19 }
 0x161   : > { %1652 = vmatmul.bf16.gmra.mxu3 %v4542_v27  ;;  %v1074_v10 = vpop.f32.mrf.mxu1 }
 0x162   : > { %v1827_v6 = vpop.f32.mrf.mxu0  ;;  %v1075_v16 = vadd.f32 %v1074_v10, %v4314_v5 }
 0x164   : > { %v1613_v44 = vpop.f32.mrf.mxu3 }
 0x165   : > { %1866 = vmatmul.bf16.gmra.mxu0 %v4548_v41  ;;  %v1672_v43 = vadd.f32 %v1613_v44, %v1480_v24 }
 0x167   : > { %v1423_v42 = vpop.f32.mrf.mxu2  ;;  %v4552_v33 = vadd.f32 %v1827_v6, %v1672_v43 }
 0x168   : > { %v1481_v18 = vadd.f32 %v1423_v42, %v1075_v16 }
 0x169   : > { %v1077_v2 = vpop.f32.mrf.mxu1 }
 0x16a   : > { %v1829_v47 = vpop.f32.mrf.mxu0  ;;  %v1078_v55 = vadd.f32 %v1077_v2, %v4193_v34 }
 0x16b   : > { %1989 = vmatmul.bf16.vlgmr.msra.gmra.mxu1 %v4105_v63 }
 0x16c   : > { %v1615_v56 = vpop.f32.mrf.mxu3  ;;  %2181 = vmatmul.bf16.vlgmr.msra.gmra.mxu2 %v4125_v7 }
 0x16d   : > { %v1673_v45 = vadd.f32 %v1615_v56, %v1481_v18 }
 0x16f   : > { %v1426_v37 = vpop.f32.mrf.mxu2  ;;  %v4557_v32 = vadd.f32 %v1829_v47, %v1673_v45 }
 0x170   : > { %v1482_v61 = vadd.f32 %v1426_v37, %v1078_v55 }
 0x171   : > { %2395 = vmatmul.bf16.vlgmr.msra.gmra.mxu3 %v4023_v40  ;;  %v1079_v5 = vpop.f32.mrf.mxu1 }
 0x172   : > { %v1832_v38 = vpop.f32.mrf.mxu0  ;;  %v1080_v63 = vadd.f32 %v1079_v5, %v4216_v57 }
 0x174   : > { %v1618_v28 = vpop.f32.mrf.mxu3 }
 0x175   : > { %2593 = vmatmul.bf16.vlgmr.msra.gmra.mxu0 %v4135_v62  ;;  %v1674_v19 = vadd.f32 %v1618_v28, %v1482_v61 }
 0x177   : > { %v1428_v46 = vpop.f32.mrf.mxu2  ;;  %v4562_v24 = vadd.f32 %v1832_v38, %v1674_v19 }
 0x178   : > { %v1483_v7 = vadd.f32 %v1428_v46, %v1080_v63 }
 0x179   : > { %v1082_v10 = vpop.f32.mrf.mxu1 }
 0x17a   : > { %v1834_v34 = vpop.f32.mrf.mxu0  ;;  %v1083_v44 = vadd.f32 %v1082_v10, %v4237_v52 }
 0x17b   : > { %1994 = vmatmul.bf16.gmra.mxu1 %v4135_v62 }
 0x17c   : > { %v1620_v6 = vpop.f32.mrf.mxu3  ;;  %2186 = vmatmul.bf16.gmra.mxu2 %v4141_v31 }
 0x17d   : > { %v1675_v40 = vadd.f32 %v1620_v6, %v1483_v7 }
 0x17f   : > { %v1431_v43 = vpop.f32.mrf.mxu2  ;;  %v4567_v16 = vadd.f32 %v1834_v34, %v1675_v40  ;;  %v4891_v40 = vld [vmem:[#allocation24_spill] sm:$0xff] }
 0x180   : > { %v1484_v42 = vadd.f32 %v1431_v43, %v1083_v44 }
 0x181   : > { %2400 = vmatmul.bf16.gmra.mxu3 %v4100_v50  ;;  %v1084_v57 = vpop.f32.mrf.mxu1 }
 0x182   : > { %v1837_v18 = vpop.f32.mrf.mxu0  ;;  %v1085_v62 = vadd.f32 %v1084_v57, %v4251_v8 }
 0x184   : > { %v1623_v2 = vpop.f32.mrf.mxu3 }
 0x185   : > { %2598 = vmatmul.bf16.gmra.mxu0 %v4163_v51  ;;  %v1676_v47 = vadd.f32 %v1623_v2, %v1484_v42 }
 0x187   : > { %v1433_v56 = vpop.f32.mrf.mxu2  ;;  %v4572_v45 = vadd.f32 %v1837_v18, %v1676_v47  ;;  %v4892_v18 = vld [vmem:[#allocation3_spill] sm:$0xff] }
 0x188   : > { %v1485_v31 = vadd.f32 %v1433_v56, %v1085_v62  ;;  %v4893_v62 = vld [vmem:[#allocation14_spill] sm:$0xff] }
 0x189   : > { %v1087_v55 = vpop.f32.mrf.mxu1 }
 0x18a   : > { %v1839_v52 = vpop.f32.mrf.mxu0  ;;  %v1088_v61 = vadd.f32 %v1087_v55, %v4267_v35 }
 0x18b   : > { %1999 = vmatmul.bf16.gmra.mxu1 %v4163_v51 }
 0x18c   : > { %v1625_v37 = vpop.f32.mrf.mxu3  ;;  %2191 = vmatmul.bf16.gmra.mxu2 %v4169_v9 }
 0x18d   : > { %v1677_v50 = vadd.f32 %v1625_v37, %v1485_v31  ;;  %v4894_v31 = vld [vmem:[#allocation26_spill] sm:$0xff] }
 0x18f   : > { %v1436_v5 = vpop.f32.mrf.mxu2  ;;  %v4577_v38 = vadd.f32 %v1839_v52, %v1677_v50 }
 0x190   : > { %v1486_v28 = vadd.f32 %v1436_v5, %v1088_v61  ;;  %v4895_v5 = vld [vmem:[#allocation15_spill] sm:$0xff] }
 0x191   : > { %2405 = vmatmul.bf16.gmra.mxu3 %v3722_v59  ;;  %v1089_v8 = vpop.f32.mrf.mxu1 }
 0x192   : > { %v1842_v19 = vpop.f32.mrf.mxu0  ;;  %v1090_v51 = vadd.f32 %v1089_v8, %v4290_v53  ;;  %v4896_v8 = vld [vmem:[#allocation12_spill] sm:$0xff] }
 0x194   : > { %v1628_v63 = vpop.f32.mrf.mxu3 }
 0x195   : > { %2603 = vmatmul.bf16.gmra.mxu0 %v4181_v49  ;;  %v1678_v46 = vadd.f32 %v1628_v63, %v1486_v28 }
 0x197   : > { %v1438_v7 = vpop.f32.mrf.mxu2  ;;  %v4582_v10 = vadd.f32 %v1842_v19, %v1678_v46 }
 0x198   : > { %v1487_v9 = vadd.f32 %v1438_v7, %v1090_v51  ;;  %v4897_v7 = vld [vmem:[#allocation5_spill] sm:$0xff] }
 0x199   : > { %v1092_v34 = vpop.f32.mrf.mxu1 }
 0x19a   : > { %v1844_v35 = vpop.f32.mrf.mxu0  ;;  %v1093_v44 = vadd.f32 %v1092_v34, %v4891_v40  ;;  %v4899_v40 = vld [vmem:[#allocation13_spill] sm:$0xff] }
 0x19b   : > { %2004 = vmatmul.bf16.gmra.mxu1 %v4181_v49 }
 0x19c   : > { %v1630_v6 = vpop.f32.mrf.mxu3  ;;  %2196 = vmatmul.bf16.gmra.mxu2 %v4189_v4 }
 0x19d   : > { %v1679_v59 = vadd.f32 %v1630_v6, %v1487_v9  ;;  %v4898_v6 = vld [vmem:[#allocation18_spill] sm:$0xff] }
 0x19f   : > { %v1441_v43 = vpop.f32.mrf.mxu2  ;;  %v4587_v42 = vadd.f32 %v1844_v35, %v1679_v59 }
 0x1a0   : > { %v1488_v57 = vadd.f32 %v1441_v43, %v1093_v44 }
 0x1a1   : > { %2410 = vmatmul.bf16.gmra.mxu3 %v4892_v18  ;;  %v1094_v53 = vpop.f32.mrf.mxu1 }
 0x1a2   : > { %v1847_v2 = vpop.f32.mrf.mxu0  ;;  %v1095_v49 = vadd.f32 %v1094_v53, %v4894_v31  ;;  %v4901_v31 = vld [vmem:[#allocation16_spill] sm:$0xff] }
 0x1a4   : > { %v1633_v47 = vpop.f32.mrf.mxu3 }
 0x1a5   : > { %2608 = vmatmul.bf16.gmra.mxu0 %v4893_v62  ;;  %v1680_v56 = vadd.f32 %v1633_v47, %v1488_v57 }
 0x1a7   : > { %v1443_v55 = vpop.f32.mrf.mxu2  ;;  %v4592_v52 = vadd.f32 %v1847_v2, %v1680_v56 }
 0x1a8   : > { %v1489_v4 = vadd.f32 %v1443_v55, %v1095_v49 }
 0x1a9   : > { %v1097_v37 = vpop.f32.mrf.mxu1 }
 0x1aa   : > { %v1849_v50 = vpop.f32.mrf.mxu0  ;;  %v1098_v19 = vadd.f32 %v1097_v37, %v4896_v8  ;;  %v4903_v8 = vld [vmem:[#allocation21_spill] sm:$0xff] }
 0x1ab   : > { %2009 = vmatmul.bf16.gmra.mxu1 %v4893_v62  ;;  %v4900_v62 = vld [vmem:[#allocation19_spill] sm:$0xff] }
 0x1ac   : > { %v1635_v61 = vpop.f32.mrf.mxu3  ;;  %2201 = vmatmul.bf16.gmra.mxu2 %v4895_v5 }
 0x1ad   : > { %v1681_v28 = vadd.f32 %v1635_v61, %v1489_v4 }
 0x1af   : > { %v1446_v63 = vpop.f32.mrf.mxu2  ;;  %v4597_v46 = vadd.f32 %v1849_v50, %v1681_v28  ;;  %v4902_v50 = vld [vmem:[#allocation10_spill] sm:$0xff] }
 0x1b0   : > { %v1490_v51 = vadd.f32 %v1446_v63, %v1098_v19  ;;  %v4904_v63 = vld [vmem:[#allocation17_spill] sm:$0xff] }
 0x1b1   : > { %2415 = vmatmul.bf16.gmra.mxu3 %v4897_v7  ;;  %v1099_v9 = vpop.f32.mrf.mxu1 }
 0x1b2   : > { %v1852_v34 = vpop.f32.mrf.mxu0  ;;  %v1100_v44 = vadd.f32 %v1099_v9, %v4899_v40  ;;  %v4905_v40 = vld [vmem:[#allocation23_spill] sm:$0xff] }
 0x1b4   : > { %v1638_v35 = vpop.f32.mrf.mxu3 }
 0x1b5   : > { %2613 = vmatmul.bf16.gmra.mxu0 %v4898_v6  ;;  %v1682_v59 = vadd.f32 %v1638_v35, %v1490_v51 }
 0x1b7   : > { %v1448_v43 = vpop.f32.mrf.mxu2  ;;  %v4602_v57 = vadd.f32 %v1852_v34, %v1682_v59 }
 0x1b8   : > { %v1491_v18 = vadd.f32 %v1448_v43, %v1100_v44  ;;  %v4906_v43 = vld [vmem:[#allocation20_spill] sm:$0xff] }
 0x1b9   : > { %v1102_v53 = vpop.f32.mrf.mxu1 }
 0x1ba   : > { %v1854_v2 = vpop.f32.mrf.mxu0  ;;  %v1103_v49 = vadd.f32 %v1102_v53, %v4901_v31 }
 0x1bb   : > { %2014 = vmatmul.bf16.gmra.mxu1 %v4898_v6 }
 0x1bc   : > { %v1640_v47 = vpop.f32.mrf.mxu3  ;;  %2206 = vmatmul.bf16.gmra.mxu2 %v4900_v62  ;;  %v4907_v62 = vld [vmem:[#allocation2_spill] sm:$0xff] }
 0x1bd   : > { %v1683_v56 = vadd.f32 %v1640_v47, %v1491_v18 }
 0x1bf   : > { %v1451_v55 = vpop.f32.mrf.mxu2  ;;  %v4607_v4 = vadd.f32 %v1854_v2, %v1683_v56 }
 0x1c0   : > { %v1492_v37 = vadd.f32 %v1451_v55, %v1103_v49  ;;  %v4908_v55 = vld [vmem:[#allocation27_spill] sm:$0xff] }
 0x1c1   : > { %2420 = vmatmul.bf16.gmra.mxu3 %v4902_v50  ;;  %v1104_v61 = vpop.f32.mrf.mxu1  ;;  %v4909_v50 = vld [vmem:[#allocation22_spill] sm:$0xff] }
 0x1c2   : > { %v1857_v5 = vpop.f32.mrf.mxu0  ;;  %v1105_v51 = vadd.f32 %v1104_v61, %v4904_v63 }
 0x1c4   : > { %v1643_v28 = vpop.f32.mrf.mxu3 }
 0x1c5   : > { %2618 = vmatmul.bf16.gmra.mxu0 %v4903_v8  ;;  %v1684_v19 = vadd.f32 %v1643_v28, %v1492_v37 }
 0x1c7   : > { %v1453_v7 = vpop.f32.mrf.mxu2  ;;  %v4612_v9 = vadd.f32 %v1857_v5, %v1684_v19 }
 0x1c8   : > { %v1493_v34 = vadd.f32 %v1453_v7, %v1105_v51 }
 0x1c9   : > { %v1107_v35 = vpop.f32.mrf.mxu1 }
 0x1ca   : > { %v1859_v6 = vpop.f32.mrf.mxu0  ;;  %v1108_v18 = vadd.f32 %v1107_v35, %v4906_v43 }
 0x1cb   : > { %2019 = vmatmul.bf16.gmra.mxu1 %v4903_v8 }
 0x1cc   : > { %v1645_v59 = vpop.f32.mrf.mxu3  ;;  %2211 = vmatmul.bf16.gmra.mxu2 %v4905_v40 }
 0x1cd   : > { %v1685_v44 = vadd.f32 %v1645_v59, %v1493_v34  ;;  %v4910_v34 = vld [vmem:[#allocation25_spill] sm:$0xff] }
 0x1cf   : > { %v1456_v53 = vpop.f32.mrf.mxu2  ;;  %v4617_v2 = vadd.f32 %v1859_v6, %v1685_v44 }
 0x1d0   : > { %v1494_v47 = vadd.f32 %v1456_v53, %v1108_v18 }
 0x1d1   : > { %2425 = vmatmul.bf16.gmra.mxu3 %v4907_v62  ;;  %v1109_v56 = vpop.f32.mrf.mxu1 }
 0x1d2   : > { %v1862_v31 = vpop.f32.mrf.mxu0  ;;  %v1110_v61 = vadd.f32 %v1109_v56, %v4909_v50 }
 0x1d4   : > { %v1648_v49 = vpop.f32.mrf.mxu3 }
 0x1d5   : > { %2623 = vmatmul.bf16.gmra.mxu0 %v4908_v55  ;;  %v1686_v37 = vadd.f32 %v1648_v49, %v1494_v47  ;;  %v4911_v47 = vld [vmem:[#allocation28_spill] sm:$0xff] }
 0x1d7   : > { %v1458_v5 = vpop.f32.mrf.mxu2  ;;  %v4622_v28 = vadd.f32 %v1862_v31, %v1686_v37 }
 0x1d8   : > { %v1495_v8 = vadd.f32 %v1458_v5, %v1110_v61 }
 0x1d9   : > { %v1112_v19 = vpop.f32.mrf.mxu1 }
 0x1da   : > { %v1864_v63 = vpop.f32.mrf.mxu0  ;;  %v1113_v35 = vadd.f32 %v1112_v19, %v4910_v34 }
 0x1db   : > { %2024 = vmatmul.bf16.gmra.mxu1 %v4908_v55 }
 0x1dc   : > { %v1650_v51 = vpop.f32.mrf.mxu3  ;;  %2216 = vmatmul.bf16.gmra.mxu2 %v4338_v14 }
 0x1dd   : > { %v1687_v7 = vadd.f32 %v1650_v51, %v1495_v8 }
 0x1df   : > { %v1461_v6 = vpop.f32.mrf.mxu2  ;;  %v4627_v59 = vadd.f32 %v1864_v63, %v1687_v7 }
 0x1e0   : > { %v1496_v40 = vadd.f32 %v1461_v6, %v1113_v35 }
 0x1e1   : > { %2430 = vmatmul.bf16.gmra.mxu3 %v3856_v12  ;;  %v1114_v44 = vpop.f32.mrf.mxu1 }
 0x1e2   : > { %v1867_v43 = vpop.f32.mrf.mxu0  ;;  %v1115_v62 = vadd.f32 %v1114_v44, %v4911_v47 }
 0x1e4   : > { %v1653_v18 = vpop.f32.mrf.mxu3 }
 0x1e5   : > { %2628 = vmatmul.bf16.gmra.mxu0 %v4360_v60  ;;  %v1688_v53 = vadd.f32 %v1653_v18, %v1496_v40 }
 0x1e7   : > { %v1463_v56 = vpop.f32.mrf.mxu2  ;;  %v4632_v31 = vadd.f32 %v1867_v43, %v1688_v53 }
 0x1e8   : > { %v1497_v14 = vadd.f32 %v1463_v56, %v1115_v62 }
 0x1e9   : > { %v1990_v49 = vpop.f32.mrf.mxu1 }
 0x1ea   : > { %v1869_v55 = vpop.f32.mrf.mxu0  ;;  %v2070_v50 = vadd.f32 %v1990_v49, %v4358_v15  ;;  %v4912_v15 = vld [vmem:[#allocation29_spill] sm:$0xff] }
 0x1eb   : > { %2029 = vmatmul.bf16.gmra.mxu1 %v4360_v60  ;;  %v4645_v60 = vld [vmem:[%s4808_s2] ss:$0 sm:$0xff] }
 0x1ec   : > { %v1655_v37 = vpop.f32.mrf.mxu3  ;;  %2221 = vmatmul.bf16.gmra.mxu2 %v4370_v29 }
 0x1ed   : > { %v1689_v12 = vadd.f32 %v1655_v37, %v1497_v14 }
 0x1ef   : > { %v2182_v61 = vpop.f32.mrf.mxu2  ;;  %v4637_v5 = vadd.f32 %v1869_v55, %v1689_v12 }
 0x1f0   : > { %v2262_v8 = vadd.f32 %v2182_v61, %v2070_v50 }
 0x1f1   : > { %2435 = vmatmul.bf16.gmra.mxu3 %v3965_v26  ;;  %v1992_v19 = vpop.f32.mrf.mxu1 }
 0x1f2   : > { %v2594_v63 = vpop.f32.mrf.mxu0  ;;  %v2071_v34 = vadd.f32 %v1992_v19, %v4912_v15 }
 0x1f4   : > { %v2396_v51 = vpop.f32.mrf.mxu3 }
 0x1f5   : > { %2633 = vmatmul.bf16.gmra.mxu0 %v4385_v11  ;;  %v2476_v7 = vadd.f32 %v2396_v51, %v2262_v8 }
 0x1f7   : > { %v2674_v29 = vadd.f32 %v2594_v63, %v2476_v7  ;;  %v2184_v35 = vpop.f32.mrf.mxu2 }
 0x1f8   : > { %v2263_v6 = vadd.f32 %v2184_v35, %v2071_v34 }
 0x1f9   : > { %v2710_v26 = vadd.f32 %v4645_v60, %v2674_v29  ;;  %v1995_v40 = vpop.f32.mrf.mxu1 }
 0x1fa   : > { %v2596_v44 = vpop.f32.mrf.mxu0  ;;  %v2072_v47 = vadd.f32 %v1995_v40, %v4383_v54 }
 0x1fb   : > { %2742 = vst [vmem:[%s4651_s6] sm:$0xff] %v2710_v26  ;;  %2034 = vmatmul.bf16.gmra.mxu1 %v4385_v11  ;;  %v2811_v37 = vmul.f32 %v2710_v26, %v2710_v26 }
 0x1fc   : > { %v2398_v43 = vpop.f32.mrf.mxu3  ;;  %2226 = vmatmul.bf16.gmra.mxu2 %v4392_v22 }
 0x1fd   : > { %v2477_v18 = vadd.f32 %v2398_v43, %v2263_v6 }
 0x1ff   : > { %v2675_v53 = vadd.f32 %v2596_v44, %v2477_v18  ;;  %v2187_v62 = vpop.f32.mrf.mxu2 }
 0x200   : > { %v2264_v14 = vadd.f32 %v2187_v62, %v2072_v47 }
 0x201   : > { %v2711_v56 = vadd.f32 %v4645_v60, %v2675_v53  ;;  %2440 = vmatmul.bf16.gmra.mxu3 %v4069_v58  ;;  %v1997_v49 = vpop.f32.mrf.mxu1 }
 0x202   : > { %v2599_v55 = vpop.f32.mrf.mxu0  ;;  %v2073_v54 = vadd.f32 %v1997_v49, %v4396_v21 }
 0x203   : > { %2743 = vst [vmem:[%s4651_s6 + $0x8] sm:$0xff] %v2711_v56  ;;  %v2774_v12 = vadd.f32 %v2711_v56, %v2710_v26  ;;  %v2812_v11 = vmul.f32 %v2711_v56, %v2711_v56 }
 0x204   : > { %v2401_v50 = vpop.f32.mrf.mxu3 }
 0x205   : > { %v2843_v61 = vadd.f32 %v2812_v11, %v2811_v37  ;;  %2638 = vmatmul.bf16.gmra.mxu0 %v4416_v23  ;;  %v2478_v22 = vadd.f32 %v2401_v50, %v2264_v14 }
 0x207   : > { %v2676_v8 = vadd.f32 %v2599_v55, %v2478_v22  ;;  %v2189_v19 = vpop.f32.mrf.mxu2  ;;  %v4914_v55 = vld [vmem:[#allocation30_spill] sm:$0xff] }
 0x208   : > { %v2265_v58 = vadd.f32 %v2189_v19, %v2073_v54  ;;  %v4915_v54 = vld [vmem:[#allocation33_spill] sm:$0xff] }
 0x209   : > { %v2712_v63 = vadd.f32 %v4645_v60, %v2676_v8  ;;  %v2000_v51 = vpop.f32.mrf.mxu1 }
 0x20a   : > { %v2601_v7 = vpop.f32.mrf.mxu0  ;;  %v2074_v21 = vadd.f32 %v2000_v51, %v4414_v17  ;;  %v4916_v51 = vld [vmem:[#allocation31_spill] sm:$0xff] }
 0x20b   : > { %2744 = vst [vmem:[%s4651_s6 + $0x10] sm:$0xff] %v2712_v63  ;;  %v2775_v29 = vadd.f32 %v2774_v12, %v2712_v63  ;;  %v2813_v15 = vmul.f32 %v2712_v63, %v2712_v63  ;;  %2039 = vmatmul.bf16.gmra.mxu1 %v4416_v23 }
 0x20c   : > { %v2403_v34 = vpop.f32.mrf.mxu3  ;;  %2231 = vmatmul.bf16.gmra.mxu2 %v4426_v39  ;;  %v4913_v39 = vld [vmem:[#allocation32_spill] sm:$0xff] }
 0x20d   : > { %v2844_v35 = vadd.f32 %v2843_v61, %v2813_v15  ;;  %v2479_v26 = vadd.f32 %v2403_v34, %v2265_v58  ;;  %v4917_v34 = vld [vmem:[#allocation4_spill] sm:$0xff] }
 0x20f   : > { %v2677_v6 = vadd.f32 %v2601_v7, %v2479_v26  ;;  %v2192_v40 = vpop.f32.mrf.mxu2 }
 0x210   : > { %v2266_v43 = vadd.f32 %v2192_v40, %v2074_v21 }
 0x211   : > { %v2713_v44 = vadd.f32 %v4645_v60, %v2677_v6  ;;  %2445 = vmatmul.bf16.gmra.mxu3 %v3765_v36  ;;  %v2002_v18 = vpop.f32.mrf.mxu1 }
 0x212   : > { %v2604_v53 = vpop.f32.mrf.mxu0  ;;  %v2075_v17 = vadd.f32 %v2002_v18, %v4914_v55  ;;  %v4918_v18 = vld [vmem:[#allocation36_spill] sm:$0xff] }
 0x213   : > { %2745 = vst [vmem:[%s4651_s6 + $0x18] sm:$0xff] %v2713_v44  ;;  %v2776_v47 = vadd.f32 %v2775_v29, %v2713_v44  ;;  %v2814_v23 = vmul.f32 %v2713_v44, %v2713_v44 }
 0x214   : > { %v2406_v62 = vpop.f32.mrf.mxu3 }
 0x215   : > { %v2845_v56 = vadd.f32 %v2844_v35, %v2814_v23  ;;  %2643 = vmatmul.bf16.gmra.mxu0 %v4913_v39  ;;  %v2480_v14 = vadd.f32 %v2406_v62, %v2266_v43  ;;  %v4919_v23 = vld [vmem:[#allocation34_spill] sm:$0xff] }
 0x217   : > { %v2678_v49 = vadd.f32 %v2604_v53, %v2480_v14  ;;  %v2194_v37 = vpop.f32.mrf.mxu2 }
 0x218   : > { %v2267_v11 = vadd.f32 %v2194_v37, %v2075_v17 }
 0x219   : > { %v2714_v12 = vadd.f32 %v4645_v60, %v2678_v49  ;;  %v2005_v36 = vpop.f32.mrf.mxu1 }
 0x21a   : > { %v2606_v50 = vpop.f32.mrf.mxu0  ;;  %v2076_v7 = vadd.f32 %v2005_v36, %v4916_v51 }
 0x21b   : > { %2746 = vst [vmem:[%s4651_s6 + $0x20] sm:$0xff] %v2714_v12  ;;  %v2777_v61 = vadd.f32 %v2776_v47, %v2714_v12  ;;  %v2815_v22 = vmul.f32 %v2714_v12, %v2714_v12  ;;  %2044 = vmatmul.bf16.gmra.mxu1 %v4913_v39 }
 0x21c   : > { %v2408_v8 = vpop.f32.mrf.mxu3  ;;  %2236 = vmatmul.bf16.gmra.mxu2 %v4915_v54 }
 0x21d   : > { %v2846_v19 = vadd.f32 %v2845_v56, %v2815_v22  ;;  %v2481_v63 = vadd.f32 %v2408_v8, %v2267_v11  ;;  %v4920_v11 = vld [vmem:[#allocation37_spill] sm:$0xff]  ;;  %v4921_v22 = vld [vmem:[#allocation35_spill] sm:$0xff] }
 0x21f   : > { %v2679_v58 = vadd.f32 %v2606_v50, %v2481_v63  ;;  %v2197_v29 = vpop.f32.mrf.mxu2  ;;  %v4922_v63 = vld [vmem:[#allocation6_spill] sm:$0xff] }
 0x220   : > { %v2268_v35 = vadd.f32 %v2197_v29, %v2076_v7 }
 0x221   : > { %v2715_v15 = vadd.f32 %v4645_v60, %v2679_v58  ;;  %2450 = vmatmul.bf16.gmra.mxu3 %v4917_v34  ;;  %v2007_v26 = vpop.f32.mrf.mxu1 }
 0x222   : > { %v2609_v6 = vpop.f32.mrf.mxu0  ;;  %v2077_v62 = vadd.f32 %v2007_v26, %v4919_v23  ;;  %v4923_v26 = vld [vmem:[#allocation42_spill] sm:$0xff] }
 0x223   : > { %2747 = vst [vmem:[%s4651_s6 + $0x28] sm:$0xff] %v2715_v15  ;;  %v2778_v21 = vadd.f32 %v2777_v61, %v2715_v15  ;;  %v2816_v40 = vmul.f32 %v2715_v15, %v2715_v15 }
 0x224   : > { %v2411_v44 = vpop.f32.mrf.mxu3 }
 0x225   : > { %v2847_v43 = vadd.f32 %v2846_v19, %v2816_v40  ;;  %2648 = vmatmul.bf16.gmra.mxu0 %v4918_v18  ;;  %v2482_v53 = vadd.f32 %v2411_v44, %v2268_v35  ;;  %v4924_v40 = vld [vmem:[#allocation38_spill] sm:$0xff] }
 0x227   : > { %v2680_v47 = vadd.f32 %v2609_v6, %v2482_v53  ;;  %v2199_v56 = vpop.f32.mrf.mxu2 }
 0x228   : > { %v2269_v14 = vadd.f32 %v2199_v56, %v2077_v62 }
 0x229   : > { %v2716_v39 = vadd.f32 %v4645_v60, %v2680_v47  ;;  %v2010_v49 = vpop.f32.mrf.mxu1 }
 0x22a   : > { %v2611_v55 = vpop.f32.mrf.mxu0  ;;  %v2078_v8 = vadd.f32 %v2010_v49, %v4921_v22  ;;  %v4926_v22 = vld [vmem:[#allocation40_spill] sm:$0xff] }
 0x22b   : > { %2748 = vst [vmem:[%s4651_s6 + $0x30] sm:$0xff] %v2716_v39  ;;  %v2779_v17 = vadd.f32 %v2778_v21, %v2716_v39  ;;  %v2817_v37 = vmul.f32 %v2716_v39, %v2716_v39  ;;  %2049 = vmatmul.bf16.gmra.mxu1 %v4918_v18 }
 0x22c   : > { %v2413_v12 = vpop.f32.mrf.mxu3  ;;  %2241 = vmatmul.bf16.gmra.mxu2 %v4920_v11 }
 0x22d   : > { %v2848_v36 = vadd.f32 %v2847_v43, %v2817_v37  ;;  %v2483_v50 = vadd.f32 %v2413_v12, %v2269_v14 }
 0x22f   : > { %v2681_v61 = vadd.f32 %v2611_v55, %v2483_v50  ;;  %v2202_v54 = vpop.f32.mrf.mxu2 }
 0x230   : > { %v2270_v58 = vadd.f32 %v2202_v54, %v2078_v8  ;;  %v1907_v8 = vrot.slane %v4926_v22, 5  ;;  %v4702_v54 = vld [vmem:[%s3689_s26 + $0xcc] sm:$0xf] }
 0x231   : > { %v2717_v19 = vadd.f32 %v4645_v60, %v2681_v61  ;;  %2455 = vmatmul.bf16.gmra.mxu3 %v4922_v63  ;;  %v2012_v51 = vpop.f32.mrf.mxu1  ;;  %v4706_v63 = vld [vmem:[%s3689_s26 + $0xd0] sm:$0xf] }
 0x232   : > { %v2614_v7 = vpop.f32.mrf.mxu0  ;;  %v2079_v44 = vadd.f32 %v2012_v51, %v4924_v40  ;;  %v4927_v51 = vld [vmem:[#allocation39_spill] sm:$0xff] }
 0x233   : > { %2749 = vst [vmem:[%s4651_s6 + $0x38] sm:$0xff] %v2717_v19  ;;  %v2780_v29 = vadd.f32 %v2779_v17, %v2717_v19  ;;  %v2818_v15 = vmul.f32 %v2717_v19, %v2717_v19  ;;  %v4925_v17 = vld [vmem:[#allocation41_spill] sm:$0xff] }
 0x234   : > { %v2416_v34 = vpop.f32.mrf.mxu3 }
 0x235   : > { %v2849_v35 = vadd.f32 %v2848_v36, %v2818_v15  ;;  %2653 = vmatmul.bf16.gmra.mxu0 %v4923_v26  ;;  %v2484_v6 = vadd.f32 %v2416_v34, %v2270_v58  ;;  %v2298_v34 = vshll.u32 %v4702_v54, 16 }
 0x237   : > { %v2682_v21 = vadd.f32 %v2614_v7, %v2484_v6  ;;  %v2204_v43 = vpop.f32.mrf.mxu2  ;;  %v3290_v7 = vrot.slane %v4927_v51, 9  ;;  %v2304_v6 = vshll.u32 %v4706_v63, 16 }
 0x238   : > { %v2271_v53 = vadd.f32 %v2204_v43, %v2079_v44 }
 0x239   : > { %v2718_v18 = vadd.f32 %v4645_v60, %v2682_v21  ;;  %v2015_v47 = vpop.f32.mrf.mxu1  ;;  %v2308_v21 = vshrl.u32 %v4706_v63, 16 }
 0x23a   : > { %v2616_v23 = vpop.f32.mrf.mxu0  ;;  %v2080_v37 = vadd.f32 %v2015_v47, %v4925_v17 }
 0x23b   : > { %2750 = vst [vmem:[%s4651_s6 + $0x40] sm:$0xff] %v2718_v18  ;;  %v2781_v62 = vadd.f32 %v2780_v29, %v2718_v18  ;;  %v2819_v56 = vmul.f32 %v2718_v18, %v2718_v18  ;;  %2054 = vmatmul.bf16.gmra.mxu1 %v4923_v26  ;;  %v1910_v26 = vrot.slane %v4519_v25, 5 }
 0x23c   : > { %v2418_v39 = vpop.f32.mrf.mxu3  ;;  %2246 = vmatmul.bf16.gmra.mxu2 %v4513_v20 }
 0x23d   : > { %v2850_v14 = vadd.f32 %v2849_v35, %v2819_v56  ;;  %v2485_v49 = vadd.f32 %v2418_v39, %v2271_v53  ;;  %v1909_v35 = vrot.slane %v1907_v8, 4  ;;  %v1908_v53 = vsel %vm4077_vm5, %v3290_v7, %v1907_v8 }
 0x23e   : > { %v2300_v39 = vrot.slane %v2298_v34, 5 }
 0x23f   : > { %v2683_v55 = vadd.f32 %v2616_v23, %v2485_v49  ;;  %v2207_v12 = vpop.f32.mrf.mxu2  ;;  %v2306_v49 = vrot.slane %v2304_v6, 5 }
 0x240   : > { %v2272_v36 = vadd.f32 %v2207_v12, %v2080_v37  ;;  %v262_v37 = vld [vmem:[%s3689_s26 + $0xd4] sm:$0x1] }
 0x241   : > { %v2719_v11 = vadd.f32 %v4645_v60, %v2683_v55  ;;  %2460 = vmatmul.bf16.gmra.mxu3 %v4087_v48  ;;  %v2017_v50 = vpop.f32.mrf.mxu1  ;;  %v2295_v48 = vshrl.u32 %v4702_v54, 16  ;;  %v2310_v55 = vrot.slane %v2308_v21, 4 }
 0x242   : > { %v2619_v61 = vpop.f32.mrf.mxu0  ;;  %v2081_v44 = vadd.f32 %v2017_v50, %v4521_v3 }
 0x243   : > { %2751 = vst [vmem:[%s4651_s6 + $0x48] sm:$0xff] %v2719_v11  ;;  %v2782_v20 = vadd.f32 %v2781_v62, %v2719_v11  ;;  %v2820_v19 = vmul.f32 %v2719_v11, %v2719_v11  ;;  %v2297_v56 = vrot.slane %v2295_v48, 4  ;;  %v1929_v11 = vunpack.c.l.b16 %v1908_v53 }
 0x244   : > { %v2421_v58 = vpop.f32.mrf.mxu3  ;;  %v2311_v8 = vor.u32 %v2310_v55, %v2306_v49 }
 0x245   : > { %v2851_v29 = vadd.f32 %v2850_v14, %v2820_v19  ;;  %2658 = vmatmul.bf16.gmra.mxu0 %v4533_v1  ;;  %v2486_v15 = vadd.f32 %v2421_v58, %v2272_v36  ;;  %v1911_v14 = vsel %vm4077_vm5, %v1909_v35, %v1910_v26  ;;  %v2301_v22 = vor.u32 %v2300_v39, %v2297_v56  ;;  %v3508_v39 = vld [vmem:[%s3689_s26 + $0xcc] sm:$0xff]  ;;  %s2981_s26 = sshll.u32 %s4930_s16, 3 }
 0x246   : > { %v2314_v19 = vshll.u32 %v262_v37, 16  ;;  %v2511_v26 = vrot.slane %v4706_v63, 5  ;;  %s208_s9 = scalar_lea.vmem %s4810_s4, %s2981_s26 }
 0x247   : > { %v2684_v40 = vadd.f32 %v2619_v61, %v2486_v15  ;;  %v2209_v43 = vpop.f32.mrf.mxu2  ;;  %v1930_v61 = vunpack.c.l.b16 %v1911_v14 }
 0x248   : > { %v2273_v23 = vadd.f32 %v2209_v43, %v2081_v44  ;;  %v2316_v35 = vrot.slane %v2314_v19, 5  ;;  %v3439_v43 = vrot.slane %v4702_v54, 9 }
 0x249   : > { %v2720_v47 = vadd.f32 %v4645_v60, %v2684_v40  ;;  %v2020_v62 = vpop.f32.mrf.mxu1 }
 0x24a   : > { %v2621_v25 = vpop.f32.mrf.mxu0  ;;  %v2082_v51 = vadd.f32 %v2020_v62, %v4531_v0  ;;  %v2512_v54 = vsel %vm4077_vm5, %v3439_v43, %v2511_v26 }
 0x24b   : > { %2752 = vst [vmem:[%s4651_s6 + $0x50] sm:$0xff] %v2720_v47  ;;  %v2783_v17 = vadd.f32 %v2782_v20, %v2720_v47  ;;  %v2821_v3 = vmul.f32 %v2720_v47, %v2720_v47  ;;  %2059 = vmatmul.bf16.gmra.mxu1 %v4533_v1  ;;  %v1931_v1 = vpack.c.b16 %v1930_v61, %v1929_v11  ;;  %v2513_v47 = vrot.slane %v2511_v26, 4 }
 0x24c   : > { %v2423_v12 = vpop.f32.mrf.mxu3  ;;  %2251 = vmatmul.bf16.gmra.mxu2 %v4542_v27  ;;  %v2302_v27 = vrot.slane %v2301_v22, 4  ;;  %v2533_v11 = vunpack.c.l.b16 %v2512_v54 }
 0x24d   : > { %v2852_v36 = vadd.f32 %v2851_v29, %v2821_v3  ;;  %v2487_v50 = vadd.f32 %v2423_v12, %v2273_v23  ;;  %v2312_v29 = vrot.slane %v2311_v8, 4  ;;  %v2514_v23 = vrot.slane %v262_v37, 5 }
 0x24f   : > { %v2685_v58 = vadd.f32 %v2621_v25, %v2487_v50  ;;  %v2212_v7 = vpop.f32.mrf.mxu2  ;;  %v2317_v53 = vsel %vm3704_vm2, %v2312_v29, %v2316_v35  ;;  %v2515_v30 = vsel %vm4077_vm5, %v2513_v47, %v2514_v23 }
 0x250   : > { %v2274_v15 = vadd.f32 %v2212_v7, %v2082_v51  ;;  %v2336_v3 = vunpack.c.l.b16 %v2317_v53  ;;  %v2534_v22 = vunpack.c.l.b16 %v2515_v30 }
 0x251   : > { %v2721_v20 = vadd.f32 %v4645_v60, %v2685_v58  ;;  %2465 = vmatmul.bf16.gmra.mxu3 %v4548_v41  ;;  %v2022_v48 = vpop.f32.mrf.mxu1  ;;  %v2307_v41 = vsel %vm3704_vm2, %v2302_v27, %v2306_v49 }
 0x252   : > { %v2624_v34 = vpop.f32.mrf.mxu0  ;;  %v2083_v62 = vadd.f32 %v2022_v48, %v4545_v13  ;;  %v2335_v25 = vunpack.c.l.b16 %v2307_v41  ;;  %v2535_v18 = vpack.c.b16 %v2534_v22, %v2533_v11 }
 0x253   : > { %2753 = vst [vmem:[%s4651_s6 + $0x58] sm:$0xff] %v2721_v20  ;;  %v2784_v6 = vadd.f32 %v2783_v17, %v2721_v20  ;;  %v2822_v21 = vmul.f32 %v2721_v20, %v2721_v20 }
 0x254   : > { %v2426_v40 = vpop.f32.mrf.mxu3  ;;  %v2337_v61 = vpack.c.b16 %v2336_v3, %v2335_v25 }
 0x255   : > { %v2853_v0 = vadd.f32 %v2852_v36, %v2822_v21  ;;  %2663 = vmatmul.bf16.gmra.mxu0 %v1931_v1  ;;  %v2488_v44 = vadd.f32 %v2426_v40, %v2274_v15 }
 0x257   : > { %v2686_v63 = vadd.f32 %v2624_v34, %v2488_v44  ;;  %v2214_v56 = vpop.f32.mrf.mxu2 }
 0x258   : > { %v2275_v55 = vadd.f32 %v2214_v56, %v2083_v62 }
 0x259   : > { %v2722_v14 = vadd.f32 %v4645_v60, %v2686_v63  ;;  %v2025_v17 = vpop.f32.mrf.mxu1 }
 0x25a   : > { %v2626_v49 = vpop.f32.mrf.mxu0  ;;  %v2084_v19 = vadd.f32 %v2025_v17, %v4552_v33 }
 0x25b   : > { %2754 = vst [vmem:[%s4651_s6 + $0x60] sm:$0xff] %v2722_v14  ;;  %v2785_v37 = vadd.f32 %v2784_v6, %v2722_v14  ;;  %v2823_v12 = vmul.f32 %v2722_v14, %v2722_v14  ;;  %2064 = vmatmul.bf16.gmra.mxu1 %v1931_v1 }
 0x25c   : > { %v2428_v13 = vpop.f32.mrf.mxu3  ;;  %2256 = vmatmul.bf16.gmra.mxu2 %v3508_v39 }
 0x25d   : > { %v2854_v36 = vadd.f32 %v2853_v0, %v2823_v12  ;;  %v2489_v50 = vadd.f32 %v2428_v13, %v2275_v55 }
 0x25f   : > { %v2687_v8 = vadd.f32 %v2626_v49, %v2489_v50  ;;  %v2217_v58 = vpop.f32.mrf.mxu2 }
 0x260   : > { %v2276_v7 = vadd.f32 %v2217_v58, %v2084_v19 }
 0x261   : > { %v2723_v51 = vadd.f32 %v4645_v60, %v2687_v8  ;;  %2470 = vmatmul.bf16.gmra.mxu3 %v2337_v61  ;;  %v2027_v20 = vpop.f32.mrf.mxu1 }
 0x262   : > { %v2629_v1 = vpop.f32.mrf.mxu0  ;;  %v2085_v26 = vadd.f32 %v2027_v20, %v4557_v32 }
 0x263   : > { %2755 = vst [vmem:[%s4651_s6 + $0x68] sm:$0xff] %v2723_v51  ;;  %v2786_v15 = vadd.f32 %v2785_v37, %v2723_v51  ;;  %v2824_v48 = vmul.f32 %v2723_v51, %v2723_v51 }
 0x264   : > { %v2431_v27 = vpop.f32.mrf.mxu3 }
 0x265   : > { %v2855_v34 = vadd.f32 %v2854_v36, %v2824_v48  ;;  %2668 = vmatmul.bf16.gmra.mxu0 %v2535_v18  ;;  %v2490_v29 = vadd.f32 %v2431_v27, %v2276_v7 }
 0x267   : > { %v2688_v35 = vadd.f32 %v2629_v1, %v2490_v29  ;;  %v2219_v33 = vpop.f32.mrf.mxu2 }
 0x268   : > { %v2277_v21 = vadd.f32 %v2219_v33, %v2085_v26 }
 0x269   : > { %v2724_v6 = vadd.f32 %v4645_v60, %v2688_v35  ;;  %v2030_v40 = vpop.f32.mrf.mxu1 }
 0x26a   : > { %v2631_v0 = vpop.f32.mrf.mxu0  ;;  %v2086_v63 = vadd.f32 %v2030_v40, %v4562_v24 }
 0x26b   : > { %2756 = vst [vmem:[%s4651_s6 + $0x70] sm:$0xff] %v2724_v6  ;;  %v2787_v44 = vadd.f32 %v2786_v15, %v2724_v6  ;;  %v2825_v41 = vmul.f32 %v2724_v6, %v2724_v6 }
 0x26c   : > { %v2433_v43 = vpop.f32.mrf.mxu3 }
 0x26d   : > { %v2856_v53 = vadd.f32 %v2855_v34, %v2825_v41  ;;  %v2491_v47 = vadd.f32 %v2433_v43, %v2277_v21 }
 0x26f   : > { %v2689_v23 = vadd.f32 %v2631_v0, %v2491_v47  ;;  %v2222_v62 = vpop.f32.mrf.mxu2 }
 0x270   : > { %v2278_v32 = vadd.f32 %v2222_v62, %v2086_v63 }
 0x271   : > { %v2725_v56 = vadd.f32 %v4645_v60, %v2689_v23  ;;  %v2032_v39 = vpop.f32.mrf.mxu1 }
 0x272   : > { %v2634_v25 = vpop.f32.mrf.mxu0  ;;  %v2087_v30 = vadd.f32 %v2032_v39, %v4567_v16 }
 0x273   : > { %2757 = vst [vmem:[%s4651_s6 + $0x78] sm:$0xff] %v2725_v56  ;;  %v2788_v14 = vadd.f32 %v2787_v44, %v2725_v56  ;;  %v2826_v55 = vmul.f32 %v2725_v56, %v2725_v56 }
 0x274   : > { %v2436_v17 = vpop.f32.mrf.mxu3 }
 0x275   : > { %v2857_v3 = vadd.f32 %v2856_v53, %v2826_v55  ;;  %v2492_v54 = vadd.f32 %v2436_v17, %v2278_v32 }
 0x277   : > { %v2690_v49 = vadd.f32 %v2634_v25, %v2492_v54  ;;  %v2224_v37 = vpop.f32.mrf.mxu2 }
 0x278   : > { %v2279_v24 = vadd.f32 %v2224_v37, %v2087_v30 }
 0x279   : > { %v2726_v12 = vadd.f32 %v4645_v60, %v2690_v49  ;;  %v2035_v13 = vpop.f32.mrf.mxu1 }
 0x27a   : > { %v2636_v11 = vpop.f32.mrf.mxu0  ;;  %v2088_v58 = vadd.f32 %v2035_v13, %v4572_v45 }
 0x27b   : > { %2758 = vst [vmem:[%s4651_s6 + $0x80] sm:$0xff] %v2726_v12  ;;  %v2789_v36 = vadd.f32 %v2788_v14, %v2726_v12  ;;  %v2827_v50 = vmul.f32 %v2726_v12, %v2726_v12 }
 0x27c   : > { %v2438_v61 = vpop.f32.mrf.mxu3 }
 0x27d   : > { %v2858_v22 = vadd.f32 %v2857_v3, %v2827_v50  ;;  %v2493_v8 = vadd.f32 %v2438_v61, %v2279_v24 }
 0x27f   : > { %v2691_v19 = vadd.f32 %v2636_v11, %v2493_v8  ;;  %v2227_v51 = vpop.f32.mrf.mxu2 }
 0x280   : > { %v2280_v16 = vadd.f32 %v2227_v51, %v2088_v58 }
 0x281   : > { %v2727_v18 = vadd.f32 %v4645_v60, %v2691_v19  ;;  %v2037_v7 = vpop.f32.mrf.mxu1 }
 0x282   : > { %v2639_v20 = vpop.f32.mrf.mxu0  ;;  %v2089_v35 = vadd.f32 %v2037_v7, %v4577_v38 }
 0x283   : > { %2759 = vst [vmem:[%s4651_s6 + $0x88] sm:$0xff] %v2727_v18  ;;  %v2790_v1 = vadd.f32 %v2789_v36, %v2727_v18  ;;  %v2828_v15 = vmul.f32 %v2727_v18, %v2727_v18 }
 0x284   : > { %v2441_v48 = vpop.f32.mrf.mxu3 }
 0x285   : > { %v2859_v27 = vadd.f32 %v2858_v22, %v2828_v15  ;;  %v2494_v34 = vadd.f32 %v2441_v48, %v2280_v16 }
 0x287   : > { %v2692_v29 = vadd.f32 %v2639_v20, %v2494_v34  ;;  %v2229_v26 = vpop.f32.mrf.mxu2 }
 0x288   : > { %v2281_v45 = vadd.f32 %v2229_v26, %v2089_v35 }
 0x289   : > { %v2728_v33 = vadd.f32 %v4645_v60, %v2692_v29  ;;  %v2040_v6 = vpop.f32.mrf.mxu1 }
 0x28a   : > { %v2641_v21 = vpop.f32.mrf.mxu0  ;;  %v2090_v47 = vadd.f32 %v2040_v6, %v4582_v10 }
 0x28b   : > { %2760 = vst [vmem:[%s4651_s6 + $0x90] sm:$0xff] %v2728_v33  ;;  %v2791_v40 = vadd.f32 %v2790_v1, %v2728_v33  ;;  %v2829_v0 = vmul.f32 %v2728_v33, %v2728_v33 }
 0x28c   : > { %v2443_v44 = vpop.f32.mrf.mxu3 }
 0x28d   : > { %v2860_v41 = vadd.f32 %v2859_v27, %v2829_v0  ;;  %v2495_v43 = vadd.f32 %v2443_v44, %v2281_v45 }
 0x28f   : > { %v2693_v53 = vadd.f32 %v2641_v21, %v2495_v43  ;;  %v2232_v23 = vpop.f32.mrf.mxu2 }
 0x290   : > { %v2282_v38 = vadd.f32 %v2232_v23, %v2090_v47 }
 0x291   : > { %v2729_v63 = vadd.f32 %v4645_v60, %v2693_v53  ;;  %v2042_v62 = vpop.f32.mrf.mxu1 }
 0x292   : > { %v2644_v56 = vpop.f32.mrf.mxu0  ;;  %v2091_v3 = vadd.f32 %v2042_v62, %v4587_v42 }
 0x293   : > { %2761 = vst [vmem:[%s4651_s6 + $0x98] sm:$0xff] %v2729_v63  ;;  %v2792_v32 = vadd.f32 %v2791_v40, %v2729_v63  ;;  %v2830_v39 = vmul.f32 %v2729_v63, %v2729_v63 }
 0x294   : > { %v2446_v25 = vpop.f32.mrf.mxu3 }
 0x295   : > { %v2861_v14 = vadd.f32 %v2860_v41, %v2830_v39  ;;  %v2496_v55 = vadd.f32 %v2446_v25, %v2282_v38 }
 0x297   : > { %v2694_v17 = vadd.f32 %v2644_v56, %v2496_v55  ;;  %v2234_v54 = vpop.f32.mrf.mxu2 }
 0x298   : > { %v2283_v10 = vadd.f32 %v2234_v54, %v2091_v3 }
 0x299   : > { %v2730_v49 = vadd.f32 %v4645_v60, %v2694_v17  ;;  %v2045_v30 = vpop.f32.mrf.mxu1 }
 0x29a   : > { %v2646_v37 = vpop.f32.mrf.mxu0  ;;  %v2092_v61 = vadd.f32 %v2045_v30, %v4592_v52 }
 0x29b   : > { %2762 = vst [vmem:[%s4651_s6 + $0xa0] sm:$0xff] %v2730_v49  ;;  %v2793_v12 = vadd.f32 %v2792_v32, %v2730_v49  ;;  %v2831_v24 = vmul.f32 %v2730_v49, %v2730_v49 }
 0x29c   : > { %v2448_v13 = vpop.f32.mrf.mxu3 }
 0x29d   : > { %v2862_v11 = vadd.f32 %v2861_v14, %v2831_v24  ;;  %v2497_v36 = vadd.f32 %v2448_v13, %v2283_v10 }
 0x29f   : > { %v2695_v50 = vadd.f32 %v2646_v37, %v2497_v36  ;;  %v2237_v22 = vpop.f32.mrf.mxu2 }
 0x2a0   : > { %v2284_v42 = vadd.f32 %v2237_v22, %v2092_v61 }
 0x2a1   : > { %v2731_v8 = vadd.f32 %v4645_v60, %v2695_v50  ;;  %v2047_v19 = vpop.f32.mrf.mxu1 }
 0x2a2   : > { %v2649_v58 = vpop.f32.mrf.mxu0  ;;  %v2093_v15 = vadd.f32 %v2047_v19, %v4597_v46 }
 0x2a3   : > { %2763 = vst [vmem:[%s4651_s6 + $0xa8] sm:$0xff] %v2731_v8  ;;  %v2794_v51 = vadd.f32 %v2793_v12, %v2731_v8  ;;  %v2832_v18 = vmul.f32 %v2731_v8, %v2731_v8 }
 0x2a4   : > { %v2451_v16 = vpop.f32.mrf.mxu3 }
 0x2a5   : > { %v2863_v7 = vadd.f32 %v2862_v11, %v2832_v18  ;;  %v2498_v20 = vadd.f32 %v2451_v16, %v2284_v42 }
 0x2a7   : > { %v2696_v1 = vadd.f32 %v2649_v58, %v2498_v20  ;;  %v2239_v48 = vpop.f32.mrf.mxu2 }
 0x2a8   : > { %v2285_v52 = vadd.f32 %v2239_v48, %v2093_v15 }
 0x2a9   : > { %v2732_v27 = vadd.f32 %v4645_v60, %v2696_v1  ;;  %v2050_v34 = vpop.f32.mrf.mxu1 }
 0x2aa   : > { %v2651_v29 = vpop.f32.mrf.mxu0  ;;  %v2094_v40 = vadd.f32 %v2050_v34, %v4602_v57 }
 0x2ab   : > { %2764 = vst [vmem:[%s4651_s6 + $0xb0] sm:$0xff] %v2732_v27  ;;  %v2795_v35 = vadd.f32 %v2794_v51, %v2732_v27  ;;  %v2833_v26 = vmul.f32 %v2732_v27, %v2732_v27 }
 0x2ac   : > { %v2453_v33 = vpop.f32.mrf.mxu3 }
 0x2ad   : > { %v2864_v45 = vadd.f32 %v2863_v7, %v2833_v26  ;;  %v2499_v6 = vadd.f32 %v2453_v33, %v2285_v52 }
 0x2af   : > { %v2697_v21 = vadd.f32 %v2651_v29, %v2499_v6  ;;  %v2242_v0 = vpop.f32.mrf.mxu2 }
 0x2b0   : > { %v2286_v46 = vadd.f32 %v2242_v0, %v2094_v40 }
 0x2b1   : > { %v2733_v44 = vadd.f32 %v4645_v60, %v2697_v21  ;;  %v2052_v41 = vpop.f32.mrf.mxu1 }
 0x2b2   : > { %v2654_v43 = vpop.f32.mrf.mxu0  ;;  %v2095_v56 = vadd.f32 %v2052_v41, %v4607_v4 }
 0x2b3   : > { %2765 = vst [vmem:[%s4651_s6 + $0xb8] sm:$0xff] %v2733_v44  ;;  %v2796_v53 = vadd.f32 %v2795_v35, %v2733_v44  ;;  %v2834_v47 = vmul.f32 %v2733_v44, %v2733_v44 }
 0x2b4   : > { %v2456_v23 = vpop.f32.mrf.mxu3 }
 0x2b5   : > { %v2865_v63 = vadd.f32 %v2864_v45, %v2834_v47  ;;  %v2500_v38 = vadd.f32 %v2456_v23, %v2286_v46 }
 0x2b7   : > { %v2698_v62 = vadd.f32 %v2654_v43, %v2500_v38  ;;  %v2244_v32 = vpop.f32.mrf.mxu2 }
 0x2b8   : > { %v2287_v57 = vadd.f32 %v2244_v32, %v2095_v56 }
 0x2b9   : > { %v2734_v39 = vadd.f32 %v4645_v60, %v2698_v62  ;;  %v2055_v25 = vpop.f32.mrf.mxu1 }
 0x2ba   : > { %v2656_v14 = vpop.f32.mrf.mxu0  ;;  %v2096_v30 = vadd.f32 %v2055_v25, %v4612_v9 }
 0x2bb   : > { %2766 = vst [vmem:[%s4651_s6 + $0xc0] sm:$0xff] %v2734_v39  ;;  %v2797_v55 = vadd.f32 %v2796_v53, %v2734_v39  ;;  %v2835_v17 = vmul.f32 %v2734_v39, %v2734_v39 }
 0x2bc   : > { %v2458_v3 = vpop.f32.mrf.mxu3 }
 0x2bd   : > { %v2866_v54 = vadd.f32 %v2865_v63, %v2835_v17  ;;  %v2501_v49 = vadd.f32 %v2458_v3, %v2287_v57 }
 0x2bf   : > { %v2699_v10 = vadd.f32 %v2656_v14, %v2501_v49  ;;  %v2247_v37 = vpop.f32.mrf.mxu2 }
 0x2c0   : > { %v2288_v4 = vadd.f32 %v2247_v37, %v2096_v30 }
 0x2c1   : > { %v2735_v12 = vadd.f32 %v4645_v60, %v2699_v10  ;;  %v2057_v24 = vpop.f32.mrf.mxu1 }
 0x2c2   : > { %v2659_v13 = vpop.f32.mrf.mxu0  ;;  %v2097_v42 = vadd.f32 %v2057_v24, %v4617_v2 }
 0x2c3   : > { %2767 = vst [vmem:[%s4651_s6 + $0xc8] sm:$0xff] %v2735_v12  ;;  %v2798_v11 = vadd.f32 %v2797_v55, %v2735_v12  ;;  %v2836_v36 = vmul.f32 %v2735_v12, %v2735_v12 }
 0x2c4   : > { %v2461_v50 = vpop.f32.mrf.mxu3 }
 0x2c5   : > { %v2867_v61 = vadd.f32 %v2866_v54, %v2836_v36  ;;  %v2502_v22 = vadd.f32 %v2461_v50, %v2288_v4 }
 0x2c7   : > { %v2700_v8 = vadd.f32 %v2659_v13, %v2502_v22  ;;  %v2249_v19 = vpop.f32.mrf.mxu2 }
 0x2c8   : > { %v2289_v9 = vadd.f32 %v2249_v19, %v2097_v42 }
 0x2c9   : > { %v2736_v58 = vadd.f32 %v4645_v60, %v2700_v8  ;;  %v2060_v51 = vpop.f32.mrf.mxu1 }
 0x2ca   : > { %v2661_v18 = vpop.f32.mrf.mxu0  ;;  %v2098_v27 = vadd.f32 %v2060_v51, %v4622_v28 }
 0x2cb   : > { %2768 = vst [vmem:[%s4651_s6 + $0xd0] sm:$0xff] %v2736_v58  ;;  %v2799_v16 = vadd.f32 %v2798_v11, %v2736_v58  ;;  %v2837_v7 = vmul.f32 %v2736_v58, %v2736_v58 }
 0x2cc   : > { %v2463_v20 = vpop.f32.mrf.mxu3 }
 0x2cd   : > { %v2868_v1 = vadd.f32 %v2867_v61, %v2837_v7  ;;  %v2503_v15 = vadd.f32 %v2463_v20, %v2289_v9  ;;  %v2880_v9 = vlaneseq }
 0x2cf   : > { %v2701_v48 = vadd.f32 %v2661_v18, %v2503_v15  ;;  %v2252_v52 = vpop.f32.mrf.mxu2  ;;  %v2881_v20 = vshrl.u32 %v2880_v9, 7 }
 0x2d0   : > { %v2290_v2 = vadd.f32 %v2252_v52, %v2098_v27 }
 0x2d1   : > { %v2737_v34 = vadd.f32 %v4645_v60, %v2701_v48  ;;  %v2062_v29 = vpop.f32.mrf.mxu1  ;;  %vm2883_vm6 = vcmp.eq.s32.totalorder %v2881_v20, 1  ;;  %vm2882_vm7 = vcmp.eq.s32.totalorder %v2881_v20, 0 }
 0x2d2   : > { %v2664_v35 = vpop.f32.mrf.mxu0  ;;  %v2099_v0 = vadd.f32 %v2062_v29, %v4627_v59 }
 0x2d3   : > { %2769 = vst [vmem:[%s4651_s6 + $0xd8] sm:$0xff] %v2737_v34  ;;  %v2800_v26 = vadd.f32 %v2799_v16, %v2737_v34  ;;  %v2838_v33 = vmul.f32 %v2737_v34, %v2737_v34 }
 0x2d4   : > { %v2466_v45 = vpop.f32.mrf.mxu3 }
 0x2d5   : > { %v2869_v6 = vadd.f32 %v2868_v1, %v2838_v33  ;;  %v2504_v21 = vadd.f32 %v2466_v45, %v2290_v2 }
 0x2d7   : > { %v2702_v40 = vadd.f32 %v2664_v35, %v2504_v21  ;;  %v2254_v44 = vpop.f32.mrf.mxu2 }
 0x2d8   : > { %v2291_v46 = vadd.f32 %v2254_v44, %v2099_v0 }
 0x2d9   : > { %v2738_v28 = vadd.f32 %v4645_v60, %v2702_v40  ;;  %v2065_v41 = vpop.f32.mrf.mxu1 }
 0x2da   : > { %v2666_v43 = vpop.f32.mrf.mxu0  ;;  %v2100_v56 = vadd.f32 %v2065_v41, %v4632_v31 }
 0x2db   : > { %2770 = vst [vmem:[%s4651_s6 + $0xe0] sm:$0xff] %v2738_v28  ;;  %v2801_v53 = vadd.f32 %v2800_v26, %v2738_v28  ;;  %v2839_v47 = vmul.f32 %v2738_v28, %v2738_v28 }
 0x2dc   : > { %v2468_v23 = vpop.f32.mrf.mxu3 }
 0x2dd   : > { %v2870_v63 = vadd.f32 %v2869_v6, %v2839_v47  ;;  %v2505_v38 = vadd.f32 %v2468_v23, %v2291_v46 }
 0x2df   : > { %v2703_v62 = vadd.f32 %v2666_v43, %v2505_v38  ;;  %v2257_v32 = vpop.f32.mrf.mxu2 }
 0x2e0   : > { %v2292_v39 = vadd.f32 %v2257_v32, %v2100_v56 }
 0x2e1   : > { %v2739_v59 = vadd.f32 %v4645_v60, %v2703_v62  ;;  %v2067_v14 = vpop.f32.mrf.mxu1 }
 0x2e2   : > { %v2669_v55 = vpop.f32.mrf.mxu0  ;;  %v2101_v10 = vadd.f32 %v2067_v14, %v4637_v5 }
 0x2e3   : > { %2771 = vst [vmem:[%s4651_s6 + $0xe8] sm:$0xff] %v2739_v59  ;;  %v2802_v57 = vadd.f32 %v2801_v53, %v2739_v59  ;;  %v2840_v25 = vmul.f32 %v2739_v59, %v2739_v59 }
 0x2e4   : > { %v2471_v17 = vpop.f32.mrf.mxu3 }
 0x2e5   : > { %v2871_v3 = vadd.f32 %v2870_v63, %v2840_v25  ;;  %v2506_v54 = vadd.f32 %v2471_v17, %v2292_v39 }
 0x2e7   : > { %v2704_v49 = vadd.f32 %v2669_v55, %v2506_v54  ;;  %v2259_v30 = vpop.f32.mrf.mxu2 }
 0x2e8   : > { %v2293_v37 = vadd.f32 %v2259_v30, %v2101_v10 }
 0x2e9   : > { %v2740_v31 = vadd.f32 %v4645_v60, %v2704_v49 }
 0x2ea   : > { %v2671_v36 = vpop.f32.mrf.mxu0 }
 0x2eb   : > { %2772 = vst [vmem:[%s4651_s6 + $0xf0] sm:$0xff] %v2740_v31  ;;  %v2803_v12 = vadd.f32 %v2802_v57, %v2740_v31  ;;  %v2841_v4 = vmul.f32 %v2740_v31, %v2740_v31 }
 0x2ec   : > { %v2473_v24 = vpop.f32.mrf.mxu3 }
 0x2ed   : > { %v2872_v13 = vadd.f32 %v2871_v3, %v2841_v4  ;;  %v2507_v11 = vadd.f32 %v2473_v24, %v2293_v37 }
 0x2ef   : > { %v2705_v50 = vadd.f32 %v2671_v36, %v2507_v11 }
 0x2f1   : > { %v2741_v61 = vadd.f32 %v4645_v60, %v2705_v50 }
 0x2f3   : > { %2773 = vst [vmem:[%s4651_s6 + $0xf8] sm:$0xff] %v2741_v61  ;;  %v2804_v22 = vadd.f32 %v2803_v12, %v2741_v61  ;;  %v2842_v8 = vmul.f32 %v2741_v61, %v2741_v61 }
 0x2f5   : > { %v2805_v42 = vrot.slane %v2804_v22, 4  ;;  %v2873_v5 = vadd.f32 %v2872_v13, %v2842_v8 }
 0x2f7   : > { %v2806_v19 = vadd.f32 %v2805_v42, %v2804_v22  ;;  %v2874_v58 = vrot.slane %v2873_v5, 4 }
 0x2f9   : > { %v2807_v51 = vrot.slane %v2806_v19, 2  ;;  %v2875_v18 = vadd.f32 %v2874_v58, %v2873_v5 }
 0x2fb   : > { %v2808_v16 = vadd.f32 %v2807_v51, %v2806_v19  ;;  %v2876_v7 = vrot.slane %v2875_v18, 2 }
 0x2fd   : > { %v2877_v1 = vadd.f32 %v2876_v7, %v2875_v18  ;;  %v2809_v15 = vrot.slane %v2808_v16, 1 }
 0x2ff   : > { %v2878_v48 = vrot.slane %v2877_v1, 1  ;;  %v2810_v27 = vadd.f32 %v2809_v15, %v2808_v16 }
 0x301   : > { %v2879_v60 = vadd.f32 %v2878_v48, %v2877_v1 }
 0x303   : > { %v2884_v52 = vsel %vm2883_vm6, %v2879_v60, 0.0 }
 0x304   : > { %v2885_v34 = vsel %vm2882_vm7, %v2810_v27, %v2884_v52 }
 0x305   : > { %2886 = vst [vmem:[%s208_s9] sm:$0xff] %v2885_v34 }
 0x306 PF: > { %s15_s15 = sadd.s32 1, %s3639_s15  }
 0x307   : > { %p12_p4 = scmp.ge.s32.totalorder %s15_s15, 4  }
 0x309   :  { %14 = sbr.rel (!%p12_p4) target bundleno = 1 (0x1), region = 82 }

</bundles_post_ra>
